<compile_context>
chip_gen: v7x
topology: tpu7x:2x2x1
jax: 0.10.0
libtpu: 0.0.40
codegen_flags: <defaults>
</compile_context>

<pallas_src>
import jax
import jax.numpy as jnp
from jax import lax
from jax.experimental import pallas as pl
from jax.experimental.pallas import tpu as pltpu

EPS = 1e-5
LANE = 128


def _round_up(x, m):
    return (x + m - 1) // m * m


# ----------------------------------------------------------------------------- fused kernel
def downsample_kernel(x_ref, w1_ref, w2_ref, g1_ref, be1_ref, g2_ref, be2_ref,
                      out_ref, xpad_ref, apad_ref, y2_ref):
    """Fused DownSample forward.

    x_ref:    (N, H, W, C_in)         NHWC input (natural channel count)
    w1_ref:   (3, 3, Cp_in, Cp_out)   HWIO conv1 weights, channel-padded to 128 lanes
    w2_ref:   (3, 3, Cp_out, Cp_out)  HWIO conv2 weights, channel-padded
    g*/be*:   (1, Cp_out)             BN gamma / beta, channel-padded
    out_ref:  (N, H//2, W//2, Cp_out) pooled output, lane-dense NHWC
    xpad_ref: (N, H+2, W+2, Cp_in)    VMEM scratch, zero halo + interior copy of x
    apad_ref: (N, H+2, W+2, Cp_out)   VMEM scratch, conv1 output -> BN1+ReLU in place
    y2_ref:   (N, H, W, Cp_out)       VMEM scratch, conv2 output
    """
    N, H, W, C_in = x_ref.shape
    Cp_out = w1_ref.shape[3]
    Ho, Wo = H // 2, W // 2
    inv_count = 1.0 / float(N * H * W)

    # ---- halo padding in VMEM (replaces two full-tensor jnp.pad HBM round trips) ----
    xpad_ref[...] = jnp.zeros_like(xpad_ref)
    apad_ref[...] = jnp.zeros_like(apad_ref)
    xpad_ref[:, 1:H + 1, 1:W + 1, :C_in] = x_ref[...]

    def conv3x3(src_ref, w_ref, store):
        """Bias-free 3x3 'same' conv + per-channel sum / sum-of-squares (training BN stats)."""
        cout = w_ref.shape[3]
        s = jnp.zeros((1, cout), jnp.float32)
        ss = jnp.zeros((1, cout), jnp.float32)
        for n in range(N):                        # N is tiny and static
            acc = jnp.zeros((H * W, cout), jnp.float32)
            for kh in range(3):
                for kw in range(3):
                    # With C padded to 128 this (H, W, C) -> (H*W, C) reshape is layout-free.
                    patch = src_ref[n, kh:kh + H, kw:kw + W, :].reshape(H * W, -1)
                    acc = acc + jnp.dot(patch, w_ref[kh, kw],
                                        preferred_element_type=jnp.float32)
            store(n, acc.reshape(H, W, cout))
            s = s + jnp.sum(acc, axis=0, keepdims=True)
            ss = ss + jnp.sum(acc * acc, axis=0, keepdims=True)
        return s, ss

    def fold_bn(s, ss, gamma, beta):
        mean = s * inv_count
        var = jnp.maximum(ss * inv_count - mean * mean, 0.0)   # clamp: E[x^2]-E[x]^2 >= 0
        scale = gamma * lax.rsqrt(var + EPS)
        shift = beta - mean * scale
        return scale, shift

    # ---- conv1 + stats -> BN1 + ReLU applied in place inside the padded buffer ----
    def store1(n, val):
        apad_ref[n, 1:H + 1, 1:W + 1, :] = val

    s1, ss1 = conv3x3(xpad_ref, w1_ref, store1)
    scale1, shift1 = fold_bn(s1, ss1, g1_ref[...], be1_ref[...])
    for n in range(N):
        a = apad_ref[n, 1:H + 1, 1:W + 1, :]
        apad_ref[n, 1:H + 1, 1:W + 1, :] = jnp.maximum(a * scale1 + shift1, 0.0)

    # ---- conv2 + stats -> BN2 + ReLU + 2x2 / stride-2 max pool ----
    def store2(n, val):
        y2_ref[n] = val

    s2, ss2 = conv3x3(apad_ref, w2_ref, store2)
    scale2, shift2 = fold_bn(s2, ss2, g2_ref[...], be2_ref[...])
    for n in range(N):
        z = jnp.maximum(y2_ref[n] * scale2 + shift2, 0.0)              # (H, W, Cp_out)
        hp = jnp.max(z.reshape(Ho, 2, W, Cp_out), axis=1)              # pool over H pairs
        out_ref[n] = jnp.max(hp.reshape(Ho, Wo, 2, Cp_out), axis=2)    # pool over W pairs


# ----------------------------------------------------------------------------- wrapper
@jax.jit
def downsample_forward(x_nchw, params):
    """Pallas implementation of DownSample.forward.  Input/output are NCHW."""
    w1, b1, g1, be1, w2, b2, g2, be2 = params
    del b1, b2  # conv bias cancels exactly under training-mode BatchNorm (mean subtraction)

    N, C_in, H, W = x_nchw.shape
    assert H % 2 == 0 and W % 2 == 0, "MaxPool2d(2,2) path assumes even H and W"
    C_out = w1.shape[3]
    Ho, Wo = H // 2, W // 2
    Cp_in = _round_up(C_in, LANE)
    Cp_out = _round_up(C_out, LANE)

    # Single layout transform in XLA (NCHW -> NHWC); channels stay at their natural count so
    # the big activation tensor is not copied again for padding.
    x = jnp.transpose(x_nchw, (0, 2, 3, 1)).astype(jnp.float32)

    # Pad the (tiny) parameters to lane-dense 128-channel layout.
    w1p = jnp.pad(w1.astype(jnp.float32),
                  ((0, 0), (0, 0), (0, Cp_in - C_in), (0, Cp_out - C_out)))
    w2p = jnp.pad(w2.astype(jnp.float32),
                  ((0, 0), (0, 0), (0, Cp_out - C_out), (0, Cp_out - C_out)))

    def pad_vec(v):
        return jnp.pad(v.astype(jnp.float32), (0, Cp_out - C_out)).reshape(1, Cp_out)

    g1p, be1p, g2p, be2p = pad_vec(g1), pad_vec(be1), pad_vec(g2), pad_vec(be2)

    out_padded = pl.pallas_call(
        downsample_kernel,
        out_shape=jax.ShapeDtypeStruct((N, Ho, Wo, Cp_out), jnp.float32),
        grid=(1,),
        in_specs=[
            pl.BlockSpec((N, H, W, C_in), lambda i: (0, 0, 0, 0)),
            pl.BlockSpec((3, 3, Cp_in, Cp_out), lambda i: (0, 0, 0, 0)),
            pl.BlockSpec((3, 3, Cp_out, Cp_out), lambda i: (0, 0, 0, 0)),
            pl.BlockSpec((1, Cp_out), lambda i: (0, 0)),
            pl.BlockSpec((1, Cp_out), lambda i: (0, 0)),
            pl.BlockSpec((1, Cp_out), lambda i: (0, 0)),
            pl.BlockSpec((1, Cp_out), lambda i: (0, 0)),
        ],
        out_specs=pl.BlockSpec((N, Ho, Wo, Cp_out), lambda i: (0, 0, 0, 0)),
        scratch_shapes=[
            pltpu.VMEM((N, H + 2, W + 2, Cp_in), jnp.float32),   # padded input
            pltpu.VMEM((N, H + 2, W + 2, Cp_out), jnp.float32),  # padded conv1/ReLU output
            pltpu.VMEM((N, H, W, Cp_out), jnp.float32),          # conv2 output
        ],
        compiler_params=pltpu.CompilerParams(
            dimension_semantics=("arbitrary",),
            vmem_limit_bytes=64 * 1024 * 1024,
        ),
    )(x, w1p, w2p, g1p, be1p, g2p, be2p)

    # Lane-dense kernel output -> slice real channels and do the single NCHW transpose in XLA.
    return jnp.transpose(out_padded[..., :C_out], (0, 3, 1, 2))


# ----------------------------------------------------------------------------- reference
def reference_forward(x_nchw, params):
    w1, b1, g1, be1, w2, b2, g2, be2 = params

    def conv(x, w_hwio, b):
        w_oihw = jnp.transpose(w_hwio, (3, 2, 0, 1))
        y = lax.conv_general_dilated(x, w_oihw, (1, 1), ((1, 1), (1, 1)),
                                     dimension_numbers=("NCHW", "OIHW", "NCHW"))
        return y + b[None, :, None, None]

    def bn_relu_ref(x, g, be):
        mean = jnp.mean(x, axis=(0, 2, 3), keepdims=True)
        var = jnp.mean((x - mean) ** 2, axis=(0, 2, 3), keepdims=True)
        y = (x - mean) / jnp.sqrt(var + EPS) * g[None, :, None, None] + be[None, :, None, None]
        return jax.nn.relu(y)

    y = bn_relu_ref(conv(x_nchw, w1, b1), g1, be1)
    y = bn_relu_ref(conv(y, w2, b2), g2, be2)
    return lax.reduce_window(y, -jnp.inf, lax.max, (1, 1, 2, 2), (1, 1, 2, 2), "VALID")


# ----------------------------------------------------------------------------- main
if __name__ == "__main__":
    N, C_IN, C_OUT, H, W = 2, 4, 8, 16, 16

    key = jax.random.PRNGKey(0)
    ks = jax.random.split(key, 9)
    w1 = 0.2 * jax.random.normal(ks[0], (3, 3, C_IN, C_OUT), jnp.float32)   # HWIO
    b1 = 0.1 * jax.random.normal(ks[1], (C_OUT,), jnp.float32)
    g1 = 1.0 + 0.1 * jax.random.normal(ks[2], (C_OUT,), jnp.float32)
    be1 = 0.1 * jax.random.normal(ks[3], (C_OUT,), jnp.float32)
    w2 = 0.2 * jax.random.normal(ks[4], (3, 3, C_OUT, C_OUT), jnp.float32)  # HWIO
    b2 = 0.1 * jax.random.normal(ks[5], (C_OUT,), jnp.float32)
    g2 = 1.0 + 0.1 * jax.random.normal(ks[6], (C_OUT,), jnp.float32)
    be2 = 0.1 * jax.random.normal(ks[7], (C_OUT,), jnp.float32)
    params = (w1, b1, g1, be1, w2, b2, g2, be2)

    x = jax.random.normal(ks[8], (N, C_IN, H, W), jnp.float32)              # NCHW, like PyTorch

    out = downsample_forward(x, params)
    out = jax.block_until_ready(out)
    assert out.shape == (N, C_OUT, H // 2, W // 2), out.shape

    ref = jax.block_until_ready(reference_forward(x, params))
    max_err = float(jnp.max(jnp.abs(out - ref)))
    assert max_err < 5e-2, f"max abs error vs reference too large: {max_err}"

    print("KERNEL_OK")
</pallas_src>

<mosaic_0001>
module attributes {stable_mosaic.version = 11 : i64} {
  func.func @downsample_kernel(%arg0: i32, %arg1: memref<2x16x16x4xf32, #tpu.memory_space<vmem>>, %arg2: memref<3x3x128x128xf32, #tpu.memory_space<vmem>>, %arg3: memref<3x3x128x128xf32, #tpu.memory_space<vmem>>, %arg4: memref<1x128xf32, #tpu.memory_space<vmem>>, %arg5: memref<1x128xf32, #tpu.memory_space<vmem>>, %arg6: memref<1x128xf32, #tpu.memory_space<vmem>>, %arg7: memref<1x128xf32, #tpu.memory_space<vmem>>, %arg8: memref<2x8x8x128xf32, #tpu.memory_space<vmem>>, %arg9: memref<2x18x18x128xf32, #tpu.memory_space<vmem>>, %arg10: memref<2x18x18x128xf32, #tpu.memory_space<vmem>>, %arg11: memref<2x16x16x128xf32, #tpu.memory_space<vmem>>) attributes {dimension_semantics = [#tpu.dimension_semantics<arbitrary>], iteration_bounds = array<i64: 1>, scalar_prefetch = 0 : i64, scratch_operands = 3 : i64, tpu.core_type = #tpu.core_type<tc>, window_params = [{pipeline_mode = #tpu.pipeline_mode<synchronous>, transform_indices = @transform_0, window_bounds = array<i64: 2, 16, 16, 4>}, {pipeline_mode = #tpu.pipeline_mode<synchronous>, transform_indices = @transform_1, window_bounds = array<i64: 3, 3, 128, 128>}, {pipeline_mode = #tpu.pipeline_mode<synchronous>, transform_indices = @transform_2, window_bounds = array<i64: 3, 3, 128, 128>}, {pipeline_mode = #tpu.pipeline_mode<synchronous>, transform_indices = @transform_3, window_bounds = array<i64: 1, 128>}, {pipeline_mode = #tpu.pipeline_mode<synchronous>, transform_indices = @transform_4, window_bounds = array<i64: 1, 128>}, {pipeline_mode = #tpu.pipeline_mode<synchronous>, transform_indices = @transform_5, window_bounds = array<i64: 1, 128>}, {pipeline_mode = #tpu.pipeline_mode<synchronous>, transform_indices = @transform_6, window_bounds = array<i64: 1, 128>}, {pipeline_mode = #tpu.pipeline_mode<synchronous>, transform_indices = @transform_7, window_bounds = array<i64: 2, 8, 8, 128>}]} {
    %cst = arith.constant 0.000000e+00 : f32
    %0 = vector.broadcast %cst : f32 to vector<2x18x18x128xf32>
    %c0 = arith.constant 0 : index
    %c0_0 = arith.constant 0 : index
    %c0_1 = arith.constant 0 : index
    %c0_2 = arith.constant 0 : index
    %1 = vector.load %arg9[%c0, %c0_0, %c0_1, %c0_2] : memref<2x18x18x128xf32, #tpu.memory_space<vmem>>, vector<2x18x18x128xf32>
    tpu.vector_store %arg9[%c0, %c0_0, %c0_1, %c0_2], %0 {strides = array<i32>} : memref<2x18x18x128xf32, #tpu.memory_space<vmem>>, vector<2x18x18x128xf32>,
    %cst_3 = arith.constant 0.000000e+00 : f32
    %2 = vector.broadcast %cst_3 : f32 to vector<2x18x18x128xf32>
    %c0_4 = arith.constant 0 : index
    %c0_5 = arith.constant 0 : index
    %c0_6 = arith.constant 0 : index
    %c0_7 = arith.constant 0 : index
    %3 = vector.load %arg10[%c0_4, %c0_5, %c0_6, %c0_7] : memref<2x18x18x128xf32, #tpu.memory_space<vmem>>, vector<2x18x18x128xf32>
    tpu.vector_store %arg10[%c0_4, %c0_5, %c0_6, %c0_7], %2 {strides = array<i32>} : memref<2x18x18x128xf32, #tpu.memory_space<vmem>>, vector<2x18x18x128xf32>,
    %c0_8 = arith.constant 0 : index
    %c0_9 = arith.constant 0 : index
    %c0_10 = arith.constant 0 : index
    %c0_11 = arith.constant 0 : index
    %4 = vector.load %arg1[%c0_8, %c0_9, %c0_10, %c0_11] : memref<2x16x16x4xf32, #tpu.memory_space<vmem>>, vector<2x16x16x4xf32>
    %c0_12 = arith.constant 0 : index
    %c1 = arith.constant 1 : index
    %c1_13 = arith.constant 1 : index
    %c0_14 = arith.constant 0 : index
    %5 = vector.load %arg9[%c0_12, %c1, %c1_13, %c0_14] : memref<2x18x18x128xf32, #tpu.memory_space<vmem>>, vector<2x16x16x4xf32>
    tpu.vector_store %arg9[%c0_12, %c1, %c1_13, %c0_14], %4 {strides = array<i32>} : memref<2x18x18x128xf32, #tpu.memory_space<vmem>>, vector<2x16x16x4xf32>,
    %cst_15 = arith.constant 0.000000e+00 : f32
    %6 = vector.broadcast %cst_15 : f32 to vector<1x128xf32>
    %cst_16 = arith.constant 0.000000e+00 : f32
    %7 = vector.broadcast %cst_16 : f32 to vector<1x128xf32>
    %cst_17 = arith.constant 0.000000e+00 : f32
    %8 = vector.broadcast %cst_17 : f32 to vector<256x128xf32>
    %c0_18 = arith.constant 0 : index
    %c0_19 = arith.constant 0 : index
    %c0_20 = arith.constant 0 : index
    %c0_21 = arith.constant 0 : index
    %9 = vector.load %arg9[%c0_18, %c0_19, %c0_20, %c0_21] : memref<2x18x18x128xf32, #tpu.memory_space<vmem>>, vector<1x16x16x128xf32>
    %10 = vector.shape_cast %9 : vector<1x16x16x128xf32> to vector<16x16x128xf32>
    %11 = vector.shape_cast %10 : vector<16x16x128xf32> to vector<256x128xf32>
    %c0_22 = arith.constant 0 : index
    %c0_23 = arith.constant 0 : index
    %c0_24 = arith.constant 0 : index
    %c0_25 = arith.constant 0 : index
    %12 = vector.load %arg2[%c0_22, %c0_23, %c0_24, %c0_25] : memref<3x3x128x128xf32, #tpu.memory_space<vmem>>, vector<1x1x128x128xf32>
    %13 = vector.shape_cast %12 : vector<1x1x128x128xf32> to vector<128x128xf32>
    %cst_26 = arith.constant dense<0.000000e+00> : vector<256x128xf32>
    %14 = tpu.matmul %11, %13, %cst_26 {dimension_numbers = #tpu.dot_dimension_numbers<[1], [0], [0], [1], [0, 0, 1, 1], [], []>} : vector<256x128xf32>, vector<128x128xf32>, vector<256x128xf32> -> vector<256x128xf32>
    %15 = arith.addf %8, %14 : vector<256x128xf32>
    %c0_27 = arith.constant 0 : index
    %c0_28 = arith.constant 0 : index
    %c1_29 = arith.constant 1 : index
    %c0_30 = arith.constant 0 : index
    %16 = vector.load %arg9[%c0_27, %c0_28, %c1_29, %c0_30] : memref<2x18x18x128xf32, #tpu.memory_space<vmem>>, vector<1x16x16x128xf32>
    %17 = vector.shape_cast %16 : vector<1x16x16x128xf32> to vector<16x16x128xf32>
    %18 = vector.shape_cast %17 : vector<16x16x128xf32> to vector<256x128xf32>
    %c0_31 = arith.constant 0 : index
    %c1_32 = arith.constant 1 : index
    %c0_33 = arith.constant 0 : index
    %c0_34 = arith.constant 0 : index
    %19 = vector.load %arg2[%c0_31, %c1_32, %c0_33, %c0_34] : memref<3x3x128x128xf32, #tpu.memory_space<vmem>>, vector<1x1x128x128xf32>
    %20 = vector.shape_cast %19 : vector<1x1x128x128xf32> to vector<128x128xf32>
    %cst_35 = arith.constant dense<0.000000e+00> : vector<256x128xf32>
    %21 = tpu.matmul %18, %20, %cst_35 {dimension_numbers = #tpu.dot_dimension_numbers<[1], [0], [0], [1], [0, 0, 1, 1], [], []>} : vector<256x128xf32>, vector<128x128xf32>, vector<256x128xf32> -> vector<256x128xf32>
    %22 = arith.addf %15, %21 : vector<256x128xf32>
    %c0_36 = arith.constant 0 : index
    %c0_37 = arith.constant 0 : index
    %c2 = arith.constant 2 : index
    %c0_38 = arith.constant 0 : index
    %23 = vector.load %arg9[%c0_36, %c0_37, %c2, %c0_38] : memref<2x18x18x128xf32, #tpu.memory_space<vmem>>, vector<1x16x16x128xf32>
    %24 = vector.shape_cast %23 : vector<1x16x16x128xf32> to vector<16x16x128xf32>
    %25 = vector.shape_cast %24 : vector<16x16x128xf32> to vector<256x128xf32>
    %c0_39 = arith.constant 0 : index
    %c2_40 = arith.constant 2 : index
    %c0_41 = arith.constant 0 : index
    %c0_42 = arith.constant 0 : index
    %26 = vector.load %arg2[%c0_39, %c2_40, %c0_41, %c0_42] : memref<3x3x128x128xf32, #tpu.memory_space<vmem>>, vector<1x1x128x128xf32>
    %27 = vector.shape_cast %26 : vector<1x1x128x128xf32> to vector<128x128xf32>
    %cst_43 = arith.constant dense<0.000000e+00> : vector<256x128xf32>
    %28 = tpu.matmul %25, %27, %cst_43 {dimension_numbers = #tpu.dot_dimension_numbers<[1], [0], [0], [1], [0, 0, 1, 1], [], []>} : vector<256x128xf32>, vector<128x128xf32>, vector<256x128xf32> -> vector<256x128xf32>
    %29 = arith.addf %22, %28 : vector<256x128xf32>
    %c0_44 = arith.constant 0 : index
    %c1_45 = arith.constant 1 : index
    %c0_46 = arith.constant 0 : index
    %c0_47 = arith.constant 0 : index
    %30 = vector.load %arg9[%c0_44, %c1_45, %c0_46, %c0_47] : memref<2x18x18x128xf32, #tpu.memory_space<vmem>>, vector<1x16x16x128xf32>
    %31 = vector.shape_cast %30 : vector<1x16x16x128xf32> to vector<16x16x128xf32>
    %32 = vector.shape_cast %31 : vector<16x16x128xf32> to vector<256x128xf32>
    %c1_48 = arith.constant 1 : index
    %c0_49 = arith.constant 0 : index
    %c0_50 = arith.constant 0 : index
    %c0_51 = arith.constant 0 : index
    %33 = vector.load %arg2[%c1_48, %c0_49, %c0_50, %c0_51] : memref<3x3x128x128xf32, #tpu.memory_space<vmem>>, vector<1x1x128x128xf32>
    %34 = vector.shape_cast %33 : vector<1x1x128x128xf32> to vector<128x128xf32>
    %cst_52 = arith.constant dense<0.000000e+00> : vector<256x128xf32>
    %35 = tpu.matmul %32, %34, %cst_52 {dimension_numbers = #tpu.dot_dimension_numbers<[1], [0], [0], [1], [0, 0, 1, 1], [], []>} : vector<256x128xf32>, vector<128x128xf32>, vector<256x128xf32> -> vector<256x128xf32>
    %36 = arith.addf %29, %35 : vector<256x128xf32>
    %c0_53 = arith.constant 0 : index
    %c1_54 = arith.constant 1 : index
    %c1_55 = arith.constant 1 : index
    %c0_56 = arith.constant 0 : index
    %37 = vector.load %arg9[%c0_53, %c1_54, %c1_55, %c0_56] : memref<2x18x18x128xf32, #tpu.memory_space<vmem>>, vector<1x16x16x128xf32>
    %38 = vector.shape_cast %37 : vector<1x16x16x128xf32> to vector<16x16x128xf32>
    %39 = vector.shape_cast %38 : vector<16x16x128xf32> to vector<256x128xf32>
    %c1_57 = arith.constant 1 : index
    %c1_58 = arith.constant 1 : index
    %c0_59 = arith.constant 0 : index
    %c0_60 = arith.constant 0 : index
    %40 = vector.load %arg2[%c1_57, %c1_58, %c0_59, %c0_60] : memref<3x3x128x128xf32, #tpu.memory_space<vmem>>, vector<1x1x128x128xf32>
    %41 = vector.shape_cast %40 : vector<1x1x128x128xf32> to vector<128x128xf32>
    %cst_61 = arith.constant dense<0.000000e+00> : vector<256x128xf32>
    %42 = tpu.matmul %39, %41, %cst_61 {dimension_numbers = #tpu.dot_dimension_numbers<[1], [0], [0], [1], [0, 0, 1, 1], [], []>} : vector<256x128xf32>, vector<128x128xf32>, vector<256x128xf32> -> vector<256x128xf32>
    %43 = arith.addf %36, %42 : vector<256x128xf32>
    %c0_62 = arith.constant 0 : index
    %c1_63 = arith.constant 1 : index
    %c2_64 = arith.constant 2 : index
    %c0_65 = arith.constant 0 : index
    %44 = vector.load %arg9[%c0_62, %c1_63, %c2_64, %c0_65] : memref<2x18x18x128xf32, #tpu.memory_space<vmem>>, vector<1x16x16x128xf32>
    %45 = vector.shape_cast %44 : vector<1x16x16x128xf32> to vector<16x16x128xf32>
    %46 = vector.shape_cast %45 : vector<16x16x128xf32> to vector<256x128xf32>
    %c1_66 = arith.constant 1 : index
    %c2_67 = arith.constant 2 : index
    %c0_68 = arith.constant 0 : index
    %c0_69 = arith.constant 0 : index
    %47 = vector.load %arg2[%c1_66, %c2_67, %c0_68, %c0_69] : memref<3x3x128x128xf32, #tpu.memory_space<vmem>>, vector<1x1x128x128xf32>
    %48 = vector.shape_cast %47 : vector<1x1x128x128xf32> to vector<128x128xf32>
    %cst_70 = arith.constant dense<0.000000e+00> : vector<256x128xf32>
    %49 = tpu.matmul %46, %48, %cst_70 {dimension_numbers = #tpu.dot_dimension_numbers<[1], [0], [0], [1], [0, 0, 1, 1], [], []>} : vector<256x128xf32>, vector<128x128xf32>, vector<256x128xf32> -> vector<256x128xf32>
    %50 = arith.addf %43, %49 : vector<256x128xf32>
    %c0_71 = arith.constant 0 : index
    %c2_72 = arith.constant 2 : index
    %c0_73 = arith.constant 0 : index
    %c0_74 = arith.constant 0 : index
    %51 = vector.load %arg9[%c0_71, %c2_72, %c0_73, %c0_74] : memref<2x18x18x128xf32, #tpu.memory_space<vmem>>, vector<1x16x16x128xf32>
    %52 = vector.shape_cast %51 : vector<1x16x16x128xf32> to vector<16x16x128xf32>
    %53 = vector.shape_cast %52 : vector<16x16x128xf32> to vector<256x128xf32>
    %c2_75 = arith.constant 2 : index
    %c0_76 = arith.constant 0 : index
    %c0_77 = arith.constant 0 : index
    %c0_78 = arith.constant 0 : index
    %54 = vector.load %arg2[%c2_75, %c0_76, %c0_77, %c0_78] : memref<3x3x128x128xf32, #tpu.memory_space<vmem>>, vector<1x1x128x128xf32>
    %55 = vector.shape_cast %54 : vector<1x1x128x128xf32> to vector<128x128xf32>
    %cst_79 = arith.constant dense<0.000000e+00> : vector<256x128xf32>
    %56 = tpu.matmul %53, %55, %cst_79 {dimension_numbers = #tpu.dot_dimension_numbers<[1], [0], [0], [1], [0, 0, 1, 1], [], []>} : vector<256x128xf32>, vector<128x128xf32>, vector<256x128xf32> -> vector<256x128xf32>
    %57 = arith.addf %50, %56 : vector<256x128xf32>
    %c0_80 = arith.constant 0 : index
    %c2_81 = arith.constant 2 : index
    %c1_82 = arith.constant 1 : index
    %c0_83 = arith.constant 0 : index
    %58 = vector.load %arg9[%c0_80, %c2_81, %c1_82, %c0_83] : memref<2x18x18x128xf32, #tpu.memory_space<vmem>>, vector<1x16x16x128xf32>
    %59 = vector.shape_cast %58 : vector<1x16x16x128xf32> to vector<16x16x128xf32>
    %60 = vector.shape_cast %59 : vector<16x16x128xf32> to vector<256x128xf32>
    %c2_84 = arith.constant 2 : index
    %c1_85 = arith.constant 1 : index
    %c0_86 = arith.constant 0 : index
    %c0_87 = arith.constant 0 : index
    %61 = vector.load %arg2[%c2_84, %c1_85, %c0_86, %c0_87] : memref<3x3x128x128xf32, #tpu.memory_space<vmem>>, vector<1x1x128x128xf32>
    %62 = vector.shape_cast %61 : vector<1x1x128x128xf32> to vector<128x128xf32>
    %cst_88 = arith.constant dense<0.000000e+00> : vector<256x128xf32>
    %63 = tpu.matmul %60, %62, %cst_88 {dimension_numbers = #tpu.dot_dimension_numbers<[1], [0], [0], [1], [0, 0, 1, 1], [], []>} : vector<256x128xf32>, vector<128x128xf32>, vector<256x128xf32> -> vector<256x128xf32>
    %64 = arith.addf %57, %63 : vector<256x128xf32>
    %c0_89 = arith.constant 0 : index
    %c2_90 = arith.constant 2 : index
    %c2_91 = arith.constant 2 : index
    %c0_92 = arith.constant 0 : index
    %65 = vector.load %arg9[%c0_89, %c2_90, %c2_91, %c0_92] : memref<2x18x18x128xf32, #tpu.memory_space<vmem>>, vector<1x16x16x128xf32>
    %66 = vector.shape_cast %65 : vector<1x16x16x128xf32> to vector<16x16x128xf32>
    %67 = vector.shape_cast %66 : vector<16x16x128xf32> to vector<256x128xf32>
    %c2_93 = arith.constant 2 : index
    %c2_94 = arith.constant 2 : index
    %c0_95 = arith.constant 0 : index
    %c0_96 = arith.constant 0 : index
    %68 = vector.load %arg2[%c2_93, %c2_94, %c0_95, %c0_96] : memref<3x3x128x128xf32, #tpu.memory_space<vmem>>, vector<1x1x128x128xf32>
    %69 = vector.shape_cast %68 : vector<1x1x128x128xf32> to vector<128x128xf32>
    %cst_97 = arith.constant dense<0.000000e+00> : vector<256x128xf32>
    %70 = tpu.matmul %67, %69, %cst_97 {dimension_numbers = #tpu.dot_dimension_numbers<[1], [0], [0], [1], [0, 0, 1, 1], [], []>} : vector<256x128xf32>, vector<128x128xf32>, vector<256x128xf32> -> vector<256x128xf32>
    %71 = arith.addf %64, %70 : vector<256x128xf32>
    %72 = vector.shape_cast %71 : vector<256x128xf32> to vector<16x16x128xf32>
    %c0_98 = arith.constant 0 : index
    %c1_99 = arith.constant 1 : index
    %c1_100 = arith.constant 1 : index
    %c0_101 = arith.constant 0 : index
    %73 = vector.load %arg10[%c0_98, %c1_99, %c1_100, %c0_101] : memref<2x18x18x128xf32, #tpu.memory_space<vmem>>, vector<1x16x16x128xf32>
    %74 = vector.shape_cast %73 : vector<1x16x16x128xf32> to vector<16x16x128xf32>
    %75 = vector.shape_cast %72 : vector<16x16x128xf32> to vector<1x16x16x128xf32>
    tpu.vector_store %arg10[%c0_98, %c1_99, %c1_100, %c0_101], %75 {strides = array<i32>} : memref<2x18x18x128xf32, #tpu.memory_space<vmem>>, vector<1x16x16x128xf32>,
    %cst_102 = arith.constant dense<0.000000e+00> : vector<128xf32>
    %76 = vector.multi_reduction <add>, %71, %cst_102 [0] : vector<256x128xf32> to vector<128xf32>
    %77 = vector.shape_cast %76 : vector<128xf32> to vector<1x128xf32>
    %78 = arith.addf %6, %77 : vector<1x128xf32>
    %79 = arith.mulf %71, %71 : vector<256x128xf32>
    %cst_103 = arith.constant dense<0.000000e+00> : vector<128xf32>
    %80 = vector.multi_reduction <add>, %79, %cst_103 [0] : vector<256x128xf32> to vector<128xf32>
    %81 = vector.shape_cast %80 : vector<128xf32> to vector<1x128xf32>
    %82 = arith.addf %7, %81 : vector<1x128xf32>
    %cst_104 = arith.constant 0.000000e+00 : f32
    %83 = vector.broadcast %cst_104 : f32 to vector<256x128xf32>
    %c1_105 = arith.constant 1 : index
    %c0_106 = arith.constant 0 : index
    %c0_107 = arith.constant 0 : index
    %c0_108 = arith.constant 0 : index
    %84 = vector.load %arg9[%c1_105, %c0_106, %c0_107, %c0_108] : memref<2x18x18x128xf32, #tpu.memory_space<vmem>>, vector<1x16x16x128xf32>
    %85 = vector.shape_cast %84 : vector<1x16x16x128xf32> to vector<16x16x128xf32>
    %86 = vector.shape_cast %85 : vector<16x16x128xf32> to vector<256x128xf32>
    %c0_109 = arith.constant 0 : index
    %c0_110 = arith.constant 0 : index
    %c0_111 = arith.constant 0 : index
    %c0_112 = arith.constant 0 : index
    %87 = vector.load %arg2[%c0_109, %c0_110, %c0_111, %c0_112] : memref<3x3x128x128xf32, #tpu.memory_space<vmem>>, vector<1x1x128x128xf32>
    %88 = vector.shape_cast %87 : vector<1x1x128x128xf32> to vector<128x128xf32>
    %cst_113 = arith.constant dense<0.000000e+00> : vector<256x128xf32>
    %89 = tpu.matmul %86, %88, %cst_113 {dimension_numbers = #tpu.dot_dimension_numbers<[1], [0], [0], [1], [0, 0, 1, 1], [], []>} : vector<256x128xf32>, vector<128x128xf32>, vector<256x128xf32> -> vector<256x128xf32>
    %90 = arith.addf %83, %89 : vector<256x128xf32>
    %c1_114 = arith.constant 1 : index
    %c0_115 = arith.constant 0 : index
    %c1_116 = arith.constant 1 : index
    %c0_117 = arith.constant 0 : index
    %91 = vector.load %arg9[%c1_114, %c0_115, %c1_116, %c0_117] : memref<2x18x18x128xf32, #tpu.memory_space<vmem>>, vector<1x16x16x128xf32>
    %92 = vector.shape_cast %91 : vector<1x16x16x128xf32> to vector<16x16x128xf32>
    %93 = vector.shape_cast %92 : vector<16x16x128xf32> to vector<256x128xf32>
    %c0_118 = arith.constant 0 : index
    %c1_119 = arith.constant 1 : index
    %c0_120 = arith.constant 0 : index
    %c0_121 = arith.constant 0 : index
    %94 = vector.load %arg2[%c0_118, %c1_119, %c0_120, %c0_121] : memref<3x3x128x128xf32, #tpu.memory_space<vmem>>, vector<1x1x128x128xf32>
    %95 = vector.shape_cast %94 : vector<1x1x128x128xf32> to vector<128x128xf32>
    %cst_122 = arith.constant dense<0.000000e+00> : vector<256x128xf32>
    %96 = tpu.matmul %93, %95, %cst_122 {dimension_numbers = #tpu.dot_dimension_numbers<[1], [0], [0], [1], [0, 0, 1, 1], [], []>} : vector<256x128xf32>, vector<128x128xf32>, vector<256x128xf32> -> vector<256x128xf32>
    %97 = arith.addf %90, %96 : vector<256x128xf32>
    %c1_123 = arith.constant 1 : index
    %c0_124 = arith.constant 0 : index
    %c2_125 = arith.constant 2 : index
    %c0_126 = arith.constant 0 : index
    %98 = vector.load %arg9[%c1_123, %c0_124, %c2_125, %c0_126] : memref<2x18x18x128xf32, #tpu.memory_space<vmem>>, vector<1x16x16x128xf32>
    %99 = vector.shape_cast %98 : vector<1x16x16x128xf32> to vector<16x16x128xf32>
    %100 = vector.shape_cast %99 : vector<16x16x128xf32> to vector<256x128xf32>
    %c0_127 = arith.constant 0 : index
    %c2_128 = arith.constant 2 : index
    %c0_129 = arith.constant 0 : index
    %c0_130 = arith.constant 0 : index
    %101 = vector.load %arg2[%c0_127, %c2_128, %c0_129, %c0_130] : memref<3x3x128x128xf32, #tpu.memory_space<vmem>>, vector<1x1x128x128xf32>
    %102 = vector.shape_cast %101 : vector<1x1x128x128xf32> to vector<128x128xf32>
    %cst_131 = arith.constant dense<0.000000e+00> : vector<256x128xf32>
    %103 = tpu.matmul %100, %102, %cst_131 {dimension_numbers = #tpu.dot_dimension_numbers<[1], [0], [0], [1], [0, 0, 1, 1], [], []>} : vector<256x128xf32>, vector<128x128xf32>, vector<256x128xf32> -> vector<256x128xf32>
    %104 = arith.addf %97, %103 : vector<256x128xf32>
    %c1_132 = arith.constant 1 : index
    %c1_133 = arith.constant 1 : index
    %c0_134 = arith.constant 0 : index
    %c0_135 = arith.constant 0 : index
    %105 = vector.load %arg9[%c1_132, %c1_133, %c0_134, %c0_135] : memref<2x18x18x128xf32, #tpu.memory_space<vmem>>, vector<1x16x16x128xf32>
    %106 = vector.shape_cast %105 : vector<1x16x16x128xf32> to vector<16x16x128xf32>
    %107 = vector.shape_cast %106 : vector<16x16x128xf32> to vector<256x128xf32>
    %c1_136 = arith.constant 1 : index
    %c0_137 = arith.constant 0 : index
    %c0_138 = arith.constant 0 : index
    %c0_139 = arith.constant 0 : index
    %108 = vector.load %arg2[%c1_136, %c0_137, %c0_138, %c0_139] : memref<3x3x128x128xf32, #tpu.memory_space<vmem>>, vector<1x1x128x128xf32>
    %109 = vector.shape_cast %108 : vector<1x1x128x128xf32> to vector<128x128xf32>
    %cst_140 = arith.constant dense<0.000000e+00> : vector<256x128xf32>
    %110 = tpu.matmul %107, %109, %cst_140 {dimension_numbers = #tpu.dot_dimension_numbers<[1], [0], [0], [1], [0, 0, 1, 1], [], []>} : vector<256x128xf32>, vector<128x128xf32>, vector<256x128xf32> -> vector<256x128xf32>
    %111 = arith.addf %104, %110 : vector<256x128xf32>
    %c1_141 = arith.constant 1 : index
    %c1_142 = arith.constant 1 : index
    %c1_143 = arith.constant 1 : index
    %c0_144 = arith.constant 0 : index
    %112 = vector.load %arg9[%c1_141, %c1_142, %c1_143, %c0_144] : memref<2x18x18x128xf32, #tpu.memory_space<vmem>>, vector<1x16x16x128xf32>
    %113 = vector.shape_cast %112 : vector<1x16x16x128xf32> to vector<16x16x128xf32>
    %114 = vector.shape_cast %113 : vector<16x16x128xf32> to vector<256x128xf32>
    %c1_145 = arith.constant 1 : index
    %c1_146 = arith.constant 1 : index
    %c0_147 = arith.constant 0 : index
    %c0_148 = arith.constant 0 : index
    %115 = vector.load %arg2[%c1_145, %c1_146, %c0_147, %c0_148] : memref<3x3x128x128xf32, #tpu.memory_space<vmem>>, vector<1x1x128x128xf32>
    %116 = vector.shape_cast %115 : vector<1x1x128x128xf32> to vector<128x128xf32>
    %cst_149 = arith.constant dense<0.000000e+00> : vector<256x128xf32>
    %117 = tpu.matmul %114, %116, %cst_149 {dimension_numbers = #tpu.dot_dimension_numbers<[1], [0], [0], [1], [0, 0, 1, 1], [], []>} : vector<256x128xf32>, vector<128x128xf32>, vector<256x128xf32> -> vector<256x128xf32>
    %118 = arith.addf %111, %117 : vector<256x128xf32>
    %c1_150 = arith.constant 1 : index
    %c1_151 = arith.constant 1 : index
    %c2_152 = arith.constant 2 : index
    %c0_153 = arith.constant 0 : index
    %119 = vector.load %arg9[%c1_150, %c1_151, %c2_152, %c0_153] : memref<2x18x18x128xf32, #tpu.memory_space<vmem>>, vector<1x16x16x128xf32>
    %120 = vector.shape_cast %119 : vector<1x16x16x128xf32> to vector<16x16x128xf32>
    %121 = vector.shape_cast %120 : vector<16x16x128xf32> to vector<256x128xf32>
    %c1_154 = arith.constant 1 : index
    %c2_155 = arith.constant 2 : index
    %c0_156 = arith.constant 0 : index
    %c0_157 = arith.constant 0 : index
    %122 = vector.load %arg2[%c1_154, %c2_155, %c0_156, %c0_157] : memref<3x3x128x128xf32, #tpu.memory_space<vmem>>, vector<1x1x128x128xf32>
    %123 = vector.shape_cast %122 : vector<1x1x128x128xf32> to vector<128x128xf32>
    %cst_158 = arith.constant dense<0.000000e+00> : vector<256x128xf32>
    %124 = tpu.matmul %121, %123, %cst_158 {dimension_numbers = #tpu.dot_dimension_numbers<[1], [0], [0], [1], [0, 0, 1, 1], [], []>} : vector<256x128xf32>, vector<128x128xf32>, vector<256x128xf32> -> vector<256x128xf32>
    %125 = arith.addf %118, %124 : vector<256x128xf32>
    %c1_159 = arith.constant 1 : index
    %c2_160 = arith.constant 2 : index
    %c0_161 = arith.constant 0 : index
    %c0_162 = arith.constant 0 : index
    %126 = vector.load %arg9[%c1_159, %c2_160, %c0_161, %c0_162] : memref<2x18x18x128xf32, #tpu.memory_space<vmem>>, vector<1x16x16x128xf32>
    %127 = vector.shape_cast %126 : vector<1x16x16x128xf32> to vector<16x16x128xf32>
    %128 = vector.shape_cast %127 : vector<16x16x128xf32> to vector<256x128xf32>
    %c2_163 = arith.constant 2 : index
    %c0_164 = arith.constant 0 : index
    %c0_165 = arith.constant 0 : index
    %c0_166 = arith.constant 0 : index
    %129 = vector.load %arg2[%c2_163, %c0_164, %c0_165, %c0_166] : memref<3x3x128x128xf32, #tpu.memory_space<vmem>>, vector<1x1x128x128xf32>
    %130 = vector.shape_cast %129 : vector<1x1x128x128xf32> to vector<128x128xf32>
    %cst_167 = arith.constant dense<0.000000e+00> : vector<256x128xf32>
    %131 = tpu.matmul %128, %130, %cst_167 {dimension_numbers = #tpu.dot_dimension_numbers<[1], [0], [0], [1], [0, 0, 1, 1], [], []>} : vector<256x128xf32>, vector<128x128xf32>, vector<256x128xf32> -> vector<256x128xf32>
    %132 = arith.addf %125, %131 : vector<256x128xf32>
    %c1_168 = arith.constant 1 : index
    %c2_169 = arith.constant 2 : index
    %c1_170 = arith.constant 1 : index
    %c0_171 = arith.constant 0 : index
    %133 = vector.load %arg9[%c1_168, %c2_169, %c1_170, %c0_171] : memref<2x18x18x128xf32, #tpu.memory_space<vmem>>, vector<1x16x16x128xf32>
    %134 = vector.shape_cast %133 : vector<1x16x16x128xf32> to vector<16x16x128xf32>
    %135 = vector.shape_cast %134 : vector<16x16x128xf32> to vector<256x128xf32>
    %c2_172 = arith.constant 2 : index
    %c1_173 = arith.constant 1 : index
    %c0_174 = arith.constant 0 : index
    %c0_175 = arith.constant 0 : index
    %136 = vector.load %arg2[%c2_172, %c1_173, %c0_174, %c0_175] : memref<3x3x128x128xf32, #tpu.memory_space<vmem>>, vector<1x1x128x128xf32>
    %137 = vector.shape_cast %136 : vector<1x1x128x128xf32> to vector<128x128xf32>
    %cst_176 = arith.constant dense<0.000000e+00> : vector<256x128xf32>
    %138 = tpu.matmul %135, %137, %cst_176 {dimension_numbers = #tpu.dot_dimension_numbers<[1], [0], [0], [1], [0, 0, 1, 1], [], []>} : vector<256x128xf32>, vector<128x128xf32>, vector<256x128xf32> -> vector<256x128xf32>
    %139 = arith.addf %132, %138 : vector<256x128xf32>
    %c1_177 = arith.constant 1 : index
    %c2_178 = arith.constant 2 : index
    %c2_179 = arith.constant 2 : index
    %c0_180 = arith.constant 0 : index
    %140 = vector.load %arg9[%c1_177, %c2_178, %c2_179, %c0_180] : memref<2x18x18x128xf32, #tpu.memory_space<vmem>>, vector<1x16x16x128xf32>
    %141 = vector.shape_cast %140 : vector<1x16x16x128xf32> to vector<16x16x128xf32>
    %142 = vector.shape_cast %141 : vector<16x16x128xf32> to vector<256x128xf32>
    %c2_181 = arith.constant 2 : index
    %c2_182 = arith.constant 2 : index
    %c0_183 = arith.constant 0 : index
    %c0_184 = arith.constant 0 : index
    %143 = vector.load %arg2[%c2_181, %c2_182, %c0_183, %c0_184] : memref<3x3x128x128xf32, #tpu.memory_space<vmem>>, vector<1x1x128x128xf32>
    %144 = vector.shape_cast %143 : vector<1x1x128x128xf32> to vector<128x128xf32>
    %cst_185 = arith.constant dense<0.000000e+00> : vector<256x128xf32>
    %145 = tpu.matmul %142, %144, %cst_185 {dimension_numbers = #tpu.dot_dimension_numbers<[1], [0], [0], [1], [0, 0, 1, 1], [], []>} : vector<256x128xf32>, vector<128x128xf32>, vector<256x128xf32> -> vector<256x128xf32>
    %146 = arith.addf %139, %145 : vector<256x128xf32>
    %147 = vector.shape_cast %146 : vector<256x128xf32> to vector<16x16x128xf32>
    %c1_186 = arith.constant 1 : index
    %c1_187 = arith.constant 1 : index
    %c1_188 = arith.constant 1 : index
    %c0_189 = arith.constant 0 : index
    %148 = vector.load %arg10[%c1_186, %c1_187, %c1_188, %c0_189] : memref<2x18x18x128xf32, #tpu.memory_space<vmem>>, vector<1x16x16x128xf32>
    %149 = vector.shape_cast %148 : vector<1x16x16x128xf32> to vector<16x16x128xf32>
    %150 = vector.shape_cast %147 : vector<16x16x128xf32> to vector<1x16x16x128xf32>
    tpu.vector_store %arg10[%c1_186, %c1_187, %c1_188, %c0_189], %150 {strides = array<i32>} : memref<2x18x18x128xf32, #tpu.memory_space<vmem>>, vector<1x16x16x128xf32>,
    %cst_190 = arith.constant dense<0.000000e+00> : vector<128xf32>
    %151 = vector.multi_reduction <add>, %146, %cst_190 [0] : vector<256x128xf32> to vector<128xf32>
    %152 = vector.shape_cast %151 : vector<128xf32> to vector<1x128xf32>
    %153 = arith.addf %78, %152 : vector<1x128xf32>
    %154 = arith.mulf %146, %146 : vector<256x128xf32>
    %cst_191 = arith.constant dense<0.000000e+00> : vector<128xf32>
    %155 = vector.multi_reduction <add>, %154, %cst_191 [0] : vector<256x128xf32> to vector<128xf32>
    %156 = vector.shape_cast %155 : vector<128xf32> to vector<1x128xf32>
    %157 = arith.addf %82, %156 : vector<1x128xf32>
    %c0_192 = arith.constant 0 : index
    %c0_193 = arith.constant 0 : index
    %158 = vector.load %arg4[%c0_192, %c0_193] : memref<1x128xf32, #tpu.memory_space<vmem>>, vector<1x128xf32>
    %c0_194 = arith.constant 0 : index
    %c0_195 = arith.constant 0 : index
    %159 = vector.load %arg5[%c0_194, %c0_195] : memref<1x128xf32, #tpu.memory_space<vmem>>, vector<1x128xf32>
    %cst_196 = arith.constant 0.001953125 : f32
    %160 = vector.broadcast %cst_196 : f32 to vector<1x128xf32>
    %161 = arith.mulf %153, %160 : vector<1x128xf32>
    %cst_197 = arith.constant 0.001953125 : f32
    %162 = vector.broadcast %cst_197 : f32 to vector<1x128xf32>
    %163 = arith.mulf %157, %162 : vector<1x128xf32>
    %164 = arith.mulf %161, %161 : vector<1x128xf32>
    %165 = arith.subf %163, %164 : vector<1x128xf32>
    %cst_198 = arith.constant 0.000000e+00 : f32
    %166 = vector.broadcast %cst_198 : f32 to vector<1x128xf32>
    %167 = arith.maximumf %165, %166 : vector<1x128xf32>
    %cst_199 = arith.constant 9.99999974E-6 : f32
    %168 = vector.broadcast %cst_199 : f32 to vector<1x128xf32>
    %169 = arith.addf %167, %168 : vector<1x128xf32>
    %170 = math.rsqrt %169 : vector<1x128xf32>
    %171 = arith.mulf %158, %170 : vector<1x128xf32>
    %172 = arith.mulf %161, %171 : vector<1x128xf32>
    %173 = arith.subf %159, %172 : vector<1x128xf32>
    %c0_200 = arith.constant 0 : index
    %c1_201 = arith.constant 1 : index
    %c1_202 = arith.constant 1 : index
    %c0_203 = arith.constant 0 : index
    %174 = vector.load %arg10[%c0_200, %c1_201, %c1_202, %c0_203] : memref<2x18x18x128xf32, #tpu.memory_space<vmem>>, vector<1x16x16x128xf32>
    %175 = vector.shape_cast %174 : vector<1x16x16x128xf32> to vector<16x16x128xf32>
    %176 = vector.shape_cast %171 : vector<1x128xf32> to vector<1x1x128xf32>
    %177 = vector.broadcast %176 : vector<1x1x128xf32> to vector<16x16x128xf32>
    %178 = arith.mulf %175, %177 : vector<16x16x128xf32>
    %179 = vector.shape_cast %173 : vector<1x128xf32> to vector<1x1x128xf32>
    %180 = vector.broadcast %179 : vector<1x1x128xf32> to vector<16x16x128xf32>
    %181 = arith.addf %178, %180 : vector<16x16x128xf32>
    %cst_204 = arith.constant 0.000000e+00 : f32
    %182 = vector.broadcast %cst_204 : f32 to vector<16x16x128xf32>
    %183 = arith.maximumf %181, %182 : vector<16x16x128xf32>
    %c0_205 = arith.constant 0 : index
    %c1_206 = arith.constant 1 : index
    %c1_207 = arith.constant 1 : index
    %c0_208 = arith.constant 0 : index
    %184 = vector.load %arg10[%c0_205, %c1_206, %c1_207, %c0_208] : memref<2x18x18x128xf32, #tpu.memory_space<vmem>>, vector<1x16x16x128xf32>
    %185 = vector.shape_cast %184 : vector<1x16x16x128xf32> to vector<16x16x128xf32>
    %186 = vector.shape_cast %183 : vector<16x16x128xf32> to vector<1x16x16x128xf32>
    tpu.vector_store %arg10[%c0_205, %c1_206, %c1_207, %c0_208], %186 {strides = array<i32>} : memref<2x18x18x128xf32, #tpu.memory_space<vmem>>, vector<1x16x16x128xf32>,
    %c1_209 = arith.constant 1 : index
    %c1_210 = arith.constant 1 : index
    %c1_211 = arith.constant 1 : index
    %c0_212 = arith.constant 0 : index
    %187 = vector.load %arg10[%c1_209, %c1_210, %c1_211, %c0_212] : memref<2x18x18x128xf32, #tpu.memory_space<vmem>>, vector<1x16x16x128xf32>
    %188 = vector.shape_cast %187 : vector<1x16x16x128xf32> to vector<16x16x128xf32>
    %189 = vector.shape_cast %171 : vector<1x128xf32> to vector<1x1x128xf32>
    %190 = vector.broadcast %189 : vector<1x1x128xf32> to vector<16x16x128xf32>
    %191 = arith.mulf %188, %190 : vector<16x16x128xf32>
    %192 = vector.shape_cast %173 : vector<1x128xf32> to vector<1x1x128xf32>
    %193 = vector.broadcast %192 : vector<1x1x128xf32> to vector<16x16x128xf32>
    %194 = arith.addf %191, %193 : vector<16x16x128xf32>
    %cst_213 = arith.constant 0.000000e+00 : f32
    %195 = vector.broadcast %cst_213 : f32 to vector<16x16x128xf32>
    %196 = arith.maximumf %194, %195 : vector<16x16x128xf32>
    %c1_214 = arith.constant 1 : index
    %c1_215 = arith.constant 1 : index
    %c1_216 = arith.constant 1 : index
    %c0_217 = arith.constant 0 : index
    %197 = vector.load %arg10[%c1_214, %c1_215, %c1_216, %c0_217] : memref<2x18x18x128xf32, #tpu.memory_space<vmem>>, vector<1x16x16x128xf32>
    %198 = vector.shape_cast %197 : vector<1x16x16x128xf32> to vector<16x16x128xf32>
    %199 = vector.shape_cast %196 : vector<16x16x128xf32> to vector<1x16x16x128xf32>
    tpu.vector_store %arg10[%c1_214, %c1_215, %c1_216, %c0_217], %199 {strides = array<i32>} : memref<2x18x18x128xf32, #tpu.memory_space<vmem>>, vector<1x16x16x128xf32>,
    %cst_218 = arith.constant 0.000000e+00 : f32
    %200 = vector.broadcast %cst_218 : f32 to vector<1x128xf32>
    %cst_219 = arith.constant 0.000000e+00 : f32
    %201 = vector.broadcast %cst_219 : f32 to vector<1x128xf32>
    %cst_220 = arith.constant 0.000000e+00 : f32
    %202 = vector.broadcast %cst_220 : f32 to vector<256x128xf32>
    %c0_221 = arith.constant 0 : index
    %c0_222 = arith.constant 0 : index
    %c0_223 = arith.constant 0 : index
    %c0_224 = arith.constant 0 : index
    %203 = vector.load %arg10[%c0_221, %c0_222, %c0_223, %c0_224] : memref<2x18x18x128xf32, #tpu.memory_space<vmem>>, vector<1x16x16x128xf32>
    %204 = vector.shape_cast %203 : vector<1x16x16x128xf32> to vector<16x16x128xf32>
    %205 = vector.shape_cast %204 : vector<16x16x128xf32> to vector<256x128xf32>
    %c0_225 = arith.constant 0 : index
    %c0_226 = arith.constant 0 : index
    %c0_227 = arith.constant 0 : index
    %c0_228 = arith.constant 0 : index
    %206 = vector.load %arg3[%c0_225, %c0_226, %c0_227, %c0_228] : memref<3x3x128x128xf32, #tpu.memory_space<vmem>>, vector<1x1x128x128xf32>
    %207 = vector.shape_cast %206 : vector<1x1x128x128xf32> to vector<128x128xf32>
    %cst_229 = arith.constant dense<0.000000e+00> : vector<256x128xf32>
    %208 = tpu.matmul %205, %207, %cst_229 {dimension_numbers = #tpu.dot_dimension_numbers<[1], [0], [0], [1], [0, 0, 1, 1], [], []>} : vector<256x128xf32>, vector<128x128xf32>, vector<256x128xf32> -> vector<256x128xf32>
    %209 = arith.addf %202, %208 : vector<256x128xf32>
    %c0_230 = arith.constant 0 : index
    %c0_231 = arith.constant 0 : index
    %c1_232 = arith.constant 1 : index
    %c0_233 = arith.constant 0 : index
    %210 = vector.load %arg10[%c0_230, %c0_231, %c1_232, %c0_233] : memref<2x18x18x128xf32, #tpu.memory_space<vmem>>, vector<1x16x16x128xf32>
    %211 = vector.shape_cast %210 : vector<1x16x16x128xf32> to vector<16x16x128xf32>
    %212 = vector.shape_cast %211 : vector<16x16x128xf32> to vector<256x128xf32>
    %c0_234 = arith.constant 0 : index
    %c1_235 = arith.constant 1 : index
    %c0_236 = arith.constant 0 : index
    %c0_237 = arith.constant 0 : index
    %213 = vector.load %arg3[%c0_234, %c1_235, %c0_236, %c0_237] : memref<3x3x128x128xf32, #tpu.memory_space<vmem>>, vector<1x1x128x128xf32>
    %214 = vector.shape_cast %213 : vector<1x1x128x128xf32> to vector<128x128xf32>
    %cst_238 = arith.constant dense<0.000000e+00> : vector<256x128xf32>
    %215 = tpu.matmul %212, %214, %cst_238 {dimension_numbers = #tpu.dot_dimension_numbers<[1], [0], [0], [1], [0, 0, 1, 1], [], []>} : vector<256x128xf32>, vector<128x128xf32>, vector<256x128xf32> -> vector<256x128xf32>
    %216 = arith.addf %209, %215 : vector<256x128xf32>
    %c0_239 = arith.constant 0 : index
    %c0_240 = arith.constant 0 : index
    %c2_241 = arith.constant 2 : index
    %c0_242 = arith.constant 0 : index
    %217 = vector.load %arg10[%c0_239, %c0_240, %c2_241, %c0_242] : memref<2x18x18x128xf32, #tpu.memory_space<vmem>>, vector<1x16x16x128xf32>
    %218 = vector.shape_cast %217 : vector<1x16x16x128xf32> to vector<16x16x128xf32>
    %219 = vector.shape_cast %218 : vector<16x16x128xf32> to vector<256x128xf32>
    %c0_243 = arith.constant 0 : index
    %c2_244 = arith.constant 2 : index
    %c0_245 = arith.constant 0 : index
    %c0_246 = arith.constant 0 : index
    %220 = vector.load %arg3[%c0_243, %c2_244, %c0_245, %c0_246] : memref<3x3x128x128xf32, #tpu.memory_space<vmem>>, vector<1x1x128x128xf32>
    %221 = vector.shape_cast %220 : vector<1x1x128x128xf32> to vector<128x128xf32>
    %cst_247 = arith.constant dense<0.000000e+00> : vector<256x128xf32>
    %222 = tpu.matmul %219, %221, %cst_247 {dimension_numbers = #tpu.dot_dimension_numbers<[1], [0], [0], [1], [0, 0, 1, 1], [], []>} : vector<256x128xf32>, vector<128x128xf32>, vector<256x128xf32> -> vector<256x128xf32>
    %223 = arith.addf %216, %222 : vector<256x128xf32>
    %c0_248 = arith.constant 0 : index
    %c1_249 = arith.constant 1 : index
    %c0_250 = arith.constant 0 : index
    %c0_251 = arith.constant 0 : index
    %224 = vector.load %arg10[%c0_248, %c1_249, %c0_250, %c0_251] : memref<2x18x18x128xf32, #tpu.memory_space<vmem>>, vector<1x16x16x128xf32>
    %225 = vector.shape_cast %224 : vector<1x16x16x128xf32> to vector<16x16x128xf32>
    %226 = vector.shape_cast %225 : vector<16x16x128xf32> to vector<256x128xf32>
    %c1_252 = arith.constant 1 : index
    %c0_253 = arith.constant 0 : index
    %c0_254 = arith.constant 0 : index
    %c0_255 = arith.constant 0 : index
    %227 = vector.load %arg3[%c1_252, %c0_253, %c0_254, %c0_255] : memref<3x3x128x128xf32, #tpu.memory_space<vmem>>, vector<1x1x128x128xf32>
    %228 = vector.shape_cast %227 : vector<1x1x128x128xf32> to vector<128x128xf32>
    %cst_256 = arith.constant dense<0.000000e+00> : vector<256x128xf32>
    %229 = tpu.matmul %226, %228, %cst_256 {dimension_numbers = #tpu.dot_dimension_numbers<[1], [0], [0], [1], [0, 0, 1, 1], [], []>} : vector<256x128xf32>, vector<128x128xf32>, vector<256x128xf32> -> vector<256x128xf32>
    %230 = arith.addf %223, %229 : vector<256x128xf32>
    %c0_257 = arith.constant 0 : index
    %c1_258 = arith.constant 1 : index
    %c1_259 = arith.constant 1 : index
    %c0_260 = arith.constant 0 : index
    %231 = vector.load %arg10[%c0_257, %c1_258, %c1_259, %c0_260] : memref<2x18x18x128xf32, #tpu.memory_space<vmem>>, vector<1x16x16x128xf32>
    %232 = vector.shape_cast %231 : vector<1x16x16x128xf32> to vector<16x16x128xf32>
    %233 = vector.shape_cast %232 : vector<16x16x128xf32> to vector<256x128xf32>
    %c1_261 = arith.constant 1 : index
    %c1_262 = arith.constant 1 : index
    %c0_263 = arith.constant 0 : index
    %c0_264 = arith.constant 0 : index
    %234 = vector.load %arg3[%c1_261, %c1_262, %c0_263, %c0_264] : memref<3x3x128x128xf32, #tpu.memory_space<vmem>>, vector<1x1x128x128xf32>
    %235 = vector.shape_cast %234 : vector<1x1x128x128xf32> to vector<128x128xf32>
    %cst_265 = arith.constant dense<0.000000e+00> : vector<256x128xf32>
    %236 = tpu.matmul %233, %235, %cst_265 {dimension_numbers = #tpu.dot_dimension_numbers<[1], [0], [0], [1], [0, 0, 1, 1], [], []>} : vector<256x128xf32>, vector<128x128xf32>, vector<256x128xf32> -> vector<256x128xf32>
    %237 = arith.addf %230, %236 : vector<256x128xf32>
    %c0_266 = arith.constant 0 : index
    %c1_267 = arith.constant 1 : index
    %c2_268 = arith.constant 2 : index
    %c0_269 = arith.constant 0 : index
    %238 = vector.load %arg10[%c0_266, %c1_267, %c2_268, %c0_269] : memref<2x18x18x128xf32, #tpu.memory_space<vmem>>, vector<1x16x16x128xf32>
    %239 = vector.shape_cast %238 : vector<1x16x16x128xf32> to vector<16x16x128xf32>
    %240 = vector.shape_cast %239 : vector<16x16x128xf32> to vector<256x128xf32>
    %c1_270 = arith.constant 1 : index
    %c2_271 = arith.constant 2 : index
    %c0_272 = arith.constant 0 : index
    %c0_273 = arith.constant 0 : index
    %241 = vector.load %arg3[%c1_270, %c2_271, %c0_272, %c0_273] : memref<3x3x128x128xf32, #tpu.memory_space<vmem>>, vector<1x1x128x128xf32>
    %242 = vector.shape_cast %241 : vector<1x1x128x128xf32> to vector<128x128xf32>
    %cst_274 = arith.constant dense<0.000000e+00> : vector<256x128xf32>
    %243 = tpu.matmul %240, %242, %cst_274 {dimension_numbers = #tpu.dot_dimension_numbers<[1], [0], [0], [1], [0, 0, 1, 1], [], []>} : vector<256x128xf32>, vector<128x128xf32>, vector<256x128xf32> -> vector<256x128xf32>
    %244 = arith.addf %237, %243 : vector<256x128xf32>
    %c0_275 = arith.constant 0 : index
    %c2_276 = arith.constant 2 : index
    %c0_277 = arith.constant 0 : index
    %c0_278 = arith.constant 0 : index
    %245 = vector.load %arg10[%c0_275, %c2_276, %c0_277, %c0_278] : memref<2x18x18x128xf32, #tpu.memory_space<vmem>>, vector<1x16x16x128xf32>
    %246 = vector.shape_cast %245 : vector<1x16x16x128xf32> to vector<16x16x128xf32>
    %247 = vector.shape_cast %246 : vector<16x16x128xf32> to vector<256x128xf32>
    %c2_279 = arith.constant 2 : index
    %c0_280 = arith.constant 0 : index
    %c0_281 = arith.constant 0 : index
    %c0_282 = arith.constant 0 : index
    %248 = vector.load %arg3[%c2_279, %c0_280, %c0_281, %c0_282] : memref<3x3x128x128xf32, #tpu.memory_space<vmem>>, vector<1x1x128x128xf32>
    %249 = vector.shape_cast %248 : vector<1x1x128x128xf32> to vector<128x128xf32>
    %cst_283 = arith.constant dense<0.000000e+00> : vector<256x128xf32>
    %250 = tpu.matmul %247, %249, %cst_283 {dimension_numbers = #tpu.dot_dimension_numbers<[1], [0], [0], [1], [0, 0, 1, 1], [], []>} : vector<256x128xf32>, vector<128x128xf32>, vector<256x128xf32> -> vector<256x128xf32>
    %251 = arith.addf %244, %250 : vector<256x128xf32>
    %c0_284 = arith.constant 0 : index
    %c2_285 = arith.constant 2 : index
    %c1_286 = arith.constant 1 : index
    %c0_287 = arith.constant 0 : index
    %252 = vector.load %arg10[%c0_284, %c2_285, %c1_286, %c0_287] : memref<2x18x18x128xf32, #tpu.memory_space<vmem>>, vector<1x16x16x128xf32>
    %253 = vector.shape_cast %252 : vector<1x16x16x128xf32> to vector<16x16x128xf32>
    %254 = vector.shape_cast %253 : vector<16x16x128xf32> to vector<256x128xf32>
    %c2_288 = arith.constant 2 : index
    %c1_289 = arith.constant 1 : index
    %c0_290 = arith.constant 0 : index
    %c0_291 = arith.constant 0 : index
    %255 = vector.load %arg3[%c2_288, %c1_289, %c0_290, %c0_291] : memref<3x3x128x128xf32, #tpu.memory_space<vmem>>, vector<1x1x128x128xf32>
    %256 = vector.shape_cast %255 : vector<1x1x128x128xf32> to vector<128x128xf32>
    %cst_292 = arith.constant dense<0.000000e+00> : vector<256x128xf32>
    %257 = tpu.matmul %254, %256, %cst_292 {dimension_numbers = #tpu.dot_dimension_numbers<[1], [0], [0], [1], [0, 0, 1, 1], [], []>} : vector<256x128xf32>, vector<128x128xf32>, vector<256x128xf32> -> vector<256x128xf32>
    %258 = arith.addf %251, %257 : vector<256x128xf32>
    %c0_293 = arith.constant 0 : index
    %c2_294 = arith.constant 2 : index
    %c2_295 = arith.constant 2 : index
    %c0_296 = arith.constant 0 : index
    %259 = vector.load %arg10[%c0_293, %c2_294, %c2_295, %c0_296] : memref<2x18x18x128xf32, #tpu.memory_space<vmem>>, vector<1x16x16x128xf32>
    %260 = vector.shape_cast %259 : vector<1x16x16x128xf32> to vector<16x16x128xf32>
    %261 = vector.shape_cast %260 : vector<16x16x128xf32> to vector<256x128xf32>
    %c2_297 = arith.constant 2 : index
    %c2_298 = arith.constant 2 : index
    %c0_299 = arith.constant 0 : index
    %c0_300 = arith.constant 0 : index
    %262 = vector.load %arg3[%c2_297, %c2_298, %c0_299, %c0_300] : memref<3x3x128x128xf32, #tpu.memory_space<vmem>>, vector<1x1x128x128xf32>
    %263 = vector.shape_cast %262 : vector<1x1x128x128xf32> to vector<128x128xf32>
    %cst_301 = arith.constant dense<0.000000e+00> : vector<256x128xf32>
    %264 = tpu.matmul %261, %263, %cst_301 {dimension_numbers = #tpu.dot_dimension_numbers<[1], [0], [0], [1], [0, 0, 1, 1], [], []>} : vector<256x128xf32>, vector<128x128xf32>, vector<256x128xf32> -> vector<256x128xf32>
    %265 = arith.addf %258, %264 : vector<256x128xf32>
    %266 = vector.shape_cast %265 : vector<256x128xf32> to vector<16x16x128xf32>
    %c0_302 = arith.constant 0 : index
    %c0_303 = arith.constant 0 : index
    %c0_304 = arith.constant 0 : index
    %c0_305 = arith.constant 0 : index
    %267 = vector.load %arg11[%c0_302, %c0_303, %c0_304, %c0_305] : memref<2x16x16x128xf32, #tpu.memory_space<vmem>>, vector<1x16x16x128xf32>
    %268 = vector.shape_cast %267 : vector<1x16x16x128xf32> to vector<16x16x128xf32>
    %269 = vector.shape_cast %266 : vector<16x16x128xf32> to vector<1x16x16x128xf32>
    tpu.vector_store %arg11[%c0_302, %c0_303, %c0_304, %c0_305], %269 {strides = array<i32>} : memref<2x16x16x128xf32, #tpu.memory_space<vmem>>, vector<1x16x16x128xf32>,
    %cst_306 = arith.constant dense<0.000000e+00> : vector<128xf32>
    %270 = vector.multi_reduction <add>, %265, %cst_306 [0] : vector<256x128xf32> to vector<128xf32>
    %271 = vector.shape_cast %270 : vector<128xf32> to vector<1x128xf32>
    %272 = arith.addf %200, %271 : vector<1x128xf32>
    %273 = arith.mulf %265, %265 : vector<256x128xf32>
    %cst_307 = arith.constant dense<0.000000e+00> : vector<128xf32>
    %274 = vector.multi_reduction <add>, %273, %cst_307 [0] : vector<256x128xf32> to vector<128xf32>
    %275 = vector.shape_cast %274 : vector<128xf32> to vector<1x128xf32>
    %276 = arith.addf %201, %275 : vector<1x128xf32>
    %cst_308 = arith.constant 0.000000e+00 : f32
    %277 = vector.broadcast %cst_308 : f32 to vector<256x128xf32>
    %c1_309 = arith.constant 1 : index
    %c0_310 = arith.constant 0 : index
    %c0_311 = arith.constant 0 : index
    %c0_312 = arith.constant 0 : index
    %278 = vector.load %arg10[%c1_309, %c0_310, %c0_311, %c0_312] : memref<2x18x18x128xf32, #tpu.memory_space<vmem>>, vector<1x16x16x128xf32>
    %279 = vector.shape_cast %278 : vector<1x16x16x128xf32> to vector<16x16x128xf32>
    %280 = vector.shape_cast %279 : vector<16x16x128xf32> to vector<256x128xf32>
    %c0_313 = arith.constant 0 : index
    %c0_314 = arith.constant 0 : index
    %c0_315 = arith.constant 0 : index
    %c0_316 = arith.constant 0 : index
    %281 = vector.load %arg3[%c0_313, %c0_314, %c0_315, %c0_316] : memref<3x3x128x128xf32, #tpu.memory_space<vmem>>, vector<1x1x128x128xf32>
    %282 = vector.shape_cast %281 : vector<1x1x128x128xf32> to vector<128x128xf32>
    %cst_317 = arith.constant dense<0.000000e+00> : vector<256x128xf32>
    %283 = tpu.matmul %280, %282, %cst_317 {dimension_numbers = #tpu.dot_dimension_numbers<[1], [0], [0], [1], [0, 0, 1, 1], [], []>} : vector<256x128xf32>, vector<128x128xf32>, vector<256x128xf32> -> vector<256x128xf32>
    %284 = arith.addf %277, %283 : vector<256x128xf32>
    %c1_318 = arith.constant 1 : index
    %c0_319 = arith.constant 0 : index
    %c1_320 = arith.constant 1 : index
    %c0_321 = arith.constant 0 : index
    %285 = vector.load %arg10[%c1_318, %c0_319, %c1_320, %c0_321] : memref<2x18x18x128xf32, #tpu.memory_space<vmem>>, vector<1x16x16x128xf32>
    %286 = vector.shape_cast %285 : vector<1x16x16x128xf32> to vector<16x16x128xf32>
    %287 = vector.shape_cast %286 : vector<16x16x128xf32> to vector<256x128xf32>
    %c0_322 = arith.constant 0 : index
    %c1_323 = arith.constant 1 : index
    %c0_324 = arith.constant 0 : index
    %c0_325 = arith.constant 0 : index
    %288 = vector.load %arg3[%c0_322, %c1_323, %c0_324, %c0_325] : memref<3x3x128x128xf32, #tpu.memory_space<vmem>>, vector<1x1x128x128xf32>
    %289 = vector.shape_cast %288 : vector<1x1x128x128xf32> to vector<128x128xf32>
    %cst_326 = arith.constant dense<0.000000e+00> : vector<256x128xf32>
    %290 = tpu.matmul %287, %289, %cst_326 {dimension_numbers = #tpu.dot_dimension_numbers<[1], [0], [0], [1], [0, 0, 1, 1], [], []>} : vector<256x128xf32>, vector<128x128xf32>, vector<256x128xf32> -> vector<256x128xf32>
    %291 = arith.addf %284, %290 : vector<256x128xf32>
    %c1_327 = arith.constant 1 : index
    %c0_328 = arith.constant 0 : index
    %c2_329 = arith.constant 2 : index
    %c0_330 = arith.constant 0 : index
    %292 = vector.load %arg10[%c1_327, %c0_328, %c2_329, %c0_330] : memref<2x18x18x128xf32, #tpu.memory_space<vmem>>, vector<1x16x16x128xf32>
    %293 = vector.shape_cast %292 : vector<1x16x16x128xf32> to vector<16x16x128xf32>
    %294 = vector.shape_cast %293 : vector<16x16x128xf32> to vector<256x128xf32>
    %c0_331 = arith.constant 0 : index
    %c2_332 = arith.constant 2 : index
    %c0_333 = arith.constant 0 : index
    %c0_334 = arith.constant 0 : index
    %295 = vector.load %arg3[%c0_331, %c2_332, %c0_333, %c0_334] : memref<3x3x128x128xf32, #tpu.memory_space<vmem>>, vector<1x1x128x128xf32>
    %296 = vector.shape_cast %295 : vector<1x1x128x128xf32> to vector<128x128xf32>
    %cst_335 = arith.constant dense<0.000000e+00> : vector<256x128xf32>
    %297 = tpu.matmul %294, %296, %cst_335 {dimension_numbers = #tpu.dot_dimension_numbers<[1], [0], [0], [1], [0, 0, 1, 1], [], []>} : vector<256x128xf32>, vector<128x128xf32>, vector<256x128xf32> -> vector<256x128xf32>
    %298 = arith.addf %291, %297 : vector<256x128xf32>
    %c1_336 = arith.constant 1 : index
    %c1_337 = arith.constant 1 : index
    %c0_338 = arith.constant 0 : index
    %c0_339 = arith.constant 0 : index
    %299 = vector.load %arg10[%c1_336, %c1_337, %c0_338, %c0_339] : memref<2x18x18x128xf32, #tpu.memory_space<vmem>>, vector<1x16x16x128xf32>
    %300 = vector.shape_cast %299 : vector<1x16x16x128xf32> to vector<16x16x128xf32>
    %301 = vector.shape_cast %300 : vector<16x16x128xf32> to vector<256x128xf32>
    %c1_340 = arith.constant 1 : index
    %c0_341 = arith.constant 0 : index
    %c0_342 = arith.constant 0 : index
    %c0_343 = arith.constant 0 : index
    %302 = vector.load %arg3[%c1_340, %c0_341, %c0_342, %c0_343] : memref<3x3x128x128xf32, #tpu.memory_space<vmem>>, vector<1x1x128x128xf32>
    %303 = vector.shape_cast %302 : vector<1x1x128x128xf32> to vector<128x128xf32>
    %cst_344 = arith.constant dense<0.000000e+00> : vector<256x128xf32>
    %304 = tpu.matmul %301, %303, %cst_344 {dimension_numbers = #tpu.dot_dimension_numbers<[1], [0], [0], [1], [0, 0, 1, 1], [], []>} : vector<256x128xf32>, vector<128x128xf32>, vector<256x128xf32> -> vector<256x128xf32>
    %305 = arith.addf %298, %304 : vector<256x128xf32>
    %c1_345 = arith.constant 1 : index
    %c1_346 = arith.constant 1 : index
    %c1_347 = arith.constant 1 : index
    %c0_348 = arith.constant 0 : index
    %306 = vector.load %arg10[%c1_345, %c1_346, %c1_347, %c0_348] : memref<2x18x18x128xf32, #tpu.memory_space<vmem>>, vector<1x16x16x128xf32>
    %307 = vector.shape_cast %306 : vector<1x16x16x128xf32> to vector<16x16x128xf32>
    %308 = vector.shape_cast %307 : vector<16x16x128xf32> to vector<256x128xf32>
    %c1_349 = arith.constant 1 : index
    %c1_350 = arith.constant 1 : index
    %c0_351 = arith.constant 0 : index
    %c0_352 = arith.constant 0 : index
    %309 = vector.load %arg3[%c1_349, %c1_350, %c0_351, %c0_352] : memref<3x3x128x128xf32, #tpu.memory_space<vmem>>, vector<1x1x128x128xf32>
    %310 = vector.shape_cast %309 : vector<1x1x128x128xf32> to vector<128x128xf32>
    %cst_353 = arith.constant dense<0.000000e+00> : vector<256x128xf32>
    %311 = tpu.matmul %308, %310, %cst_353 {dimension_numbers = #tpu.dot_dimension_numbers<[1], [0], [0], [1], [0, 0, 1, 1], [], []>} : vector<256x128xf32>, vector<128x128xf32>, vector<256x128xf32> -> vector<256x128xf32>
    %312 = arith.addf %305, %311 : vector<256x128xf32>
    %c1_354 = arith.constant 1 : index
    %c1_355 = arith.constant 1 : index
    %c2_356 = arith.constant 2 : index
    %c0_357 = arith.constant 0 : index
    %313 = vector.load %arg10[%c1_354, %c1_355, %c2_356, %c0_357] : memref<2x18x18x128xf32, #tpu.memory_space<vmem>>, vector<1x16x16x128xf32>
    %314 = vector.shape_cast %313 : vector<1x16x16x128xf32> to vector<16x16x128xf32>
    %315 = vector.shape_cast %314 : vector<16x16x128xf32> to vector<256x128xf32>
    %c1_358 = arith.constant 1 : index
    %c2_359 = arith.constant 2 : index
    %c0_360 = arith.constant 0 : index
    %c0_361 = arith.constant 0 : index
    %316 = vector.load %arg3[%c1_358, %c2_359, %c0_360, %c0_361] : memref<3x3x128x128xf32, #tpu.memory_space<vmem>>, vector<1x1x128x128xf32>
    %317 = vector.shape_cast %316 : vector<1x1x128x128xf32> to vector<128x128xf32>
    %cst_362 = arith.constant dense<0.000000e+00> : vector<256x128xf32>
    %318 = tpu.matmul %315, %317, %cst_362 {dimension_numbers = #tpu.dot_dimension_numbers<[1], [0], [0], [1], [0, 0, 1, 1], [], []>} : vector<256x128xf32>, vector<128x128xf32>, vector<256x128xf32> -> vector<256x128xf32>
    %319 = arith.addf %312, %318 : vector<256x128xf32>
    %c1_363 = arith.constant 1 : index
    %c2_364 = arith.constant 2 : index
    %c0_365 = arith.constant 0 : index
    %c0_366 = arith.constant 0 : index
    %320 = vector.load %arg10[%c1_363, %c2_364, %c0_365, %c0_366] : memref<2x18x18x128xf32, #tpu.memory_space<vmem>>, vector<1x16x16x128xf32>
    %321 = vector.shape_cast %320 : vector<1x16x16x128xf32> to vector<16x16x128xf32>
    %322 = vector.shape_cast %321 : vector<16x16x128xf32> to vector<256x128xf32>
    %c2_367 = arith.constant 2 : index
    %c0_368 = arith.constant 0 : index
    %c0_369 = arith.constant 0 : index
    %c0_370 = arith.constant 0 : index
    %323 = vector.load %arg3[%c2_367, %c0_368, %c0_369, %c0_370] : memref<3x3x128x128xf32, #tpu.memory_space<vmem>>, vector<1x1x128x128xf32>
    %324 = vector.shape_cast %323 : vector<1x1x128x128xf32> to vector<128x128xf32>
    %cst_371 = arith.constant dense<0.000000e+00> : vector<256x128xf32>
    %325 = tpu.matmul %322, %324, %cst_371 {dimension_numbers = #tpu.dot_dimension_numbers<[1], [0], [0], [1], [0, 0, 1, 1], [], []>} : vector<256x128xf32>, vector<128x128xf32>, vector<256x128xf32> -> vector<256x128xf32>
    %326 = arith.addf %319, %325 : vector<256x128xf32>
    %c1_372 = arith.constant 1 : index
    %c2_373 = arith.constant 2 : index
    %c1_374 = arith.constant 1 : index
    %c0_375 = arith.constant 0 : index
    %327 = vector.load %arg10[%c1_372, %c2_373, %c1_374, %c0_375] : memref<2x18x18x128xf32, #tpu.memory_space<vmem>>, vector<1x16x16x128xf32>
    %328 = vector.shape_cast %327 : vector<1x16x16x128xf32> to vector<16x16x128xf32>
    %329 = vector.shape_cast %328 : vector<16x16x128xf32> to vector<256x128xf32>
    %c2_376 = arith.constant 2 : index
    %c1_377 = arith.constant 1 : index
    %c0_378 = arith.constant 0 : index
    %c0_379 = arith.constant 0 : index
    %330 = vector.load %arg3[%c2_376, %c1_377, %c0_378, %c0_379] : memref<3x3x128x128xf32, #tpu.memory_space<vmem>>, vector<1x1x128x128xf32>
    %331 = vector.shape_cast %330 : vector<1x1x128x128xf32> to vector<128x128xf32>
    %cst_380 = arith.constant dense<0.000000e+00> : vector<256x128xf32>
    %332 = tpu.matmul %329, %331, %cst_380 {dimension_numbers = #tpu.dot_dimension_numbers<[1], [0], [0], [1], [0, 0, 1, 1], [], []>} : vector<256x128xf32>, vector<128x128xf32>, vector<256x128xf32> -> vector<256x128xf32>
    %333 = arith.addf %326, %332 : vector<256x128xf32>
    %c1_381 = arith.constant 1 : index
    %c2_382 = arith.constant 2 : index
    %c2_383 = arith.constant 2 : index
    %c0_384 = arith.constant 0 : index
    %334 = vector.load %arg10[%c1_381, %c2_382, %c2_383, %c0_384] : memref<2x18x18x128xf32, #tpu.memory_space<vmem>>, vector<1x16x16x128xf32>
    %335 = vector.shape_cast %334 : vector<1x16x16x128xf32> to vector<16x16x128xf32>
    %336 = vector.shape_cast %335 : vector<16x16x128xf32> to vector<256x128xf32>
    %c2_385 = arith.constant 2 : index
    %c2_386 = arith.constant 2 : index
    %c0_387 = arith.constant 0 : index
    %c0_388 = arith.constant 0 : index
    %337 = vector.load %arg3[%c2_385, %c2_386, %c0_387, %c0_388] : memref<3x3x128x128xf32, #tpu.memory_space<vmem>>, vector<1x1x128x128xf32>
    %338 = vector.shape_cast %337 : vector<1x1x128x128xf32> to vector<128x128xf32>
    %cst_389 = arith.constant dense<0.000000e+00> : vector<256x128xf32>
    %339 = tpu.matmul %336, %338, %cst_389 {dimension_numbers = #tpu.dot_dimension_numbers<[1], [0], [0], [1], [0, 0, 1, 1], [], []>} : vector<256x128xf32>, vector<128x128xf32>, vector<256x128xf32> -> vector<256x128xf32>
    %340 = arith.addf %333, %339 : vector<256x128xf32>
    %341 = vector.shape_cast %340 : vector<256x128xf32> to vector<16x16x128xf32>
    %c1_390 = arith.constant 1 : index
    %c0_391 = arith.constant 0 : index
    %c0_392 = arith.constant 0 : index
    %c0_393 = arith.constant 0 : index
    %342 = vector.load %arg11[%c1_390, %c0_391, %c0_392, %c0_393] : memref<2x16x16x128xf32, #tpu.memory_space<vmem>>, vector<1x16x16x128xf32>
    %343 = vector.shape_cast %342 : vector<1x16x16x128xf32> to vector<16x16x128xf32>
    %344 = vector.shape_cast %341 : vector<16x16x128xf32> to vector<1x16x16x128xf32>
    tpu.vector_store %arg11[%c1_390, %c0_391, %c0_392, %c0_393], %344 {strides = array<i32>} : memref<2x16x16x128xf32, #tpu.memory_space<vmem>>, vector<1x16x16x128xf32>,
    %cst_394 = arith.constant dense<0.000000e+00> : vector<128xf32>
    %345 = vector.multi_reduction <add>, %340, %cst_394 [0] : vector<256x128xf32> to vector<128xf32>
    %346 = vector.shape_cast %345 : vector<128xf32> to vector<1x128xf32>
    %347 = arith.addf %272, %346 : vector<1x128xf32>
    %348 = arith.mulf %340, %340 : vector<256x128xf32>
    %cst_395 = arith.constant dense<0.000000e+00> : vector<128xf32>
    %349 = vector.multi_reduction <add>, %348, %cst_395 [0] : vector<256x128xf32> to vector<128xf32>
    %350 = vector.shape_cast %349 : vector<128xf32> to vector<1x128xf32>
    %351 = arith.addf %276, %350 : vector<1x128xf32>
    %c0_396 = arith.constant 0 : index
    %c0_397 = arith.constant 0 : index
    %352 = vector.load %arg6[%c0_396, %c0_397] : memref<1x128xf32, #tpu.memory_space<vmem>>, vector<1x128xf32>
    %c0_398 = arith.constant 0 : index
    %c0_399 = arith.constant 0 : index
    %353 = vector.load %arg7[%c0_398, %c0_399] : memref<1x128xf32, #tpu.memory_space<vmem>>, vector<1x128xf32>
    %cst_400 = arith.constant 0.001953125 : f32
    %354 = vector.broadcast %cst_400 : f32 to vector<1x128xf32>
    %355 = arith.mulf %347, %354 : vector<1x128xf32>
    %cst_401 = arith.constant 0.001953125 : f32
    %356 = vector.broadcast %cst_401 : f32 to vector<1x128xf32>
    %357 = arith.mulf %351, %356 : vector<1x128xf32>
    %358 = arith.mulf %355, %355 : vector<1x128xf32>
    %359 = arith.subf %357, %358 : vector<1x128xf32>
    %cst_402 = arith.constant 0.000000e+00 : f32
    %360 = vector.broadcast %cst_402 : f32 to vector<1x128xf32>
    %361 = arith.maximumf %359, %360 : vector<1x128xf32>
    %cst_403 = arith.constant 9.99999974E-6 : f32
    %362 = vector.broadcast %cst_403 : f32 to vector<1x128xf32>
    %363 = arith.addf %361, %362 : vector<1x128xf32>
    %364 = math.rsqrt %363 : vector<1x128xf32>
    %365 = arith.mulf %352, %364 : vector<1x128xf32>
    %366 = arith.mulf %355, %365 : vector<1x128xf32>
    %367 = arith.subf %353, %366 : vector<1x128xf32>
    %c0_404 = arith.constant 0 : index
    %c0_405 = arith.constant 0 : index
    %c0_406 = arith.constant 0 : index
    %c0_407 = arith.constant 0 : index
    %368 = vector.load %arg11[%c0_404, %c0_405, %c0_406, %c0_407] : memref<2x16x16x128xf32, #tpu.memory_space<vmem>>, vector<1x16x16x128xf32>
    %369 = vector.shape_cast %368 : vector<1x16x16x128xf32> to vector<16x16x128xf32>
    %370 = vector.shape_cast %365 : vector<1x128xf32> to vector<1x1x128xf32>
    %371 = vector.broadcast %370 : vector<1x1x128xf32> to vector<16x16x128xf32>
    %372 = arith.mulf %369, %371 : vector<16x16x128xf32>
    %373 = vector.shape_cast %367 : vector<1x128xf32> to vector<1x1x128xf32>
    %374 = vector.broadcast %373 : vector<1x1x128xf32> to vector<16x16x128xf32>
    %375 = arith.addf %372, %374 : vector<16x16x128xf32>
    %cst_408 = arith.constant 0.000000e+00 : f32
    %376 = vector.broadcast %cst_408 : f32 to vector<16x16x128xf32>
    %377 = arith.maximumf %375, %376 : vector<16x16x128xf32>
    %378 = vector.shape_cast %377 : vector<16x16x128xf32> to vector<8x2x16x128xf32>
    %cst_409 = arith.constant dense<0xFF800000> : vector<8x16x128xf32>
    %379 = vector.multi_reduction <maximumf>, %378, %cst_409 [1] : vector<8x2x16x128xf32> to vector<8x16x128xf32>
    %380 = vector.shape_cast %379 : vector<8x16x128xf32> to vector<8x8x2x128xf32>
    %cst_410 = arith.constant dense<0xFF800000> : vector<8x8x128xf32>
    %381 = vector.multi_reduction <maximumf>, %380, %cst_410 [2] : vector<8x8x2x128xf32> to vector<8x8x128xf32>
    %c0_411 = arith.constant 0 : index
    %c0_412 = arith.constant 0 : index
    %c0_413 = arith.constant 0 : index
    %c0_414 = arith.constant 0 : index
    %382 = vector.load %arg8[%c0_411, %c0_412, %c0_413, %c0_414] : memref<2x8x8x128xf32, #tpu.memory_space<vmem>>, vector<1x8x8x128xf32>
    %383 = vector.shape_cast %382 : vector<1x8x8x128xf32> to vector<8x8x128xf32>
    %384 = vector.shape_cast %381 : vector<8x8x128xf32> to vector<1x8x8x128xf32>
    tpu.vector_store %arg8[%c0_411, %c0_412, %c0_413, %c0_414], %384 {strides = array<i32>} : memref<2x8x8x128xf32, #tpu.memory_space<vmem>>, vector<1x8x8x128xf32>,
    %c1_415 = arith.constant 1 : index
    %c0_416 = arith.constant 0 : index
    %c0_417 = arith.constant 0 : index
    %c0_418 = arith.constant 0 : index
    %385 = vector.load %arg11[%c1_415, %c0_416, %c0_417, %c0_418] : memref<2x16x16x128xf32, #tpu.memory_space<vmem>>, vector<1x16x16x128xf32>
    %386 = vector.shape_cast %385 : vector<1x16x16x128xf32> to vector<16x16x128xf32>
    %387 = vector.shape_cast %365 : vector<1x128xf32> to vector<1x1x128xf32>
    %388 = vector.broadcast %387 : vector<1x1x128xf32> to vector<16x16x128xf32>
    %389 = arith.mulf %386, %388 : vector<16x16x128xf32>
    %390 = vector.shape_cast %367 : vector<1x128xf32> to vector<1x1x128xf32>
    %391 = vector.broadcast %390 : vector<1x1x128xf32> to vector<16x16x128xf32>
    %392 = arith.addf %389, %391 : vector<16x16x128xf32>
    %cst_419 = arith.constant 0.000000e+00 : f32
    %393 = vector.broadcast %cst_419 : f32 to vector<16x16x128xf32>
    %394 = arith.maximumf %392, %393 : vector<16x16x128xf32>
    %395 = vector.shape_cast %394 : vector<16x16x128xf32> to vector<8x2x16x128xf32>
    %cst_420 = arith.constant dense<0xFF800000> : vector<8x16x128xf32>
    %396 = vector.multi_reduction <maximumf>, %395, %cst_420 [1] : vector<8x2x16x128xf32> to vector<8x16x128xf32>
    %397 = vector.shape_cast %396 : vector<8x16x128xf32> to vector<8x8x2x128xf32>
    %cst_421 = arith.constant dense<0xFF800000> : vector<8x8x128xf32>
    %398 = vector.multi_reduction <maximumf>, %397, %cst_421 [2] : vector<8x8x2x128xf32> to vector<8x8x128xf32>
    %c1_422 = arith.constant 1 : index
    %c0_423 = arith.constant 0 : index
    %c0_424 = arith.constant 0 : index
    %c0_425 = arith.constant 0 : index
    %399 = vector.load %arg8[%c1_422, %c0_423, %c0_424, %c0_425] : memref<2x8x8x128xf32, #tpu.memory_space<vmem>>, vector<1x8x8x128xf32>
    %400 = vector.shape_cast %399 : vector<1x8x8x128xf32> to vector<8x8x128xf32>
    %401 = vector.shape_cast %398 : vector<8x8x128xf32> to vector<1x8x8x128xf32>
    tpu.vector_store %arg8[%c1_422, %c0_423, %c0_424, %c0_425], %401 {strides = array<i32>} : memref<2x8x8x128xf32, #tpu.memory_space<vmem>>, vector<1x8x8x128xf32>,
    return
  }
  func.func @transform_0(%arg0: i32) -> (i32, i32, i32, i32) {
    %c0_i32 = arith.constant 0 : i32
    %c0_i32_0 = arith.constant 0 : i32
    %c0_i32_1 = arith.constant 0 : i32
    %c0_i32_2 = arith.constant 0 : i32
    %c0_i32_3 = arith.constant 0 : i32
    return %c0_i32, %c0_i32_0, %c0_i32_1, %c0_i32_2 : i32, i32, i32, i32
  }
  func.func @transform_1(%arg0: i32) -> (i32, i32, i32, i32) {
    %c0_i32 = arith.constant 0 : i32
    %c0_i32_0 = arith.constant 0 : i32
    %c0_i32_1 = arith.constant 0 : i32
    %c0_i32_2 = arith.constant 0 : i32
    %c0_i32_3 = arith.constant 0 : i32
    return %c0_i32, %c0_i32_0, %c0_i32_1, %c0_i32_2 : i32, i32, i32, i32
  }
  func.func @transform_2(%arg0: i32) -> (i32, i32, i32, i32) {
    %c0_i32 = arith.constant 0 : i32
    %c0_i32_0 = arith.constant 0 : i32
    %c0_i32_1 = arith.constant 0 : i32
    %c0_i32_2 = arith.constant 0 : i32
    %c0_i32_3 = arith.constant 0 : i32
    return %c0_i32, %c0_i32_0, %c0_i32_1, %c0_i32_2 : i32, i32, i32, i32
  }
  func.func @transform_3(%arg0: i32) -> (i32, i32) {
    %c0_i32 = arith.constant 0 : i32
    %c0_i32_0 = arith.constant 0 : i32
    %c0_i32_1 = arith.constant 0 : i32
    return %c0_i32, %c0_i32_0 : i32, i32
  }
  func.func @transform_4(%arg0: i32) -> (i32, i32) {
    %c0_i32 = arith.constant 0 : i32
    %c0_i32_0 = arith.constant 0 : i32
    %c0_i32_1 = arith.constant 0 : i32
    return %c0_i32, %c0_i32_0 : i32, i32
  }
  func.func @transform_5(%arg0: i32) -> (i32, i32) {
    %c0_i32 = arith.constant 0 : i32
    %c0_i32_0 = arith.constant 0 : i32
    %c0_i32_1 = arith.constant 0 : i32
    return %c0_i32, %c0_i32_0 : i32, i32
  }
  func.func @transform_6(%arg0: i32) -> (i32, i32) {
    %c0_i32 = arith.constant 0 : i32
    %c0_i32_0 = arith.constant 0 : i32
    %c0_i32_1 = arith.constant 0 : i32
    return %c0_i32, %c0_i32_0 : i32, i32
  }
  func.func @transform_7(%arg0: i32) -> (i32, i32, i32, i32) {
    %c0_i32 = arith.constant 0 : i32
    %c0_i32_0 = arith.constant 0 : i32
    %c0_i32_1 = arith.constant 0 : i32
    %c0_i32_2 = arith.constant 0 : i32
    %c0_i32_3 = arith.constant 0 : i32
    return %c0_i32, %c0_i32_0, %c0_i32_1, %c0_i32_2 : i32, i32, i32, i32
  }
}

</mosaic_0001>

<bundles_post_ra>
// kernel: downsample_forward.1
= control target key start
LH: loop header
LB: loop body
LE: loop exit
PB: predicated region body
PF: predicated region fallthrough
CT: control target
= control target key end

     0   :  { %12 = vsyncpa [#allocation6], 0  ;;  %s25454_s0 = inlined_call_operand.hbm [shape: f32[2,16,16,4], index: 0, kind: input, shape index: {}]   ;;  %s25455_s1 = inlined_call_operand.hbm [shape: f32[3,3,128,128], index: 1, kind: input, shape index: {}]   ;;  %s25456_s2 = inlined_call_operand.hbm [shape: f32[3,3,128,128], index: 2, kind: input, shape index: {}]   ;;  %s25457_s3 = inlined_call_operand.hbm [shape: f32[1,128], index: 3, kind: input, shape index: {}]   ;;  %s25458_s4 = inlined_call_operand.hbm [shape: f32[1,128], index: 4, kind: input, shape index: {}]   ;;  %s25459_s5 = inlined_call_operand.hbm [shape: f32[1,128], index: 5, kind: input, shape index: {}]   ;;  %s25460_s6 = inlined_call_operand.hbm [shape: f32[1,128], index: 6, kind: input, shape index: {}]   ;;  %s25461_s7 = inlined_call_operand.hbm [shape: f32[2,8,8,128], index: 7, kind: output, shape index: {}]  }
   0x1   :  { %13 = vsyncpa [#allocation9], 0 }
   0x2   :  { %14 = vsyncpa [#allocation12], 0 }
   0x3   :  { %15 = vsyncpa [#allocation15], 0 }
   0x4   :  { %16 = vsyncpa [#allocation7], 0  ;;  %s21317_s24 = smov [#allocation8]   ;;  %s21318_s26 = smov [#allocation11]  }
   0x5   :  { %s34_s25 = sshll.u32 %s21317_s24, 4  ;;  %s59_s27 = sshll.u32 %s21318_s26, 4  ;;  %s35_s25 = int_to_ptr.vmem [resolvable:$true] %s34_s25  ;;  %s21369_s27 = int_to_ptr.vmem [resolvable:$true] %s59_s27 }
   0x6   :  { %s21131_s30 = scalar_lea.hbm %s25455_s1, 18432 }
   0x7   :  { %p21132_p0 = scmp.ne.s32.totalorder %s25455_s1, %s21131_s30  ;;  %p21135_p1 = scmp.lt.u32.totalorder %s21131_s30, %s25455_s1 }
   0x9   :  { %p21137_p2 = pnand %p21135_p1, %p21132_p0 }
   0xb   :  { %21140 = shalt.err (!%p21137_p2)
}
   0xc   :  { %s21141_s12 = scalar_lea.vmem %s35_s25, 18432  ;;  %p21146_p4 = scmp.lt.s32.totalorder %s35_s25, %s35_s25 }
   0xd   :  { %p21142_p3 = scmp.ne.s32.totalorder %s35_s25, %s21141_s12  ;;  %p21147_p5 = scmp.lt.s32.totalorder %s21141_s12, %s21141_s12 }
   0xf   :  { %p21148_p6 = por %p21147_p5, %p21146_p4 }
  0x11   :  { %p21149_p7 = pnand %p21148_p6, %p21142_p3 }
  0x13   :  { %21152 = shalt.err (!%p21149_p7)
}
  0x14   :  { %s21319_s13 = smov 128   ;;  %s21320_s14 = smov 8  }
  0x15   :  { %40 = dma.hbm_to_vmem [thread:$0]  %s25455_s1, 18432, %s35_s25, [#allocation9], %s21319_s13, %s21319_s13, %s21320_s14  }
  0x16   :  { %s21153_s19 = scalar_lea.hbm %s25457_s3, 16 }
  0x17   :  { %p21154_p8 = scmp.ne.s32.totalorder %s25457_s3, %s21153_s19  ;;  %p21157_p9 = scmp.lt.u32.totalorder %s21153_s19, %s25457_s3 }
  0x19   :  { %p21159_p10 = pnand %p21157_p9, %p21154_p8 }
  0x1b   :  { %21162 = shalt.err (!%p21159_p10)
}
  0x1c   :  { %s21163_s24 = scalar_lea.vmem %s21369_s27, 16  ;;  %s21167_s1 = scalar_lea.vmem %s21369_s27, 32 }
  0x1d   :  { %p21164_p11 = scmp.ne.s32.totalorder %s21369_s27, %s21163_s24  ;;  %p21168_p12 = scmp.lt.s32.totalorder %s21369_s27, %s21369_s27 }
  0x1e   :  { %p21169_p13 = scmp.lt.s32.totalorder %s21167_s1, %s21163_s24 }
  0x20   :  { %p21170_p0 = por %p21169_p13, %p21168_p12 }
  0x22   :  { %p21171_p1 = pnand %p21170_p0, %p21164_p11 }
  0x24   :  { %21174 = shalt.err (!%p21171_p1)
}
  0x25   :  { %62 = dma.hbm_to_vmem [thread:$0]  %s25457_s3, 16, %s21369_s27, [#allocation12]  }
  0x26   :  { %s21321_s28 = smov [#allocation14]   ;;  %s21322_s30 = smov [#allocation5]  }
  0x27   :  { %s79_s29 = sshll.u32 %s21321_s28, 4  ;;  %s22_s8 = sshll.u32 %s21322_s30, 4  ;;  %s80_s29 = int_to_ptr.vmem [resolvable:$true] %s79_s29  ;;  %s21404_s8 = int_to_ptr.vmem [resolvable:$true] %s22_s8 }
  0x28   :  { %s21175_s11 = scalar_lea.hbm %s25459_s5, 16 }
  0x29   :  { %p21176_p2 = scmp.ne.s32.totalorder %s25459_s5, %s21175_s11  ;;  %p21179_p3 = scmp.lt.u32.totalorder %s21175_s11, %s25459_s5 }
  0x2b   :  { %p21181_p4 = pnand %p21179_p3, %p21176_p2 }
  0x2d   :  { %21184 = shalt.err (!%p21181_p4)
}
  0x2e   :  { %s21185_s3 = scalar_lea.vmem %s80_s29, 16  ;;  %s21189_s27 = scalar_lea.vmem %s80_s29, 32 }
  0x2f   :  { %p21186_p5 = scmp.ne.s32.totalorder %s80_s29, %s21185_s3  ;;  %p21190_p6 = scmp.lt.s32.totalorder %s80_s29, %s80_s29 }
  0x30   :  { %p21191_p7 = scmp.lt.s32.totalorder %s21189_s27, %s21185_s3 }
  0x32   :  { %p21192_p8 = por %p21191_p7, %p21190_p6 }
  0x34   :  { %p21193_p9 = pnand %p21192_p8, %p21186_p5 }
  0x36   :  { %21196 = shalt.err (!%p21193_p9)
}
  0x37   :  { %82 = dma.hbm_to_vmem [thread:$0]  %s25459_s5, 16, %s80_s29, [#allocation15]  }
  0x38   :  { %s21197_s22 = scalar_lea.hbm %s25454_s0, 8192 }
  0x39   :  { %p21198_p10 = scmp.ne.s32.totalorder %s25454_s0, %s21197_s22  ;;  %p21201_p11 = scmp.lt.u32.totalorder %s21197_s22, %s25454_s0 }
  0x3b   :  { %p21203_p12 = pnand %p21201_p11, %p21198_p10 }
  0x3d   :  { %21206 = shalt.err (!%p21203_p12)
}
  0x3e   :  { %s21207_s26 = scalar_lea.vmem %s21404_s8, 8192  ;;  %p21212_p0 = scmp.lt.s32.totalorder %s21404_s8, %s21404_s8 }
  0x3f   :  { %p21208_p13 = scmp.ne.s32.totalorder %s21404_s8, %s21207_s26  ;;  %p21213_p1 = scmp.lt.s32.totalorder %s21207_s26, %s21207_s26 }
  0x41   :  { %p21214_p2 = por %p21213_p1, %p21212_p0 }
  0x43   :  { %p21215_p3 = pnand %p21214_p2, %p21208_p13 }
  0x45   :  { %21218 = shalt.err (!%p21215_p3)
}
  0x46   :  { %28 = dma.hbm_to_vmem [thread:$0]  %s25454_s0, 8192, %s21404_s8, [#allocation6], %s21319_s13, %s21319_s13, %s21320_s14  }
  0x47   :  { %s21323_s29 = smov [#allocation10]   ;;  %s21324_s9 = smov [#allocation13]  }
  0x48   :  { %s46_s30 = sshll.u32 %s21323_s29, 4  ;;  %s69_s10 = sshll.u32 %s21324_s9, 4  ;;  %s47_s30 = int_to_ptr.vmem [resolvable:$true] %s46_s30  ;;  %s70_s10 = int_to_ptr.vmem [resolvable:$true] %s69_s10 }
  0x49   :  { %s21219_s15 = scalar_lea.hbm %s25456_s2, 18432 }
  0x4a   :  { %p21220_p4 = scmp.ne.s32.totalorder %s25456_s2, %s21219_s15  ;;  %p21223_p5 = scmp.lt.u32.totalorder %s21219_s15, %s25456_s2 }
  0x4c   :  { %p21225_p6 = pnand %p21223_p5, %p21220_p4 }
  0x4e   :  { %21228 = shalt.err (!%p21225_p6)
}
  0x4f   :  { %s21229_s0 = scalar_lea.vmem %s47_s30, 18432  ;;  %p21234_p8 = scmp.lt.s32.totalorder %s47_s30, %s47_s30 }
  0x50   :  { %p21230_p7 = scmp.ne.s32.totalorder %s47_s30, %s21229_s0  ;;  %p21235_p9 = scmp.lt.s32.totalorder %s21229_s0, %s21229_s0 }
  0x52   :  { %p21236_p10 = por %p21235_p9, %p21234_p8 }
  0x54   :  { %p21237_p11 = pnand %p21236_p10, %p21230_p7 }
  0x56   :  { %21240 = shalt.err (!%p21237_p11)
}
  0x57   :  { %52 = dma.hbm_to_vmem [thread:$0]  %s25456_s2, 18432, %s47_s30, [#allocation9], %s21319_s13, %s21319_s13, %s21320_s14  }
  0x58   :  { %s21241_s21 = scalar_lea.hbm %s25458_s4, 16 }
  0x59   :  { %p21242_p12 = scmp.ne.s32.totalorder %s25458_s4, %s21241_s21  ;;  %p21245_p13 = scmp.lt.u32.totalorder %s21241_s21, %s25458_s4 }
  0x5b   :  { %p21247_p0 = pnand %p21245_p13, %p21242_p12 }
  0x5d   :  { %21250 = shalt.err (!%p21247_p0)
}
  0x5e   :  { %s21251_s25 = scalar_lea.vmem %s70_s10, 16  ;;  %s21255_s26 = scalar_lea.vmem %s70_s10, 32 }
  0x5f   :  { %p21252_p1 = scmp.ne.s32.totalorder %s70_s10, %s21251_s25  ;;  %p21256_p2 = scmp.lt.s32.totalorder %s70_s10, %s70_s10 }
  0x60   :  { %p21257_p3 = scmp.lt.s32.totalorder %s21255_s26, %s21251_s25 }
  0x62   :  { %p21258_p4 = por %p21257_p3, %p21256_p2 }
  0x64   :  { %p21259_p5 = pnand %p21258_p4, %p21252_p1 }
  0x66   :  { %21262 = shalt.err (!%p21259_p5)
}
  0x67   :  { %72 = dma.hbm_to_vmem [thread:$0]  %s25458_s4, 16, %s70_s10, [#allocation12]  }
  0x68   :  { %s21325_s28 = smov [#allocation16]   ;;  %s21263_s11 = scalar_lea.hbm %s25460_s6, 16 }
  0x69   :  { %s89_s29 = sshll.u32 %s21325_s28, 4  ;;  %p21264_p6 = scmp.ne.s32.totalorder %s25460_s6, %s21263_s11  ;;  %s90_s29 = int_to_ptr.vmem [resolvable:$true] %s89_s29 }
  0x6a   :  { %p21267_p7 = scmp.lt.u32.totalorder %s21263_s11, %s25460_s6 }
  0x6c   :  { %p21269_p8 = pnand %p21267_p7, %p21264_p6 }
  0x6e   :  { %21272 = shalt.err (!%p21269_p8)
}
  0x6f   :  { %s21273_s3 = scalar_lea.vmem %s90_s29, 16  ;;  %s21277_s4 = scalar_lea.vmem %s90_s29, 32 }
  0x70   :  { %p21274_p9 = scmp.ne.s32.totalorder %s90_s29, %s21273_s3  ;;  %p21278_p10 = scmp.lt.s32.totalorder %s90_s29, %s90_s29 }
  0x71   :  { %p21279_p11 = scmp.lt.s32.totalorder %s21277_s4, %s21273_s3 }
  0x73   :  { %p21280_p12 = por %p21279_p11, %p21278_p10 }
  0x75   :  { %p21281_p13 = pnand %p21280_p12, %p21274_p9 }
  0x77   :  { %21284 = shalt.err (!%p21281_p13)
}
  0x78   :  { %92 = dma.hbm_to_vmem [thread:$0]  %s25460_s6, 16, %s90_s29, [#allocation15]  }
  0x79   :  { %21307 = dma.done.wait [#allocation6], 8192  }
  0x7a   :  { %21308 = vsyncadd [#allocation6], 4294959104 }
  0x7b   :  { %21309 = dma.done.wait [#allocation9], 36864  }
  0x7c   :  { %21310 = vsyncadd [#allocation9], 4294930432 }
  0x7d   :  { %21311 = dma.done.wait [#allocation12], 32  }
  0x7e   :  { %21312 = vsyncadd [#allocation12], 4294967264 }
  0x7f   :  { %21313 = dma.done.wait [#allocation15], 32  }
  0x80   :  { %21314 = vsyncadd [#allocation15], 4294967264  ;;  %v21326_v0 = vmov 0.0   ;;  %v541_v1 = vld [vmem:[#allocation8 + $0x80] sm:$0xff]  ;;  %v542_v2 = vld [vmem:[#allocation8 + $0x88] sm:$0xff]  ;;  %vm395_vm0 = vcmask 31744  }
  0x81   :  { %114 = vst [vmem:[#allocation2] sm:$0xff] %v21326_v0  ;;  %115 = vst [vmem:[#allocation2 + $0x8] sm:$0xff] %v21326_v0  ;;  %v543_v3 = vld [vmem:[#allocation8 + $0x90] sm:$0xff]  ;;  %v18935_v4 = vpack.c.bf16 %v542_v2, %v541_v1  ;;  %v544_v5 = vld [vmem:[#allocation8 + $0x98] sm:$0xff]  ;;  %vm12634_vm1 = vcmask 1041408   ;;  %vm13147_vm2 = vcmask 1041409  }
  0x82   :  { %116 = vst [vmem:[#allocation2 + $0x10] sm:$0x3] %v21326_v0  ;;  %117 = vst [vmem:[#allocation2 + $0x18] sm:$0xff] %v21326_v0  ;;  %v18939_v6 = vpack.c.bf16 %v544_v5, %v543_v3  ;;  %v545_v7 = vld [vmem:[#allocation8 + $0xa0] sm:$0xff]  ;;  %v546_v8 = vld [vmem:[#allocation8 + $0xa8] sm:$0xff]  ;;  %vm13149_vm3 = vcmask 1042434  }
  0x83   :  { %118 = vst [vmem:[#allocation2 + $0x20] sm:$0xff] %v21326_v0  ;;  %119 = vst [vmem:[#allocation2 + $0x28] sm:$0x3] %v21326_v0  ;;  %18936 = vmatprep.subr.bf16.mxu0 %v18935_v4  ;;  %19224 = vmatprep.subr.bf16.mxu1 %v18935_v4  ;;  %v18943_v9 = vpack.c.bf16 %v546_v8, %v545_v7  ;;  %v547_v12 = vld [vmem:[#allocation8 + $0xb0] sm:$0xff]  ;;  %v548_v13 = vld [vmem:[#allocation8 + $0xb8] sm:$0xff]  ;;  %vm13151_vm4 = vcmask 1043459  }
  0x84   :  { %120 = vst [vmem:[#allocation2 + $0x30] sm:$0xff] %v21326_v0  ;;  %121 = vst [vmem:[#allocation2 + $0x38] sm:$0xff] %v21326_v0  ;;  %18938 = vmatpush3.bf16.msra.mxu0 %v18935_v4  ;;  %19226 = vmatpush3.bf16.msra.mxu1 %v18935_v4  ;;  %v330_v14 = vld [vmem:[#allocation5] sm:$0xff]  ;;  %v331_v16 = vld [vmem:[#allocation5 + $0x8] sm:$0xff]  ;;  %v18947_v19 = vpack.c.bf16 %v548_v13, %v547_v12  ;;  %vm13153_vm5 = vcmask 1044484   ;;  %vm13155_vm6 = vcmask 1045509  }
  0x85   :  { %122 = vst [vmem:[#allocation2 + $0x40] sm:$0x3] %v21326_v0  ;;  %123 = vst [vmem:[#allocation2 + $0x48] sm:$0xff] %v21326_v0  ;;  %18940 = vmatprep.subr.bf16.mxu0 %v18939_v6  ;;  %19228 = vmatprep.subr.bf16.mxu1 %v18939_v6  ;;  %v362_v15 = vld [vmem:[#allocation5 + $0x100] sm:$0xff]  ;;  %v363_v17 = vld [vmem:[#allocation5 + $0x108] sm:$0xff]  ;;  %vm13157_vm7 = vcmask 1046534  }
  0x86   :  { %124 = vst [vmem:[#allocation2 + $0x50] sm:$0xff] %v21326_v0  ;;  %125 = vst [vmem:[#allocation2 + $0x58] sm:$0x3] %v21326_v0  ;;  %v332_v18 = vld [vmem:[#allocation5 + $0x10] sm:$0xff]  ;;  %v549_v20 = vld [vmem:[#allocation8 + $0xc0] sm:$0xff]  ;;  %vm13159_vm8 = vcmask 1047559  }
  0x87   :  { %126 = vst [vmem:[#allocation2 + $0x60] sm:$0xff] %v21326_v0  ;;  %127 = vst [vmem:[#allocation2 + $0x68] sm:$0xff] %v21326_v0  ;;  %v364_v21 = vld [vmem:[#allocation5 + $0x110] sm:$0xff]  ;;  %v333_v22 = vld [vmem:[#allocation5 + $0x18] sm:$0xff]  ;;  %s21328_s6 = smov [#allocation17]  }
  0x88   :  { %128 = vst [vmem:[#allocation2 + $0x70] sm:$0x3] %v21326_v0  ;;  %129 = vst [vmem:[#allocation2 + $0x78] sm:$0xff] %v21326_v0  ;;  %v508_v10 = vld [vmem:[#allocation2 + $0x1] sm:$0xff]  ;;  %18942 = vmatpush3.bf16.msra.mxu0 %v18939_v6  ;;  %19230 = vmatpush3.bf16.msra.mxu1 %v18939_v6  ;;  %v365_v24 = vld [vmem:[#allocation5 + $0x118] sm:$0xff]  ;;  %s14312_s0 = sshll.u32 %s21328_s6, 4  ;;  %s14313_s0 = int_to_ptr.vmem [resolvable:$true] %s14312_s0 }
  0x89   :  { %130 = vst [vmem:[#allocation2 + $0x80] sm:$0xff] %v21326_v0  ;;  %131 = vst [vmem:[#allocation2 + $0x88] sm:$0x3] %v21326_v0  ;;  %16087 = vmatprep.mubr.f32.mxu0 %v508_v10  ;;  %18944 = vmatprep.subr.bf16.mxu0 %v18943_v9  ;;  %v550_v23 = vld [vmem:[#allocation8 + $0xc8] sm:$0xff]  ;;  %v334_v25 = vld [vmem:[#allocation5 + $0x20] sm:$0xff]  ;;  %s21285_s8 = scalar_lea.vmem %s14313_s0, 2048  ;;  %p21290_p1 = scmp.lt.s32.totalorder %s14313_s0, %s14313_s0 }
  0x8a   :  { %132 = vst [vmem:[#allocation2 + $0x90] sm:$0xff] %v21326_v0  ;;  %133 = vst [vmem:[#allocation2 + $0x98] sm:$0xff] %v21326_v0  ;;  %19232 = vmatprep.subr.bf16.mxu1 %v18943_v9  ;;  %v366_v26 = vld [vmem:[#allocation5 + $0x120] sm:$0xff]  ;;  %v335_v27 = vld [vmem:[#allocation5 + $0x28] sm:$0xff]  ;;  %v18951_v32 = vpack.c.bf16 %v550_v23, %v549_v20  ;;  %p21286_p0 = scmp.ne.s32.totalorder %s14313_s0, %s21285_s8  ;;  %p21291_p2 = scmp.lt.s32.totalorder %s21285_s8, %s21285_s8 }
  0x8b   :  { %134 = vst [vmem:[#allocation2 + $0xa0] sm:$0x3] %v21326_v0  ;;  %135 = vst [vmem:[#allocation2 + $0xa8] sm:$0xff] %v21326_v0  ;;  %v367_v28 = vld [vmem:[#allocation5 + $0x128] sm:$0xff]  ;;  %v336_v29 = vld [vmem:[#allocation5 + $0x30] sm:$0xff] }
  0x8c   :  { %136 = vst [vmem:[#allocation2 + $0xb0] sm:$0xff] %v21326_v0  ;;  %137 = vst [vmem:[#allocation2 + $0xb8] sm:$0x3] %v21326_v0  ;;  %18946 = vmatpush3.bf16.msra.mxu0 %v18943_v9  ;;  %19234 = vmatpush3.bf16.msra.mxu1 %v18943_v9  ;;  %v368_v30 = vld [vmem:[#allocation5 + $0x130] sm:$0xff]  ;;  %v337_v31 = vld [vmem:[#allocation5 + $0x38] sm:$0xff]  ;;  %p21292_p3 = por %p21291_p2, %p21290_p1 }
  0x8d   :  { %138 = vst [vmem:[#allocation2 + $0xc0] sm:$0xff] %v21326_v0  ;;  %139 = vst [vmem:[#allocation2 + $0xc8] sm:$0xff] %v21326_v0  ;;  %18948 = vmatprep.subr.bf16.mxu0 %v18947_v19  ;;  %19236 = vmatprep.subr.bf16.mxu1 %v18947_v19  ;;  %v551_v33 = vld [vmem:[#allocation8 + $0xd0] sm:$0xff]  ;;  %v552_v34 = vld [vmem:[#allocation8 + $0xd8] sm:$0xff] }
  0x8e   :  { %140 = vst [vmem:[#allocation2 + $0xd0] sm:$0x3] %v21326_v0  ;;  %141 = vst [vmem:[#allocation2 + $0xd8] sm:$0xff] %v21326_v0  ;;  %v369_v35 = vld [vmem:[#allocation5 + $0x138] sm:$0xff]  ;;  %v338_v36 = vld [vmem:[#allocation5 + $0x40] sm:$0xff]  ;;  %v18955_v40 = vpack.c.bf16 %v552_v34, %v551_v33  ;;  %p21293_p4 = pnand %p21292_p3, %p21286_p0 }
  0x8f   :  { %142 = vst [vmem:[#allocation2 + $0xe0] sm:$0xff] %v21326_v0  ;;  %143 = vst [vmem:[#allocation2 + $0xe8] sm:$0x3] %v21326_v0  ;;  %v370_v37 = vld [vmem:[#allocation5 + $0x140] sm:$0xff]  ;;  %v339_v38 = vld [vmem:[#allocation5 + $0x48] sm:$0xff] }
  0x90   :  { %144 = vst [vmem:[#allocation2 + $0xf0] sm:$0xff] %v21326_v0  ;;  %145 = vst [vmem:[#allocation2 + $0xf8] sm:$0xff] %v21326_v0  ;;  %v371_v39 = vld [vmem:[#allocation5 + $0x148] sm:$0xff]  ;;  %18950 = vmatpush3.bf16.msra.mxu0 %v18947_v19  ;;  %19238 = vmatpush3.bf16.msra.mxu1 %v18947_v19  ;;  %v340_v41 = vld [vmem:[#allocation5 + $0x50] sm:$0xff] }
  0x91   :  { %146 = vst [vmem:[#allocation2 + $0x100] sm:$0x3] %v21326_v0  ;;  %147 = vst [vmem:[#allocation2 + $0x108] sm:$0xff] %v21326_v0  ;;  %18952 = vmatprep.subr.bf16.mxu0 %v18951_v32  ;;  %19240 = vmatprep.subr.bf16.mxu1 %v18951_v32  ;;  %v553_v42 = vld [vmem:[#allocation8 + $0xe0] sm:$0xff]  ;;  %v554_v43 = vld [vmem:[#allocation8 + $0xe8] sm:$0xff] }
  0x92   :  { %148 = vst [vmem:[#allocation2 + $0x110] sm:$0xff] %v21326_v0  ;;  %149 = vst [vmem:[#allocation2 + $0x118] sm:$0x3] %v21326_v0  ;;  %v372_v44 = vld [vmem:[#allocation5 + $0x150] sm:$0xff]  ;;  %v18959_v45 = vpack.c.bf16 %v554_v43, %v553_v42  ;;  %v341_v46 = vld [vmem:[#allocation5 + $0x58] sm:$0xff] }
  0x93   :  { %150 = vst [vmem:[#allocation2 + $0x120] sm:$0xff] %v21326_v0  ;;  %151 = vst [vmem:[#allocation2 + $0x128] sm:$0xff] %v21326_v0  ;;  %v555_v47 = vld [vmem:[#allocation8 + $0xf0] sm:$0xff]  ;;  %v556_v48 = vld [vmem:[#allocation8 + $0xf8] sm:$0xff] }
  0x94   :  { %152 = vst [vmem:[#allocation2 + $0x130] sm:$0x3] %v21326_v0  ;;  %153 = vst [vmem:[#allocation2 + $0x138] sm:$0xff] %v21326_v0  ;;  %18954 = vmatpush3.bf16.msra.mxu0 %v18951_v32  ;;  %19242 = vmatpush3.bf16.msra.mxu1 %v18951_v32  ;;  %v373_v49 = vld [vmem:[#allocation5 + $0x158] sm:$0xff]  ;;  %v342_v50 = vld [vmem:[#allocation5 + $0x60] sm:$0xff]  ;;  %v18963_v53 = vpack.c.bf16 %v556_v48, %v555_v47 }
  0x95   :  { %154 = vst [vmem:[#allocation2 + $0x140] sm:$0xff] %v21326_v0  ;;  %155 = vst [vmem:[#allocation2 + $0x148] sm:$0x3] %v21326_v0  ;;  %18956 = vmatprep.subr.bf16.mxu0 %v18955_v40  ;;  %19244 = vmatprep.subr.bf16.mxu1 %v18955_v40  ;;  %v374_v51 = vld [vmem:[#allocation5 + $0x160] sm:$0xff]  ;;  %v343_v52 = vld [vmem:[#allocation5 + $0x68] sm:$0xff] }
  0x96   :  { %156 = vst [vmem:[#allocation2 + $0x150] sm:$0xff] %v21326_v0  ;;  %157 = vst [vmem:[#allocation2 + $0x158] sm:$0xff] %v21326_v0  ;;  %v492_v54 = vld [vmem:[#allocation8] sm:$0xff]  ;;  %v375_v55 = vld [vmem:[#allocation5 + $0x168] sm:$0xff] }
  0x97   :  { %158 = vst [vmem:[#allocation2 + $0x160] sm:$0x3] %v21326_v0  ;;  %159 = vst [vmem:[#allocation2 + $0x168] sm:$0xff] %v21326_v0  ;;  %v344_v56 = vld [vmem:[#allocation5 + $0x70] sm:$0xff]  ;;  %v493_v57 = vld [vmem:[#allocation8 + $0x8] sm:$0xff] }
  0x98   :  { %160 = vst [vmem:[#allocation2 + $0x170] sm:$0xff] %v21326_v0  ;;  %161 = vst [vmem:[#allocation2 + $0x178] sm:$0x3] %v21326_v0  ;;  %18958 = vmatpush3.bf16.msra.mxu0 %v18955_v40  ;;  %19246 = vmatpush3.bf16.msra.mxu1 %v18955_v40  ;;  %v376_v58 = vld [vmem:[#allocation5 + $0x170] sm:$0xff]  ;;  %v345_v59 = vld [vmem:[#allocation5 + $0x78] sm:$0xff] }
  0x99   :  { %162 = vst [vmem:[#allocation2 + $0x180] sm:$0xff] %v21326_v0  ;;  %163 = vst [vmem:[#allocation2 + $0x188] sm:$0xff] %v21326_v0  ;;  %18960 = vmatprep.subr.bf16.mxu0 %v18959_v45  ;;  %19248 = vmatprep.subr.bf16.mxu1 %v18959_v45  ;;  %v377_v60 = vld [vmem:[#allocation5 + $0x178] sm:$0xff]  ;;  %v346_v61 = vld [vmem:[#allocation5 + $0x80] sm:$0xff] }
  0x9a   :  { %164 = vst [vmem:[#allocation2 + $0x190] sm:$0x3] %v21326_v0  ;;  %165 = vst [vmem:[#allocation2 + $0x198] sm:$0xff] %v21326_v0  ;;  %v378_v62 = vld [vmem:[#allocation5 + $0x180] sm:$0xff]  ;;  %v347_v63 = vld [vmem:[#allocation5 + $0x88] sm:$0xff] }
  0x9b   :  { %166 = vst [vmem:[#allocation2 + $0x1a0] sm:$0xff] %v21326_v0  ;;  %167 = vst [vmem:[#allocation2 + $0x1a8] sm:$0x3] %v21326_v0  ;;  %v379_v1 = vld [vmem:[#allocation5 + $0x188] sm:$0xff]  ;;  %v348_v2 = vld [vmem:[#allocation5 + $0x90] sm:$0xff] }
  0x9c   :  { %168 = vst [vmem:[#allocation2 + $0x1b0] sm:$0xff] %v21326_v0  ;;  %169 = vst [vmem:[#allocation2 + $0x1b8] sm:$0xff] %v21326_v0  ;;  %18962 = vmatpush3.bf16.msra.mxu0 %v18959_v45  ;;  %19250 = vmatpush3.bf16.msra.mxu1 %v18959_v45  ;;  %v380_v3 = vld [vmem:[#allocation5 + $0x190] sm:$0xff]  ;;  %v349_v4 = vld [vmem:[#allocation5 + $0x98] sm:$0xff] }
  0x9d   :  { %170 = vst [vmem:[#allocation2 + $0x1c0] sm:$0x3] %v21326_v0  ;;  %171 = vst [vmem:[#allocation2 + $0x1c8] sm:$0xff] %v21326_v0  ;;  %18964 = vmatprep.subr.bf16.mxu0 %v18963_v53  ;;  %19252 = vmatprep.subr.bf16.mxu1 %v18963_v53  ;;  %v494_v5 = vld [vmem:[#allocation8 + $0x10] sm:$0xff]  ;;  %v495_v6 = vld [vmem:[#allocation8 + $0x18] sm:$0xff] }
  0x9e   :  { %172 = vst [vmem:[#allocation2 + $0x1d0] sm:$0xff] %v21326_v0  ;;  %173 = vst [vmem:[#allocation2 + $0x1d8] sm:$0x3] %v21326_v0  ;;  %v381_v7 = vld [vmem:[#allocation5 + $0x198] sm:$0xff]  ;;  %v509_v8 = vld [vmem:[#allocation2 + $0x9] sm:$0xff] }
  0x9f   :  { %174 = vst [vmem:[#allocation2 + $0x1e0] sm:$0xff] %v21326_v0  ;;  %175 = vst [vmem:[#allocation2 + $0x1e8] sm:$0xff] %v21326_v0  ;;  %v496_v10 = vld [vmem:[#allocation8 + $0x20] sm:$0xff]  ;;  %v352_v23 = vld [vmem:[#allocation5 + $0xb0] sm:$0xff] }
  0xa0   :  { %176 = vst [vmem:[#allocation2 + $0x1f0] sm:$0x3] %v21326_v0  ;;  %177 = vst [vmem:[#allocation2 + $0x1f8] sm:$0xff] %v21326_v0  ;;  %18966 = vmatpush3.bf16.msra.mxu0 %v18963_v53  ;;  %19254 = vmatpush3.bf16.msra.mxu1 %v18963_v53  ;;  %v385_v32 = vld [vmem:[#allocation5 + $0x1b8] sm:$0xff]  ;;  %v354_v33 = vld [vmem:[#allocation5 + $0xc0] sm:$0xff] }
  0xa1   :  { %178 = vst [vmem:[#allocation2 + $0x200] sm:$0xff] %v21326_v0  ;;  %179 = vst [vmem:[#allocation2 + $0x208] sm:$0x3] %v21326_v0  ;;  %v356_v40 = vld [vmem:[#allocation5 + $0xd0] sm:$0xff]  ;;  %v501_v42 = vld [vmem:[#allocation8 + $0x48] sm:$0xff] }
  0xa2   :  { %180 = vst [vmem:[#allocation2 + $0x210] sm:$0xff] %v21326_v0  ;;  %181 = vst [vmem:[#allocation2 + $0x218] sm:$0xff] %v21326_v0  ;;  %v388_v43 = vld [vmem:[#allocation5 + $0x1d0] sm:$0xff]  ;;  %v389_v48 = vld [vmem:[#allocation5 + $0x1d8] sm:$0xff] }
  0xa3   :  { %182 = vst [vmem:[#allocation2 + $0x220] sm:$0x3] %v21326_v0  ;;  %183 = vst [vmem:[#allocation2 + $0x228] sm:$0xff] %v21326_v0  ;;  %v3340_v11 = vld [vmem:[#allocation2 + $0x1b1] sm:$0xff]  ;;  %16088 = vmatmul.mubr.f32.vlgmr.msra.gmra.mrb[0].mxu0 %v509_v8 }
  0xa4   :  { %184 = vst [vmem:[#allocation2 + $0x230] sm:$0xff] %v21326_v0  ;;  %185 = vst [vmem:[#allocation2 + $0x238] sm:$0x3] %v21326_v0  ;;  %16807 = vmatprep.mubr.f32.mxu1 %v3340_v11  ;;  %v3341_v9 = vld [vmem:[#allocation2 + $0x1b9] sm:$0xff]  ;;  %v502_v53 = vld [vmem:[#allocation8 + $0x50] sm:$0xff] }
  0xa5   :  { %186 = vst [vmem:[#allocation2 + $0x240] sm:$0xff] %v21326_v0  ;;  %187 = vst [vmem:[#allocation2 + $0x248] sm:$0xff] %v21326_v0  ;;  %v350_v11 = vld [vmem:[#allocation5 + $0xa0] sm:$0xff]  ;;  %16808 = vmatmul.mubr.f32.vlgmr.msra.gmra.mrb[0].mxu1 %v3341_v9 }
  0xa6   :  { %188 = vst [vmem:[#allocation2 + $0x250] sm:$0x3] %v21326_v0  ;;  %189 = vst [vmem:[#allocation2 + $0x258] sm:$0xff] %v21326_v0 }
  0xa7   :  { %190 = vst [vmem:[#allocation2 + $0x260] sm:$0xff] %v21326_v0  ;;  %191 = vst [vmem:[#allocation2 + $0x268] sm:$0x3] %v21326_v0 }
  0xa8   :  { %192 = vst [vmem:[#allocation2 + $0x270] sm:$0xff] %v21326_v0  ;;  %193 = vst [vmem:[#allocation2 + $0x278] sm:$0xff] %v21326_v0 }
  0xa9   :  { %194 = vst [vmem:[#allocation2 + $0x280] sm:$0x3] %v21326_v0  ;;  %195 = vst [vmem:[#allocation2 + $0x288] sm:$0xff] %v21326_v0 }
  0xaa   :  { %196 = vst [vmem:[#allocation2 + $0x290] sm:$0xff] %v21326_v0  ;;  %197 = vst [vmem:[#allocation2 + $0x298] sm:$0x3] %v21326_v0 }
  0xab   :  { %198 = vst [vmem:[#allocation2 + $0x2a0] sm:$0xff] %v21326_v0  ;;  %199 = vst [vmem:[#allocation2 + $0x2a8] sm:$0xff] %v21326_v0 }
  0xac   :  { %200 = vst [vmem:[#allocation2 + $0x2b0] sm:$0x3] %v21326_v0  ;;  %201 = vst [vmem:[#allocation2 + $0x2b8] sm:$0xff] %v21326_v0 }
  0xad   :  { %202 = vst [vmem:[#allocation2 + $0x2c0] sm:$0xff] %v21326_v0  ;;  %203 = vst [vmem:[#allocation2 + $0x2c8] sm:$0x3] %v21326_v0 }
  0xae   :  { %204 = vst [vmem:[#allocation2 + $0x2d0] sm:$0xff] %v21326_v0  ;;  %205 = vst [vmem:[#allocation2 + $0x2d8] sm:$0xff] %v21326_v0 }
  0xaf   :  { %206 = vst [vmem:[#allocation2 + $0x2e0] sm:$0x3] %v21326_v0  ;;  %207 = vst [vmem:[#allocation2 + $0x2e8] sm:$0xff] %v21326_v0 }
  0xb0   :  { %208 = vst [vmem:[#allocation2 + $0x2f0] sm:$0xff] %v21326_v0  ;;  %209 = vst [vmem:[#allocation2 + $0x2f8] sm:$0x3] %v21326_v0 }
  0xb1   :  { %210 = vst [vmem:[#allocation2 + $0x300] sm:$0xff] %v21326_v0  ;;  %211 = vst [vmem:[#allocation2 + $0x308] sm:$0xff] %v21326_v0 }
  0xb2   :  { %212 = vst [vmem:[#allocation2 + $0x310] sm:$0x3] %v21326_v0  ;;  %213 = vst [vmem:[#allocation2 + $0x318] sm:$0xff] %v21326_v0 }
  0xb3   :  { %214 = vst [vmem:[#allocation2 + $0x320] sm:$0xff] %v21326_v0  ;;  %215 = vst [vmem:[#allocation2 + $0x328] sm:$0x3] %v21326_v0 }
  0xb4   :  { %216 = vst [vmem:[#allocation2 + $0x330] sm:$0xff] %v21326_v0  ;;  %217 = vst [vmem:[#allocation2 + $0x338] sm:$0xff] %v21326_v0 }
  0xb5   :  { %218 = vst [vmem:[#allocation2 + $0x340] sm:$0x3] %v21326_v0  ;;  %219 = vst [vmem:[#allocation2 + $0x348] sm:$0xff] %v21326_v0 }
  0xb6   :  { %220 = vst [vmem:[#allocation2 + $0x350] sm:$0xff] %v21326_v0  ;;  %221 = vst [vmem:[#allocation2 + $0x358] sm:$0x3] %v21326_v0 }
  0xb7   :  { %222 = vst [vmem:[#allocation3] sm:$0xff] %v21326_v0  ;;  %223 = vst [vmem:[#allocation3 + $0x8] sm:$0xff] %v21326_v0 }
  0xb8   :  { %224 = vst [vmem:[#allocation3 + $0x10] sm:$0x3] %v21326_v0  ;;  %225 = vst [vmem:[#allocation3 + $0x18] sm:$0xff] %v21326_v0 }
  0xb9   :  { %226 = vst [vmem:[#allocation3 + $0x20] sm:$0xff] %v21326_v0  ;;  %227 = vst [vmem:[#allocation3 + $0x28] sm:$0x3] %v21326_v0 }
  0xba   :  { %228 = vst [vmem:[#allocation3 + $0x30] sm:$0xff] %v21326_v0  ;;  %229 = vst [vmem:[#allocation3 + $0x38] sm:$0xff] %v21326_v0 }
  0xbb   :  { %230 = vst [vmem:[#allocation3 + $0x40] sm:$0x3] %v21326_v0  ;;  %231 = vst [vmem:[#allocation3 + $0x48] sm:$0xff] %v21326_v0 }
  0xbc   :  { %232 = vst [vmem:[#allocation3 + $0x50] sm:$0xff] %v21326_v0  ;;  %233 = vst [vmem:[#allocation3 + $0x58] sm:$0x3] %v21326_v0 }
  0xbd   :  { %234 = vst [vmem:[#allocation3 + $0x60] sm:$0xff] %v21326_v0  ;;  %235 = vst [vmem:[#allocation3 + $0x68] sm:$0xff] %v21326_v0 }
  0xbe   :  { %236 = vst [vmem:[#allocation3 + $0x70] sm:$0x3] %v21326_v0  ;;  %237 = vst [vmem:[#allocation3 + $0x78] sm:$0xff] %v21326_v0 }
  0xbf   :  { %238 = vst [vmem:[#allocation3 + $0x80] sm:$0xff] %v21326_v0  ;;  %239 = vst [vmem:[#allocation3 + $0x88] sm:$0x3] %v21326_v0 }
  0xc0   :  { %240 = vst [vmem:[#allocation3 + $0x90] sm:$0xff] %v21326_v0  ;;  %241 = vst [vmem:[#allocation3 + $0x98] sm:$0xff] %v21326_v0 }
  0xc1   :  { %242 = vst [vmem:[#allocation3 + $0xa0] sm:$0x3] %v21326_v0  ;;  %243 = vst [vmem:[#allocation3 + $0xa8] sm:$0xff] %v21326_v0 }
  0xc2   :  { %244 = vst [vmem:[#allocation3 + $0xb0] sm:$0xff] %v21326_v0  ;;  %245 = vst [vmem:[#allocation3 + $0xb8] sm:$0x3] %v21326_v0 }
  0xc3   :  { %246 = vst [vmem:[#allocation3 + $0xc0] sm:$0xff] %v21326_v0  ;;  %247 = vst [vmem:[#allocation3 + $0xc8] sm:$0xff] %v21326_v0 }
  0xc4   :  { %248 = vst [vmem:[#allocation3 + $0xd0] sm:$0x3] %v21326_v0  ;;  %249 = vst [vmem:[#allocation3 + $0xd8] sm:$0xff] %v21326_v0 }
  0xc5   :  { %250 = vst [vmem:[#allocation3 + $0xe0] sm:$0xff] %v21326_v0  ;;  %251 = vst [vmem:[#allocation3 + $0xe8] sm:$0x3] %v21326_v0 }
  0xc6   :  { %252 = vst [vmem:[#allocation3 + $0xf0] sm:$0xff] %v21326_v0  ;;  %253 = vst [vmem:[#allocation3 + $0xf8] sm:$0xff] %v21326_v0 }
  0xc7   :  { %254 = vst [vmem:[#allocation3 + $0x100] sm:$0x3] %v21326_v0  ;;  %255 = vst [vmem:[#allocation3 + $0x108] sm:$0xff] %v21326_v0 }
  0xc8   :  { %256 = vst [vmem:[#allocation3 + $0x110] sm:$0xff] %v21326_v0  ;;  %257 = vst [vmem:[#allocation3 + $0x118] sm:$0x3] %v21326_v0 }
  0xc9   :  { %258 = vst [vmem:[#allocation3 + $0x120] sm:$0xff] %v21326_v0  ;;  %259 = vst [vmem:[#allocation3 + $0x128] sm:$0xff] %v21326_v0 }
  0xca   :  { %260 = vst [vmem:[#allocation3 + $0x130] sm:$0x3] %v21326_v0  ;;  %261 = vst [vmem:[#allocation3 + $0x138] sm:$0xff] %v21326_v0 }
  0xcb   :  { %262 = vst [vmem:[#allocation3 + $0x140] sm:$0xff] %v21326_v0  ;;  %263 = vst [vmem:[#allocation3 + $0x148] sm:$0x3] %v21326_v0 }
  0xcc   :  { %264 = vst [vmem:[#allocation3 + $0x150] sm:$0xff] %v21326_v0  ;;  %265 = vst [vmem:[#allocation3 + $0x158] sm:$0xff] %v21326_v0 }
  0xcd   :  { %266 = vst [vmem:[#allocation3 + $0x160] sm:$0x3] %v21326_v0  ;;  %267 = vst [vmem:[#allocation3 + $0x168] sm:$0xff] %v21326_v0 }
  0xce   :  { %268 = vst [vmem:[#allocation3 + $0x170] sm:$0xff] %v21326_v0  ;;  %269 = vst [vmem:[#allocation3 + $0x178] sm:$0x3] %v21326_v0 }
  0xcf   :  { %270 = vst [vmem:[#allocation3 + $0x180] sm:$0xff] %v21326_v0  ;;  %271 = vst [vmem:[#allocation3 + $0x188] sm:$0xff] %v21326_v0 }
  0xd0   :  { %272 = vst [vmem:[#allocation3 + $0x190] sm:$0x3] %v21326_v0  ;;  %273 = vst [vmem:[#allocation3 + $0x198] sm:$0xff] %v21326_v0 }
  0xd1   :  { %274 = vst [vmem:[#allocation3 + $0x1a0] sm:$0xff] %v21326_v0  ;;  %275 = vst [vmem:[#allocation3 + $0x1a8] sm:$0x3] %v21326_v0 }
  0xd2   :  { %276 = vst [vmem:[#allocation3 + $0x1b0] sm:$0xff] %v21326_v0  ;;  %277 = vst [vmem:[#allocation3 + $0x1b8] sm:$0xff] %v21326_v0 }
  0xd3   :  { %278 = vst [vmem:[#allocation3 + $0x1c0] sm:$0x3] %v21326_v0  ;;  %279 = vst [vmem:[#allocation3 + $0x1c8] sm:$0xff] %v21326_v0 }
  0xd4   :  { %280 = vst [vmem:[#allocation3 + $0x1d0] sm:$0xff] %v21326_v0  ;;  %281 = vst [vmem:[#allocation3 + $0x1d8] sm:$0x3] %v21326_v0 }
  0xd5   :  { %282 = vst [vmem:[#allocation3 + $0x1e0] sm:$0xff] %v21326_v0  ;;  %283 = vst [vmem:[#allocation3 + $0x1e8] sm:$0xff] %v21326_v0 }
  0xd6   :  { %284 = vst [vmem:[#allocation3 + $0x1f0] sm:$0x3] %v21326_v0  ;;  %285 = vst [vmem:[#allocation3 + $0x1f8] sm:$0xff] %v21326_v0 }
  0xd7   :  { %286 = vst [vmem:[#allocation3 + $0x200] sm:$0xff] %v21326_v0  ;;  %287 = vst [vmem:[#allocation3 + $0x208] sm:$0x3] %v21326_v0 }
  0xd8   :  { %288 = vst [vmem:[#allocation3 + $0x210] sm:$0xff] %v21326_v0  ;;  %289 = vst [vmem:[#allocation3 + $0x218] sm:$0xff] %v21326_v0 }
  0xd9   :  { %290 = vst [vmem:[#allocation3 + $0x220] sm:$0x3] %v21326_v0  ;;  %291 = vst [vmem:[#allocation3 + $0x228] sm:$0xff] %v21326_v0 }
  0xda   :  { %292 = vst [vmem:[#allocation3 + $0x230] sm:$0xff] %v21326_v0  ;;  %293 = vst [vmem:[#allocation3 + $0x238] sm:$0x3] %v21326_v0 }
  0xdb   :  { %294 = vst [vmem:[#allocation3 + $0x240] sm:$0xff] %v21326_v0  ;;  %295 = vst [vmem:[#allocation3 + $0x248] sm:$0xff] %v21326_v0 }
  0xdc   :  { %296 = vst [vmem:[#allocation3 + $0x250] sm:$0x3] %v21326_v0  ;;  %297 = vst [vmem:[#allocation3 + $0x258] sm:$0xff] %v21326_v0 }
  0xdd   :  { %298 = vst [vmem:[#allocation3 + $0x260] sm:$0xff] %v21326_v0  ;;  %299 = vst [vmem:[#allocation3 + $0x268] sm:$0x3] %v21326_v0 }
  0xde   :  { %300 = vst [vmem:[#allocation3 + $0x270] sm:$0xff] %v21326_v0  ;;  %301 = vst [vmem:[#allocation3 + $0x278] sm:$0xff] %v21326_v0 }
  0xdf   :  { %302 = vst [vmem:[#allocation3 + $0x280] sm:$0x3] %v21326_v0  ;;  %303 = vst [vmem:[#allocation3 + $0x288] sm:$0xff] %v21326_v0 }
  0xe0   :  { %304 = vst [vmem:[#allocation3 + $0x290] sm:$0xff] %v21326_v0  ;;  %305 = vst [vmem:[#allocation3 + $0x298] sm:$0x3] %v21326_v0 }
  0xe1   :  { %306 = vst [vmem:[#allocation3 + $0x2a0] sm:$0xff] %v21326_v0  ;;  %307 = vst [vmem:[#allocation3 + $0x2a8] sm:$0xff] %v21326_v0 }
  0xe2   :  { %308 = vst [vmem:[#allocation3 + $0x2b0] sm:$0x3] %v21326_v0  ;;  %309 = vst [vmem:[#allocation3 + $0x2b8] sm:$0xff] %v21326_v0 }
  0xe3   :  { %310 = vst [vmem:[#allocation3 + $0x2c0] sm:$0xff] %v21326_v0  ;;  %311 = vst [vmem:[#allocation3 + $0x2c8] sm:$0x3] %v21326_v0 }
  0xe4   :  { %312 = vst [vmem:[#allocation3 + $0x2d0] sm:$0xff] %v21326_v0  ;;  %313 = vst [vmem:[#allocation3 + $0x2d8] sm:$0xff] %v21326_v0 }
  0xe5   :  { %314 = vst [vmem:[#allocation3 + $0x2e0] sm:$0x3] %v21326_v0  ;;  %315 = vst [vmem:[#allocation3 + $0x2e8] sm:$0xff] %v21326_v0 }
  0xe6   :  { %316 = vst [vmem:[#allocation3 + $0x2f0] sm:$0xff] %v21326_v0  ;;  %317 = vst [vmem:[#allocation3 + $0x2f8] sm:$0x3] %v21326_v0 }
  0xe7   :  { %318 = vst [vmem:[#allocation3 + $0x300] sm:$0xff] %v21326_v0  ;;  %319 = vst [vmem:[#allocation3 + $0x308] sm:$0xff] %v21326_v0 }
  0xe8   :  { %320 = vst [vmem:[#allocation3 + $0x310] sm:$0x3] %v21326_v0  ;;  %321 = vst [vmem:[#allocation3 + $0x318] sm:$0xff] %v21326_v0 }
  0xe9   :  { %322 = vst [vmem:[#allocation3 + $0x320] sm:$0xff] %v21326_v0  ;;  %323 = vst [vmem:[#allocation3 + $0x328] sm:$0x3] %v21326_v0 }
  0xea   :  { %324 = vst [vmem:[#allocation3 + $0x330] sm:$0xff] %v21326_v0  ;;  %325 = vst [vmem:[#allocation3 + $0x338] sm:$0xff] %v21326_v0 }
  0xeb   :  { %326 = vst [vmem:[#allocation3 + $0x340] sm:$0x3] %v21326_v0  ;;  %327 = vst [vmem:[#allocation3 + $0x348] sm:$0xff] %v21326_v0 }
  0xec   :  { %328 = vst [vmem:[#allocation3 + $0x350] sm:$0xff] %v21326_v0  ;;  %329 = vst [vmem:[#allocation3 + $0x358] sm:$0x3] %v21326_v0  ;;  %v18967_v0 = vpack.c.bf16 %v493_v57, %v492_v54  ;;  %v503_v54 = vld [vmem:[#allocation8 + $0x58] sm:$0xff] }
  0xed   :  { %396 = vst.msk [vmem:[#allocation2 + $0x19] sm:$0xff] %vm395_vm0, %v330_v14  ;;  %428 = vst.msk [vmem:[#allocation2 + $0x1c9] sm:$0xff] %vm395_vm0, %v362_v15  ;;  %v18971_v14 = vpack.c.bf16 %v495_v6, %v494_v5  ;;  %v382_v15 = vld [vmem:[#allocation5 + $0x1a0] sm:$0xff]  ;;  %v507_v5 = vld [vmem:[#allocation8 + $0x78] sm:$0xff] }
  0xee   :  { %397 = vst.msk [vmem:[#allocation2 + $0x21] sm:$0xff] %vm395_vm0, %v331_v16  ;;  %429 = vst.msk [vmem:[#allocation2 + $0x1d1] sm:$0xff] %vm395_vm0, %v363_v17  ;;  %18968 = vmatprep.subr.bf16.mxu0 %v18967_v0  ;;  %19256 = vmatprep.subr.bf16.mxu1 %v18967_v0  ;;  %v497_v16 = vld [vmem:[#allocation8 + $0x28] sm:$0xff] }
  0xef   :  { %398 = vst.msk [vmem:[#allocation2 + $0x31] sm:$0xff] %vm395_vm0, %v332_v18  ;;  %430 = vst.msk [vmem:[#allocation2 + $0x1e1] sm:$0xff] %vm395_vm0, %v364_v21  ;;  %v351_v17 = vld [vmem:[#allocation5 + $0xa8] sm:$0xff]  ;;  %18970 = vmatpush3.bf16.msra.mxu0 %v18967_v0  ;;  %19258 = vmatpush3.bf16.msra.mxu1 %v18967_v0 }
  0xf0   :  { %399 = vst.msk [vmem:[#allocation2 + $0x39] sm:$0xff] %vm395_vm0, %v333_v22  ;;  %431 = vst.msk [vmem:[#allocation2 + $0x1e9] sm:$0xff] %vm395_vm0, %v365_v24  ;;  %v383_v18 = vld [vmem:[#allocation5 + $0x1a8] sm:$0xff]  ;;  %18972 = vmatprep.subr.bf16.mxu0 %v18971_v14  ;;  %19260 = vmatprep.subr.bf16.mxu1 %v18971_v14 }
  0xf1   :  { %400 = vst.msk [vmem:[#allocation2 + $0x49] sm:$0xff] %vm395_vm0, %v334_v25  ;;  %432 = vst.msk [vmem:[#allocation2 + $0x1f9] sm:$0xff] %vm395_vm0, %v366_v26  ;;  %v18975_v26 = vpack.c.bf16 %v497_v16, %v496_v10 }
  0xf2   :  { %401 = vst.msk [vmem:[#allocation2 + $0x51] sm:$0xff] %vm395_vm0, %v335_v27  ;;  %433 = vst.msk [vmem:[#allocation2 + $0x201] sm:$0xff] %vm395_vm0, %v367_v28  ;;  %v384_v27 = vld [vmem:[#allocation5 + $0x1b0] sm:$0xff] }
  0xf3   :  { %402 = vst.msk [vmem:[#allocation2 + $0x61] sm:$0xff] %vm395_vm0, %v336_v29  ;;  %434 = vst.msk [vmem:[#allocation2 + $0x211] sm:$0xff] %vm395_vm0, %v368_v30  ;;  %v498_v28 = vld [vmem:[#allocation8 + $0x30] sm:$0xff]  ;;  %v499_v29 = vld [vmem:[#allocation8 + $0x38] sm:$0xff]  ;;  %18974 = vmatpush3.bf16.msra.mxu0 %v18971_v14  ;;  %19262 = vmatpush3.bf16.msra.mxu1 %v18971_v14 }
  0xf4   :  { %403 = vst.msk [vmem:[#allocation2 + $0x69] sm:$0xff] %vm395_vm0, %v337_v31  ;;  %435 = vst.msk [vmem:[#allocation2 + $0x219] sm:$0xff] %vm395_vm0, %v369_v35  ;;  %v510_v12 = vld [vmem:[#allocation2 + $0x19] sm:$0xff]  ;;  %v3342_v13 = vld [vmem:[#allocation2 + $0x1c9] sm:$0xff]  ;;  %18976 = vmatprep.subr.bf16.mxu0 %v18975_v26  ;;  %19264 = vmatprep.subr.bf16.mxu1 %v18975_v26 }
  0xf5   :  { %404 = vst.msk [vmem:[#allocation2 + $0x79] sm:$0xff] %vm395_vm0, %v338_v36  ;;  %436 = vst.msk [vmem:[#allocation2 + $0x229] sm:$0xff] %vm395_vm0, %v370_v37  ;;  %v511_v19 = vld [vmem:[#allocation2 + $0x21] sm:$0xff]  ;;  %v3343_v20 = vld [vmem:[#allocation2 + $0x1d1] sm:$0xff]  ;;  %16090 = vmatprep.mubr.f32.mxu0 %v510_v12  ;;  %16810 = vmatprep.mubr.f32.mxu1 %v3342_v13 }
  0xf6   :  { %405 = vst.msk [vmem:[#allocation2 + $0x81] sm:$0xff] %vm395_vm0, %v339_v38  ;;  %437 = vst.msk [vmem:[#allocation2 + $0x231] sm:$0xff] %vm395_vm0, %v371_v39  ;;  %v512_v21 = vld [vmem:[#allocation2 + $0x31] sm:$0xff]  ;;  %v3344_v22 = vld [vmem:[#allocation2 + $0x1e1] sm:$0xff]  ;;  %16091 = vmatmul.mubr.f32.gmra.mrb[2].mxu0 %v511_v19  ;;  %16811 = vmatmul.mubr.f32.gmra.mrb[2].mxu1 %v3343_v20  ;;  %v18979_v38 = vpack.c.bf16 %v499_v29, %v498_v28 }
  0xf7   :  { %406 = vst.msk [vmem:[#allocation2 + $0x91] sm:$0xff] %vm395_vm0, %v340_v41  ;;  %438 = vst.msk [vmem:[#allocation2 + $0x241] sm:$0xff] %vm395_vm0, %v372_v44  ;;  %v513_v24 = vld [vmem:[#allocation2 + $0x39] sm:$0xff]  ;;  %v3345_v25 = vld [vmem:[#allocation2 + $0x1e9] sm:$0xff]  ;;  %16093 = vmatprep.mubr.f32.mxu0 %v512_v21  ;;  %16813 = vmatprep.mubr.f32.mxu1 %v3344_v22 }
  0xf8   :  { %407 = vst.msk [vmem:[#allocation2 + $0x99] sm:$0xff] %vm395_vm0, %v341_v46  ;;  %439 = vst.msk [vmem:[#allocation2 + $0x249] sm:$0xff] %vm395_vm0, %v373_v49  ;;  %v353_v30 = vld [vmem:[#allocation5 + $0xb8] sm:$0xff]  ;;  %v514_v31 = vld [vmem:[#allocation2 + $0x49] sm:$0xff]  ;;  %18978 = vmatpush3.bf16.msra.mxu0 %v18975_v26  ;;  %19266 = vmatpush3.bf16.msra.mxu1 %v18975_v26 }
  0xf9   :  { %408 = vst.msk [vmem:[#allocation2 + $0xa9] sm:$0xff] %vm395_vm0, %v342_v50  ;;  %440 = vst.msk [vmem:[#allocation2 + $0x259] sm:$0xff] %vm395_vm0, %v374_v51  ;;  %v3346_v34 = vld [vmem:[#allocation2 + $0x1f9] sm:$0xff]  ;;  %v355_v36 = vld [vmem:[#allocation5 + $0xc8] sm:$0xff]  ;;  %18980 = vmatprep.subr.bf16.mxu0 %v18979_v38  ;;  %19268 = vmatprep.subr.bf16.mxu1 %v18979_v38 }
  0xfa   :  { %409 = vst.msk [vmem:[#allocation2 + $0xb1] sm:$0xff] %vm395_vm0, %v343_v52  ;;  %441 = vst.msk [vmem:[#allocation2 + $0x261] sm:$0xff] %vm395_vm0, %v375_v55  ;;  %v386_v35 = vld [vmem:[#allocation5 + $0x1c0] sm:$0xff]  ;;  %v515_v37 = vld [vmem:[#allocation2 + $0x51] sm:$0xff]  ;;  %16094 = vmatmul.mubr.f32.gmra.mrb[4].mxu0 %v513_v24  ;;  %16814 = vmatmul.mubr.f32.gmra.mrb[4].mxu1 %v3345_v25 }
  0xfb   :  { %410 = vst.msk [vmem:[#allocation2 + $0xc1] sm:$0xff] %vm395_vm0, %v344_v56  ;;  %442 = vst.msk [vmem:[#allocation2 + $0x271] sm:$0xff] %vm395_vm0, %v376_v58  ;;  %v387_v39 = vld [vmem:[#allocation5 + $0x1c8] sm:$0xff]  ;;  %v500_v41 = vld [vmem:[#allocation8 + $0x40] sm:$0xff]  ;;  %16096 = vmatprep.mubr.f32.mxu0 %v514_v31  ;;  %16816 = vmatprep.mubr.f32.mxu1 %v3346_v34 }
  0xfc   :  { %411 = vst.msk [vmem:[#allocation2 + $0xc9] sm:$0xff] %vm395_vm0, %v345_v59  ;;  %443 = vst.msk [vmem:[#allocation2 + $0x279] sm:$0xff] %vm395_vm0, %v377_v60  ;;  %v3347_v44 = vld [vmem:[#allocation2 + $0x201] sm:$0xff]  ;;  %v357_v46 = vld [vmem:[#allocation5 + $0xd8] sm:$0xff]  ;;  %v18983_v50 = vpack.c.bf16 %v501_v42, %v500_v41  ;;  %18982 = vmatpush3.bf16.msra.mxu0 %v18979_v38  ;;  %19270 = vmatpush3.bf16.msra.mxu1 %v18979_v38  ;;  %v18987_v60 = vpack.c.bf16 %v503_v54, %v502_v53 }
  0xfd   :  { %412 = vst.msk [vmem:[#allocation2 + $0xd9] sm:$0xff] %vm395_vm0, %v346_v61  ;;  %444 = vst.msk [vmem:[#allocation2 + $0x289] sm:$0xff] %vm395_vm0, %v378_v62  ;;  %v516_v45 = vld [vmem:[#allocation2 + $0x61] sm:$0xff]  ;;  %v3348_v47 = vld [vmem:[#allocation2 + $0x211] sm:$0xff] }
  0xfe   :  { %413 = vst.msk [vmem:[#allocation2 + $0xe1] sm:$0xff] %vm395_vm0, %v347_v63  ;;  %445 = vst.msk [vmem:[#allocation2 + $0x291] sm:$0xff] %vm395_vm0, %v379_v1  ;;  %v358_v49 = vld [vmem:[#allocation5 + $0xe0] sm:$0xff]  ;;  %v359_v52 = vld [vmem:[#allocation5 + $0xe8] sm:$0xff]  ;;  %16097 = vmatmul.mubr.f32.gmra.mrb[6].mxu0 %v515_v37  ;;  %16817 = vmatmul.mubr.f32.gmra.mrb[6].mxu1 %v3347_v44 }
  0xff   :  { %414 = vst.msk [vmem:[#allocation2 + $0xf1] sm:$0xff] %vm395_vm0, %v348_v2  ;;  %446 = vst.msk [vmem:[#allocation2 + $0x2a1] sm:$0xff] %vm395_vm0, %v380_v3  ;;  %v390_v51 = vld [vmem:[#allocation5 + $0x1e0] sm:$0xff]  ;;  %v391_v55 = vld [vmem:[#allocation5 + $0x1e8] sm:$0xff]  ;;  %16099 = vmatprep.mubr.f32.mxu0 %v516_v45  ;;  %16819 = vmatprep.mubr.f32.mxu1 %v3348_v47 }
 0x100   :  { %415 = vst.msk [vmem:[#allocation2 + $0xf9] sm:$0xff] %vm395_vm0, %v349_v4  ;;  %447 = vst.msk [vmem:[#allocation2 + $0x2a9] sm:$0xff] %vm395_vm0, %v381_v7  ;;  %v517_v56 = vld [vmem:[#allocation2 + $0x69] sm:$0xff]  ;;  %v3349_v57 = vld [vmem:[#allocation2 + $0x219] sm:$0xff]  ;;  %18984 = vmatprep.subr.bf16.mxu0 %v18983_v50  ;;  %19272 = vmatprep.subr.bf16.mxu1 %v18983_v50 }
 0x101   :  { %416 = vst.msk [vmem:[#allocation2 + $0x109] sm:$0xff] %vm395_vm0, %v350_v11  ;;  %448 = vst.msk [vmem:[#allocation2 + $0x2b9] sm:$0xff] %vm395_vm0, %v382_v15  ;;  %v518_v58 = vld [vmem:[#allocation2 + $0x79] sm:$0xff]  ;;  %v3350_v59 = vld [vmem:[#allocation2 + $0x229] sm:$0xff]  ;;  %18986 = vmatpush3.bf16.msra.mxu0 %v18983_v50  ;;  %19274 = vmatpush3.bf16.msra.mxu1 %v18983_v50 }
 0x102   :  { %417 = vst.msk [vmem:[#allocation2 + $0x111] sm:$0xff] %vm395_vm0, %v351_v17  ;;  %449 = vst.msk [vmem:[#allocation2 + $0x2c1] sm:$0xff] %vm395_vm0, %v383_v18  ;;  %16100 = vmatmul.mubr.f32.gmra.mrb[8].mxu0 %v517_v56  ;;  %16820 = vmatmul.mubr.f32.gmra.mrb[8].mxu1 %v3349_v57  ;;  %v504_v61 = vld [vmem:[#allocation8 + $0x60] sm:$0xff]  ;;  %v505_v62 = vld [vmem:[#allocation8 + $0x68] sm:$0xff] }
 0x103   :  { %418 = vst.msk [vmem:[#allocation2 + $0x121] sm:$0xff] %vm395_vm0, %v352_v23  ;;  %450 = vst.msk [vmem:[#allocation2 + $0x2d1] sm:$0xff] %vm395_vm0, %v384_v27  ;;  %16102 = vmatprep.mubr.f32.mxu0 %v518_v58  ;;  %16822 = vmatprep.mubr.f32.mxu1 %v3350_v59  ;;  %v519_v63 = vld [vmem:[#allocation2 + $0x81] sm:$0xff]  ;;  %v3351_v0 = vld [vmem:[#allocation2 + $0x231] sm:$0xff]  ;;  %v18991_v3 = vpack.c.bf16 %v505_v62, %v504_v61 }
 0x104   :  { %419 = vst.msk [vmem:[#allocation2 + $0x129] sm:$0xff] %vm395_vm0, %v353_v30  ;;  %451 = vst.msk [vmem:[#allocation2 + $0x2d9] sm:$0xff] %vm395_vm0, %v385_v32  ;;  %v520_v1 = vld [vmem:[#allocation2 + $0x91] sm:$0xff]  ;;  %v3352_v2 = vld [vmem:[#allocation2 + $0x241] sm:$0xff]  ;;  %18988 = vmatprep.subr.bf16.mxu0 %v18987_v60  ;;  %19276 = vmatprep.subr.bf16.mxu1 %v18987_v60 }
 0x105   :  { %420 = vst.msk [vmem:[#allocation2 + $0x139] sm:$0xff] %vm395_vm0, %v354_v33  ;;  %452 = vst.msk [vmem:[#allocation2 + $0x2e9] sm:$0xff] %vm395_vm0, %v386_v35  ;;  %v506_v4 = vld [vmem:[#allocation8 + $0x70] sm:$0xff]  ;;  %v521_v6 = vld [vmem:[#allocation2 + $0x99] sm:$0xff]  ;;  %18990 = vmatpush3.bf16.msra.mxu0 %v18987_v60  ;;  %19278 = vmatpush3.bf16.msra.mxu1 %v18987_v60 }
 0x106   :  { %421 = vst.msk [vmem:[#allocation2 + $0x141] sm:$0xff] %vm395_vm0, %v355_v36  ;;  %453 = vst.msk [vmem:[#allocation2 + $0x2f1] sm:$0xff] %vm395_vm0, %v387_v39  ;;  %16103 = vmatmul.mubr.f32.gmra.mrb[10].mxu0 %v519_v63  ;;  %16823 = vmatmul.mubr.f32.gmra.mrb[10].mxu1 %v3351_v0  ;;  %v3353_v7 = vld [vmem:[#allocation2 + $0x249] sm:$0xff]  ;;  %v3354_v9 = vld [vmem:[#allocation2 + $0x259] sm:$0xff]  ;;  %v18995_v10 = vpack.c.bf16 %v507_v5, %v506_v4 }
 0x107   :  { %422 = vst.msk [vmem:[#allocation2 + $0x151] sm:$0xff] %vm395_vm0, %v356_v40  ;;  %454 = vst.msk [vmem:[#allocation2 + $0x301] sm:$0xff] %vm395_vm0, %v388_v43  ;;  %16105 = vmatprep.mubr.f32.mxu0 %v520_v1  ;;  %16825 = vmatprep.mubr.f32.mxu1 %v3352_v2  ;;  %v522_v8 = vld [vmem:[#allocation2 + $0xa9] sm:$0xff]  ;;  %v1040_v11 = vld [vmem:[#allocation8 + $0x100] sm:$0xff] }
 0x108   :  { %423 = vst.msk [vmem:[#allocation2 + $0x159] sm:$0xff] %vm395_vm0, %v357_v46  ;;  %455 = vst.msk [vmem:[#allocation2 + $0x309] sm:$0xff] %vm395_vm0, %v389_v48  ;;  %18992 = vmatprep.subr.bf16.mxu0 %v18991_v3  ;;  %19280 = vmatprep.subr.bf16.mxu1 %v18991_v3  ;;  %v1041_v12 = vld [vmem:[#allocation8 + $0x108] sm:$0xff]  ;;  %v523_v13 = vld [vmem:[#allocation2 + $0xb1] sm:$0xff] }
 0x109   :  { %424 = vst.msk [vmem:[#allocation2 + $0x169] sm:$0xff] %vm395_vm0, %v358_v49  ;;  %456 = vst.msk [vmem:[#allocation2 + $0x319] sm:$0xff] %vm395_vm0, %v390_v51  ;;  %v3355_v14 = vld [vmem:[#allocation2 + $0x261] sm:$0xff]  ;;  %v3356_v16 = vld [vmem:[#allocation2 + $0x271] sm:$0xff]  ;;  %18994 = vmatpush3.bf16.msra.mxu0 %v18991_v3  ;;  %19282 = vmatpush3.bf16.msra.mxu1 %v18991_v3  ;;  %v21753_v17 = vpack.c.bf16 %v1041_v12, %v1040_v11 }
 0x10a   :  { %425 = vst.msk [vmem:[#allocation2 + $0x171] sm:$0xff] %vm395_vm0, %v359_v52  ;;  %457 = vst.msk [vmem:[#allocation2 + $0x321] sm:$0xff] %vm395_vm0, %v391_v55  ;;  %16106 = vmatmul.mubr.f32.gmra.mrb[12].mxu0 %v521_v6  ;;  %16826 = vmatmul.mubr.f32.gmra.mrb[12].mxu1 %v3353_v7  ;;  %v524_v15 = vld [vmem:[#allocation2 + $0xc1] sm:$0xff]  ;;  %v525_v18 = vld [vmem:[#allocation2 + $0xc9] sm:$0xff] }
 0x10b   :  { %16108 = vmatprep.mubr.f32.mxu0 %v522_v8  ;;  %16828 = vmatprep.mubr.f32.mxu1 %v3354_v9  ;;  %v3357_v19 = vld [vmem:[#allocation2 + $0x279] sm:$0xff]  ;;  %v3358_v21 = vld [vmem:[#allocation2 + $0x289] sm:$0xff]  ;;  %v527_v22 = vld [vmem:[#allocation2 + $0xe1] sm:$0xff] }
 0x10c   :  { %18996 = vmatprep.subr.bf16.mxu0 %v18995_v10  ;;  %19284 = vmatprep.subr.bf16.mxu1 %v18995_v10  ;;  %v526_v20 = vld [vmem:[#allocation2 + $0xd9] sm:$0xff]  ;;  %v3359_v23 = vld [vmem:[#allocation2 + $0x291] sm:$0xff]  ;;  %v3360_v25 = vld [vmem:[#allocation2 + $0x2a1] sm:$0xff] }
 0x10d   :  { %18998 = vmatpush3.bf16.msra.mxu0 %v18995_v10  ;;  %19286 = vmatpush3.bf16.msra.mxu1 %v18995_v10  ;;  %v528_v24 = vld [vmem:[#allocation2 + $0xf1] sm:$0xff]  ;;  %v529_v26 = vld [vmem:[#allocation2 + $0xf9] sm:$0xff]  ;;  %v3361_v27 = vld [vmem:[#allocation2 + $0x2a9] sm:$0xff] }
 0x10e   :  { %16109 = vmatmul.mubr.f32.gmra.mrb[14].mxu0 %v523_v13  ;;  %16829 = vmatmul.mubr.f32.gmra.mrb[14].mxu1 %v3355_v14  ;;  %v530_v28 = vld [vmem:[#allocation2 + $0x109] sm:$0xff]  ;;  %v3362_v29 = vld [vmem:[#allocation2 + $0x2b9] sm:$0xff]  ;;  %v531_v30 = vld [vmem:[#allocation2 + $0x111] sm:$0xff] }
 0x10f   :  { %16111 = vmatprep.mubr.f32.mxu0 %v524_v15  ;;  %16831 = vmatprep.mubr.f32.mxu1 %v3356_v16  ;;  %v3363_v31 = vld [vmem:[#allocation2 + $0x2c1] sm:$0xff]  ;;  %v3364_v33 = vld [vmem:[#allocation2 + $0x2d1] sm:$0xff]  ;;  %v533_v34 = vld [vmem:[#allocation2 + $0x129] sm:$0xff] }
 0x110   :  { %19000 = vmatprep.subr.bf16.mxu0 %v21753_v17  ;;  %19288 = vmatprep.subr.bf16.mxu1 %v21753_v17  ;;  %v532_v32 = vld [vmem:[#allocation2 + $0x121] sm:$0xff]  ;;  %v3365_v35 = vld [vmem:[#allocation2 + $0x2d9] sm:$0xff]  ;;  %v3366_v37 = vld [vmem:[#allocation2 + $0x2e9] sm:$0xff] }
 0x111   :  { %v534_v36 = vld [vmem:[#allocation2 + $0x139] sm:$0xff]  ;;  %v535_v38 = vld [vmem:[#allocation2 + $0x141] sm:$0xff]  ;;  %v3367_v39 = vld [vmem:[#allocation2 + $0x2f1] sm:$0xff] }
 0x112   :  { %16112 = vmatmul.mubr.f32.gmra.mrb[16].mxu0 %v525_v18  ;;  %16832 = vmatmul.mubr.f32.gmra.mrb[16].mxu1 %v3357_v19  ;;  %v536_v40 = vld [vmem:[#allocation2 + $0x151] sm:$0xff]  ;;  %v3368_v41 = vld [vmem:[#allocation2 + $0x301] sm:$0xff]  ;;  %v537_v42 = vld [vmem:[#allocation2 + $0x159] sm:$0xff] }
 0x113   :  { %16114 = vmatprep.mubr.f32.mxu0 %v526_v20  ;;  %16834 = vmatprep.mubr.f32.mxu1 %v3358_v21  ;;  %v3369_v43 = vld [vmem:[#allocation2 + $0x309] sm:$0xff]  ;;  %v3370_v45 = vld [vmem:[#allocation2 + $0x319] sm:$0xff]  ;;  %v539_v46 = vld [vmem:[#allocation2 + $0x171] sm:$0xff] }
 0x114   :  { %v538_v44 = vld [vmem:[#allocation2 + $0x169] sm:$0xff]  ;;  %v3371_v47 = vld [vmem:[#allocation2 + $0x321] sm:$0xff]  ;;  %v1043_v49 = vld [vmem:[#allocation8 + $0x118] sm:$0xff] }
 0x115   :  { %v1042_v48 = vld [vmem:[#allocation8 + $0x110] sm:$0xff]  ;;  %v21127_v50 = vld [vmem:[#allocation2] sm:$0xff]  ;;  %v21757_v51 = vld [vmem:[#allocation2 + $0x18] sm:$0xff] }
 0x116   :  { %16115 = vmatmul.mubr.f32.gmra.mrb[18].mxu0 %v527_v22  ;;  %16835 = vmatmul.mubr.f32.gmra.mrb[18].mxu1 %v3359_v23  ;;  %v21759_v52 = vld [vmem:[#allocation2 + $0x1c8] sm:$0xff]  ;;  %v19003_v53 = vpack.c.bf16 %v1043_v49, %v1042_v48  ;;  %v1044_v54 = vld [vmem:[#allocation8 + $0x120] sm:$0xff]  ;;  %v21765_v57 = vld [vmem:[#allocation2 + $0x1d0] sm:$0xff] }
 0x117   :  { %16117 = vmatprep.mubr.f32.mxu0 %v528_v24  ;;  %16837 = vmatprep.mubr.f32.mxu1 %v3360_v25  ;;  %v1045_v55 = vld [vmem:[#allocation8 + $0x128] sm:$0xff]  ;;  %v21763_v56 = vld [vmem:[#allocation2 + $0x20] sm:$0xff]  ;;  %v21769_v58 = vld [vmem:[#allocation2 + $0x30] sm:$0xff] }
 0x118   :  { %v21771_v59 = vld [vmem:[#allocation2 + $0x1e0] sm:$0xff]  ;;  %v19007_v60 = vpack.c.bf16 %v1045_v55, %v1044_v54  ;;  %v1046_v61 = vld [vmem:[#allocation8 + $0x130] sm:$0xff]  ;;  %v1047_v62 = vld [vmem:[#allocation8 + $0x138] sm:$0xff] }
 0x119   :  { %v21777_v63 = vld [vmem:[#allocation2 + $0x38] sm:$0xff]  ;;  %v21779_v0 = vld [vmem:[#allocation2 + $0x1e8] sm:$0xff]  ;;  %v19011_v3 = vpack.c.bf16 %v1047_v62, %v1046_v61  ;;  %v1048_v4 = vld [vmem:[#allocation8 + $0x140] sm:$0xff] }
 0x11a   :  { %16118 = vmatmul.mubr.f32.gmra.mrb[20].mxu0 %v529_v26  ;;  %16838 = vmatmul.mubr.f32.gmra.mrb[20].mxu1 %v3361_v27  ;;  %v21781_v1 = vld [vmem:[#allocation2 + $0x48] sm:$0xff]  ;;  %v21783_v2 = vld [vmem:[#allocation2 + $0x1f8] sm:$0xff]  ;;  %v21789_v6 = vld [vmem:[#allocation2 + $0x50] sm:$0xff] }
 0x11b   :  { %16120 = vmatprep.mubr.f32.mxu0 %v530_v28  ;;  %16840 = vmatprep.mubr.f32.mxu1 %v3362_v29  ;;  %v1049_v5 = vld [vmem:[#allocation8 + $0x148] sm:$0xff]  ;;  %v21791_v7 = vld [vmem:[#allocation2 + $0x200] sm:$0xff]  ;;  %v21795_v9 = vld [vmem:[#allocation2 + $0x210] sm:$0xff] }
 0x11c   :  { %v21793_v8 = vld [vmem:[#allocation2 + $0x60] sm:$0xff]  ;;  %v19015_v10 = vpack.c.bf16 %v1049_v5, %v1048_v4  ;;  %v1050_v11 = vld [vmem:[#allocation8 + $0x150] sm:$0xff]  ;;  %v1051_v12 = vld [vmem:[#allocation8 + $0x158] sm:$0xff] }
 0x11d   :  { %v21801_v13 = vld [vmem:[#allocation2 + $0x68] sm:$0xff]  ;;  %v21803_v14 = vld [vmem:[#allocation2 + $0x218] sm:$0xff]  ;;  %v1052_v18 = vld [vmem:[#allocation8 + $0x160] sm:$0xff] }
 0x11e   :  { %16121 = vmatmul.mubr.f32.gmra.mrb[22].mxu0 %v531_v30  ;;  %16841 = vmatmul.mubr.f32.gmra.mrb[22].mxu1 %v3363_v31  ;;  %v21805_v15 = vld [vmem:[#allocation2 + $0x78] sm:$0xff]  ;;  %v21807_v16 = vld [vmem:[#allocation2 + $0x228] sm:$0xff]  ;;  %v21813_v20 = vld [vmem:[#allocation2 + $0x80] sm:$0xff] }
 0x11f   :  { %16123 = vmatprep.mubr.f32.mxu0 %v532_v32  ;;  %16843 = vmatprep.mubr.f32.mxu1 %v3364_v33  ;;  %v1053_v19 = vld [vmem:[#allocation8 + $0x168] sm:$0xff]  ;;  %v21815_v21 = vld [vmem:[#allocation2 + $0x230] sm:$0xff]  ;;  %v21819_v23 = vld [vmem:[#allocation2 + $0x240] sm:$0xff] }
 0x120   :  { %v21817_v22 = vld [vmem:[#allocation2 + $0x90] sm:$0xff]  ;;  %v19023_v24 = vpack.c.bf16 %v1053_v19, %v1052_v18  ;;  %v1055_v26 = vld [vmem:[#allocation8 + $0x178] sm:$0xff]  ;;  %v21827_v28 = vld [vmem:[#allocation2 + $0x248] sm:$0xff] }
 0x121   :  { %v1054_v25 = vld [vmem:[#allocation8 + $0x170] sm:$0xff]  ;;  %v21825_v27 = vld [vmem:[#allocation2 + $0x98] sm:$0xff]  ;;  %v21829_v29 = vld [vmem:[#allocation2 + $0xa8] sm:$0xff] }
 0x122   :  { %16124 = vmatmul.mubr.f32.gmra.mrb[24].mxu0 %v533_v34  ;;  %16844 = vmatmul.mubr.f32.gmra.mrb[24].mxu1 %v3365_v35  ;;  %v21831_v30 = vld [vmem:[#allocation2 + $0x258] sm:$0xff]  ;;  %v19027_v31 = vpack.c.bf16 %v1055_v26, %v1054_v25  ;;  %v1346_v32 = vld [vmem:[#allocation8 + $0x180] sm:$0xff]  ;;  %v1347_v33 = vld [vmem:[#allocation8 + $0x188] sm:$0xff] }
 0x123   :  { %16126 = vmatprep.mubr.f32.mxu0 %v534_v36  ;;  %16846 = vmatprep.mubr.f32.mxu1 %v3366_v37  ;;  %v21837_v34 = vld [vmem:[#allocation2 + $0xb0] sm:$0xff]  ;;  %v21839_v35 = vld [vmem:[#allocation2 + $0x260] sm:$0xff]  ;;  %v21879_v48 = vld [vmem:[#allocation2 + $0x2a8] sm:$0xff] }
 0x124   :  { %v21841_v36 = vld [vmem:[#allocation2 + $0xc0] sm:$0xff]  ;;  %v21843_v37 = vld [vmem:[#allocation2 + $0x270] sm:$0xff]  ;;  %v21881_v49 = vld [vmem:[#allocation2 + $0x108] sm:$0xff] }
 0x125   :  { %v21891_v54 = vld [vmem:[#allocation2 + $0x2c0] sm:$0xff]  ;;  %v21901_v61 = vld [vmem:[#allocation2 + $0x128] sm:$0xff]  ;;  %v21903_v62 = vld [vmem:[#allocation2 + $0x2d8] sm:$0xff] }
 0x126   :  { %16127 = vmatmul.mubr.f32.gmra.mrb[26].mxu0 %v535_v38  ;;  %16847 = vmatmul.mubr.f32.gmra.mrb[26].mxu1 %v3367_v39  ;;  %v21845_v38 = vpack.c.bf16 %v1347_v33, %v1346_v32  ;;  %v21851_v39 = vld [vmem:[#allocation2 + $0xc8] sm:$0xff]  ;;  %v21893_v55 = vld [vmem:[#allocation2 + $0x120] sm:$0xff]  ;;  %25579 = vst [vmem:[#allocation23_spill] sm:$0xff] %v21903_v62  ;;  %v392_v18 = vld [vmem:[#allocation5 + $0x1f0] sm:$0xff] }
 0x127   :  { %16129 = vmatprep.mubr.f32.mxu0 %v536_v40  ;;  %16849 = vmatprep.mubr.f32.mxu1 %v3368_v41  ;;  %v21853_v40 = vld [vmem:[#allocation2 + $0x278] sm:$0xff]  ;;  %v21907_v4 = vld [vmem:[#allocation2 + $0x2e8] sm:$0xff]  ;;  %v21913_v5 = vld [vmem:[#allocation2 + $0x140] sm:$0xff]  ;;  %458 = vst.msk [vmem:[#allocation2 + $0x331] sm:$0xff] %vm395_vm0, %v392_v18 }
 0x128   :  { %v21855_v41 = vld [vmem:[#allocation2 + $0xd8] sm:$0xff]  ;;  %25581 = vst [vmem:[#allocation25_spill] sm:$0xff] %v21907_v4  ;;  %25582 = vst [vmem:[#allocation26_spill] sm:$0xff] %v21913_v5  ;;  %v21931_v26 = vld [vmem:[#allocation2 + $0x308] sm:$0xff] }
 0x129   :  { %v361_v19 = vld [vmem:[#allocation5 + $0xf8] sm:$0xff]  ;;  %25587 = vst [vmem:[#allocation31_spill] sm:$0xff] %v21931_v26  ;;  %v21941_v33 = vld [vmem:[#allocation2 + $0x170] sm:$0xff]  ;;  %v1007_v18 = vld [vmem:[#allocation2 + $0x2] sm:$0xff] }
 0x12a   :  { %16130 = vmatmul.mubr.f32.gmra.mrb[28].mxu0 %v537_v42  ;;  %16850 = vmatmul.mubr.f32.gmra.mrb[28].mxu1 %v3369_v43  ;;  %v21857_v42 = vld [vmem:[#allocation2 + $0x288] sm:$0xff]  ;;  %v21865_v43 = vld [vmem:[#allocation2 + $0xe0] sm:$0xff]  ;;  %427 = vst.msk [vmem:[#allocation2 + $0x189] sm:$0xff] %vm395_vm0, %v361_v19  ;;  %v21929_v25 = vld [vmem:[#allocation2 + $0x158] sm:$0xff] }
 0x12b   :  { %16132 = vmatprep.mubr.f32.mxu0 %v538_v44  ;;  %16852 = vmatprep.mubr.f32.mxu1 %v3370_v45  ;;  %v21867_v44 = vld [vmem:[#allocation2 + $0x290] sm:$0xff]  ;;  %25586 = vst [vmem:[#allocation30_spill] sm:$0xff] %v21929_v25  ;;  %v21935_v32 = vld [vmem:[#allocation2 + $0x318] sm:$0xff]  ;;  %25590 = vst [vmem:[#allocation34_spill] sm:$0xff] %v21941_v33 }
 0x12c   :  { %v21869_v45 = vld [vmem:[#allocation2 + $0xf0] sm:$0xff]  ;;  %25589 = vst [vmem:[#allocation33_spill] sm:$0xff] %v21935_v32 }
 0x12d   :  { %v3838_v19 = vld [vmem:[#allocation2 + $0x1b2] sm:$0xff] }
 0x12e   :  { %16133 = vmatmul.mubr.f32.gmra.mrb[30].mxu0 %v539_v46  ;;  %16853 = vmatmul.mubr.f32.gmra.mrb[30].mxu1 %v3371_v47  ;;  %v21871_v46 = vld [vmem:[#allocation2 + $0x2a0] sm:$0xff]  ;;  %v21877_v47 = vld [vmem:[#allocation2 + $0xf8] sm:$0xff] }
 0x12f   :  { %16167 = vmatprep.mubr.f32.mxu0 %v21127_v50  ;;  %16887 = vmatprep.mubr.f32.mxu1 %v21127_v50 }
 0x132   :  { %16168 = vmatmul.mubr.f32.vlgmr.msra.gmra.mrb[0].mxu0 %v21127_v50  ;;  %16888 = vmatmul.mubr.f32.vlgmr.msra.gmra.mrb[0].mxu1 %v21127_v50  ;;  %v21883_v50 = vld [vmem:[#allocation2 + $0x2b8] sm:$0xff] }
 0x133   :  { %19002 = vmatpush3.bf16.msra.mxu0 %v21753_v17  ;;  %19290 = vmatpush3.bf16.msra.mxu1 %v21753_v17  ;;  %v19019_v17 = vpack.c.bf16 %v1051_v12, %v1050_v11  ;;  %v21917_v11 = vld [vmem:[#allocation2 + $0x150] sm:$0xff]  ;;  %v21919_v12 = vld [vmem:[#allocation2 + $0x300] sm:$0xff] }
 0x134   :  { %16170 = vmatprep.mubr.f32.mxu0 %v21757_v51  ;;  %16890 = vmatprep.mubr.f32.mxu1 %v21759_v52  ;;  %25584 = vst [vmem:[#allocation28_spill] sm:$0xff] %v21917_v11  ;;  %25585 = vst [vmem:[#allocation29_spill] sm:$0xff] %v21919_v12 }
 0x135   :  { %19004 = vmatprep.subr.bf16.mxu0 %v19003_v53  ;;  %19292 = vmatprep.subr.bf16.mxu1 %v19003_v53 }
 0x136   :  { %16171 = vmatmul.mubr.f32.gmra.mrb[2].mxu0 %v21763_v56  ;;  %16891 = vmatmul.mubr.f32.gmra.mrb[2].mxu1 %v21765_v57 }
 0x137   :  { %16173 = vmatprep.mubr.f32.mxu0 %v21769_v58  ;;  %16893 = vmatprep.mubr.f32.mxu1 %v21771_v59 }
 0x138   :  { %19006 = vmatpush3.bf16.msra.mxu0 %v19003_v53  ;;  %19294 = vmatpush3.bf16.msra.mxu1 %v19003_v53  ;;  %v21889_v53 = vld [vmem:[#allocation2 + $0x110] sm:$0xff] }
 0x139   :  { %19008 = vmatprep.subr.bf16.mxu0 %v19007_v60  ;;  %19296 = vmatprep.subr.bf16.mxu1 %v19007_v60 }
 0x13a   :  { %16174 = vmatmul.mubr.f32.gmra.mrb[4].mxu0 %v21777_v63  ;;  %16894 = vmatmul.mubr.f32.gmra.mrb[4].mxu1 %v21779_v0 }
 0x13b   :  { %16176 = vmatprep.mubr.f32.mxu0 %v21781_v1  ;;  %16896 = vmatprep.mubr.f32.mxu1 %v21783_v2 }
 0x13c   :  { %19010 = vmatpush3.bf16.msra.mxu0 %v19007_v60  ;;  %19298 = vmatpush3.bf16.msra.mxu1 %v19007_v60  ;;  %v21895_v60 = vld [vmem:[#allocation2 + $0x2d0] sm:$0xff] }
 0x13d   :  { %19012 = vmatprep.subr.bf16.mxu0 %v19011_v3  ;;  %19300 = vmatprep.subr.bf16.mxu1 %v19011_v3 }
 0x13e   :  { %16177 = vmatmul.mubr.f32.gmra.mrb[6].mxu0 %v21789_v6  ;;  %16897 = vmatmul.mubr.f32.gmra.mrb[6].mxu1 %v21791_v7 }
 0x13f   :  { %16179 = vmatprep.mubr.f32.mxu0 %v21793_v8  ;;  %16899 = vmatprep.mubr.f32.mxu1 %v21795_v9 }
 0x140   :  { %19014 = vmatpush3.bf16.msra.mxu0 %v19011_v3  ;;  %19302 = vmatpush3.bf16.msra.mxu1 %v19011_v3  ;;  %v21905_v3 = vld [vmem:[#allocation2 + $0x138] sm:$0xff] }
 0x141   :  { %19016 = vmatprep.subr.bf16.mxu0 %v19015_v10  ;;  %19304 = vmatprep.subr.bf16.mxu1 %v19015_v10  ;;  %25580 = vst [vmem:[#allocation24_spill] sm:$0xff] %v21905_v3 }
 0x142   :  { %16180 = vmatmul.mubr.f32.gmra.mrb[8].mxu0 %v21801_v13  ;;  %16900 = vmatmul.mubr.f32.gmra.mrb[8].mxu1 %v21803_v14 }
 0x143   :  { %16182 = vmatprep.mubr.f32.mxu0 %v21805_v15  ;;  %16902 = vmatprep.mubr.f32.mxu1 %v21807_v16 }
 0x144   :  { %19018 = vmatpush3.bf16.msra.mxu0 %v19015_v10  ;;  %19306 = vmatpush3.bf16.msra.mxu1 %v19015_v10  ;;  %v21915_v10 = vld [vmem:[#allocation2 + $0x2f0] sm:$0xff] }
 0x145   :  { %19020 = vmatprep.subr.bf16.mxu0 %v19019_v17  ;;  %19308 = vmatprep.subr.bf16.mxu1 %v19019_v17  ;;  %25583 = vst [vmem:[#allocation27_spill] sm:$0xff] %v21915_v10 }
 0x146   :  { %16183 = vmatmul.mubr.f32.gmra.mrb[10].mxu0 %v21813_v20  ;;  %16903 = vmatmul.mubr.f32.gmra.mrb[10].mxu1 %v21815_v21 }
 0x147   :  { %16185 = vmatprep.mubr.f32.mxu0 %v21817_v22  ;;  %16905 = vmatprep.mubr.f32.mxu1 %v21819_v23 }
 0x148   :  { %19022 = vmatpush3.bf16.msra.mxu0 %v19019_v17  ;;  %19310 = vmatpush3.bf16.msra.mxu1 %v19019_v17  ;;  %v360_v17 = vld [vmem:[#allocation5 + $0xf0] sm:$0xff] }
 0x149   :  { %19024 = vmatprep.subr.bf16.mxu0 %v19023_v24  ;;  %19312 = vmatprep.subr.bf16.mxu1 %v19023_v24  ;;  %426 = vst.msk [vmem:[#allocation2 + $0x181] sm:$0xff] %vm395_vm0, %v360_v17  ;;  %v21943_v17 = vld [vmem:[#allocation2 + $0x320] sm:$0xff] }
 0x14a   :  { %16186 = vmatmul.mubr.f32.gmra.mrb[12].mxu0 %v21825_v27  ;;  %16906 = vmatmul.mubr.f32.gmra.mrb[12].mxu1 %v21827_v28  ;;  %25591 = vst [vmem:[#allocation35_spill] sm:$0xff] %v21943_v17 }
 0x14b   :  { %16188 = vmatprep.mubr.f32.mxu0 %v21829_v29  ;;  %16908 = vmatprep.mubr.f32.mxu1 %v21831_v30 }
 0x14c   :  { %19026 = vmatpush3.bf16.msra.mxu0 %v19023_v24  ;;  %19314 = vmatpush3.bf16.msra.mxu1 %v19023_v24  ;;  %v393_v24 = vld [vmem:[#allocation5 + $0x1f8] sm:$0xff] }
 0x14d   :  { %19028 = vmatprep.subr.bf16.mxu0 %v19027_v31  ;;  %19316 = vmatprep.subr.bf16.mxu1 %v19027_v31  ;;  %459 = vst.msk [vmem:[#allocation2 + $0x339] sm:$0xff] %vm395_vm0, %v393_v24  ;;  %v1348_v24 = vld [vmem:[#allocation8 + $0x190] sm:$0xff] }
 0x14e   :  { %16189 = vmatmul.mubr.f32.gmra.mrb[14].mxu0 %v21837_v34  ;;  %16909 = vmatmul.mubr.f32.gmra.mrb[14].mxu1 %v21839_v35 }
 0x14f   :  { %16191 = vmatprep.mubr.f32.mxu0 %v21841_v36  ;;  %16911 = vmatprep.mubr.f32.mxu1 %v21843_v37 }
 0x150   :  { %19030 = vmatpush3.bf16.msra.mxu0 %v19027_v31  ;;  %19318 = vmatpush3.bf16.msra.mxu1 %v19027_v31  ;;  %v21933_v31 = vld [vmem:[#allocation2 + $0x168] sm:$0xff] }
 0x151   :  { %19032 = vmatprep.subr.bf16.mxu0 %v21845_v38  ;;  %19320 = vmatprep.subr.bf16.mxu1 %v21845_v38  ;;  %25588 = vst [vmem:[#allocation32_spill] sm:$0xff] %v21933_v31 }
 0x152   :  { %16192 = vmatmul.mubr.f32.gmra.mrb[16].mxu0 %v21851_v39  ;;  %16912 = vmatmul.mubr.f32.gmra.mrb[16].mxu1 %v21853_v40 }
 0x153   :  { %16194 = vmatprep.mubr.f32.mxu0 %v21855_v41  ;;  %16914 = vmatprep.mubr.f32.mxu1 %v21857_v42 }
 0x156   :  { %16195 = vmatmul.mubr.f32.gmra.mrb[18].mxu0 %v21865_v43  ;;  %16915 = vmatmul.mubr.f32.gmra.mrb[18].mxu1 %v21867_v44 }
 0x157   :  { %16197 = vmatprep.mubr.f32.mxu0 %v21869_v45  ;;  %16917 = vmatprep.mubr.f32.mxu1 %v21871_v46 }
 0x15a   :  { %16198 = vmatmul.mubr.f32.gmra.mrb[20].mxu0 %v21877_v47  ;;  %16918 = vmatmul.mubr.f32.gmra.mrb[20].mxu1 %v21879_v48 }
 0x15b   :  { %16200 = vmatprep.mubr.f32.mxu0 %v21881_v49  ;;  %16920 = vmatprep.mubr.f32.mxu1 %v21883_v50 }
 0x15e   :  { %16201 = vmatmul.mubr.f32.gmra.mrb[22].mxu0 %v21889_v53  ;;  %16921 = vmatmul.mubr.f32.gmra.mrb[22].mxu1 %v21891_v54 }
 0x15f   :  { %16203 = vmatprep.mubr.f32.mxu0 %v21893_v55  ;;  %16923 = vmatprep.mubr.f32.mxu1 %v21895_v60 }
 0x162   :  { %16204 = vmatmul.mubr.f32.gmra.mrb[24].mxu0 %v21901_v61  ;;  %16924 = vmatmul.mubr.f32.gmra.mrb[24].mxu1 %v21903_v62  ;;  %v1355_v62 = vld [vmem:[#allocation8 + $0x1c8] sm:$0xff] }
 0x163   :  { %16206 = vmatprep.mubr.f32.mxu0 %v21905_v3  ;;  %16926 = vmatprep.mubr.f32.mxu1 %v21907_v4  ;;  %v3841_v4 = vld [vmem:[#allocation2 + $0x1d2] sm:$0xff]  ;;  %v3844_v3 = vld [vmem:[#allocation2 + $0x1fa] sm:$0xff] }
 0x166   :  { %16207 = vmatmul.mubr.f32.gmra.mrb[26].mxu0 %v21913_v5  ;;  %16927 = vmatmul.mubr.f32.gmra.mrb[26].mxu1 %v21915_v10  ;;  %v1351_v5 = vld [vmem:[#allocation8 + $0x1a8] sm:$0xff] }
 0x167   :  { %16209 = vmatprep.mubr.f32.mxu0 %v21917_v11  ;;  %16929 = vmatprep.mubr.f32.mxu1 %v21919_v12  ;;  %v1349_v12 = vld [vmem:[#allocation8 + $0x198] sm:$0xff] }
 0x168   :  { %v1009_v11 = vld [vmem:[#allocation2 + $0x1a] sm:$0xff]  ;;  %v19035_v10 = vpack.c.bf16 %v1349_v12, %v1348_v24  ;;  %v1352_v12 = vld [vmem:[#allocation8 + $0x1b0] sm:$0xff] }
 0x169   :  { %v3843_v24 = vld [vmem:[#allocation2 + $0x1ea] sm:$0xff] }
 0x16a   :  { %16210 = vmatmul.mubr.f32.gmra.mrb[28].mxu0 %v21929_v25  ;;  %16930 = vmatmul.mubr.f32.gmra.mrb[28].mxu1 %v21931_v26  ;;  %v1008_v25 = vld [vmem:[#allocation2 + $0xa] sm:$0xff]  ;;  %v3839_v26 = vld [vmem:[#allocation2 + $0x1ba] sm:$0xff] }
 0x16b   :  { %16212 = vmatprep.mubr.f32.mxu0 %v21933_v31  ;;  %16932 = vmatprep.mubr.f32.mxu1 %v21935_v32  ;;  %v3840_v31 = vld [vmem:[#allocation2 + $0x1ca] sm:$0xff]  ;;  %v1350_v32 = vld [vmem:[#allocation8 + $0x1a0] sm:$0xff] }
 0x16e   :  { %16213 = vmatmul.mubr.f32.gmra.mrb[30].mxu0 %v21941_v33  ;;  %16933 = vmatmul.mubr.f32.gmra.mrb[30].mxu1 %v21943_v17  ;;  %v1010_v33 = vld [vmem:[#allocation2 + $0x22] sm:$0xff]  ;;  %v1011_v17 = vld [vmem:[#allocation2 + $0x32] sm:$0xff] }
 0x16f   :  { %16247 = vmatprep.mubr.f32.mxu0 %v1007_v18  ;;  %16967 = vmatprep.mubr.f32.mxu1 %v3838_v19  ;;  %v3842_v18 = vld [vmem:[#allocation2 + $0x1e2] sm:$0xff]  ;;  %v19039_v19 = vpack.c.bf16 %v1351_v5, %v1350_v32 }
 0x170   :  { %v3845_v5 = vld [vmem:[#allocation2 + $0x202] sm:$0xff] }
 0x171   :  { %v1015_v32 = vld [vmem:[#allocation2 + $0x62] sm:$0xff] }
 0x172   :  { %16248 = vmatmul.mubr.f32.vlgmr.msra.gmra.mrb[0].mxu0 %v1008_v25  ;;  %16968 = vmatmul.mubr.f32.vlgmr.msra.gmra.mrb[0].mxu1 %v3839_v26  ;;  %v1353_v25 = vld [vmem:[#allocation8 + $0x1b8] sm:$0xff] }
 0x173   :  { %19034 = vmatpush3.bf16.msra.mxu0 %v21845_v38  ;;  %19322 = vmatpush3.bf16.msra.mxu1 %v21845_v38  ;;  %v1012_v26 = vld [vmem:[#allocation2 + $0x3a] sm:$0xff]  ;;  %v1013_v38 = vld [vmem:[#allocation2 + $0x4a] sm:$0xff] }
 0x174   :  { %16250 = vmatprep.mubr.f32.mxu0 %v1009_v11  ;;  %16970 = vmatprep.mubr.f32.mxu1 %v3840_v31  ;;  %v19043_v11 = vpack.c.bf16 %v1353_v25, %v1352_v12  ;;  %v1354_v31 = vld [vmem:[#allocation8 + $0x1c0] sm:$0xff]  ;;  %v1016_v12 = vld [vmem:[#allocation2 + $0x6a] sm:$0xff] }
 0x175   :  { %19036 = vmatprep.subr.bf16.mxu0 %v19035_v10  ;;  %19324 = vmatprep.subr.bf16.mxu1 %v19035_v10  ;;  %v3847_v25 = vld [vmem:[#allocation2 + $0x21a] sm:$0xff] }
 0x176   :  { %16251 = vmatmul.mubr.f32.gmra.mrb[2].mxu0 %v1010_v33  ;;  %16971 = vmatmul.mubr.f32.gmra.mrb[2].mxu1 %v3841_v4  ;;  %v1014_v4 = vld [vmem:[#allocation2 + $0x52] sm:$0xff] }
 0x177   :  { %16253 = vmatprep.mubr.f32.mxu0 %v1011_v17  ;;  %16973 = vmatprep.mubr.f32.mxu1 %v3842_v18  ;;  %v3846_v33 = vld [vmem:[#allocation2 + $0x212] sm:$0xff] }
 0x178   :  { %19038 = vmatpush3.bf16.msra.mxu0 %v19035_v10  ;;  %19326 = vmatpush3.bf16.msra.mxu1 %v19035_v10  ;;  %v19047_v10 = vpack.c.bf16 %v1355_v62, %v1354_v31  ;;  %v1356_v17 = vld [vmem:[#allocation8 + $0x1d0] sm:$0xff]  ;;  %v1357_v18 = vld [vmem:[#allocation8 + $0x1d8] sm:$0xff]  ;;  %v1018_v62 = vld [vmem:[#allocation2 + $0x82] sm:$0xff] }
 0x179   :  { %19040 = vmatprep.subr.bf16.mxu0 %v19039_v19  ;;  %19328 = vmatprep.subr.bf16.mxu1 %v19039_v19  ;;  %v3849_v31 = vld [vmem:[#allocation2 + $0x232] sm:$0xff] }
 0x17a   :  { %16254 = vmatmul.mubr.f32.gmra.mrb[4].mxu0 %v1012_v26  ;;  %16974 = vmatmul.mubr.f32.gmra.mrb[4].mxu1 %v3843_v24  ;;  %v1017_v26 = vld [vmem:[#allocation2 + $0x7a] sm:$0xff]  ;;  %v3848_v24 = vld [vmem:[#allocation2 + $0x22a] sm:$0xff] }
 0x17b   :  { %16256 = vmatprep.mubr.f32.mxu0 %v1013_v38  ;;  %16976 = vmatprep.mubr.f32.mxu1 %v3844_v3  ;;  %v19051_v3 = vpack.c.bf16 %v1357_v18, %v1356_v17  ;;  %v1359_v38 = vld [vmem:[#allocation8 + $0x1e8] sm:$0xff]  ;;  %v1020_v17 = vld [vmem:[#allocation2 + $0x9a] sm:$0xff] }
 0x17c   :  { %19042 = vmatpush3.bf16.msra.mxu0 %v19039_v19  ;;  %19330 = vmatpush3.bf16.msra.mxu1 %v19039_v19  ;;  %v1358_v19 = vld [vmem:[#allocation8 + $0x1e0] sm:$0xff]  ;;  %v3851_v18 = vld [vmem:[#allocation2 + $0x24a] sm:$0xff] }
 0x17d   :  { %19044 = vmatprep.subr.bf16.mxu0 %v19043_v11  ;;  %19332 = vmatprep.subr.bf16.mxu1 %v19043_v11 }
 0x17e   :  { %16257 = vmatmul.mubr.f32.gmra.mrb[6].mxu0 %v1014_v4  ;;  %16977 = vmatmul.mubr.f32.gmra.mrb[6].mxu1 %v3845_v5  ;;  %v1019_v4 = vld [vmem:[#allocation2 + $0x92] sm:$0xff]  ;;  %v3850_v5 = vld [vmem:[#allocation2 + $0x242] sm:$0xff] }
 0x17f   :  { %16259 = vmatprep.mubr.f32.mxu0 %v1015_v32  ;;  %16979 = vmatprep.mubr.f32.mxu1 %v3846_v33  ;;  %v19055_v32 = vpack.c.bf16 %v1359_v38, %v1358_v19  ;;  %v1361_v33 = vld [vmem:[#allocation8 + $0x1f8] sm:$0xff]  ;;  %v3853_v38 = vld [vmem:[#allocation2 + $0x262] sm:$0xff] }
 0x180   :  { %19046 = vmatpush3.bf16.msra.mxu0 %v19043_v11  ;;  %19334 = vmatpush3.bf16.msra.mxu1 %v19043_v11  ;;  %v1360_v11 = vld [vmem:[#allocation8 + $0x1f0] sm:$0xff] }
 0x181   :  { %19048 = vmatprep.subr.bf16.mxu0 %v19047_v10  ;;  %19336 = vmatprep.subr.bf16.mxu1 %v19047_v10  ;;  %v1022_v19 = vld [vmem:[#allocation2 + $0xb2] sm:$0xff] }
 0x182   :  { %16260 = vmatmul.mubr.f32.gmra.mrb[8].mxu0 %v1016_v12  ;;  %16980 = vmatmul.mubr.f32.gmra.mrb[8].mxu1 %v3847_v25  ;;  %v1021_v12 = vld [vmem:[#allocation2 + $0xaa] sm:$0xff]  ;;  %v3852_v25 = vld [vmem:[#allocation2 + $0x25a] sm:$0xff] }
 0x183   :  { %16262 = vmatprep.mubr.f32.mxu0 %v1017_v26  ;;  %16982 = vmatprep.mubr.f32.mxu1 %v3848_v24  ;;  %v19059_v26 = vpack.c.bf16 %v1361_v33, %v1360_v11  ;;  %v1653_v24 = vld [vmem:[#allocation8 + $0x208] sm:$0xff]  ;;  %v1025_v11 = vld [vmem:[#allocation2 + $0xda] sm:$0xff] }
 0x184   :  { %19050 = vmatpush3.bf16.msra.mxu0 %v19047_v10  ;;  %19338 = vmatpush3.bf16.msra.mxu1 %v19047_v10  ;;  %v1652_v10 = vld [vmem:[#allocation8 + $0x200] sm:$0xff]  ;;  %v3856_v33 = vld [vmem:[#allocation2 + $0x28a] sm:$0xff] }
 0x185   :  { %19052 = vmatprep.subr.bf16.mxu0 %v19051_v3  ;;  %19340 = vmatprep.subr.bf16.mxu1 %v19051_v3 }
 0x186   :  { %16263 = vmatmul.mubr.f32.gmra.mrb[10].mxu0 %v1018_v62  ;;  %16983 = vmatmul.mubr.f32.gmra.mrb[10].mxu1 %v3849_v31  ;;  %v1023_v62 = vld [vmem:[#allocation2 + $0xc2] sm:$0xff]  ;;  %v3854_v31 = vld [vmem:[#allocation2 + $0x272] sm:$0xff] }
 0x187   :  { %16265 = vmatprep.mubr.f32.mxu0 %v1019_v4  ;;  %16985 = vmatprep.mubr.f32.mxu1 %v3850_v5  ;;  %v21949_v4 = vpack.c.bf16 %v1653_v24, %v1652_v10  ;;  %v3855_v5 = vld [vmem:[#allocation2 + $0x27a] sm:$0xff]  ;;  %v3859_v10 = vld [vmem:[#allocation2 + $0x2aa] sm:$0xff] }
 0x188   :  { %19054 = vmatpush3.bf16.msra.mxu0 %v19051_v3  ;;  %19342 = vmatpush3.bf16.msra.mxu1 %v19051_v3  ;;  %v1024_v3 = vld [vmem:[#allocation2 + $0xca] sm:$0xff] }
 0x189   :  { %19056 = vmatprep.subr.bf16.mxu0 %v19055_v32  ;;  %19344 = vmatprep.subr.bf16.mxu1 %v19055_v32  ;;  %v1029_v24 = vld [vmem:[#allocation2 + $0x10a] sm:$0xff] }
 0x18a   :  { %16266 = vmatmul.mubr.f32.gmra.mrb[12].mxu0 %v1020_v17  ;;  %16986 = vmatmul.mubr.f32.gmra.mrb[12].mxu1 %v3851_v18  ;;  %v3857_v17 = vld [vmem:[#allocation2 + $0x292] sm:$0xff] }
 0x18b   :  { %16268 = vmatprep.mubr.f32.mxu0 %v1021_v12  ;;  %16988 = vmatprep.mubr.f32.mxu1 %v3852_v25  ;;  %v1027_v18 = vld [vmem:[#allocation2 + $0xf2] sm:$0xff]  ;;  %v3858_v12 = vld [vmem:[#allocation2 + $0x2a2] sm:$0xff]  ;;  %v1028_v25 = vld [vmem:[#allocation2 + $0xfa] sm:$0xff] }
 0x18c   :  { %19058 = vmatpush3.bf16.msra.mxu0 %v19055_v32  ;;  %19346 = vmatpush3.bf16.msra.mxu1 %v19055_v32  ;;  %v1026_v32 = vld [vmem:[#allocation2 + $0xe2] sm:$0xff] }
 0x18d   :  { %19060 = vmatprep.subr.bf16.mxu0 %v19059_v26  ;;  %19348 = vmatprep.subr.bf16.mxu1 %v19059_v26 }
 0x18e   :  { %16269 = vmatmul.mubr.f32.gmra.mrb[14].mxu0 %v1022_v19  ;;  %16989 = vmatmul.mubr.f32.gmra.mrb[14].mxu1 %v3853_v38  ;;  %v1030_v19 = vld [vmem:[#allocation2 + $0x112] sm:$0xff]  ;;  %v3861_v38 = vld [vmem:[#allocation2 + $0x2c2] sm:$0xff] }
 0x18f   :  { %16271 = vmatprep.mubr.f32.mxu0 %v1023_v62  ;;  %16991 = vmatprep.mubr.f32.mxu1 %v3854_v31  ;;  %v1031_v62 = vld [vmem:[#allocation2 + $0x122] sm:$0xff]  ;;  %v3862_v31 = vld [vmem:[#allocation2 + $0x2d2] sm:$0xff] }
 0x190   :  { %19062 = vmatpush3.bf16.msra.mxu0 %v19059_v26  ;;  %19350 = vmatpush3.bf16.msra.mxu1 %v19059_v26  ;;  %v3860_v26 = vld [vmem:[#allocation2 + $0x2ba] sm:$0xff] }
 0x191   :  { %19064 = vmatprep.subr.bf16.mxu0 %v21949_v4  ;;  %19352 = vmatprep.subr.bf16.mxu1 %v21949_v4 }
 0x192   :  { %16272 = vmatmul.mubr.f32.gmra.mrb[16].mxu0 %v1024_v3  ;;  %16992 = vmatmul.mubr.f32.gmra.mrb[16].mxu1 %v3855_v5  ;;  %v1032_v3 = vld [vmem:[#allocation2 + $0x12a] sm:$0xff]  ;;  %v3863_v5 = vld [vmem:[#allocation2 + $0x2da] sm:$0xff] }
 0x193   :  { %16274 = vmatprep.mubr.f32.mxu0 %v1025_v11  ;;  %16994 = vmatprep.mubr.f32.mxu1 %v3856_v33  ;;  %v1033_v11 = vld [vmem:[#allocation2 + $0x13a] sm:$0xff]  ;;  %v3864_v33 = vld [vmem:[#allocation2 + $0x2ea] sm:$0xff] }
 0x196   :  { %16275 = vmatmul.mubr.f32.gmra.mrb[18].mxu0 %v1026_v32  ;;  %16995 = vmatmul.mubr.f32.gmra.mrb[18].mxu1 %v3857_v17  ;;  %v1034_v32 = vld [vmem:[#allocation2 + $0x142] sm:$0xff]  ;;  %v3865_v17 = vld [vmem:[#allocation2 + $0x2f2] sm:$0xff] }
 0x197   :  { %16277 = vmatprep.mubr.f32.mxu0 %v1027_v18  ;;  %16997 = vmatprep.mubr.f32.mxu1 %v3858_v12  ;;  %v1035_v18 = vld [vmem:[#allocation2 + $0x152] sm:$0xff]  ;;  %v3866_v12 = vld [vmem:[#allocation2 + $0x302] sm:$0xff] }
 0x19a   :  { %16278 = vmatmul.mubr.f32.gmra.mrb[20].mxu0 %v1028_v25  ;;  %16998 = vmatmul.mubr.f32.gmra.mrb[20].mxu1 %v3859_v10  ;;  %v1036_v25 = vld [vmem:[#allocation2 + $0x15a] sm:$0xff]  ;;  %v3867_v10 = vld [vmem:[#allocation2 + $0x30a] sm:$0xff] }
 0x19b   :  { %16280 = vmatprep.mubr.f32.mxu0 %v1029_v24  ;;  %17000 = vmatprep.mubr.f32.mxu1 %v3860_v26  ;;  %v1037_v24 = vld [vmem:[#allocation2 + $0x16a] sm:$0xff]  ;;  %v3868_v26 = vld [vmem:[#allocation2 + $0x31a] sm:$0xff] }
 0x19e   :  { %16281 = vmatmul.mubr.f32.gmra.mrb[22].mxu0 %v1030_v19  ;;  %17001 = vmatmul.mubr.f32.gmra.mrb[22].mxu1 %v3861_v38  ;;  %v1038_v19 = vld [vmem:[#allocation2 + $0x172] sm:$0xff]  ;;  %v3869_v38 = vld [vmem:[#allocation2 + $0x322] sm:$0xff] }
 0x19f   :  { %16283 = vmatprep.mubr.f32.mxu0 %v1031_v62  ;;  %17003 = vmatprep.mubr.f32.mxu1 %v3862_v31  ;;  %v1654_v62 = vld [vmem:[#allocation8 + $0x210] sm:$0xff]  ;;  %v1655_v31 = vld [vmem:[#allocation8 + $0x218] sm:$0xff] }
 0x1a2   :  { %16284 = vmatmul.mubr.f32.gmra.mrb[24].mxu0 %v1032_v3  ;;  %17004 = vmatmul.mubr.f32.gmra.mrb[24].mxu1 %v3863_v5  ;;  %v19067_v3 = vpack.c.bf16 %v1655_v31, %v1654_v62  ;;  %v1656_v5 = vld [vmem:[#allocation8 + $0x220] sm:$0xff]  ;;  %v1967_v31 = vld [vmem:[#allocation8 + $0x2c8] sm:$0xff] }
 0x1a3   :  { %16286 = vmatprep.mubr.f32.mxu0 %v1033_v11  ;;  %17006 = vmatprep.mubr.f32.mxu1 %v3864_v33  ;;  %v1657_v11 = vld [vmem:[#allocation8 + $0x228] sm:$0xff]  ;;  %v1966_v62 = vld [vmem:[#allocation8 + $0x2c0] sm:$0xff] }
 0x1a4   :  { %v4452_v33 = vld [vmem:[#allocation2 + $0x1e9] sm:$0xff] }
 0x1a6   :  { %16287 = vmatmul.mubr.f32.gmra.mrb[26].mxu0 %v1034_v32  ;;  %17007 = vmatmul.mubr.f32.gmra.mrb[26].mxu1 %v3865_v17  ;;  %v1623_v32 = vld [vmem:[#allocation2 + $0x49] sm:$0xff]  ;;  %v4453_v17 = vld [vmem:[#allocation2 + $0x1f9] sm:$0xff] }
 0x1a7   :  { %16289 = vmatprep.mubr.f32.mxu0 %v1035_v18  ;;  %17009 = vmatprep.mubr.f32.mxu1 %v3866_v12  ;;  %v1964_v12 = vld [vmem:[#allocation8 + $0x2b0] sm:$0xff] }
 0x1aa   :  { %16290 = vmatmul.mubr.f32.gmra.mrb[28].mxu0 %v1036_v25  ;;  %17010 = vmatmul.mubr.f32.gmra.mrb[28].mxu1 %v3867_v10  ;;  %v1965_v25 = vld [vmem:[#allocation8 + $0x2b8] sm:$0xff] }
 0x1ab   :  { %16292 = vmatprep.mubr.f32.mxu0 %v1037_v24  ;;  %17012 = vmatprep.mubr.f32.mxu1 %v3868_v26  ;;  %v1624_v10 = vld [vmem:[#allocation2 + $0x51] sm:$0xff]  ;;  %v4454_v24 = vld [vmem:[#allocation2 + $0x201] sm:$0xff] }
 0x1ac   :  { %v1625_v26 = vld [vmem:[#allocation2 + $0x61] sm:$0xff] }
 0x1ae   :  { %16293 = vmatmul.mubr.f32.gmra.mrb[30].mxu0 %v1038_v19  ;;  %17013 = vmatmul.mubr.f32.gmra.mrb[30].mxu1 %v3869_v38  ;;  %v4455_v19 = vld [vmem:[#allocation2 + $0x211] sm:$0xff]  ;;  %v19107_v38 = vpack.c.bf16 %v1965_v25, %v1964_v12  ;;  %v1647_v12 = vld [vmem:[#allocation2 + $0x169] sm:$0xff]  ;;  %v4477_v25 = vld [vmem:[#allocation2 + $0x319] sm:$0xff] }
 0x1af   :  { %16327 = vmatprep.mubr.f32.mxu0 %v21757_v51  ;;  %17047 = vmatprep.mubr.f32.mxu1 %v21759_v52  ;;  %v19071_v51 = vpack.c.bf16 %v1657_v11, %v1656_v5  ;;  %v1658_v52 = vld [vmem:[#allocation8 + $0x230] sm:$0xff]  ;;  %v4456_v5 = vld [vmem:[#allocation2 + $0x219] sm:$0xff] }
 0x1b0   :  { %v1627_v11 = vld [vmem:[#allocation2 + $0x79] sm:$0xff] }
 0x1b2   :  { %16328 = vmatmul.mubr.f32.vlgmr.msra.gmra.mrb[0].mxu0 %v21763_v56  ;;  %17048 = vmatmul.mubr.f32.vlgmr.msra.gmra.mrb[0].mxu1 %v21765_v57  ;;  %v1659_v56 = vld [vmem:[#allocation8 + $0x238] sm:$0xff] }
 0x1b3   :  { %19066 = vmatpush3.bf16.msra.mxu0 %v21949_v4  ;;  %19354 = vmatpush3.bf16.msra.mxu1 %v21949_v4  ;;  %v19075_v57 = vpack.c.bf16 %v1659_v56, %v1658_v52  ;;  %v1622_v4 = vld [vmem:[#allocation2 + $0x39] sm:$0xff]  ;;  %v19111_v52 = vpack.c.bf16 %v1967_v31, %v1966_v62  ;;  %v1968_v56 = vld [vmem:[#allocation8 + $0x2d0] sm:$0xff] }
 0x1b4   :  { %16330 = vmatprep.mubr.f32.mxu0 %v21769_v58  ;;  %17050 = vmatprep.mubr.f32.mxu1 %v21771_v59  ;;  %v1660_v58 = vld [vmem:[#allocation8 + $0x240] sm:$0xff]  ;;  %v1661_v59 = vld [vmem:[#allocation8 + $0x248] sm:$0xff] }
 0x1b5   :  { %19068 = vmatprep.subr.bf16.mxu0 %v19067_v3  ;;  %19356 = vmatprep.subr.bf16.mxu1 %v19067_v3  ;;  %v4480_v62 = vld [vmem:[#allocation2 + $0x339] sm:$0xff] }
 0x1b6   :  { %16331 = vmatmul.mubr.f32.gmra.mrb[2].mxu0 %v21777_v63  ;;  %17051 = vmatmul.mubr.f32.gmra.mrb[2].mxu1 %v21779_v0  ;;  %v19079_v63 = vpack.c.bf16 %v1661_v59, %v1660_v58  ;;  %v1662_v0 = vld [vmem:[#allocation8 + $0x250] sm:$0xff]  ;;  %v1628_v58 = vld [vmem:[#allocation2 + $0x81] sm:$0xff] }
 0x1b7   :  { %16333 = vmatprep.mubr.f32.mxu0 %v21781_v1  ;;  %17053 = vmatprep.mubr.f32.mxu1 %v21783_v2  ;;  %v1663_v1 = vld [vmem:[#allocation8 + $0x258] sm:$0xff] }
 0x1b8   :  { %19070 = vmatpush3.bf16.msra.mxu0 %v19067_v3  ;;  %19358 = vmatpush3.bf16.msra.mxu1 %v19067_v3  ;;  %v19083_v2 = vpack.c.bf16 %v1663_v1, %v1662_v0  ;;  %v1626_v3 = vld [vmem:[#allocation2 + $0x69] sm:$0xff]  ;;  %v4458_v59 = vld [vmem:[#allocation2 + $0x231] sm:$0xff]  ;;  %v4459_v0 = vld [vmem:[#allocation2 + $0x241] sm:$0xff] }
 0x1b9   :  { %19072 = vmatprep.subr.bf16.mxu0 %v19071_v51  ;;  %19360 = vmatprep.subr.bf16.mxu1 %v19071_v51  ;;  %v1925_v31 = vld [vmem:[#allocation2 + $0x1a] sm:$0xff] }
 0x1ba   :  { %16334 = vmatmul.mubr.f32.gmra.mrb[4].mxu0 %v21789_v6  ;;  %17054 = vmatmul.mubr.f32.gmra.mrb[4].mxu1 %v21791_v7  ;;  %v1664_v6 = vld [vmem:[#allocation8 + $0x260] sm:$0xff]  ;;  %v1665_v7 = vld [vmem:[#allocation8 + $0x268] sm:$0xff] }
 0x1bb   :  { %16336 = vmatprep.mubr.f32.mxu0 %v21793_v8  ;;  %17056 = vmatprep.mubr.f32.mxu1 %v21795_v9  ;;  %v19087_v8 = vpack.c.bf16 %v1665_v7, %v1664_v6  ;;  %v1666_v9 = vld [vmem:[#allocation8 + $0x270] sm:$0xff]  ;;  %v1971_v6 = vld [vmem:[#allocation8 + $0x2e8] sm:$0xff]  ;;  %v1630_v7 = vld [vmem:[#allocation2 + $0x99] sm:$0xff] }
 0x1bc   :  { %19074 = vmatpush3.bf16.msra.mxu0 %v19071_v51  ;;  %19362 = vmatpush3.bf16.msra.mxu1 %v19071_v51  ;;  %v4457_v51 = vld [vmem:[#allocation2 + $0x229] sm:$0xff] }
 0x1bd   :  { %19076 = vmatprep.subr.bf16.mxu0 %v19075_v57  ;;  %19364 = vmatprep.subr.bf16.mxu1 %v19075_v57 }
 0x1be   :  { %16337 = vmatmul.mubr.f32.gmra.mrb[6].mxu0 %v21801_v13  ;;  %17057 = vmatmul.mubr.f32.gmra.mrb[6].mxu1 %v21803_v14  ;;  %v1667_v13 = vld [vmem:[#allocation8 + $0x278] sm:$0xff] }
 0x1bf   :  { %16339 = vmatprep.mubr.f32.mxu0 %v21805_v15  ;;  %17059 = vmatprep.mubr.f32.mxu1 %v21807_v16  ;;  %v19091_v14 = vpack.c.bf16 %v1667_v13, %v1666_v9  ;;  %v1958_v15 = vld [vmem:[#allocation8 + $0x280] sm:$0xff]  ;;  %v1959_v16 = vld [vmem:[#allocation8 + $0x288] sm:$0xff] }
 0x1c0   :  { %19078 = vmatpush3.bf16.msra.mxu0 %v19075_v57  ;;  %19366 = vmatpush3.bf16.msra.mxu1 %v19075_v57  ;;  %v1969_v57 = vld [vmem:[#allocation8 + $0x2d8] sm:$0xff]  ;;  %v1631_v9 = vld [vmem:[#allocation2 + $0xa9] sm:$0xff] }
 0x1c1   :  { %19080 = vmatprep.subr.bf16.mxu0 %v19079_v63  ;;  %19368 = vmatprep.subr.bf16.mxu1 %v19079_v63  ;;  %v19115_v1 = vpack.c.bf16 %v1969_v57, %v1968_v56  ;;  %v4461_v13 = vld [vmem:[#allocation2 + $0x259] sm:$0xff]  ;;  %v4756_v57 = vld [vmem:[#allocation2 + $0x1e2] sm:$0xff] }
 0x1c2   :  { %16340 = vmatmul.mubr.f32.gmra.mrb[8].mxu0 %v21813_v20  ;;  %17060 = vmatmul.mubr.f32.gmra.mrb[8].mxu1 %v21815_v21  ;;  %v19095_v20 = vpack.c.bf16 %v1959_v16, %v1958_v15  ;;  %v25592_v21 = vld [vmem:[#allocation23_spill] sm:$0xff]  ;;  %v1972_v15 = vld [vmem:[#allocation8 + $0x2f0] sm:$0xff]  ;;  %v1973_v16 = vld [vmem:[#allocation8 + $0x2f8] sm:$0xff] }
 0x1c3   :  { %16342 = vmatprep.mubr.f32.mxu0 %v21817_v22  ;;  %17062 = vmatprep.mubr.f32.mxu1 %v21819_v23  ;;  %v25593_v22 = vld [vmem:[#allocation24_spill] sm:$0xff]  ;;  %v25594_v23 = vld [vmem:[#allocation25_spill] sm:$0xff] }
 0x1c4   :  { %19082 = vmatpush3.bf16.msra.mxu0 %v19079_v63  ;;  %19370 = vmatpush3.bf16.msra.mxu1 %v19079_v63  ;;  %v1629_v63 = vld [vmem:[#allocation2 + $0x91] sm:$0xff] }
 0x1c5   :  { %19084 = vmatprep.subr.bf16.mxu0 %v19083_v2  ;;  %19372 = vmatprep.subr.bf16.mxu1 %v19083_v2  ;;  %v1927_v56 = vld [vmem:[#allocation2 + $0x32] sm:$0xff] }
 0x1c6   :  { %16343 = vmatmul.mubr.f32.gmra.mrb[10].mxu0 %v21825_v27  ;;  %17063 = vmatmul.mubr.f32.gmra.mrb[10].mxu1 %v21827_v28  ;;  %v25595_v27 = vld [vmem:[#allocation26_spill] sm:$0xff]  ;;  %v25596_v28 = vld [vmem:[#allocation27_spill] sm:$0xff] }
 0x1c7   :  { %16345 = vmatprep.mubr.f32.mxu0 %v21829_v29  ;;  %17065 = vmatprep.mubr.f32.mxu1 %v21831_v30  ;;  %v25597_v29 = vld [vmem:[#allocation28_spill] sm:$0xff]  ;;  %v25598_v30 = vld [vmem:[#allocation29_spill] sm:$0xff] }
 0x1c8   :  { %19086 = vmatpush3.bf16.msra.mxu0 %v19083_v2  ;;  %19374 = vmatpush3.bf16.msra.mxu1 %v19083_v2  ;;  %v1970_v2 = vld [vmem:[#allocation8 + $0x2e0] sm:$0xff] }
 0x1c9   :  { %19088 = vmatprep.subr.bf16.mxu0 %v19087_v8  ;;  %19376 = vmatprep.subr.bf16.mxu1 %v19087_v8 }
 0x1ca   :  { %16346 = vmatmul.mubr.f32.gmra.mrb[12].mxu0 %v21837_v34  ;;  %17066 = vmatmul.mubr.f32.gmra.mrb[12].mxu1 %v21839_v35  ;;  %v25599_v34 = vld [vmem:[#allocation30_spill] sm:$0xff]  ;;  %v25600_v35 = vld [vmem:[#allocation31_spill] sm:$0xff] }
 0x1cb   :  { %16348 = vmatprep.mubr.f32.mxu0 %v21841_v36  ;;  %17068 = vmatprep.mubr.f32.mxu1 %v21843_v37  ;;  %v25601_v36 = vld [vmem:[#allocation32_spill] sm:$0xff]  ;;  %v25602_v37 = vld [vmem:[#allocation33_spill] sm:$0xff] }
 0x1cc   :  { %19090 = vmatpush3.bf16.msra.mxu0 %v19087_v8  ;;  %19378 = vmatpush3.bf16.msra.mxu1 %v19087_v8  ;;  %v4460_v8 = vld [vmem:[#allocation2 + $0x249] sm:$0xff] }
 0x1cd   :  { %19092 = vmatprep.subr.bf16.mxu0 %v19091_v14  ;;  %19380 = vmatprep.subr.bf16.mxu1 %v19091_v14 }
 0x1ce   :  { %16349 = vmatmul.mubr.f32.gmra.mrb[14].mxu0 %v21851_v39  ;;  %17069 = vmatmul.mubr.f32.gmra.mrb[14].mxu1 %v21853_v40  ;;  %v1343_v39 = vld [vmem:[#allocation2 + $0x180] sm:$0xff]  ;;  %v4174_v40 = vld [vmem:[#allocation2 + $0x330] sm:$0xff] }
 0x1cf   :  { %16351 = vmatprep.mubr.f32.mxu0 %v21855_v41  ;;  %17071 = vmatprep.mubr.f32.mxu1 %v21857_v42  ;;  %v25603_v41 = vld [vmem:[#allocation34_spill] sm:$0xff]  ;;  %v25604_v42 = vld [vmem:[#allocation35_spill] sm:$0xff] }
 0x1d0   :  { %19094 = vmatpush3.bf16.msra.mxu0 %v19091_v14  ;;  %19382 = vmatpush3.bf16.msra.mxu1 %v19091_v14  ;;  %v19119_v14 = vpack.c.bf16 %v1971_v6, %v1970_v2  ;;  %v1929_v2 = vld [vmem:[#allocation2 + $0x4a] sm:$0xff]  ;;  %v4758_v6 = vld [vmem:[#allocation2 + $0x1fa] sm:$0xff] }
 0x1d1   :  { %19096 = vmatprep.subr.bf16.mxu0 %v19095_v20  ;;  %19384 = vmatprep.subr.bf16.mxu1 %v19095_v20 }
 0x1d2   :  { %16352 = vmatmul.mubr.f32.gmra.mrb[16].mxu0 %v21865_v43  ;;  %17072 = vmatmul.mubr.f32.gmra.mrb[16].mxu1 %v21867_v44  ;;  %v1344_v43 = vld [vmem:[#allocation2 + $0x188] sm:$0xff]  ;;  %v4175_v44 = vld [vmem:[#allocation2 + $0x338] sm:$0xff] }
 0x1d3   :  { %16354 = vmatprep.mubr.f32.mxu0 %v21869_v45  ;;  %17074 = vmatprep.mubr.f32.mxu1 %v21871_v46  ;;  %v1619_v45 = vld [vmem:[#allocation2 + $0x19] sm:$0xff]  ;;  %v4449_v46 = vld [vmem:[#allocation2 + $0x1c9] sm:$0xff] }
 0x1d6   :  { %16355 = vmatmul.mubr.f32.gmra.mrb[18].mxu0 %v21877_v47  ;;  %17075 = vmatmul.mubr.f32.gmra.mrb[18].mxu1 %v21879_v48  ;;  %v1960_v47 = vld [vmem:[#allocation8 + $0x290] sm:$0xff]  ;;  %v1961_v48 = vld [vmem:[#allocation8 + $0x298] sm:$0xff] }
 0x1d7   :  { %16357 = vmatprep.mubr.f32.mxu0 %v21881_v49  ;;  %17077 = vmatprep.mubr.f32.mxu1 %v21883_v50  ;;  %v1620_v49 = vld [vmem:[#allocation2 + $0x21] sm:$0xff]  ;;  %v4450_v50 = vld [vmem:[#allocation2 + $0x1d1] sm:$0xff] }
 0x1da   :  { %16358 = vmatmul.mubr.f32.gmra.mrb[20].mxu0 %v21889_v53  ;;  %17078 = vmatmul.mubr.f32.gmra.mrb[20].mxu1 %v21891_v54  ;;  %v1621_v53 = vld [vmem:[#allocation2 + $0x31] sm:$0xff]  ;;  %v4451_v54 = vld [vmem:[#allocation2 + $0x1e1] sm:$0xff] }
 0x1db   :  { %16360 = vmatprep.mubr.f32.mxu0 %v21893_v55  ;;  %17080 = vmatprep.mubr.f32.mxu1 %v21895_v60  ;;  %v19099_v55 = vpack.c.bf16 %v1961_v48, %v1960_v47  ;;  %v1962_v60 = vld [vmem:[#allocation8 + $0x2a0] sm:$0xff]  ;;  %v1640_v47 = vld [vmem:[#allocation2 + $0x111] sm:$0xff] }
 0x1dc   :  { %v4470_v48 = vld [vmem:[#allocation2 + $0x2c1] sm:$0xff] }
 0x1de   :  { %16361 = vmatmul.mubr.f32.gmra.mrb[22].mxu0 %v21901_v61  ;;  %17081 = vmatmul.mubr.f32.gmra.mrb[22].mxu1 %v25592_v21  ;;  %v1963_v61 = vld [vmem:[#allocation8 + $0x2a8] sm:$0xff] }
 0x1df   :  { %16363 = vmatprep.mubr.f32.mxu0 %v25593_v22  ;;  %17083 = vmatprep.mubr.f32.mxu1 %v25594_v23  ;;  %v19103_v18 = vpack.c.bf16 %v1963_v61, %v1962_v60  ;;  %v4462_v21 = vld [vmem:[#allocation2 + $0x261] sm:$0xff]  ;;  %v4463_v23 = vld [vmem:[#allocation2 + $0x271] sm:$0xff]  ;;  %v4473_v60 = vld [vmem:[#allocation2 + $0x2e9] sm:$0xff] }
 0x1e0   :  { %v1633_v22 = vld [vmem:[#allocation2 + $0xc1] sm:$0xff] }
 0x1e1   :  { %v1644_v61 = vld [vmem:[#allocation2 + $0x141] sm:$0xff] }
 0x1e2   :  { %16364 = vmatmul.mubr.f32.gmra.mrb[24].mxu0 %v25595_v27  ;;  %17084 = vmatmul.mubr.f32.gmra.mrb[24].mxu1 %v25596_v28  ;;  %v19123_v27 = vpack.c.bf16 %v1973_v16, %v1972_v15  ;;  %v2265_v28 = vld [vmem:[#allocation8 + $0x300] sm:$0xff]  ;;  %v4760_v16 = vld [vmem:[#allocation2 + $0x212] sm:$0xff] }
 0x1e3   :  { %16366 = vmatprep.mubr.f32.mxu0 %v25597_v29  ;;  %17086 = vmatprep.mubr.f32.mxu1 %v25598_v30  ;;  %v2266_v29 = vld [vmem:[#allocation8 + $0x308] sm:$0xff] }
 0x1e4   :  { %v1634_v30 = vld [vmem:[#allocation2 + $0xc9] sm:$0xff] }
 0x1e5   :  { %v1931_v15 = vld [vmem:[#allocation2 + $0x62] sm:$0xff] }
 0x1e6   :  { %16367 = vmatmul.mubr.f32.gmra.mrb[26].mxu0 %v25599_v34  ;;  %17087 = vmatmul.mubr.f32.gmra.mrb[26].mxu1 %v25600_v35  ;;  %v4464_v34 = vld [vmem:[#allocation2 + $0x279] sm:$0xff] }
 0x1e7   :  { %16369 = vmatprep.mubr.f32.mxu0 %v25601_v36  ;;  %17089 = vmatprep.mubr.f32.mxu1 %v25602_v37  ;;  %v1635_v35 = vld [vmem:[#allocation2 + $0xd9] sm:$0xff]  ;;  %v4465_v36 = vld [vmem:[#allocation2 + $0x289] sm:$0xff]  ;;  %v22015_v37 = vpack.c.bf16 %v2266_v29, %v2265_v28 }
 0x1e8   :  { %v1933_v28 = vld [vmem:[#allocation2 + $0x7a] sm:$0xff]  ;;  %v4762_v29 = vld [vmem:[#allocation2 + $0x22a] sm:$0xff] }
 0x1ea   :  { %16370 = vmatmul.mubr.f32.gmra.mrb[28].mxu0 %v25603_v41  ;;  %17090 = vmatmul.mubr.f32.gmra.mrb[28].mxu1 %v25604_v42  ;;  %v1637_v41 = vld [vmem:[#allocation2 + $0xf1] sm:$0xff]  ;;  %v4467_v42 = vld [vmem:[#allocation2 + $0x2a1] sm:$0xff] }
 0x1eb   :  { %16372 = vmatprep.mubr.f32.mxu0 %v1343_v39  ;;  %17092 = vmatprep.mubr.f32.mxu1 %v4174_v40  ;;  %v1636_v39 = vld [vmem:[#allocation2 + $0xe1] sm:$0xff]  ;;  %v4466_v40 = vld [vmem:[#allocation2 + $0x291] sm:$0xff] }
 0x1ee   :  { %16373 = vmatmul.mubr.f32.gmra.mrb[30].mxu0 %v1344_v43  ;;  %17093 = vmatmul.mubr.f32.gmra.mrb[30].mxu1 %v4175_v44  ;;  %v1638_v43 = vld [vmem:[#allocation2 + $0xf9] sm:$0xff]  ;;  %v4468_v44 = vld [vmem:[#allocation2 + $0x2a9] sm:$0xff] }
 0x1ef   :  { %16407 = vmatprep.mubr.f32.mxu0 %v1619_v45  ;;  %17127 = vmatprep.mubr.f32.mxu1 %v4449_v46  ;;  %v1639_v45 = vld [vmem:[#allocation2 + $0x109] sm:$0xff]  ;;  %v4469_v46 = vld [vmem:[#allocation2 + $0x2b9] sm:$0xff] }
 0x1f2   :  { %16408 = vmatmul.mubr.f32.vlgmr.msra.gmra.mrb[0].mxu0 %v1620_v49  ;;  %17128 = vmatmul.mubr.f32.vlgmr.msra.gmra.mrb[0].mxu1 %v4450_v50  ;;  %v1641_v49 = vld [vmem:[#allocation2 + $0x121] sm:$0xff]  ;;  %v4471_v50 = vld [vmem:[#allocation2 + $0x2d1] sm:$0xff] }
 0x1f3   :  { %19098 = vmatpush3.bf16.msra.mxu0 %v19095_v20  ;;  %19386 = vmatpush3.bf16.msra.mxu1 %v19095_v20  ;;  %v1632_v20 = vld [vmem:[#allocation2 + $0xb1] sm:$0xff] }
 0x1f4   :  { %16410 = vmatprep.mubr.f32.mxu0 %v1621_v53  ;;  %17130 = vmatprep.mubr.f32.mxu1 %v4451_v54  ;;  %v1642_v53 = vld [vmem:[#allocation2 + $0x129] sm:$0xff]  ;;  %v4472_v54 = vld [vmem:[#allocation2 + $0x2d9] sm:$0xff] }
 0x1f5   :  { %19100 = vmatprep.subr.bf16.mxu0 %v19099_v55  ;;  %19388 = vmatprep.subr.bf16.mxu1 %v19099_v55 }
 0x1f6   :  { %16411 = vmatmul.mubr.f32.gmra.mrb[2].mxu0 %v1622_v4  ;;  %17131 = vmatmul.mubr.f32.gmra.mrb[2].mxu1 %v4452_v33  ;;  %v4474_v4 = vld [vmem:[#allocation2 + $0x2f1] sm:$0xff] }
 0x1f7   :  { %16413 = vmatprep.mubr.f32.mxu0 %v1623_v32  ;;  %17133 = vmatprep.mubr.f32.mxu1 %v4453_v17  ;;  %v1645_v33 = vld [vmem:[#allocation2 + $0x151] sm:$0xff]  ;;  %v4475_v32 = vld [vmem:[#allocation2 + $0x301] sm:$0xff]  ;;  %v1646_v17 = vld [vmem:[#allocation2 + $0x159] sm:$0xff] }
 0x1f8   :  { %19102 = vmatpush3.bf16.msra.mxu0 %v19099_v55  ;;  %19390 = vmatpush3.bf16.msra.mxu1 %v19099_v55  ;;  %v1643_v55 = vld [vmem:[#allocation2 + $0x139] sm:$0xff] }
 0x1f9   :  { %19104 = vmatprep.subr.bf16.mxu0 %v19103_v18  ;;  %19392 = vmatprep.subr.bf16.mxu1 %v19103_v18 }
 0x1fa   :  { %16414 = vmatmul.mubr.f32.gmra.mrb[4].mxu0 %v1624_v10  ;;  %17134 = vmatmul.mubr.f32.gmra.mrb[4].mxu1 %v4454_v24  ;;  %v1648_v10 = vld [vmem:[#allocation2 + $0x171] sm:$0xff]  ;;  %v4478_v24 = vld [vmem:[#allocation2 + $0x321] sm:$0xff] }
 0x1fb   :  { %16416 = vmatprep.mubr.f32.mxu0 %v1625_v26  ;;  %17136 = vmatprep.mubr.f32.mxu1 %v4455_v19  ;;  %v1649_v26 = vld [vmem:[#allocation2 + $0x181] sm:$0xff]  ;;  %v4479_v19 = vld [vmem:[#allocation2 + $0x331] sm:$0xff] }
 0x1fc   :  { %19106 = vmatpush3.bf16.msra.mxu0 %v19103_v18  ;;  %19394 = vmatpush3.bf16.msra.mxu1 %v19103_v18  ;;  %v4476_v18 = vld [vmem:[#allocation2 + $0x309] sm:$0xff] }
 0x1fd   :  { %19108 = vmatprep.subr.bf16.mxu0 %v19107_v38  ;;  %19396 = vmatprep.subr.bf16.mxu1 %v19107_v38 }
 0x1fe   :  { %16417 = vmatmul.mubr.f32.gmra.mrb[6].mxu0 %v1626_v3  ;;  %17137 = vmatmul.mubr.f32.gmra.mrb[6].mxu1 %v4456_v5  ;;  %v4754_v3 = vld [vmem:[#allocation2 + $0x1ca] sm:$0xff] }
 0x1ff   :  { %16419 = vmatprep.mubr.f32.mxu0 %v1627_v11  ;;  %17139 = vmatprep.mubr.f32.mxu1 %v4457_v51  ;;  %v2267_v5 = vld [vmem:[#allocation8 + $0x310] sm:$0xff]  ;;  %v2268_v11 = vld [vmem:[#allocation8 + $0x318] sm:$0xff]  ;;  %v1926_v51 = vld [vmem:[#allocation2 + $0x22] sm:$0xff] }
 0x200   :  { %19110 = vmatpush3.bf16.msra.mxu0 %v19107_v38  ;;  %19398 = vmatpush3.bf16.msra.mxu1 %v19107_v38  ;;  %v1650_v38 = vld [vmem:[#allocation2 + $0x189] sm:$0xff] }
 0x201   :  { %19112 = vmatprep.subr.bf16.mxu0 %v19111_v52  ;;  %19400 = vmatprep.subr.bf16.mxu1 %v19111_v52 }
 0x202   :  { %16420 = vmatmul.mubr.f32.gmra.mrb[8].mxu0 %v1628_v58  ;;  %17140 = vmatmul.mubr.f32.gmra.mrb[8].mxu1 %v4458_v59  ;;  %v19131_v58 = vpack.c.bf16 %v2268_v11, %v2267_v5  ;;  %v2269_v59 = vld [vmem:[#allocation8 + $0x320] sm:$0xff]  ;;  %v1946_v5 = vld [vmem:[#allocation2 + $0x112] sm:$0xff] }
 0x203   :  { %16422 = vmatprep.mubr.f32.mxu0 %v1629_v63  ;;  %17142 = vmatprep.mubr.f32.mxu1 %v4459_v0  ;;  %v2270_v63 = vld [vmem:[#allocation8 + $0x328] sm:$0xff]  ;;  %v1928_v0 = vld [vmem:[#allocation2 + $0x3a] sm:$0xff] }
 0x204   :  { %19114 = vmatpush3.bf16.msra.mxu0 %v19111_v52  ;;  %19402 = vmatpush3.bf16.msra.mxu1 %v19111_v52  ;;  %v4755_v52 = vld [vmem:[#allocation2 + $0x1d2] sm:$0xff]  ;;  %v4775_v11 = vld [vmem:[#allocation2 + $0x2c2] sm:$0xff] }
 0x205   :  { %19116 = vmatprep.subr.bf16.mxu0 %v19115_v1  ;;  %19404 = vmatprep.subr.bf16.mxu1 %v19115_v1 }
 0x206   :  { %16423 = vmatmul.mubr.f32.gmra.mrb[10].mxu0 %v1630_v7  ;;  %17143 = vmatmul.mubr.f32.gmra.mrb[10].mxu1 %v4460_v8  ;;  %v19135_v7 = vpack.c.bf16 %v2270_v63, %v2269_v59  ;;  %v2271_v8 = vld [vmem:[#allocation8 + $0x330] sm:$0xff]  ;;  %v1950_v63 = vld [vmem:[#allocation2 + $0x142] sm:$0xff] }
 0x207   :  { %16425 = vmatprep.mubr.f32.mxu0 %v1631_v9  ;;  %17145 = vmatprep.mubr.f32.mxu1 %v4461_v13  ;;  %v2272_v9 = vld [vmem:[#allocation8 + $0x338] sm:$0xff]  ;;  %v4778_v59 = vld [vmem:[#allocation2 + $0x2ea] sm:$0xff] }
 0x208   :  { %19118 = vmatpush3.bf16.msra.mxu0 %v19115_v1  ;;  %19406 = vmatpush3.bf16.msra.mxu1 %v19115_v1  ;;  %v4757_v1 = vld [vmem:[#allocation2 + $0x1ea] sm:$0xff]  ;;  %v1930_v13 = vld [vmem:[#allocation2 + $0x52] sm:$0xff] }
 0x209   :  { %19120 = vmatprep.subr.bf16.mxu0 %v19119_v14  ;;  %19408 = vmatprep.subr.bf16.mxu1 %v19119_v14 }
 0x20a   :  { %16426 = vmatmul.mubr.f32.gmra.mrb[12].mxu0 %v1632_v20  ;;  %17146 = vmatmul.mubr.f32.gmra.mrb[12].mxu1 %v4462_v21  ;;  %v19139_v20 = vpack.c.bf16 %v2272_v9, %v2271_v8  ;;  %v2273_v21 = vld [vmem:[#allocation8 + $0x340] sm:$0xff]  ;;  %v1953_v8 = vld [vmem:[#allocation2 + $0x16a] sm:$0xff] }
 0x20b   :  { %16428 = vmatprep.mubr.f32.mxu0 %v1633_v22  ;;  %17148 = vmatprep.mubr.f32.mxu1 %v4463_v23  ;;  %v2274_v22 = vld [vmem:[#allocation8 + $0x348] sm:$0xff]  ;;  %v4782_v9 = vld [vmem:[#allocation2 + $0x31a] sm:$0xff] }
 0x20c   :  { %19122 = vmatpush3.bf16.msra.mxu0 %v19119_v14  ;;  %19410 = vmatpush3.bf16.msra.mxu1 %v19119_v14  ;;  %v4759_v14 = vld [vmem:[#allocation2 + $0x202] sm:$0xff]  ;;  %v1932_v23 = vld [vmem:[#allocation2 + $0x6a] sm:$0xff] }
 0x20d   :  { %19124 = vmatprep.subr.bf16.mxu0 %v19123_v27  ;;  %19412 = vmatprep.subr.bf16.mxu1 %v19123_v27 }
 0x20e   :  { %16429 = vmatmul.mubr.f32.gmra.mrb[14].mxu0 %v1634_v30  ;;  %17149 = vmatmul.mubr.f32.gmra.mrb[14].mxu1 %v4464_v34  ;;  %v19143_v30 = vpack.c.bf16 %v2274_v22, %v2273_v21  ;;  %v2275_v34 = vld [vmem:[#allocation8 + $0x350] sm:$0xff]  ;;  %v4785_v21 = vld [vmem:[#allocation2 + $0x33a] sm:$0xff] }
 0x20f   :  { %16431 = vmatprep.mubr.f32.mxu0 %v1635_v35  ;;  %17151 = vmatprep.mubr.f32.mxu1 %v4465_v36  ;;  %v2276_v35 = vld [vmem:[#allocation8 + $0x358] sm:$0xff]  ;;  %v1934_v36 = vld [vmem:[#allocation2 + $0x82] sm:$0xff]  ;;  %v2232_v22 = vld [vmem:[#allocation2 + $0x30] sm:$0xff] }
 0x210   :  { %19126 = vmatpush3.bf16.msra.mxu0 %v19123_v27  ;;  %19414 = vmatpush3.bf16.msra.mxu1 %v19123_v27  ;;  %v4761_v27 = vld [vmem:[#allocation2 + $0x21a] sm:$0xff] }
 0x211   :  { %19128 = vmatprep.subr.bf16.mxu0 %v22015_v37  ;;  %19416 = vmatprep.subr.bf16.mxu1 %v22015_v37 }
 0x212   :  { %16432 = vmatmul.mubr.f32.gmra.mrb[16].mxu0 %v1636_v39  ;;  %17152 = vmatmul.mubr.f32.gmra.mrb[16].mxu1 %v4466_v40  ;;  %v1935_v39 = vld [vmem:[#allocation2 + $0x92] sm:$0xff]  ;;  %v4764_v40 = vld [vmem:[#allocation2 + $0x242] sm:$0xff] }
 0x213   :  { %16434 = vmatprep.mubr.f32.mxu0 %v1637_v41  ;;  %17154 = vmatprep.mubr.f32.mxu1 %v4467_v42  ;;  %v19147_v41 = vpack.c.bf16 %v2276_v35, %v2275_v34  ;;  %v2277_v42 = vld [vmem:[#allocation8 + $0x360] sm:$0xff]  ;;  %v2234_v34 = vld [vmem:[#allocation2 + $0x48] sm:$0xff]  ;;  %v5062_v35 = vld [vmem:[#allocation2 + $0x1f8] sm:$0xff] }
 0x216   :  { %16435 = vmatmul.mubr.f32.gmra.mrb[18].mxu0 %v1638_v43  ;;  %17155 = vmatmul.mubr.f32.gmra.mrb[18].mxu1 %v4468_v44  ;;  %v2278_v43 = vld [vmem:[#allocation8 + $0x368] sm:$0xff]  ;;  %v1936_v44 = vld [vmem:[#allocation2 + $0x9a] sm:$0xff] }
 0x217   :  { %16437 = vmatprep.mubr.f32.mxu0 %v1639_v45  ;;  %17157 = vmatprep.mubr.f32.mxu1 %v4469_v46  ;;  %v4765_v45 = vld [vmem:[#allocation2 + $0x24a] sm:$0xff] }
 0x218   :  { %v1937_v46 = vld [vmem:[#allocation2 + $0xaa] sm:$0xff] }
 0x21a   :  { %16438 = vmatmul.mubr.f32.gmra.mrb[20].mxu0 %v1640_v47  ;;  %17158 = vmatmul.mubr.f32.gmra.mrb[20].mxu1 %v4470_v48  ;;  %v4766_v47 = vld [vmem:[#allocation2 + $0x25a] sm:$0xff]  ;;  %v19151_v48 = vpack.c.bf16 %v2278_v43, %v2277_v42  ;;  %v5064_v43 = vld [vmem:[#allocation2 + $0x210] sm:$0xff] }
 0x21b   :  { %16440 = vmatprep.mubr.f32.mxu0 %v1641_v49  ;;  %17160 = vmatprep.mubr.f32.mxu1 %v4471_v50  ;;  %v2279_v49 = vld [vmem:[#allocation8 + $0x370] sm:$0xff]  ;;  %v2280_v50 = vld [vmem:[#allocation8 + $0x378] sm:$0xff]  ;;  %v2236_v42 = vld [vmem:[#allocation2 + $0x60] sm:$0xff] }
 0x21e   :  { %16441 = vmatmul.mubr.f32.gmra.mrb[22].mxu0 %v1642_v53  ;;  %17161 = vmatmul.mubr.f32.gmra.mrb[22].mxu1 %v4472_v54  ;;  %v1938_v53 = vld [vmem:[#allocation2 + $0xb2] sm:$0xff]  ;;  %v4767_v54 = vld [vmem:[#allocation2 + $0x262] sm:$0xff] }
 0x21f   :  { %16443 = vmatprep.mubr.f32.mxu0 %v1643_v55  ;;  %17163 = vmatprep.mubr.f32.mxu1 %v4473_v60  ;;  %v1939_v55 = vld [vmem:[#allocation2 + $0xc2] sm:$0xff]  ;;  %v4768_v60 = vld [vmem:[#allocation2 + $0x272] sm:$0xff] }
 0x222   :  { %16444 = vmatmul.mubr.f32.gmra.mrb[24].mxu0 %v1644_v61  ;;  %17164 = vmatmul.mubr.f32.gmra.mrb[24].mxu1 %v4474_v4  ;;  %v19155_v61 = vpack.c.bf16 %v2280_v50, %v2279_v49  ;;  %v2571_v4 = vld [vmem:[#allocation8 + $0x380] sm:$0xff]  ;;  %v2238_v49 = vld [vmem:[#allocation2 + $0x78] sm:$0xff]  ;;  %v5066_v50 = vld [vmem:[#allocation2 + $0x228] sm:$0xff] }
 0x223   :  { %16446 = vmatprep.mubr.f32.mxu0 %v1645_v33  ;;  %17166 = vmatprep.mubr.f32.mxu1 %v4475_v32  ;;  %v2572_v33 = vld [vmem:[#allocation8 + $0x388] sm:$0xff] }
 0x224   :  { %v1940_v32 = vld [vmem:[#allocation2 + $0xca] sm:$0xff] }
 0x226   :  { %16447 = vmatmul.mubr.f32.gmra.mrb[26].mxu0 %v1646_v17  ;;  %17167 = vmatmul.mubr.f32.gmra.mrb[26].mxu1 %v4476_v18  ;;  %v4769_v17 = vld [vmem:[#allocation2 + $0x27a] sm:$0xff] }
 0x227   :  { %16449 = vmatprep.mubr.f32.mxu0 %v1647_v12  ;;  %17169 = vmatprep.mubr.f32.mxu1 %v4477_v25  ;;  %v1941_v18 = vld [vmem:[#allocation2 + $0xda] sm:$0xff]  ;;  %v4770_v12 = vld [vmem:[#allocation2 + $0x28a] sm:$0xff]  ;;  %v22021_v25 = vpack.c.bf16 %v2572_v33, %v2571_v4 }
 0x228   :  { %v2240_v4 = vld [vmem:[#allocation2 + $0x90] sm:$0xff]  ;;  %v5068_v33 = vld [vmem:[#allocation2 + $0x240] sm:$0xff] }
 0x22a   :  { %16450 = vmatmul.mubr.f32.gmra.mrb[28].mxu0 %v1648_v10  ;;  %17170 = vmatmul.mubr.f32.gmra.mrb[28].mxu1 %v4478_v24  ;;  %v1942_v10 = vld [vmem:[#allocation2 + $0xe2] sm:$0xff]  ;;  %v4771_v24 = vld [vmem:[#allocation2 + $0x292] sm:$0xff] }
 0x22b   :  { %16452 = vmatprep.mubr.f32.mxu0 %v1649_v26  ;;  %17172 = vmatprep.mubr.f32.mxu1 %v4479_v19  ;;  %v1943_v26 = vld [vmem:[#allocation2 + $0xf2] sm:$0xff]  ;;  %v4772_v19 = vld [vmem:[#allocation2 + $0x2a2] sm:$0xff] }
 0x22e   :  { %16453 = vmatmul.mubr.f32.gmra.mrb[30].mxu0 %v1650_v38  ;;  %17173 = vmatmul.mubr.f32.gmra.mrb[30].mxu1 %v4480_v62  ;;  %v1944_v38 = vld [vmem:[#allocation2 + $0xfa] sm:$0xff]  ;;  %v4773_v62 = vld [vmem:[#allocation2 + $0x2aa] sm:$0xff] }
 0x22f   :  { %16487 = vmatprep.mubr.f32.mxu0 %v1925_v31  ;;  %17207 = vmatprep.mubr.f32.mxu1 %v4754_v3  ;;  %v1945_v31 = vld [vmem:[#allocation2 + $0x10a] sm:$0xff]  ;;  %v4774_v3 = vld [vmem:[#allocation2 + $0x2ba] sm:$0xff] }
 0x232   :  { %16488 = vmatmul.mubr.f32.vlgmr.msra.gmra.mrb[0].mxu0 %v1926_v51  ;;  %17208 = vmatmul.mubr.f32.vlgmr.msra.gmra.mrb[0].mxu1 %v4755_v52  ;;  %v1947_v51 = vld [vmem:[#allocation2 + $0x122] sm:$0xff]  ;;  %v4776_v52 = vld [vmem:[#allocation2 + $0x2d2] sm:$0xff] }
 0x233   :  { %19130 = vmatpush3.bf16.msra.mxu0 %v22015_v37  ;;  %19418 = vmatpush3.bf16.msra.mxu1 %v22015_v37  ;;  %v4763_v37 = vld [vmem:[#allocation2 + $0x232] sm:$0xff] }
 0x234   :  { %16490 = vmatprep.mubr.f32.mxu0 %v1927_v56  ;;  %17210 = vmatprep.mubr.f32.mxu1 %v4756_v57  ;;  %v1948_v56 = vld [vmem:[#allocation2 + $0x12a] sm:$0xff]  ;;  %v4777_v57 = vld [vmem:[#allocation2 + $0x2da] sm:$0xff] }
 0x235   :  { %19132 = vmatprep.subr.bf16.mxu0 %v19131_v58  ;;  %19420 = vmatprep.subr.bf16.mxu1 %v19131_v58 }
 0x236   :  { %16491 = vmatmul.mubr.f32.gmra.mrb[2].mxu0 %v1928_v0  ;;  %17211 = vmatmul.mubr.f32.gmra.mrb[2].mxu1 %v4757_v1  ;;  %v4779_v0 = vld [vmem:[#allocation2 + $0x2f2] sm:$0xff] }
 0x237   :  { %16493 = vmatprep.mubr.f32.mxu0 %v1929_v2  ;;  %17213 = vmatprep.mubr.f32.mxu1 %v4758_v6  ;;  %v1951_v1 = vld [vmem:[#allocation2 + $0x152] sm:$0xff]  ;;  %v4780_v2 = vld [vmem:[#allocation2 + $0x302] sm:$0xff]  ;;  %v1952_v6 = vld [vmem:[#allocation2 + $0x15a] sm:$0xff] }
 0x238   :  { %19134 = vmatpush3.bf16.msra.mxu0 %v19131_v58  ;;  %19422 = vmatpush3.bf16.msra.mxu1 %v19131_v58  ;;  %v1949_v58 = vld [vmem:[#allocation2 + $0x13a] sm:$0xff] }
 0x239   :  { %19136 = vmatprep.subr.bf16.mxu0 %v19135_v7  ;;  %19424 = vmatprep.subr.bf16.mxu1 %v19135_v7 }
 0x23a   :  { %16494 = vmatmul.mubr.f32.gmra.mrb[4].mxu0 %v1930_v13  ;;  %17214 = vmatmul.mubr.f32.gmra.mrb[4].mxu1 %v4759_v14  ;;  %v1954_v13 = vld [vmem:[#allocation2 + $0x172] sm:$0xff]  ;;  %v4783_v14 = vld [vmem:[#allocation2 + $0x322] sm:$0xff] }
 0x23b   :  { %16496 = vmatprep.mubr.f32.mxu0 %v1931_v15  ;;  %17216 = vmatprep.mubr.f32.mxu1 %v4760_v16  ;;  %v1955_v15 = vld [vmem:[#allocation2 + $0x182] sm:$0xff]  ;;  %v4784_v16 = vld [vmem:[#allocation2 + $0x332] sm:$0xff] }
 0x23c   :  { %19138 = vmatpush3.bf16.msra.mxu0 %v19135_v7  ;;  %19426 = vmatpush3.bf16.msra.mxu1 %v19135_v7  ;;  %v4781_v7 = vld [vmem:[#allocation2 + $0x30a] sm:$0xff] }
 0x23d   :  { %19140 = vmatprep.subr.bf16.mxu0 %v19139_v20  ;;  %19428 = vmatprep.subr.bf16.mxu1 %v19139_v20 }
 0x23e   :  { %16497 = vmatmul.mubr.f32.gmra.mrb[6].mxu0 %v1932_v23  ;;  %17217 = vmatmul.mubr.f32.gmra.mrb[6].mxu1 %v4761_v27  ;;  %v5060_v23 = vld [vmem:[#allocation2 + $0x1e0] sm:$0xff]  ;;  %v2573_v27 = vld [vmem:[#allocation8 + $0x390] sm:$0xff] }
 0x23f   :  { %16499 = vmatprep.mubr.f32.mxu0 %v1933_v28  ;;  %17219 = vmatprep.mubr.f32.mxu1 %v4762_v29  ;;  %v2574_v28 = vld [vmem:[#allocation8 + $0x398] sm:$0xff] }
 0x240   :  { %19142 = vmatpush3.bf16.msra.mxu0 %v19139_v20  ;;  %19430 = vmatpush3.bf16.msra.mxu1 %v19139_v20  ;;  %v1956_v20 = vld [vmem:[#allocation2 + $0x18a] sm:$0xff]  ;;  %v2233_v29 = vld [vmem:[#allocation2 + $0x38] sm:$0xff] }
 0x241   :  { %19144 = vmatprep.subr.bf16.mxu0 %v19143_v30  ;;  %19432 = vmatprep.subr.bf16.mxu1 %v19143_v30 }
 0x242   :  { %16500 = vmatmul.mubr.f32.gmra.mrb[8].mxu0 %v1934_v36  ;;  %17220 = vmatmul.mubr.f32.gmra.mrb[8].mxu1 %v4763_v37  ;;  %v19163_v36 = vpack.c.bf16 %v2574_v28, %v2573_v27  ;;  %v2575_v37 = vld [vmem:[#allocation8 + $0x3a0] sm:$0xff]  ;;  %v2253_v27 = vld [vmem:[#allocation2 + $0x128] sm:$0xff]  ;;  %v5081_v28 = vld [vmem:[#allocation2 + $0x2d8] sm:$0xff] }
 0x243   :  { %16502 = vmatprep.mubr.f32.mxu0 %v1935_v39  ;;  %17222 = vmatprep.mubr.f32.mxu1 %v4764_v40  ;;  %v2576_v39 = vld [vmem:[#allocation8 + $0x3a8] sm:$0xff]  ;;  %v2235_v40 = vld [vmem:[#allocation2 + $0x50] sm:$0xff] }
 0x244   :  { %19146 = vmatpush3.bf16.msra.mxu0 %v19143_v30  ;;  %19434 = vmatpush3.bf16.msra.mxu1 %v19143_v30  ;;  %v5061_v30 = vld [vmem:[#allocation2 + $0x1e8] sm:$0xff] }
 0x245   :  { %19148 = vmatprep.subr.bf16.mxu0 %v19147_v41  ;;  %19436 = vmatprep.subr.bf16.mxu1 %v19147_v41 }
 0x246   :  { %16503 = vmatmul.mubr.f32.gmra.mrb[10].mxu0 %v1936_v44  ;;  %17223 = vmatmul.mubr.f32.gmra.mrb[10].mxu1 %v4765_v45  ;;  %v19167_v44 = vpack.c.bf16 %v2576_v39, %v2575_v37  ;;  %v2577_v45 = vld [vmem:[#allocation8 + $0x3b0] sm:$0xff]  ;;  %v5084_v37 = vld [vmem:[#allocation2 + $0x300] sm:$0xff]  ;;  %v2257_v39 = vld [vmem:[#allocation2 + $0x158] sm:$0xff] }
 0x247   :  { %16505 = vmatprep.mubr.f32.mxu0 %v1937_v46  ;;  %17225 = vmatprep.mubr.f32.mxu1 %v4766_v47  ;;  %v2578_v46 = vld [vmem:[#allocation8 + $0x3b8] sm:$0xff]  ;;  %v2237_v47 = vld [vmem:[#allocation2 + $0x68] sm:$0xff] }
 0x248   :  { %19150 = vmatpush3.bf16.msra.mxu0 %v19147_v41  ;;  %19438 = vmatpush3.bf16.msra.mxu1 %v19147_v41  ;;  %v5063_v41 = vld [vmem:[#allocation2 + $0x200] sm:$0xff] }
 0x249   :  { %19152 = vmatprep.subr.bf16.mxu0 %v19151_v48  ;;  %19440 = vmatprep.subr.bf16.mxu1 %v19151_v48 }
 0x24a   :  { %16506 = vmatmul.mubr.f32.gmra.mrb[12].mxu0 %v1938_v53  ;;  %17226 = vmatmul.mubr.f32.gmra.mrb[12].mxu1 %v4767_v54  ;;  %v19171_v53 = vpack.c.bf16 %v2578_v46, %v2577_v45  ;;  %v2579_v54 = vld [vmem:[#allocation8 + $0x3c0] sm:$0xff]  ;;  %v5088_v46 = vld [vmem:[#allocation2 + $0x330] sm:$0xff] }
 0x24b   :  { %16508 = vmatprep.mubr.f32.mxu0 %v1939_v55  ;;  %17228 = vmatprep.mubr.f32.mxu1 %v4768_v60  ;;  %v2580_v55 = vld [vmem:[#allocation8 + $0x3c8] sm:$0xff]  ;;  %v2239_v60 = vld [vmem:[#allocation2 + $0x80] sm:$0xff] }
 0x24c   :  { %19154 = vmatpush3.bf16.msra.mxu0 %v19151_v48  ;;  %19442 = vmatpush3.bf16.msra.mxu1 %v19151_v48  ;;  %v5065_v48 = vld [vmem:[#allocation2 + $0x218] sm:$0xff]  ;;  %v2260_v45 = vld [vmem:[#allocation2 + $0x180] sm:$0xff] }
 0x24d   :  { %19156 = vmatprep.subr.bf16.mxu0 %v19155_v61  ;;  %19444 = vmatprep.subr.bf16.mxu1 %v19155_v61 }
 0x24e   :  { %16509 = vmatmul.mubr.f32.gmra.mrb[14].mxu0 %v1940_v32  ;;  %17229 = vmatmul.mubr.f32.gmra.mrb[14].mxu1 %v4769_v17  ;;  %v19175_v32 = vpack.c.bf16 %v2580_v55, %v2579_v54  ;;  %v2581_v17 = vld [vmem:[#allocation8 + $0x3d0] sm:$0xff]  ;;  %v2880_v55 = vld [vmem:[#allocation8 + $0x418] sm:$0xff] }
 0x24f   :  { %16511 = vmatprep.mubr.f32.mxu0 %v1941_v18  ;;  %17231 = vmatprep.mubr.f32.mxu1 %v4770_v12  ;;  %v2582_v18 = vld [vmem:[#allocation8 + $0x3d8] sm:$0xff]  ;;  %v2879_v54 = vld [vmem:[#allocation8 + $0x410] sm:$0xff] }
 0x250   :  { %19158 = vmatpush3.bf16.msra.mxu0 %v19155_v61  ;;  %19446 = vmatpush3.bf16.msra.mxu1 %v19155_v61  ;;  %v5067_v61 = vld [vmem:[#allocation2 + $0x230] sm:$0xff]  ;;  %v2241_v12 = vld [vmem:[#allocation2 + $0x98] sm:$0xff] }
 0x251   :  { %19160 = vmatprep.subr.bf16.mxu0 %v22021_v25  ;;  %19448 = vmatprep.subr.bf16.mxu1 %v22021_v25 }
 0x252   :  { %16512 = vmatmul.mubr.f32.gmra.mrb[16].mxu0 %v1942_v10  ;;  %17232 = vmatmul.mubr.f32.gmra.mrb[16].mxu1 %v4771_v24  ;;  %v2242_v10 = vld [vmem:[#allocation2 + $0xa8] sm:$0xff]  ;;  %v5070_v24 = vld [vmem:[#allocation2 + $0x258] sm:$0xff] }
 0x253   :  { %16514 = vmatprep.mubr.f32.mxu0 %v1943_v26  ;;  %17234 = vmatprep.mubr.f32.mxu1 %v4772_v19  ;;  %v19179_v26 = vpack.c.bf16 %v2582_v18, %v2581_v17  ;;  %v2583_v19 = vld [vmem:[#allocation8 + $0x3e0] sm:$0xff]  ;;  %v2882_v18 = vld [vmem:[#allocation8 + $0x428] sm:$0xff] }
 0x254   :  { %v2881_v17 = vld [vmem:[#allocation8 + $0x420] sm:$0xff] }
 0x256   :  { %16515 = vmatmul.mubr.f32.gmra.mrb[18].mxu0 %v1944_v38  ;;  %17235 = vmatmul.mubr.f32.gmra.mrb[18].mxu1 %v4773_v62  ;;  %v2584_v38 = vld [vmem:[#allocation8 + $0x3e8] sm:$0xff]  ;;  %v2243_v62 = vld [vmem:[#allocation2 + $0xb0] sm:$0xff] }
 0x257   :  { %16517 = vmatprep.mubr.f32.mxu0 %v1945_v31  ;;  %17237 = vmatprep.mubr.f32.mxu1 %v4774_v3  ;;  %v5071_v31 = vld [vmem:[#allocation2 + $0x260] sm:$0xff] }
 0x258   :  { %v2244_v3 = vld [vmem:[#allocation2 + $0xc0] sm:$0xff] }
 0x25a   :  { %16518 = vmatmul.mubr.f32.gmra.mrb[20].mxu0 %v1946_v5  ;;  %17238 = vmatmul.mubr.f32.gmra.mrb[20].mxu1 %v4775_v11  ;;  %v5072_v5 = vld [vmem:[#allocation2 + $0x270] sm:$0xff]  ;;  %v19183_v11 = vpack.c.bf16 %v2584_v38, %v2583_v19  ;;  %v2884_v38 = vld [vmem:[#allocation8 + $0x438] sm:$0xff] }
 0x25b   :  { %16520 = vmatprep.mubr.f32.mxu0 %v1947_v51  ;;  %17240 = vmatprep.mubr.f32.mxu1 %v4776_v52  ;;  %v2585_v51 = vld [vmem:[#allocation8 + $0x3f0] sm:$0xff]  ;;  %v2586_v52 = vld [vmem:[#allocation8 + $0x3f8] sm:$0xff] }
 0x25c   :  { %v2883_v19 = vld [vmem:[#allocation8 + $0x430] sm:$0xff] }
 0x25e   :  { %16521 = vmatmul.mubr.f32.gmra.mrb[22].mxu0 %v1948_v56  ;;  %17241 = vmatmul.mubr.f32.gmra.mrb[22].mxu1 %v4777_v57  ;;  %v2245_v56 = vld [vmem:[#allocation2 + $0xc8] sm:$0xff]  ;;  %v5073_v57 = vld [vmem:[#allocation2 + $0x278] sm:$0xff] }
 0x25f   :  { %16523 = vmatprep.mubr.f32.mxu0 %v1949_v58  ;;  %17243 = vmatprep.mubr.f32.mxu1 %v4778_v59  ;;  %v2246_v58 = vld [vmem:[#allocation2 + $0xd8] sm:$0xff]  ;;  %v5074_v59 = vld [vmem:[#allocation2 + $0x288] sm:$0xff] }
 0x262   :  { %16524 = vmatmul.mubr.f32.gmra.mrb[24].mxu0 %v1950_v63  ;;  %17244 = vmatmul.mubr.f32.gmra.mrb[24].mxu1 %v4779_v0  ;;  %v19187_v63 = vpack.c.bf16 %v2586_v52, %v2585_v51  ;;  %v2877_v0 = vld [vmem:[#allocation8 + $0x400] sm:$0xff]  ;;  %v2886_v52 = vld [vmem:[#allocation8 + $0x448] sm:$0xff] }
 0x263   :  { %16526 = vmatprep.mubr.f32.mxu0 %v1951_v1  ;;  %17246 = vmatprep.mubr.f32.mxu1 %v4780_v2  ;;  %v2878_v1 = vld [vmem:[#allocation8 + $0x408] sm:$0xff]  ;;  %v2247_v2 = vld [vmem:[#allocation2 + $0xe0] sm:$0xff] }
 0x264   :  { %v2885_v51 = vld [vmem:[#allocation8 + $0x440] sm:$0xff] }
 0x266   :  { %16527 = vmatmul.mubr.f32.gmra.mrb[26].mxu0 %v1952_v6  ;;  %17247 = vmatmul.mubr.f32.gmra.mrb[26].mxu1 %v4781_v7  ;;  %v5075_v6 = vld [vmem:[#allocation2 + $0x290] sm:$0xff] }
 0x267   :  { %16529 = vmatprep.mubr.f32.mxu0 %v1953_v8  ;;  %17249 = vmatprep.mubr.f32.mxu1 %v4782_v9  ;;  %v2248_v7 = vld [vmem:[#allocation2 + $0xf0] sm:$0xff]  ;;  %v5076_v8 = vld [vmem:[#allocation2 + $0x2a0] sm:$0xff]  ;;  %v22027_v9 = vpack.c.bf16 %v2878_v1, %v2877_v0  ;;  %v2888_v1 = vld [vmem:[#allocation8 + $0x458] sm:$0xff] }
 0x268   :  { %v2887_v0 = vld [vmem:[#allocation8 + $0x450] sm:$0xff] }
 0x26a   :  { %16530 = vmatmul.mubr.f32.gmra.mrb[28].mxu0 %v1954_v13  ;;  %17250 = vmatmul.mubr.f32.gmra.mrb[28].mxu1 %v4783_v14  ;;  %v2249_v13 = vld [vmem:[#allocation2 + $0xf8] sm:$0xff]  ;;  %v5077_v14 = vld [vmem:[#allocation2 + $0x2a8] sm:$0xff] }
 0x26b   :  { %16532 = vmatprep.mubr.f32.mxu0 %v1955_v15  ;;  %17252 = vmatprep.mubr.f32.mxu1 %v4784_v16  ;;  %v2250_v15 = vld [vmem:[#allocation2 + $0x108] sm:$0xff]  ;;  %v5078_v16 = vld [vmem:[#allocation2 + $0x2b8] sm:$0xff] }
 0x26e   :  { %16533 = vmatmul.mubr.f32.gmra.mrb[30].mxu0 %v1956_v20  ;;  %17253 = vmatmul.mubr.f32.gmra.mrb[30].mxu1 %v4785_v21  ;;  %v2251_v20 = vld [vmem:[#allocation2 + $0x110] sm:$0xff]  ;;  %v5079_v21 = vld [vmem:[#allocation2 + $0x2c0] sm:$0xff] }
 0x26f   :  { %16567 = vmatprep.mubr.f32.mxu0 %v2232_v22  ;;  %17287 = vmatprep.mubr.f32.mxu1 %v5060_v23  ;;  %v2252_v22 = vld [vmem:[#allocation2 + $0x120] sm:$0xff]  ;;  %v5080_v23 = vld [vmem:[#allocation2 + $0x2d0] sm:$0xff] }
 0x272   :  { %16568 = vmatmul.mubr.f32.vlgmr.msra.gmra.mrb[0].mxu0 %v2233_v29  ;;  %17288 = vmatmul.mubr.f32.vlgmr.msra.gmra.mrb[0].mxu1 %v5061_v30  ;;  %v2254_v29 = vld [vmem:[#allocation2 + $0x138] sm:$0xff]  ;;  %v5082_v30 = vld [vmem:[#allocation2 + $0x2e8] sm:$0xff] }
 0x273   :  { %19162 = vmatpush3.bf16.msra.mxu0 %v22021_v25  ;;  %19450 = vmatpush3.bf16.msra.mxu1 %v22021_v25  ;;  %v5069_v25 = vld [vmem:[#allocation2 + $0x248] sm:$0xff] }
 0x274   :  { %16570 = vmatprep.mubr.f32.mxu0 %v2234_v34  ;;  %17290 = vmatprep.mubr.f32.mxu1 %v5062_v35  ;;  %v2255_v34 = vld [vmem:[#allocation2 + $0x140] sm:$0xff]  ;;  %v5083_v35 = vld [vmem:[#allocation2 + $0x2f0] sm:$0xff] }
 0x275   :  { %19164 = vmatprep.subr.bf16.mxu0 %v19163_v36  ;;  %19452 = vmatprep.subr.bf16.mxu1 %v19163_v36 }
 0x276   :  { %16571 = vmatmul.mubr.f32.gmra.mrb[2].mxu0 %v2235_v40  ;;  %17291 = vmatmul.mubr.f32.gmra.mrb[2].mxu1 %v5063_v41  ;;  %v5085_v40 = vld [vmem:[#allocation2 + $0x308] sm:$0xff] }
 0x277   :  { %16573 = vmatprep.mubr.f32.mxu0 %v2236_v42  ;;  %17293 = vmatprep.mubr.f32.mxu1 %v5064_v43  ;;  %v2258_v41 = vld [vmem:[#allocation2 + $0x168] sm:$0xff]  ;;  %v5086_v42 = vld [vmem:[#allocation2 + $0x318] sm:$0xff]  ;;  %v2259_v43 = vld [vmem:[#allocation2 + $0x170] sm:$0xff] }
 0x278   :  { %19166 = vmatpush3.bf16.msra.mxu0 %v19163_v36  ;;  %19454 = vmatpush3.bf16.msra.mxu1 %v19163_v36  ;;  %v2256_v36 = vld [vmem:[#allocation2 + $0x150] sm:$0xff] }
 0x279   :  { %19168 = vmatprep.subr.bf16.mxu0 %v19167_v44  ;;  %19456 = vmatprep.subr.bf16.mxu1 %v19167_v44 }
 0x27a   :  { %16574 = vmatmul.mubr.f32.gmra.mrb[4].mxu0 %v2237_v47  ;;  %17294 = vmatmul.mubr.f32.gmra.mrb[4].mxu1 %v5065_v48  ;;  %v2261_v47 = vld [vmem:[#allocation2 + $0x188] sm:$0xff]  ;;  %v5089_v48 = vld [vmem:[#allocation2 + $0x338] sm:$0xff] }
 0x27b   :  { %16576 = vmatprep.mubr.f32.mxu0 %v2238_v49  ;;  %17296 = vmatprep.mubr.f32.mxu1 %v5066_v50  ;;  %v21128_v49 = vld [vmem:[#allocation2] sm:$0xff]  ;;  %v2538_v50 = vld [vmem:[#allocation2 + $0x31] sm:$0xff] }
 0x27c   :  { %19170 = vmatpush3.bf16.msra.mxu0 %v19167_v44  ;;  %19458 = vmatpush3.bf16.msra.mxu1 %v19167_v44  ;;  %v5087_v44 = vld [vmem:[#allocation2 + $0x320] sm:$0xff] }
 0x27d   :  { %19172 = vmatprep.subr.bf16.mxu0 %v19171_v53  ;;  %19460 = vmatprep.subr.bf16.mxu1 %v19171_v53 }
 0x27e   :  { %16577 = vmatmul.mubr.f32.gmra.mrb[6].mxu0 %v2239_v60  ;;  %17297 = vmatmul.mubr.f32.gmra.mrb[6].mxu1 %v5067_v61  ;;  %v2539_v60 = vld [vmem:[#allocation2 + $0x39] sm:$0xff]  ;;  %v5366_v61 = vld [vmem:[#allocation2 + $0x1e9] sm:$0xff] }
 0x27f   :  { %16579 = vmatprep.mubr.f32.mxu0 %v2240_v4  ;;  %17299 = vmatprep.mubr.f32.mxu1 %v5068_v33  ;;  %v2540_v4 = vld [vmem:[#allocation2 + $0x49] sm:$0xff]  ;;  %v5367_v33 = vld [vmem:[#allocation2 + $0x1f9] sm:$0xff] }
 0x280   :  { %19174 = vmatpush3.bf16.msra.mxu0 %v19171_v53  ;;  %19462 = vmatpush3.bf16.msra.mxu1 %v19171_v53  ;;  %v5365_v53 = vld [vmem:[#allocation2 + $0x1e1] sm:$0xff] }
 0x281   :  { %19176 = vmatprep.subr.bf16.mxu0 %v19175_v32  ;;  %19464 = vmatprep.subr.bf16.mxu1 %v19175_v32 }
 0x282   :  { %16580 = vmatmul.mubr.f32.gmra.mrb[8].mxu0 %v2241_v12  ;;  %17300 = vmatmul.mubr.f32.gmra.mrb[8].mxu1 %v5069_v25  ;;  %v2541_v12 = vld [vmem:[#allocation2 + $0x51] sm:$0xff]  ;;  %v5368_v25 = vld [vmem:[#allocation2 + $0x201] sm:$0xff] }
 0x283   :  { %16582 = vmatprep.mubr.f32.mxu0 %v2242_v10  ;;  %17302 = vmatprep.mubr.f32.mxu1 %v5070_v24  ;;  %v2542_v10 = vld [vmem:[#allocation2 + $0x61] sm:$0xff]  ;;  %v5369_v24 = vld [vmem:[#allocation2 + $0x211] sm:$0xff] }
 0x284   :  { %19178 = vmatpush3.bf16.msra.mxu0 %v19175_v32  ;;  %19466 = vmatpush3.bf16.msra.mxu1 %v19175_v32  ;;  %v19195_v32 = vpack.c.bf16 %v2880_v55, %v2879_v54  ;;  %v5387_v54 = vld [vmem:[#allocation2 + $0x2e9] sm:$0xff]  ;;  %v2561_v55 = vld [vmem:[#allocation2 + $0x141] sm:$0xff] }
 0x285   :  { %19180 = vmatprep.subr.bf16.mxu0 %v19179_v26  ;;  %19468 = vmatprep.subr.bf16.mxu1 %v19179_v26 }
 0x286   :  { %16583 = vmatmul.mubr.f32.gmra.mrb[10].mxu0 %v2243_v62  ;;  %17303 = vmatmul.mubr.f32.gmra.mrb[10].mxu1 %v5071_v31  ;;  %v2543_v62 = vld [vmem:[#allocation2 + $0x69] sm:$0xff]  ;;  %v5370_v31 = vld [vmem:[#allocation2 + $0x219] sm:$0xff] }
 0x287   :  { %16585 = vmatprep.mubr.f32.mxu0 %v2244_v3  ;;  %17305 = vmatprep.mubr.f32.mxu1 %v5072_v5  ;;  %v2544_v3 = vld [vmem:[#allocation2 + $0x79] sm:$0xff]  ;;  %v5371_v5 = vld [vmem:[#allocation2 + $0x229] sm:$0xff] }
 0x288   :  { %19182 = vmatpush3.bf16.msra.mxu0 %v19179_v26  ;;  %19470 = vmatpush3.bf16.msra.mxu1 %v19179_v26  ;;  %v19199_v26 = vpack.c.bf16 %v2882_v18, %v2881_v17  ;;  %v2564_v17 = vld [vmem:[#allocation2 + $0x169] sm:$0xff]  ;;  %v5391_v18 = vld [vmem:[#allocation2 + $0x319] sm:$0xff] }
 0x289   :  { %19184 = vmatprep.subr.bf16.mxu0 %v19183_v11  ;;  %19472 = vmatprep.subr.bf16.mxu1 %v19183_v11 }
 0x28a   :  { %16586 = vmatmul.mubr.f32.gmra.mrb[12].mxu0 %v2245_v56  ;;  %17306 = vmatmul.mubr.f32.gmra.mrb[12].mxu1 %v5073_v57  ;;  %v2545_v56 = vld [vmem:[#allocation2 + $0x81] sm:$0xff]  ;;  %v5372_v57 = vld [vmem:[#allocation2 + $0x231] sm:$0xff] }
 0x28b   :  { %16588 = vmatprep.mubr.f32.mxu0 %v2246_v58  ;;  %17308 = vmatprep.mubr.f32.mxu1 %v5074_v59  ;;  %v2546_v58 = vld [vmem:[#allocation2 + $0x91] sm:$0xff]  ;;  %v5373_v59 = vld [vmem:[#allocation2 + $0x241] sm:$0xff] }
 0x28c   :  { %19186 = vmatpush3.bf16.msra.mxu0 %v19183_v11  ;;  %19474 = vmatpush3.bf16.msra.mxu1 %v19183_v11  ;;  %v19203_v11 = vpack.c.bf16 %v2884_v38, %v2883_v19  ;;  %v5394_v19 = vld [vmem:[#allocation2 + $0x339] sm:$0xff] }
 0x28d   :  { %19188 = vmatprep.subr.bf16.mxu0 %v19187_v63  ;;  %19476 = vmatprep.subr.bf16.mxu1 %v19187_v63  ;;  %v2568_v38 = vld [vmem:[#allocation2 + $0x199] sm:$0xff] }
 0x28e   :  { %16589 = vmatmul.mubr.f32.gmra.mrb[14].mxu0 %v2247_v2  ;;  %17309 = vmatmul.mubr.f32.gmra.mrb[14].mxu1 %v5075_v6  ;;  %v2547_v2 = vld [vmem:[#allocation2 + $0x99] sm:$0xff]  ;;  %v5374_v6 = vld [vmem:[#allocation2 + $0x249] sm:$0xff] }
 0x28f   :  { %16591 = vmatprep.mubr.f32.mxu0 %v2248_v7  ;;  %17311 = vmatprep.mubr.f32.mxu1 %v5076_v8  ;;  %v2548_v7 = vld [vmem:[#allocation2 + $0xa9] sm:$0xff]  ;;  %v5375_v8 = vld [vmem:[#allocation2 + $0x259] sm:$0xff] }
 0x290   :  { %19190 = vmatpush3.bf16.msra.mxu0 %v19187_v63  ;;  %19478 = vmatpush3.bf16.msra.mxu1 %v19187_v63  ;;  %v19207_v63 = vpack.c.bf16 %v2886_v52, %v2885_v51  ;;  %v2845_v51 = vld [vmem:[#allocation2 + $0x3a] sm:$0xff]  ;;  %v5671_v52 = vld [vmem:[#allocation2 + $0x1ea] sm:$0xff] }
 0x291   :  { %19192 = vmatprep.subr.bf16.mxu0 %v22027_v9  ;;  %19480 = vmatprep.subr.bf16.mxu1 %v22027_v9 }
 0x292   :  { %16592 = vmatmul.mubr.f32.gmra.mrb[16].mxu0 %v2249_v13  ;;  %17312 = vmatmul.mubr.f32.gmra.mrb[16].mxu1 %v5077_v14  ;;  %v2889_v13 = vld [vmem:[#allocation8 + $0x460] sm:$0xff]  ;;  %v2890_v14 = vld [vmem:[#allocation8 + $0x468] sm:$0xff] }
 0x293   :  { %16594 = vmatprep.mubr.f32.mxu0 %v2250_v15  ;;  %17314 = vmatprep.mubr.f32.mxu1 %v5078_v16  ;;  %v2549_v15 = vld [vmem:[#allocation2 + $0xb1] sm:$0xff]  ;;  %v5376_v16 = vld [vmem:[#allocation2 + $0x261] sm:$0xff] }
 0x296   :  { %16595 = vmatmul.mubr.f32.gmra.mrb[18].mxu0 %v2251_v20  ;;  %17315 = vmatmul.mubr.f32.gmra.mrb[18].mxu1 %v5079_v21  ;;  %v2550_v20 = vld [vmem:[#allocation2 + $0xc1] sm:$0xff]  ;;  %v5377_v21 = vld [vmem:[#allocation2 + $0x271] sm:$0xff] }
 0x297   :  { %16597 = vmatprep.mubr.f32.mxu0 %v2252_v22  ;;  %17317 = vmatprep.mubr.f32.mxu1 %v5080_v23  ;;  %v19215_v22 = vpack.c.bf16 %v2890_v14, %v2889_v13  ;;  %v2891_v23 = vld [vmem:[#allocation8 + $0x470] sm:$0xff]  ;;  %v5678_v14 = vld [vmem:[#allocation2 + $0x242] sm:$0xff] }
 0x298   :  { %v2852_v13 = vld [vmem:[#allocation2 + $0x92] sm:$0xff] }
 0x29a   :  { %16598 = vmatmul.mubr.f32.gmra.mrb[20].mxu0 %v2253_v27  ;;  %17318 = vmatmul.mubr.f32.gmra.mrb[20].mxu1 %v5081_v28  ;;  %v2892_v27 = vld [vmem:[#allocation8 + $0x478] sm:$0xff]  ;;  %v2551_v28 = vld [vmem:[#allocation2 + $0xc9] sm:$0xff] }
 0x29b   :  { %16600 = vmatprep.mubr.f32.mxu0 %v2254_v29  ;;  %17320 = vmatprep.mubr.f32.mxu1 %v5082_v30  ;;  %v5378_v29 = vld [vmem:[#allocation2 + $0x279] sm:$0xff] }
 0x29c   :  { %v2552_v30 = vld [vmem:[#allocation2 + $0xd9] sm:$0xff] }
 0x29e   :  { %16601 = vmatmul.mubr.f32.gmra.mrb[22].mxu0 %v2255_v34  ;;  %17321 = vmatmul.mubr.f32.gmra.mrb[22].mxu1 %v5083_v35  ;;  %v5379_v34 = vld [vmem:[#allocation2 + $0x289] sm:$0xff]  ;;  %v19219_v35 = vpack.c.bf16 %v2892_v27, %v2891_v23 }
 0x29f   :  { %16603 = vmatprep.mubr.f32.mxu0 %v2256_v36  ;;  %17323 = vmatprep.mubr.f32.mxu1 %v5084_v37  ;;  %v2553_v36 = vld [vmem:[#allocation2 + $0xe1] sm:$0xff]  ;;  %v5380_v37 = vld [vmem:[#allocation2 + $0x291] sm:$0xff] }
 0x2a0   :  { %v5681_v23 = vld [vmem:[#allocation2 + $0x262] sm:$0xff] }
 0x2a1   :  { %v2856_v27 = vld [vmem:[#allocation2 + $0xc2] sm:$0xff] }
 0x2a2   :  { %16604 = vmatmul.mubr.f32.gmra.mrb[24].mxu0 %v2257_v39  ;;  %17324 = vmatmul.mubr.f32.gmra.mrb[24].mxu1 %v5085_v40  ;;  %v2554_v39 = vld [vmem:[#allocation2 + $0xf1] sm:$0xff]  ;;  %v5381_v40 = vld [vmem:[#allocation2 + $0x2a1] sm:$0xff] }
 0x2a3   :  { %16606 = vmatprep.mubr.f32.mxu0 %v2258_v41  ;;  %17326 = vmatprep.mubr.f32.mxu1 %v5086_v42  ;;  %v2555_v41 = vld [vmem:[#allocation2 + $0xf9] sm:$0xff]  ;;  %v5382_v42 = vld [vmem:[#allocation2 + $0x2a9] sm:$0xff] }
 0x2a6   :  { %16607 = vmatmul.mubr.f32.gmra.mrb[26].mxu0 %v2259_v43  ;;  %17327 = vmatmul.mubr.f32.gmra.mrb[26].mxu1 %v5087_v44  ;;  %v2556_v43 = vld [vmem:[#allocation2 + $0x109] sm:$0xff]  ;;  %v5383_v44 = vld [vmem:[#allocation2 + $0x2b9] sm:$0xff] }
 0x2a7   :  { %16609 = vmatprep.mubr.f32.mxu0 %v2260_v45  ;;  %17329 = vmatprep.mubr.f32.mxu1 %v5088_v46  ;;  %v2557_v45 = vld [vmem:[#allocation2 + $0x111] sm:$0xff]  ;;  %v5384_v46 = vld [vmem:[#allocation2 + $0x2c1] sm:$0xff] }
 0x2aa   :  { %16610 = vmatmul.mubr.f32.gmra.mrb[28].mxu0 %v2261_v47  ;;  %17330 = vmatmul.mubr.f32.gmra.mrb[28].mxu1 %v5089_v48  ;;  %v2558_v47 = vld [vmem:[#allocation2 + $0x121] sm:$0xff]  ;;  %v5385_v48 = vld [vmem:[#allocation2 + $0x2d1] sm:$0xff] }
 0x2ab   :  { %16612 = vmatprep.mubr.f32.mxu0 %v21128_v49  ;;  %17332 = vmatprep.mubr.f32.mxu1 %v21128_v49 }
 0x2ae   :  { %16613 = vmatmul.mubr.f32.gmra.mrb[30].mxu0 %v21128_v49  ;;  %17333 = vmatmul.mubr.f32.gmra.mrb[30].mxu1 %v21128_v49  ;;  %v2559_v49 = vld [vmem:[#allocation2 + $0x129] sm:$0xff] }
 0x2af   :  { %16647 = vmatprep.mubr.f32.mxu0 %v2538_v50  ;;  %17367 = vmatprep.mubr.f32.mxu1 %v5365_v53  ;;  %v5386_v50 = vld [vmem:[#allocation2 + $0x2d9] sm:$0xff] }
 0x2b0   :  { %v2560_v53 = vld [vmem:[#allocation2 + $0x139] sm:$0xff] }
 0x2b2   :  { %16648 = vmatmul.mubr.f32.vlgmr.msra.gmra.mrb[0].mxu0 %v2539_v60  ;;  %17368 = vmatmul.mubr.f32.vlgmr.msra.gmra.mrb[0].mxu1 %v5366_v61  ;;  %v5388_v60 = vld [vmem:[#allocation2 + $0x2f1] sm:$0xff] }
 0x2b3   :  { %19194 = vmatpush3.bf16.msra.mxu0 %v22027_v9  ;;  %19482 = vmatpush3.bf16.msra.mxu1 %v22027_v9  ;;  %v19211_v9 = vpack.c.bf16 %v2888_v1, %v2887_v0  ;;  %v2562_v61 = vld [vmem:[#allocation2 + $0x151] sm:$0xff] }
 0x2b4   :  { %16650 = vmatprep.mubr.f32.mxu0 %v2540_v4  ;;  %17370 = vmatprep.mubr.f32.mxu1 %v5367_v33  ;;  %v5389_v4 = vld [vmem:[#allocation2 + $0x301] sm:$0xff]  ;;  %v2563_v33 = vld [vmem:[#allocation2 + $0x159] sm:$0xff]  ;;  %v2849_v1 = vld [vmem:[#allocation2 + $0x6a] sm:$0xff] }
 0x2b5   :  { %19196 = vmatprep.subr.bf16.mxu0 %v19195_v32  ;;  %19484 = vmatprep.subr.bf16.mxu1 %v19195_v32  ;;  %v5674_v0 = vld [vmem:[#allocation2 + $0x212] sm:$0xff] }
 0x2b6   :  { %16651 = vmatmul.mubr.f32.gmra.mrb[2].mxu0 %v2541_v12  ;;  %17371 = vmatmul.mubr.f32.gmra.mrb[2].mxu1 %v5368_v25  ;;  %v2565_v12 = vld [vmem:[#allocation2 + $0x171] sm:$0xff]  ;;  %v5392_v25 = vld [vmem:[#allocation2 + $0x321] sm:$0xff] }
 0x2b7   :  { %16653 = vmatprep.mubr.f32.mxu0 %v2542_v10  ;;  %17373 = vmatprep.mubr.f32.mxu1 %v5369_v24  ;;  %v2566_v10 = vld [vmem:[#allocation2 + $0x181] sm:$0xff]  ;;  %v5393_v24 = vld [vmem:[#allocation2 + $0x331] sm:$0xff] }
 0x2b8   :  { %19198 = vmatpush3.bf16.msra.mxu0 %v19195_v32  ;;  %19486 = vmatpush3.bf16.msra.mxu1 %v19195_v32  ;;  %v5390_v32 = vld [vmem:[#allocation2 + $0x309] sm:$0xff] }
 0x2b9   :  { %19200 = vmatprep.subr.bf16.mxu0 %v19199_v26  ;;  %19488 = vmatprep.subr.bf16.mxu1 %v19199_v26 }
 0x2ba   :  { %16654 = vmatmul.mubr.f32.gmra.mrb[4].mxu0 %v2543_v62  ;;  %17374 = vmatmul.mubr.f32.gmra.mrb[4].mxu1 %v5370_v31  ;;  %v5395_v62 = vld [vmem:[#allocation2 + $0x349] sm:$0xff]  ;;  %v2569_v31 = vld [vmem:[#allocation2 + $0x1a1] sm:$0xff] }
 0x2bb   :  { %16656 = vmatprep.mubr.f32.mxu0 %v2544_v3  ;;  %17376 = vmatprep.mubr.f32.mxu1 %v5371_v5  ;;  %v5396_v3 = vld [vmem:[#allocation2 + $0x351] sm:$0xff] }
 0x2bc   :  { %19202 = vmatpush3.bf16.msra.mxu0 %v19199_v26  ;;  %19490 = vmatpush3.bf16.msra.mxu1 %v19199_v26  ;;  %v2567_v26 = vld [vmem:[#allocation2 + $0x189] sm:$0xff]  ;;  %v2844_v5 = vld [vmem:[#allocation2 + $0x32] sm:$0xff] }
 0x2bd   :  { %19204 = vmatprep.subr.bf16.mxu0 %v19203_v11  ;;  %19492 = vmatprep.subr.bf16.mxu1 %v19203_v11 }
 0x2be   :  { %16657 = vmatmul.mubr.f32.gmra.mrb[6].mxu0 %v2545_v56  ;;  %17377 = vmatmul.mubr.f32.gmra.mrb[6].mxu1 %v5372_v57  ;;  %v2846_v56 = vld [vmem:[#allocation2 + $0x4a] sm:$0xff]  ;;  %v5672_v57 = vld [vmem:[#allocation2 + $0x1fa] sm:$0xff] }
 0x2bf   :  { %16659 = vmatprep.mubr.f32.mxu0 %v2546_v58  ;;  %17379 = vmatprep.mubr.f32.mxu1 %v5373_v59  ;;  %v2847_v58 = vld [vmem:[#allocation2 + $0x52] sm:$0xff]  ;;  %v5673_v59 = vld [vmem:[#allocation2 + $0x202] sm:$0xff] }
 0x2c0   :  { %19206 = vmatpush3.bf16.msra.mxu0 %v19203_v11  ;;  %19494 = vmatpush3.bf16.msra.mxu1 %v19203_v11  ;;  %v5670_v11 = vld [vmem:[#allocation2 + $0x1e2] sm:$0xff] }
 0x2c1   :  { %19208 = vmatprep.subr.bf16.mxu0 %v19207_v63  ;;  %19496 = vmatprep.subr.bf16.mxu1 %v19207_v63 }
 0x2c2   :  { %16660 = vmatmul.mubr.f32.gmra.mrb[8].mxu0 %v2547_v2  ;;  %17380 = vmatmul.mubr.f32.gmra.mrb[8].mxu1 %v5374_v6  ;;  %v5675_v2 = vld [vmem:[#allocation2 + $0x21a] sm:$0xff] }
 0x2c3   :  { %16662 = vmatprep.mubr.f32.mxu0 %v2548_v7  ;;  %17382 = vmatprep.mubr.f32.mxu1 %v5375_v8  ;;  %v2850_v6 = vld [vmem:[#allocation2 + $0x7a] sm:$0xff]  ;;  %v5676_v7 = vld [vmem:[#allocation2 + $0x22a] sm:$0xff]  ;;  %v2851_v8 = vld [vmem:[#allocation2 + $0x82] sm:$0xff] }
 0x2c4   :  { %19210 = vmatpush3.bf16.msra.mxu0 %v19207_v63  ;;  %19498 = vmatpush3.bf16.msra.mxu1 %v19207_v63  ;;  %v2848_v63 = vld [vmem:[#allocation2 + $0x62] sm:$0xff] }
 0x2c5   :  { %19212 = vmatprep.subr.bf16.mxu0 %v19211_v9  ;;  %19500 = vmatprep.subr.bf16.mxu1 %v19211_v9 }
 0x2c6   :  { %16663 = vmatmul.mubr.f32.gmra.mrb[10].mxu0 %v2549_v15  ;;  %17383 = vmatmul.mubr.f32.gmra.mrb[10].mxu1 %v5376_v16  ;;  %v2853_v15 = vld [vmem:[#allocation2 + $0x9a] sm:$0xff]  ;;  %v5679_v16 = vld [vmem:[#allocation2 + $0x24a] sm:$0xff] }
 0x2c7   :  { %16665 = vmatprep.mubr.f32.mxu0 %v2550_v20  ;;  %17385 = vmatprep.mubr.f32.mxu1 %v5377_v21  ;;  %v2854_v20 = vld [vmem:[#allocation2 + $0xaa] sm:$0xff]  ;;  %v5680_v21 = vld [vmem:[#allocation2 + $0x25a] sm:$0xff] }
 0x2c8   :  { %19214 = vmatpush3.bf16.msra.mxu0 %v19211_v9  ;;  %19502 = vmatpush3.bf16.msra.mxu1 %v19211_v9  ;;  %v5677_v9 = vld [vmem:[#allocation2 + $0x232] sm:$0xff] }
 0x2c9   :  { %19216 = vmatprep.subr.bf16.mxu0 %v19215_v22  ;;  %19504 = vmatprep.subr.bf16.mxu1 %v19215_v22 }
 0x2ca   :  { %16666 = vmatmul.mubr.f32.gmra.mrb[12].mxu0 %v2551_v28  ;;  %17386 = vmatmul.mubr.f32.gmra.mrb[12].mxu1 %v5378_v29  ;;  %v5682_v28 = vld [vmem:[#allocation2 + $0x272] sm:$0xff]  ;;  %v2857_v29 = vld [vmem:[#allocation2 + $0xca] sm:$0xff] }
 0x2cb   :  { %16668 = vmatprep.mubr.f32.mxu0 %v2552_v30  ;;  %17388 = vmatprep.mubr.f32.mxu1 %v5379_v34  ;;  %v5683_v30 = vld [vmem:[#allocation2 + $0x27a] sm:$0xff] }
 0x2cc   :  { %19218 = vmatpush3.bf16.msra.mxu0 %v19215_v22  ;;  %19506 = vmatpush3.bf16.msra.mxu1 %v19215_v22  ;;  %v2855_v22 = vld [vmem:[#allocation2 + $0xb2] sm:$0xff]  ;;  %v2858_v34 = vld [vmem:[#allocation2 + $0xda] sm:$0xff] }
 0x2cd   :  { %19220 = vmatprep.subr.bf16.mxu0 %v19219_v35  ;;  %19508 = vmatprep.subr.bf16.mxu1 %v19219_v35 }
 0x2ce   :  { %16669 = vmatmul.mubr.f32.gmra.mrb[14].mxu0 %v2553_v36  ;;  %17389 = vmatmul.mubr.f32.gmra.mrb[14].mxu1 %v5380_v37  ;;  %v2859_v36 = vld [vmem:[#allocation2 + $0xe2] sm:$0xff]  ;;  %v5685_v37 = vld [vmem:[#allocation2 + $0x292] sm:$0xff] }
 0x2cf   :  { %16671 = vmatprep.mubr.f32.mxu0 %v2554_v39  ;;  %17391 = vmatprep.mubr.f32.mxu1 %v5381_v40  ;;  %v2860_v39 = vld [vmem:[#allocation2 + $0xf2] sm:$0xff]  ;;  %v5686_v40 = vld [vmem:[#allocation2 + $0x2a2] sm:$0xff] }
 0x2d0   :  { %19222 = vmatpush3.bf16.msra.mxu0 %v19219_v35  ;;  %19510 = vmatpush3.bf16.msra.mxu1 %v19219_v35  ;;  %v5684_v35 = vld [vmem:[#allocation2 + $0x28a] sm:$0xff] }
 0x2d2   :  { %16672 = vmatmul.mubr.f32.gmra.mrb[16].mxu0 %v2555_v41  ;;  %17392 = vmatmul.mubr.f32.gmra.mrb[16].mxu1 %v5382_v42  ;;  %v2861_v41 = vld [vmem:[#allocation2 + $0xfa] sm:$0xff]  ;;  %v5687_v42 = vld [vmem:[#allocation2 + $0x2aa] sm:$0xff] }
 0x2d3   :  { %16674 = vmatprep.mubr.f32.mxu0 %v2556_v43  ;;  %17394 = vmatprep.mubr.f32.mxu1 %v5383_v44  ;;  %v2862_v43 = vld [vmem:[#allocation2 + $0x10a] sm:$0xff]  ;;  %v5688_v44 = vld [vmem:[#allocation2 + $0x2ba] sm:$0xff] }
 0x2d6   :  { %16675 = vmatmul.mubr.f32.gmra.mrb[18].mxu0 %v2557_v45  ;;  %17395 = vmatmul.mubr.f32.gmra.mrb[18].mxu1 %v5384_v46  ;;  %v2863_v45 = vld [vmem:[#allocation2 + $0x112] sm:$0xff]  ;;  %v5689_v46 = vld [vmem:[#allocation2 + $0x2c2] sm:$0xff] }
 0x2d7   :  { %16677 = vmatprep.mubr.f32.mxu0 %v2558_v47  ;;  %17397 = vmatprep.mubr.f32.mxu1 %v5385_v48  ;;  %v2864_v47 = vld [vmem:[#allocation2 + $0x122] sm:$0xff]  ;;  %v5690_v48 = vld [vmem:[#allocation2 + $0x2d2] sm:$0xff] }
 0x2da   :  { %16678 = vmatmul.mubr.f32.gmra.mrb[20].mxu0 %v2559_v49  ;;  %17398 = vmatmul.mubr.f32.gmra.mrb[20].mxu1 %v5386_v50  ;;  %v2865_v49 = vld [vmem:[#allocation2 + $0x12a] sm:$0xff]  ;;  %v5691_v50 = vld [vmem:[#allocation2 + $0x2da] sm:$0xff] }
 0x2db   :  { %16680 = vmatprep.mubr.f32.mxu0 %v2560_v53  ;;  %17400 = vmatprep.mubr.f32.mxu1 %v5387_v54  ;;  %v2866_v53 = vld [vmem:[#allocation2 + $0x13a] sm:$0xff]  ;;  %v5692_v54 = vld [vmem:[#allocation2 + $0x2ea] sm:$0xff] }
 0x2de   :  { %16681 = vmatmul.mubr.f32.gmra.mrb[22].mxu0 %v2561_v55  ;;  %17401 = vmatmul.mubr.f32.gmra.mrb[22].mxu1 %v5388_v60  ;;  %v2867_v55 = vld [vmem:[#allocation2 + $0x142] sm:$0xff]  ;;  %v5693_v60 = vld [vmem:[#allocation2 + $0x2f2] sm:$0xff] }
 0x2df   :  { %16683 = vmatprep.mubr.f32.mxu0 %v2562_v61  ;;  %17403 = vmatprep.mubr.f32.mxu1 %v5389_v4  ;;  %v2868_v61 = vld [vmem:[#allocation2 + $0x152] sm:$0xff]  ;;  %v5694_v4 = vld [vmem:[#allocation2 + $0x302] sm:$0xff] }
 0x2e2   :  { %16684 = vmatmul.mubr.f32.gmra.mrb[24].mxu0 %v2563_v33  ;;  %17404 = vmatmul.mubr.f32.gmra.mrb[24].mxu1 %v5390_v32  ;;  %v2869_v33 = vld [vmem:[#allocation2 + $0x15a] sm:$0xff]  ;;  %v5695_v32 = vld [vmem:[#allocation2 + $0x30a] sm:$0xff] }
 0x2e3   :  { %16686 = vmatprep.mubr.f32.mxu0 %v2564_v17  ;;  %17406 = vmatprep.mubr.f32.mxu1 %v5391_v18  ;;  %v2870_v17 = vld [vmem:[#allocation2 + $0x16a] sm:$0xff]  ;;  %v5696_v18 = vld [vmem:[#allocation2 + $0x31a] sm:$0xff] }
 0x2e6   :  { %16687 = vmatmul.mubr.f32.gmra.mrb[26].mxu0 %v2565_v12  ;;  %17407 = vmatmul.mubr.f32.gmra.mrb[26].mxu1 %v5392_v25  ;;  %v2871_v12 = vld [vmem:[#allocation2 + $0x172] sm:$0xff]  ;;  %v5697_v25 = vld [vmem:[#allocation2 + $0x322] sm:$0xff] }
 0x2e7   :  { %16689 = vmatprep.mubr.f32.mxu0 %v2566_v10  ;;  %17409 = vmatprep.mubr.f32.mxu1 %v5393_v24  ;;  %v2872_v10 = vld [vmem:[#allocation2 + $0x182] sm:$0xff]  ;;  %v5698_v24 = vld [vmem:[#allocation2 + $0x332] sm:$0xff] }
 0x2ea   :  { %16690 = vmatmul.mubr.f32.gmra.mrb[28].mxu0 %v2567_v26  ;;  %17410 = vmatmul.mubr.f32.gmra.mrb[28].mxu1 %v5394_v19  ;;  %v2873_v26 = vld [vmem:[#allocation2 + $0x18a] sm:$0xff]  ;;  %v5699_v19 = vld [vmem:[#allocation2 + $0x33a] sm:$0xff] }
 0x2eb   :  { %16692 = vmatprep.mubr.f32.mxu0 %v2568_v38  ;;  %17412 = vmatprep.mubr.f32.mxu1 %v5395_v62  ;;  %v2874_v38 = vld [vmem:[#allocation2 + $0x19a] sm:$0xff]  ;;  %v5700_v62 = vld [vmem:[#allocation2 + $0x34a] sm:$0xff] }
 0x2ee   :  { %16693 = vmatmul.mubr.f32.gmra.mrb[30].mxu0 %v2569_v31  ;;  %17413 = vmatmul.mubr.f32.gmra.mrb[30].mxu1 %v5396_v3  ;;  %v2875_v31 = vld [vmem:[#allocation2 + $0x1a2] sm:$0xff]  ;;  %v5701_v3 = vld [vmem:[#allocation2 + $0x352] sm:$0xff] }
 0x2ef   :  { %16727 = vmatprep.mubr.f32.mxu0 %v2844_v5  ;;  %17447 = vmatprep.mubr.f32.mxu1 %v5670_v11  ;;  %v6541_v5 = vld [vmem:[#allocation10 + $0x80] sm:$0xff]  ;;  %v6542_v11 = vld [vmem:[#allocation10 + $0x88] sm:$0xff] }
 0x2f2   :  { %16728 = vmatmul.mubr.f32.vlgmr.msra.gmra.mrb[0].mxu0 %v2845_v51  ;;  %17448 = vmatmul.mubr.f32.vlgmr.msra.gmra.mrb[0].mxu1 %v5671_v52  ;;  %v19511_v51 = vpack.c.bf16 %v6542_v11, %v6541_v5  ;;  %v6543_v52 = vld [vmem:[#allocation10 + $0x90] sm:$0xff] }
 0x2f3   :  { %16730 = vmatprep.mubr.f32.mxu0 %v2846_v56  ;;  %17450 = vmatprep.mubr.f32.mxu1 %v5672_v57  ;;  %v6544_v56 = vld [vmem:[#allocation10 + $0x98] sm:$0xff] }
 0x2f4   :  { %19512 = vmatprep.subr.bf16.mxu0 %v19511_v51  ;;  %19800 = vmatprep.subr.bf16.mxu1 %v19511_v51  ;;  %v19515_v57 = vpack.c.bf16 %v6544_v56, %v6543_v52  ;;  %v6553_v56 = vld [vmem:[#allocation10 + $0xe0] sm:$0xff] }
 0x2f5   :  { %19514 = vmatpush3.bf16.msra.mxu0 %v19511_v51  ;;  %19802 = vmatpush3.bf16.msra.mxu1 %v19511_v51 }
 0x2f6   :  { %16731 = vmatmul.mubr.f32.gmra.mrb[2].mxu0 %v2847_v58  ;;  %17451 = vmatmul.mubr.f32.gmra.mrb[2].mxu1 %v5673_v59  ;;  %v6545_v58 = vld [vmem:[#allocation10 + $0xa0] sm:$0xff]  ;;  %v6546_v59 = vld [vmem:[#allocation10 + $0xa8] sm:$0xff] }
 0x2f7   :  { %16733 = vmatprep.mubr.f32.mxu0 %v2848_v63  ;;  %17453 = vmatprep.mubr.f32.mxu1 %v5674_v0  ;;  %v19519_v63 = vpack.c.bf16 %v6546_v59, %v6545_v58 }
 0x2f8   :  { %19516 = vmatprep.subr.bf16.mxu0 %v19515_v57  ;;  %19804 = vmatprep.subr.bf16.mxu1 %v19515_v57 }
 0x2f9   :  { %19518 = vmatpush3.bf16.msra.mxu0 %v19515_v57  ;;  %19806 = vmatpush3.bf16.msra.mxu1 %v19515_v57  ;;  %v6554_v57 = vld [vmem:[#allocation10 + $0xe8] sm:$0xff] }
 0x2fa   :  { %16734 = vmatmul.mubr.f32.gmra.mrb[4].mxu0 %v2849_v1  ;;  %17454 = vmatmul.mubr.f32.gmra.mrb[4].mxu1 %v5675_v2 }
 0x2fb   :  { %16736 = vmatprep.mubr.f32.mxu0 %v2850_v6  ;;  %17456 = vmatprep.mubr.f32.mxu1 %v5676_v7 }
 0x2fc   :  { %19520 = vmatprep.subr.bf16.mxu0 %v19519_v63  ;;  %19808 = vmatprep.subr.bf16.mxu1 %v19519_v63 }
 0x2fd   :  { %19522 = vmatpush3.bf16.msra.mxu0 %v19519_v63  ;;  %19810 = vmatpush3.bf16.msra.mxu1 %v19519_v63  ;;  %v19535_v63 = vpack.c.bf16 %v6554_v57, %v6553_v56  ;;  %v6509_v56 = vld [vmem:[#allocation3 + $0x9] sm:$0xff]  ;;  %v9340_v57 = vld [vmem:[#allocation3 + $0x1b9] sm:$0xff] }
 0x2fe   :  { %16737 = vmatmul.mubr.f32.gmra.mrb[6].mxu0 %v2851_v8  ;;  %17457 = vmatmul.mubr.f32.gmra.mrb[6].mxu1 %v5677_v9 }
 0x2ff   :  { %16739 = vmatprep.mubr.f32.mxu0 %v2852_v13  ;;  %17459 = vmatprep.mubr.f32.mxu1 %v5678_v14 }
 0x302   :  { %16740 = vmatmul.mubr.f32.gmra.mrb[8].mxu0 %v2853_v15  ;;  %17460 = vmatmul.mubr.f32.gmra.mrb[8].mxu1 %v5679_v16  ;;  %v6547_v16 = vld [vmem:[#allocation10 + $0xb0] sm:$0xff] }
 0x303   :  { %16742 = vmatprep.mubr.f32.mxu0 %v2854_v20  ;;  %17462 = vmatprep.mubr.f32.mxu1 %v5680_v21  ;;  %v6548_v20 = vld [vmem:[#allocation10 + $0xb8] sm:$0xff] }
 0x304   :  { %v19523_v21 = vpack.c.bf16 %v6548_v20, %v6547_v16 }
 0x306   :  { %16743 = vmatmul.mubr.f32.gmra.mrb[10].mxu0 %v2855_v22  ;;  %17463 = vmatmul.mubr.f32.gmra.mrb[10].mxu1 %v5681_v23 }
 0x307   :  { %16745 = vmatprep.mubr.f32.mxu0 %v2856_v27  ;;  %17465 = vmatprep.mubr.f32.mxu1 %v5682_v28 }
 0x308   :  { %19524 = vmatprep.subr.bf16.mxu0 %v19523_v21  ;;  %19812 = vmatprep.subr.bf16.mxu1 %v19523_v21 }
 0x309   :  { %19526 = vmatpush3.bf16.msra.mxu0 %v19523_v21  ;;  %19814 = vmatpush3.bf16.msra.mxu1 %v19523_v21 }
 0x30a   :  { %16746 = vmatmul.mubr.f32.gmra.mrb[12].mxu0 %v2857_v29  ;;  %17466 = vmatmul.mubr.f32.gmra.mrb[12].mxu1 %v5683_v30 }
 0x30b   :  { %16748 = vmatprep.mubr.f32.mxu0 %v2858_v34  ;;  %17468 = vmatprep.mubr.f32.mxu1 %v5684_v35 }
 0x30e   :  { %16749 = vmatmul.mubr.f32.gmra.mrb[14].mxu0 %v2859_v36  ;;  %17469 = vmatmul.mubr.f32.gmra.mrb[14].mxu1 %v5685_v37 }
 0x30f   :  { %16751 = vmatprep.mubr.f32.mxu0 %v2860_v39  ;;  %17471 = vmatprep.mubr.f32.mxu1 %v5686_v40  ;;  %v6549_v39 = vld [vmem:[#allocation10 + $0xc0] sm:$0xff]  ;;  %v6550_v40 = vld [vmem:[#allocation10 + $0xc8] sm:$0xff] }
 0x312   :  { %16752 = vmatmul.mubr.f32.gmra.mrb[16].mxu0 %v2861_v41  ;;  %17472 = vmatmul.mubr.f32.gmra.mrb[16].mxu1 %v5687_v42  ;;  %v19527_v42 = vpack.c.bf16 %v6550_v40, %v6549_v39  ;;  %v6556_v39 = vld [vmem:[#allocation10 + $0xf8] sm:$0xff] }
 0x313   :  { %16754 = vmatprep.mubr.f32.mxu0 %v2862_v43  ;;  %17474 = vmatprep.mubr.f32.mxu1 %v5688_v44 }
 0x314   :  { %19528 = vmatprep.subr.bf16.mxu0 %v19527_v42  ;;  %19816 = vmatprep.subr.bf16.mxu1 %v19527_v42 }
 0x315   :  { %19530 = vmatpush3.bf16.msra.mxu0 %v19527_v42  ;;  %19818 = vmatpush3.bf16.msra.mxu1 %v19527_v42 }
 0x316   :  { %16755 = vmatmul.mubr.f32.gmra.mrb[18].mxu0 %v2863_v45  ;;  %17475 = vmatmul.mubr.f32.gmra.mrb[18].mxu1 %v5689_v46 }
 0x317   :  { %16757 = vmatprep.mubr.f32.mxu0 %v2864_v47  ;;  %17477 = vmatprep.mubr.f32.mxu1 %v5690_v48 }
 0x31a   :  { %16758 = vmatmul.mubr.f32.gmra.mrb[20].mxu0 %v2865_v49  ;;  %17478 = vmatmul.mubr.f32.gmra.mrb[20].mxu1 %v5691_v50 }
 0x31b   :  { %16760 = vmatprep.mubr.f32.mxu0 %v2866_v53  ;;  %17480 = vmatprep.mubr.f32.mxu1 %v5692_v54 }
 0x31e   :  { %16761 = vmatmul.mubr.f32.gmra.mrb[22].mxu0 %v2867_v55  ;;  %17481 = vmatmul.mubr.f32.gmra.mrb[22].mxu1 %v5693_v60 }
 0x31f   :  { %16763 = vmatprep.mubr.f32.mxu0 %v2868_v61  ;;  %17483 = vmatprep.mubr.f32.mxu1 %v5694_v4  ;;  %v6551_v4 = vld [vmem:[#allocation10 + $0xd0] sm:$0xff] }
 0x322   :  { %16764 = vmatmul.mubr.f32.gmra.mrb[24].mxu0 %v2869_v33  ;;  %17484 = vmatmul.mubr.f32.gmra.mrb[24].mxu1 %v5695_v32  ;;  %v6552_v33 = vld [vmem:[#allocation10 + $0xd8] sm:$0xff] }
 0x323   :  { %16766 = vmatprep.mubr.f32.mxu0 %v2870_v17  ;;  %17486 = vmatprep.mubr.f32.mxu1 %v5696_v18  ;;  %v19531_v18 = vpack.c.bf16 %v6552_v33, %v6551_v4 }
 0x325   :  { %19532 = vmatprep.subr.bf16.mxu0 %v19531_v18  ;;  %19820 = vmatprep.subr.bf16.mxu1 %v19531_v18 }
 0x326   :  { %16767 = vmatmul.mubr.f32.gmra.mrb[26].mxu0 %v2871_v12  ;;  %17487 = vmatmul.mubr.f32.gmra.mrb[26].mxu1 %v5697_v25 }
 0x327   :  { %16769 = vmatprep.mubr.f32.mxu0 %v2872_v10  ;;  %17489 = vmatprep.mubr.f32.mxu1 %v5698_v24 }
 0x328   :  { %19534 = vmatpush3.bf16.msra.mxu0 %v19531_v18  ;;  %19822 = vmatpush3.bf16.msra.mxu1 %v19531_v18 }
 0x329   :  { %19536 = vmatprep.subr.bf16.mxu0 %v19535_v63  ;;  %19824 = vmatprep.subr.bf16.mxu1 %v19535_v63 }
 0x32a   :  { %16770 = vmatmul.mubr.f32.gmra.mrb[28].mxu0 %v2873_v26  ;;  %17490 = vmatmul.mubr.f32.gmra.mrb[28].mxu1 %v5699_v19 }
 0x32b   :  { %16772 = vmatprep.mubr.f32.mxu0 %v2874_v38  ;;  %17492 = vmatprep.mubr.f32.mxu1 %v5700_v62 }
 0x32c   :  { %19538 = vmatpush3.bf16.msra.mxu0 %v19535_v63  ;;  %19826 = vmatpush3.bf16.msra.mxu1 %v19535_v63 }
 0x32e   :  { %16773 = vmatmul.mubr.f32.gmra.mrb[30].mxu0 %v2875_v31  ;;  %17493 = vmatmul.mubr.f32.gmra.mrb[30].mxu1 %v5701_v3 }
 0x3c5   :  { %v22033_v0 = vpop.f32.mrb[0].mxu0  ;;  %v22035_v1 = vpop.f32.mrb[0].mxu1 }
 0x3c6   :  { %v3222_v2 = vmul.f32 %v22033_v0, %v22033_v0  ;;  %v6047_v6 = vmul.f32 %v22035_v1, %v22035_v1  ;;  %v22041_v7 = vpop.f32.mrb[1].mxu0  ;;  %v22043_v8 = vpop.f32.mrb[1].mxu1 }
 0x3c7   :  { %v3183_v9 = vadd.f32 %v22033_v0, %v22041_v7  ;;  %v3221_v13 = vmul.f32 %v22041_v7, %v22041_v7  ;;  %v6008_v14 = vadd.f32 %v22035_v1, %v22043_v8  ;;  %v6046_v15 = vmul.f32 %v22043_v8, %v22043_v8 }
 0x3c9   :  { %v3253_v22 = vadd.f32 %v3222_v2, %v3221_v13  ;;  %v6078_v23 = vadd.f32 %v6047_v6, %v6046_v15  ;;  %v22053_v27 = vpop.f32.mrb[2].mxu0  ;;  %v22055_v28 = vpop.f32.mrb[2].mxu1 }
 0x3ca   :  { %v22057_v29 = vpop.f32.mrb[3].mxu0  ;;  %v22059_v30 = vpop.f32.mrb[3].mxu1  ;;  %v3224_v41 = vmul.f32 %v22053_v27, %v22053_v27  ;;  %v6049_v49 = vmul.f32 %v22055_v28, %v22055_v28 }
 0x3cb   :  { %v3184_v34 = vadd.f32 %v3183_v9, %v22057_v29  ;;  %v3223_v35 = vmul.f32 %v22057_v29, %v22057_v29  ;;  %v6009_v36 = vadd.f32 %v6008_v14, %v22059_v30  ;;  %v6048_v37 = vmul.f32 %v22059_v30, %v22059_v30 }
 0x3cd   :  { %v3254_v43 = vadd.f32 %v3253_v22, %v3223_v35  ;;  %v6079_v44 = vadd.f32 %v6078_v23, %v6048_v37  ;;  %v22069_v45 = vpop.f32.mrb[4].mxu0  ;;  %v22071_v46 = vpop.f32.mrb[4].mxu1  ;;  %v3185_v47 = vadd.f32 %v22053_v27, %v3184_v34  ;;  %v6010_v48 = vadd.f32 %v22055_v28, %v6009_v36  ;;  %v6555_v37 = vld [vmem:[#allocation10 + $0xf0] sm:$0xff] }
 0x3ce   :  { %25605 = vst [vmem:[#allocation23_spill] sm:$0xff] %v22071_v46  ;;  %v22077_v50 = vpop.f32.mrb[5].mxu0  ;;  %v22079_v53 = vpop.f32.mrb[5].mxu1  ;;  %v3226_v12 = vmul.f32 %v22069_v45, %v22069_v45  ;;  %v6051_v38 = vmul.f32 %v22071_v46, %v22071_v46  ;;  %v19539_v42 = vpack.c.bf16 %v6556_v39, %v6555_v37 }
 0x3cf   :  { %v3186_v54 = vadd.f32 %v3185_v47, %v22077_v50  ;;  %v3225_v55 = vmul.f32 %v22077_v50, %v22077_v50  ;;  %v3255_v60 = vadd.f32 %v3254_v43, %v3224_v41  ;;  %v6011_v61 = vadd.f32 %v6010_v48, %v22079_v53 }
 0x3d0   :  { %v6050_v32 = vmul.f32 %v22079_v53, %v22079_v53  ;;  %v6080_v17 = vadd.f32 %v6079_v44, %v6049_v49  ;;  %19540 = vmatprep.subr.bf16.mxu0 %v19539_v42  ;;  %19828 = vmatprep.subr.bf16.mxu1 %v19539_v42 }
 0x3d1   :  { %v3256_v25 = vadd.f32 %v3255_v60, %v3225_v55  ;;  %v22089_v10 = vpop.f32.mrb[6].mxu0  ;;  %v22091_v24 = vpop.f32.mrb[6].mxu1  ;;  %v3187_v26 = vadd.f32 %v22069_v45, %v3186_v54  ;;  %v6012_v19 = vadd.f32 %v22071_v46, %v6011_v61  ;;  %19542 = vmatpush3.bf16.msra.mxu0 %v19539_v42  ;;  %19830 = vmatpush3.bf16.msra.mxu1 %v19539_v42  ;;  %v6493_v42 = vld [vmem:[#allocation10 + $0x8] sm:$0xff] }
 0x3d2   :  { %25606 = vst [vmem:[#allocation24_spill] sm:$0xff] %v22091_v24  ;;  %v6081_v62 = vadd.f32 %v6080_v17, %v6050_v32  ;;  %v22097_v31 = vpop.f32.mrb[7].mxu0  ;;  %v22099_v3 = vpop.f32.mrb[7].mxu1  ;;  %v3228_v2 = vmul.f32 %v22089_v10, %v22089_v10  ;;  %v6053_v16 = vmul.f32 %v22091_v24, %v22091_v24 }
 0x3d3   :  { %25607 = vst [vmem:[#allocation25_spill] sm:$0xff] %v22099_v3  ;;  %v3188_v5 = vadd.f32 %v3187_v26, %v22097_v31  ;;  %v3227_v11 = vmul.f32 %v22097_v31, %v22097_v31  ;;  %v3257_v51 = vadd.f32 %v3256_v25, %v3226_v12  ;;  %v6013_v52 = vadd.f32 %v6012_v19, %v22099_v3  ;;  %v6508_v19 = vld [vmem:[#allocation3 + $0x1] sm:$0xff] }
 0x3d4   :  { %v6052_v58 = vmul.f32 %v22099_v3, %v22099_v3  ;;  %v6082_v59 = vadd.f32 %v6081_v62, %v6051_v38  ;;  %v9339_v38 = vld [vmem:[#allocation3 + $0x1b1] sm:$0xff]  ;;  %17527 = vmatprep.mubr.f32.mxu0 %v6508_v19 }
 0x3d5   :  { %v3258_v6 = vadd.f32 %v3257_v51, %v3227_v11  ;;  %v22109_v9 = vpop.f32.mrb[8].mxu0  ;;  %v22111_v13 = vpop.f32.mrb[8].mxu1  ;;  %v3189_v14 = vadd.f32 %v22089_v10, %v3188_v5  ;;  %v6014_v15 = vadd.f32 %v22091_v24, %v6013_v52  ;;  %18247 = vmatprep.mubr.f32.mxu1 %v9339_v38  ;;  %17528 = vmatmul.mubr.f32.vlgmr.msra.gmra.mrb[32].mxu0 %v6509_v56 }
 0x3d6   :  { %25608 = vst [vmem:[#allocation26_spill] sm:$0xff] %v22111_v13  ;;  %v6083_v20 = vadd.f32 %v6082_v59, %v6052_v58  ;;  %v22117_v21 = vpop.f32.mrb[9].mxu0  ;;  %v22119_v22 = vpop.f32.mrb[9].mxu1  ;;  %v3230_v43 = vmul.f32 %v22109_v9, %v22109_v9  ;;  %v6055_v55 = vmul.f32 %v22111_v13, %v22111_v13  ;;  %18248 = vmatmul.mubr.f32.vlgmr.msra.gmra.mrb[32].mxu1 %v9340_v57 }
 0x3d7   :  { %25609 = vst [vmem:[#allocation27_spill] sm:$0xff] %v22119_v22  ;;  %v3190_v23 = vadd.f32 %v3189_v14, %v22117_v21  ;;  %v3229_v34 = vmul.f32 %v22117_v21, %v22117_v21  ;;  %v3259_v35 = vadd.f32 %v3258_v6, %v3228_v2  ;;  %v6015_v36 = vadd.f32 %v6014_v15, %v22119_v22 }
 0x3d8   :  { %v6054_v40 = vmul.f32 %v22119_v22, %v22119_v22  ;;  %v6084_v41 = vadd.f32 %v6083_v20, %v6053_v16  ;;  %v6507_v22 = vld [vmem:[#allocation10 + $0x78] sm:$0xff] }
 0x3d9   :  { %v3260_v44 = vadd.f32 %v3259_v35, %v3229_v34  ;;  %v22129_v47 = vpop.f32.mrb[10].mxu0  ;;  %v22131_v48 = vpop.f32.mrb[10].mxu1  ;;  %v3191_v49 = vadd.f32 %v22109_v9, %v3190_v23  ;;  %v6016_v54 = vadd.f32 %v22111_v13, %v6015_v36 }
 0x3da   :  { %25610 = vst [vmem:[#allocation28_spill] sm:$0xff] %v22131_v48  ;;  %v6085_v60 = vadd.f32 %v6084_v41, %v6054_v40  ;;  %v22137_v61 = vpop.f32.mrb[11].mxu0  ;;  %v22139_v4 = vpop.f32.mrb[11].mxu1  ;;  %v3232_v12 = vmul.f32 %v22129_v47, %v22129_v47  ;;  %v6057_v58 = vmul.f32 %v22131_v48, %v22131_v48  ;;  %v6492_v41 = vld [vmem:[#allocation10] sm:$0xff] }
 0x3db   :  { %25611 = vst [vmem:[#allocation29_spill] sm:$0xff] %v22139_v4  ;;  %v3192_v33 = vadd.f32 %v3191_v49, %v22137_v61  ;;  %v3231_v32 = vmul.f32 %v22137_v61, %v22137_v61  ;;  %v3261_v17 = vadd.f32 %v3260_v44, %v3230_v43  ;;  %v6017_v18 = vadd.f32 %v6016_v54, %v22139_v4  ;;  %v6494_v43 = vld [vmem:[#allocation10 + $0x10] sm:$0xff] }
 0x3dc   :  { %v6056_v25 = vmul.f32 %v22139_v4, %v22139_v4  ;;  %v6086_v26 = vadd.f32 %v6085_v60, %v6055_v55 }
 0x3dd   :  { %v3262_v62 = vadd.f32 %v3261_v17, %v3231_v32  ;;  %v22149_v5 = vpop.f32.mrb[12].mxu0  ;;  %v22151_v11 = vpop.f32.mrb[12].mxu1  ;;  %v3193_v51 = vadd.f32 %v22129_v47, %v3192_v33  ;;  %v6018_v52 = vadd.f32 %v22131_v48, %v6017_v18  ;;  %v19543_v33 = vpack.c.bf16 %v6493_v42, %v6492_v41  ;;  %v6495_v32 = vld [vmem:[#allocation10 + $0x18] sm:$0xff] }
 0x3de   :  { %25612 = vst [vmem:[#allocation30_spill] sm:$0xff] %v22151_v11  ;;  %v6087_v59 = vadd.f32 %v6086_v26, %v6056_v25  ;;  %v22157_v63 = vpop.f32.mrb[13].mxu0  ;;  %v22159_v2 = vpop.f32.mrb[13].mxu1  ;;  %v3234_v34 = vmul.f32 %v22149_v5, %v22149_v5  ;;  %v6059_v44 = vmul.f32 %v22151_v11, %v22151_v11  ;;  %v19547_v38 = vpack.c.bf16 %v6495_v32, %v6494_v43 }
 0x3df   :  { %25613 = vst [vmem:[#allocation31_spill] sm:$0xff] %v22159_v2  ;;  %v3194_v6 = vadd.f32 %v3193_v51, %v22157_v63  ;;  %v3233_v14 = vmul.f32 %v22157_v63, %v22157_v63  ;;  %v3263_v15 = vadd.f32 %v3262_v62, %v3232_v12  ;;  %v6019_v16 = vadd.f32 %v6018_v52, %v22159_v2 }
 0x3e0   :  { %v6058_v20 = vmul.f32 %v22159_v2, %v22159_v2  ;;  %v6088_v23 = vadd.f32 %v6087_v59, %v6057_v58  ;;  %19544 = vmatprep.subr.bf16.mxu0 %v19543_v33  ;;  %19832 = vmatprep.subr.bf16.mxu1 %v19543_v33  ;;  %v6496_v58 = vld [vmem:[#allocation10 + $0x20] sm:$0xff]  ;;  %v6497_v59 = vld [vmem:[#allocation10 + $0x28] sm:$0xff] }
 0x3e1   :  { %v3264_v35 = vadd.f32 %v3263_v15, %v3233_v14  ;;  %v22169_v36 = vpop.f32.mrb[14].mxu0  ;;  %v22171_v37 = vpop.f32.mrb[14].mxu1  ;;  %v3195_v39 = vadd.f32 %v22149_v5, %v3194_v6  ;;  %v6020_v40 = vadd.f32 %v22151_v11, %v6019_v16  ;;  %19546 = vmatpush3.bf16.msra.mxu0 %v19543_v33  ;;  %19834 = vmatpush3.bf16.msra.mxu1 %v19543_v33 }
 0x3e2   :  { %25614 = vst [vmem:[#allocation32_spill] sm:$0xff] %v22171_v37  ;;  %v6089_v49 = vadd.f32 %v6088_v23, %v6058_v20  ;;  %v3236_v54 = vmul.f32 %v22169_v36, %v22169_v36  ;;  %v22179_v55 = vpop.f32.mrb[15].mxu0  ;;  %v22181_v60 = vpop.f32.mrb[15].mxu1  ;;  %v6061_v6 = vmul.f32 %v22171_v37, %v22171_v37  ;;  %19548 = vmatprep.subr.bf16.mxu0 %v19547_v38 }
 0x3e3   :  { %25615 = vst [vmem:[#allocation33_spill] sm:$0xff] %v22181_v60  ;;  %v3196_v17 = vadd.f32 %v3195_v39, %v22179_v55  ;;  %v3235_v18 = vmul.f32 %v22179_v55, %v22179_v55  ;;  %v3265_v12 = vadd.f32 %v3264_v35, %v3234_v34  ;;  %v6021_v25 = vadd.f32 %v6020_v40, %v22181_v60 }
 0x3e4   :  { %v6060_v26 = vmul.f32 %v22181_v60, %v22181_v60  ;;  %v6090_v19 = vadd.f32 %v6089_v49, %v6059_v44  ;;  %19836 = vmatprep.subr.bf16.mxu1 %v19547_v38  ;;  %v19551_v42 = vpack.c.bf16 %v6497_v59, %v6496_v58 }
 0x3e5   :  { %v3266_v62 = vadd.f32 %v3265_v12, %v3235_v18  ;;  %v22189_v51 = vpop.f32.mrb[16].mxu0  ;;  %v22191_v52 = vpop.f32.mrb[16].mxu1  ;;  %v3197_v56 = vadd.f32 %v22169_v36, %v3196_v17  ;;  %v6022_v57 = vadd.f32 %v22171_v37, %v6021_v25  ;;  %19550 = vmatpush3.bf16.msra.mxu0 %v19547_v38  ;;  %19838 = vmatpush3.bf16.msra.mxu1 %v19547_v38  ;;  %v6499_v38 = vld [vmem:[#allocation10 + $0x38] sm:$0xff] }
 0x3e6   :  { %25616 = vst [vmem:[#allocation34_spill] sm:$0xff] %v22191_v52  ;;  %v6091_v14 = vadd.f32 %v6090_v19, %v6060_v26  ;;  %v22197_v15 = vpop.f32.mrb[17].mxu0  ;;  %v22199_v16 = vpop.f32.mrb[17].mxu1  ;;  %v3238_v39 = vmul.f32 %v22189_v51, %v22189_v51  ;;  %19552 = vmatprep.subr.bf16.mxu0 %v19551_v42  ;;  %19840 = vmatprep.subr.bf16.mxu1 %v19551_v42 }
 0x3e7   :  { %25617 = vst [vmem:[#allocation35_spill] sm:$0xff] %v22199_v16  ;;  %v3198_v20 = vadd.f32 %v3197_v56, %v22197_v15  ;;  %v3237_v23 = vmul.f32 %v22197_v15, %v22197_v15  ;;  %v3267_v34 = vadd.f32 %v3266_v62, %v3236_v54  ;;  %v6023_v35 = vadd.f32 %v6022_v57, %v22199_v16  ;;  %v6498_v56 = vld [vmem:[#allocation10 + $0x30] sm:$0xff] }
 0x3e8   :  { %v6062_v40 = vmul.f32 %v22199_v16, %v22199_v16  ;;  %v6092_v41 = vadd.f32 %v6091_v14, %v6061_v6  ;;  %v6063_v54 = vmul.f32 %v22191_v52, %v22191_v52  ;;  %v19555_v6 = vpack.c.bf16 %v6499_v38, %v6498_v56 }
 0x3e9   :  { %v3268_v43 = vadd.f32 %v3267_v34, %v3237_v23  ;;  %v22209_v44 = vpop.f32.mrb[18].mxu0  ;;  %v22211_v49 = vpop.f32.mrb[18].mxu1  ;;  %v3199_v33 = vadd.f32 %v22189_v51, %v3198_v20  ;;  %v6024_v32 = vadd.f32 %v22191_v52, %v6023_v35  ;;  %19554 = vmatpush3.bf16.msra.mxu0 %v19551_v42  ;;  %19842 = vmatpush3.bf16.msra.mxu1 %v19551_v42 }
 0x3ea   :  { %25618 = vst [vmem:[#allocation36_spill] sm:$0xff] %v22211_v49  ;;  %v6093_v17 = vadd.f32 %v6092_v41, %v6062_v40  ;;  %v22217_v18 = vpop.f32.mrb[19].mxu0  ;;  %v22219_v12 = vpop.f32.mrb[19].mxu1  ;;  %v3240_v57 = vmul.f32 %v22209_v44, %v22209_v44  ;;  %19556 = vmatprep.subr.bf16.mxu0 %v19555_v6  ;;  %19844 = vmatprep.subr.bf16.mxu1 %v19555_v6 }
 0x3eb   :  { %25619 = vst [vmem:[#allocation37_spill] sm:$0xff] %v22219_v12  ;;  %v3200_v25 = vadd.f32 %v3199_v33, %v22217_v18  ;;  %v3239_v26 = vmul.f32 %v22217_v18, %v22217_v18  ;;  %v3269_v19 = vadd.f32 %v3268_v43, %v3238_v39  ;;  %v6025_v62 = vadd.f32 %v6024_v32, %v22219_v12 }
 0x3ec   :  { %v6064_v58 = vmul.f32 %v22219_v12, %v22219_v12  ;;  %v6094_v59 = vadd.f32 %v6093_v17, %v6063_v54  ;;  %v6065_v39 = vmul.f32 %v22211_v49, %v22211_v49 }
 0x3ed   :  { %v3270_v14 = vadd.f32 %v3269_v19, %v3239_v26  ;;  %v22229_v20 = vpop.f32.mrb[20].mxu0  ;;  %v22231_v23 = vpop.f32.mrb[20].mxu1  ;;  %v3201_v34 = vadd.f32 %v22209_v44, %v3200_v25  ;;  %v6026_v35 = vadd.f32 %v22211_v49, %v6025_v62  ;;  %19558 = vmatpush3.bf16.msra.mxu0 %v19555_v6  ;;  %19846 = vmatpush3.bf16.msra.mxu1 %v19555_v6 }
 0x3ee   :  { %25620 = vst [vmem:[#allocation38_spill] sm:$0xff] %v22231_v23  ;;  %v6095_v40 = vadd.f32 %v6094_v59, %v6064_v58  ;;  %v22237_v41 = vpop.f32.mrb[21].mxu0  ;;  %v22239_v43 = vpop.f32.mrb[21].mxu1  ;;  %v3242_v42 = vmul.f32 %v22229_v20, %v22229_v20 }
 0x3ef   :  { %25621 = vst [vmem:[#allocation39_spill] sm:$0xff] %v22239_v43  ;;  %v3202_v33 = vadd.f32 %v3201_v34, %v22237_v41  ;;  %v3241_v32 = vmul.f32 %v22237_v41, %v22237_v41  ;;  %v3271_v54 = vadd.f32 %v3270_v14, %v3240_v57  ;;  %v6027_v17 = vadd.f32 %v6026_v35, %v22239_v43 }
 0x3f0   :  { %v6066_v25 = vmul.f32 %v22239_v43, %v22239_v43  ;;  %v6096_v26 = vadd.f32 %v6095_v40, %v6065_v39  ;;  %v6067_v57 = vmul.f32 %v22231_v23, %v22231_v23 }
 0x3f1   :  { %v3272_v19 = vadd.f32 %v3271_v54, %v3241_v32  ;;  %v22249_v62 = vpop.f32.mrb[22].mxu0  ;;  %v22251_v56 = vpop.f32.mrb[22].mxu1  ;;  %v3203_v38 = vadd.f32 %v22229_v20, %v3202_v33  ;;  %v6028_v58 = vadd.f32 %v22231_v23, %v6027_v17  ;;  %v6500_v32 = vld [vmem:[#allocation10 + $0x40] sm:$0xff]  ;;  %v6501_v54 = vld [vmem:[#allocation10 + $0x48] sm:$0xff] }
 0x3f2   :  { %25622 = vst [vmem:[#allocation40_spill] sm:$0xff] %v22251_v56  ;;  %v6097_v59 = vadd.f32 %v6096_v26, %v6066_v25  ;;  %v22257_v14 = vpop.f32.mrb[23].mxu0  ;;  %v22259_v34 = vpop.f32.mrb[23].mxu1  ;;  %v19559_v23 = vpack.c.bf16 %v6501_v54, %v6500_v32  ;;  %v3244_v25 = vmul.f32 %v22249_v62, %v22249_v62 }
 0x3f3   :  { %25623 = vst [vmem:[#allocation41_spill] sm:$0xff] %v22259_v34  ;;  %v3204_v35 = vadd.f32 %v3203_v38, %v22257_v14  ;;  %v3243_v39 = vmul.f32 %v22257_v14, %v22257_v14  ;;  %v3273_v40 = vadd.f32 %v3272_v19, %v3242_v42  ;;  %v6029_v33 = vadd.f32 %v6028_v58, %v22259_v34 }
 0x3f4   :  { %v6068_v6 = vmul.f32 %v22259_v34, %v22259_v34  ;;  %v6098_v17 = vadd.f32 %v6097_v59, %v6067_v57  ;;  %v6069_v19 = vmul.f32 %v22251_v56, %v22251_v56  ;;  %19560 = vmatprep.subr.bf16.mxu0 %v19559_v23  ;;  %19848 = vmatprep.subr.bf16.mxu1 %v19559_v23 }
 0x3f5   :  { %v3274_v26 = vadd.f32 %v3273_v40, %v3243_v39  ;;  %v22269_v43 = vpop.f32.mrb[24].mxu0  ;;  %v22271_v38 = vpop.f32.mrb[24].mxu1  ;;  %v3205_v49 = vadd.f32 %v22249_v62, %v3204_v35  ;;  %v6030_v42 = vadd.f32 %v22251_v56, %v6029_v33  ;;  %19562 = vmatpush3.bf16.msra.mxu0 %v19559_v23  ;;  %19850 = vmatpush3.bf16.msra.mxu1 %v19559_v23 }
 0x3f6   :  { %25624 = vst [vmem:[#allocation42_spill] sm:$0xff] %v22271_v38  ;;  %v6099_v58 = vadd.f32 %v6098_v17, %v6068_v6  ;;  %v22277_v12 = vpop.f32.mrb[25].mxu0  ;;  %v22279_v57 = vpop.f32.mrb[25].mxu1  ;;  %v3246_v54 = vmul.f32 %v22269_v43, %v22269_v43 }
 0x3f7   :  { %25625 = vst [vmem:[#allocation43_spill] sm:$0xff] %v22279_v57  ;;  %v3206_v59 = vadd.f32 %v3205_v49, %v22277_v12  ;;  %v3245_v39 = vmul.f32 %v22277_v12, %v22277_v12  ;;  %v3275_v40 = vadd.f32 %v3274_v26, %v3244_v25  ;;  %v6031_v35 = vadd.f32 %v6030_v42, %v22279_v57 }
 0x3f8   :  { %v6070_v33 = vmul.f32 %v22279_v57, %v22279_v57  ;;  %v6100_v32 = vadd.f32 %v6099_v58, %v6069_v19  ;;  %v6071_v26 = vmul.f32 %v22271_v38, %v22271_v38  ;;  %v6502_v57 = vld [vmem:[#allocation10 + $0x50] sm:$0xff] }
 0x3f9   :  { %v3276_v6 = vadd.f32 %v3275_v40, %v3245_v39  ;;  %v22289_v17 = vpop.f32.mrb[26].mxu0  ;;  %v22291_v56 = vpop.f32.mrb[26].mxu1  ;;  %v3207_v49 = vadd.f32 %v22269_v43, %v3206_v59  ;;  %v6032_v25 = vadd.f32 %v22271_v38, %v6031_v35  ;;  %v6503_v59 = vld [vmem:[#allocation10 + $0x58] sm:$0xff] }
 0x3fa   :  { %25626 = vst [vmem:[#allocation44_spill] sm:$0xff] %v22291_v56  ;;  %v6101_v42 = vadd.f32 %v6100_v32, %v6070_v33  ;;  %v22297_v34 = vpop.f32.mrb[27].mxu0  ;;  %v22299_v19 = vpop.f32.mrb[27].mxu1  ;;  %v19563_v38 = vpack.c.bf16 %v6503_v59, %v6502_v57  ;;  %v3248_v33 = vmul.f32 %v22289_v17, %v22289_v17 }
 0x3fb   :  { %25627 = vst [vmem:[#allocation45_spill] sm:$0xff] %v22299_v19  ;;  %v3208_v23 = vadd.f32 %v3207_v49, %v22297_v34  ;;  %v3247_v58 = vmul.f32 %v22297_v34, %v22297_v34  ;;  %v3277_v39 = vadd.f32 %v3276_v6, %v3246_v54  ;;  %v6033_v40 = vadd.f32 %v6032_v25, %v22299_v19 }
 0x3fc   :  { %v6072_v35 = vmul.f32 %v22299_v19, %v22299_v19  ;;  %v6102_v52 = vadd.f32 %v6101_v42, %v6071_v26  ;;  %v6073_v6 = vmul.f32 %v22291_v56, %v22291_v56  ;;  %19564 = vmatprep.subr.bf16.mxu0 %v19563_v38  ;;  %19852 = vmatprep.subr.bf16.mxu1 %v19563_v38 }
 0x3fd   :  { %v3278_v32 = vadd.f32 %v3277_v39, %v3247_v58  ;;  %v22309_v16 = vpop.f32.mrb[28].mxu0  ;;  %v22311_v49 = vpop.f32.mrb[28].mxu1  ;;  %v3209_v37 = vadd.f32 %v22289_v17, %v3208_v23  ;;  %v6034_v54 = vadd.f32 %v22291_v56, %v6033_v40  ;;  %19566 = vmatpush3.bf16.msra.mxu0 %v19563_v38  ;;  %19854 = vmatpush3.bf16.msra.mxu1 %v19563_v38 }
 0x3fe   :  { %25628 = vst [vmem:[#allocation46_spill] sm:$0xff] %v22311_v49  ;;  %v6103_v25 = vadd.f32 %v6102_v52, %v6072_v35  ;;  %v22317_v60 = vpop.f32.mrb[29].mxu0  ;;  %v22319_v26 = vpop.f32.mrb[29].mxu1  ;;  %v3250_v52 = vmul.f32 %v22309_v16, %v22309_v16 }
 0x3ff   :  { %25629 = vst [vmem:[#allocation47_spill] sm:$0xff] %v22319_v26  ;;  %v3210_v57 = vadd.f32 %v3209_v37, %v22317_v60  ;;  %v3249_v42 = vmul.f32 %v22317_v60, %v22317_v60  ;;  %v3279_v58 = vadd.f32 %v3278_v32, %v3248_v33  ;;  %v6035_v23 = vadd.f32 %v6034_v54, %v22319_v26 }
 0x400   :  { %v6074_v39 = vmul.f32 %v22319_v26, %v22319_v26  ;;  %v6104_v40 = vadd.f32 %v6103_v25, %v6073_v6  ;;  %v6075_v32 = vmul.f32 %v22311_v49, %v22311_v49  ;;  %v6504_v26 = vld [vmem:[#allocation10 + $0x60] sm:$0xff] }
 0x401   :  { %v3280_v59 = vadd.f32 %v3279_v58, %v3249_v42  ;;  %v22329_v35 = vpop.f32.mrb[30].mxu0  ;;  %v22331_v56 = vpop.f32.mrb[30].mxu1  ;;  %v3211_v37 = vadd.f32 %v22309_v16, %v3210_v57  ;;  %v6036_v33 = vadd.f32 %v22311_v49, %v6035_v23  ;;  %v6505_v57 = vld [vmem:[#allocation10 + $0x68] sm:$0xff] }
 0x402   :  { %25630 = vst [vmem:[#allocation48_spill] sm:$0xff] %v22331_v56  ;;  %v6105_v54 = vadd.f32 %v6104_v40, %v6074_v39  ;;  %v22337_v19 = vpop.f32.mrb[31].mxu0  ;;  %v22339_v6 = vpop.f32.mrb[31].mxu1  ;;  %v19567_v49 = vpack.c.bf16 %v6505_v57, %v6504_v26  ;;  %v3252_v39 = vmul.f32 %v22329_v35, %v22329_v35 }
 0x403   :  { %v3212_v38 = vadd.f32 %v3211_v37, %v22337_v19  ;;  %v3251_v25 = vmul.f32 %v22337_v19, %v22337_v19  ;;  %v3281_v42 = vadd.f32 %v3280_v59, %v3250_v52  ;;  %v6037_v58 = vadd.f32 %v6036_v33, %v22339_v6 }
 0x404   :  { %v6076_v23 = vmul.f32 %v22339_v6, %v22339_v6  ;;  %v6106_v11 = vadd.f32 %v6105_v54, %v6075_v32  ;;  %v6077_v52 = vmul.f32 %v22331_v56, %v22331_v56  ;;  %19568 = vmatprep.subr.bf16.mxu0 %v19567_v49  ;;  %19856 = vmatprep.subr.bf16.mxu1 %v19567_v49 }
 0x405   :  { %v3213_v40 = vadd.f32 %v22329_v35, %v3212_v38  ;;  %v3282_v2 = vadd.f32 %v3281_v42, %v3251_v25  ;;  %v6038_v37 = vadd.f32 %v22331_v56, %v6037_v58  ;;  %19570 = vmatpush3.bf16.msra.mxu0 %v19567_v49  ;;  %19858 = vmatpush3.bf16.msra.mxu1 %v19567_v49  ;;  %v6506_v58 = vld [vmem:[#allocation10 + $0x70] sm:$0xff] }
 0x406   :  { %v6107_v59 = vadd.f32 %v6106_v11, %v6076_v23  ;;  %v19571_v56 = vpack.c.bf16 %v6507_v22, %v6506_v58  ;;  %v7041_v22 = vld [vmem:[#allocation10 + $0x108] sm:$0xff]  ;;  %v6116_v58 = vld [vmem:[#allocation11] sm:$0x1] }
 0x407   :  { %v3214_v33 = vrot.slane %v3213_v40, 4  ;;  %v3283_v48 = vadd.f32 %v3282_v2, %v3252_v39  ;;  %v6039_v4 = vrot.slane %v6038_v37, 4 }
 0x408   :  { %v6108_v26 = vadd.f32 %v6107_v59, %v6077_v52  ;;  %19572 = vmatprep.subr.bf16.mxu0 %v19571_v56  ;;  %19860 = vmatprep.subr.bf16.mxu1 %v19571_v56 }
 0x409   :  { %v3215_v32 = vadd.f32 %v3214_v33, %v3213_v40  ;;  %v3284_v54 = vrot.slane %v3283_v48, 4  ;;  %v6040_v57 = vadd.f32 %v6039_v4, %v6038_v37  ;;  %19574 = vmatpush3.bf16.msra.mxu0 %v19571_v56  ;;  %19862 = vmatpush3.bf16.msra.mxu1 %v19571_v56 }
 0x40a   :  { %v6109_v13 = vrot.slane %v6108_v26, 4 }
 0x40b   :  { %v3216_v38 = vrot.slane %v3215_v32, 2  ;;  %v3285_v25 = vadd.f32 %v3284_v54, %v3283_v48  ;;  %v6041_v42 = vrot.slane %v6040_v57, 2 }
 0x40c   :  { %v6110_v24 = vadd.f32 %v6109_v13, %v6108_v26  ;;  %v7040_v13 = vld [vmem:[#allocation10 + $0x100] sm:$0xff] }
 0x40d   :  { %v3217_v11 = vadd.f32 %v3216_v38, %v3215_v32  ;;  %v3286_v23 = vrot.slane %v3285_v25, 2  ;;  %v6042_v3 = vadd.f32 %v6041_v42, %v6040_v57  ;;  %v22353_v32 = vpack.c.bf16 %v7041_v22, %v7040_v13 }
 0x40e   :  { %v6111_v46 = vrot.slane %v6110_v24, 2 }
 0x40f   :  { %v3218_v2 = vrot.slane %v3217_v11, 1  ;;  %v3287_v49 = vadd.f32 %v3286_v23, %v3285_v25  ;;  %v6043_v39 = vrot.slane %v6042_v3, 1  ;;  %25631 = vst [vmem:[#allocation49_spill] sm:$0xff] %v22353_v32  ;;  %19576 = vmatprep.subr.bf16.mxu0 %v22353_v32  ;;  %19864 = vmatprep.subr.bf16.mxu1 %v22353_v32  ;;  %v25658_v32 = vld [vmem:[#allocation43_spill] sm:$0xff] }
 0x410   :  { %v6112_v4 = vadd.f32 %v6111_v46, %v6110_v24 }
 0x411   :  { %v3219_v40 = vadd.f32 %v3218_v2, %v3217_v11  ;;  %v3288_v37 = vrot.slane %v3287_v49, 1  ;;  %v6044_v48 = vadd.f32 %v6043_v39, %v6042_v3  ;;  %v6161_v3 = vlaneseq }
 0x412   :  { %v6113_v52 = vrot.slane %v6112_v4, 1 }
 0x413   :  { %v3289_v59 = vadd.f32 %v3288_v37, %v3287_v49  ;;  %v6045_v33 = vadd.f32 %v6044_v48, %v3219_v40  ;;  %v22357_v42 = vshrl.u32 %v6161_v3, 7  ;;  %v6117_v49 = vld [vmem:[#allocation13] sm:$0x1]  ;;  %v25640_v3 = vld [vmem:[#allocation28_spill] sm:$0xff] }
 0x414   :  { %v6114_v26 = vadd.f32 %v6113_v52, %v6112_v4 }
 0x415   :  { %v6118_v54 = vmul.f32 0.001953125, %v6045_v33  ;;  %25632 = vst [vmem:[#allocation50_spill] sm:$0xff] %v22357_v42  ;;  %v22360_v11 = vsub.s32 0, %v22357_v42  ;;  %v25654_v42 = vld [vmem:[#allocation41_spill] sm:$0xff] }
 0x416   :  { %v6115_v57 = vadd.f32 %v6114_v26, %v3289_v59 }
 0x417   :  { %v6120_v38 = vmul.f32 %v6118_v54, %v6118_v54  ;;  %25633 = vst [vmem:[#allocation51_spill] sm:$0xff] %v22360_v11 }
 0x418   :  { %v6119_v56 = vmul.f32 0.001953125, %v6115_v57  ;;  %v25635_v57 = vld [vmem:[#allocation25_spill] sm:$0xff] }
 0x41a   :  { %v6121_v46 = vsub.f32 %v6119_v56, %v6120_v38  ;;  %v25636_v38 = vld [vmem:[#allocation24_spill] sm:$0xff]  ;;  %v25637_v56 = vld [vmem:[#allocation27_spill] sm:$0xff] }
 0x41c   :  { %v6122_v24 = vmax.f32 %v6121_v46, 0.0  ;;  %v25638_v46 = vld [vmem:[#allocation26_spill] sm:$0xff] }
 0x41e   :  { %v6123_v25 = vadd.f32 1e-05, %v6122_v24  ;;  %v25639_v24 = vld [vmem:[#allocation29_spill] sm:$0xff] }
 0x420   :  { %21123 = vrsqrt.f32 %v6123_v25 }
 0x42a   :  { %v21124_v23 = vpop.eup %21123 }
 0x42b   :  { %v6125_v2 = vmul.f32 %v21124_v23, %v6116_v58  ;;  %v25641_v23 = vld [vmem:[#allocation31_spill] sm:$0xff] }
 0x42d   :  { %v6126_v39 = vmul.f32 %v6125_v2, %v6118_v54  ;;  %v22363_v4 = vrot.slane %v6125_v2, %v22360_v11  ;;  %v25634_v54 = vld [vmem:[#allocation23_spill] sm:$0xff] }
 0x42f   :  { %v6127_v40 = vsub.f32 %v6117_v49, %v6126_v39  ;;  %v6362_v37 = vmul.f32 %v22363_v4, %v22339_v6  ;;  %v22369_v48 = vmul.f32 %v22363_v4, %v22041_v7  ;;  %v22373_v52 = vmul.f32 %v22033_v0, %v22363_v4  ;;  %v25642_v49 = vld [vmem:[#allocation30_spill] sm:$0xff] }
 0x430   :  { %v22377_v59 = vmul.f32 %v22363_v4, %v22057_v29  ;;  %v22381_v33 = vmul.f32 %v22053_v27, %v22363_v4  ;;  %v22385_v13 = vmul.f32 %v22363_v4, %v22077_v50  ;;  %v22389_v7 = vmul.f32 %v22069_v45, %v22363_v4 }
 0x431   :  { %v22392_v6 = vrot.slane %v6127_v40, %v22360_v11  ;;  %v22396_v0 = vmul.f32 %v22363_v4, %v22097_v31  ;;  %v22400_v29 = vmul.f32 %v22089_v10, %v22363_v4  ;;  %v22404_v27 = vmul.f32 %v22363_v4, %v22117_v21  ;;  %v25643_v40 = vld [vmem:[#allocation33_spill] sm:$0xff]  ;;  %v25656_v11 = vld [vmem:[#allocation40_spill] sm:$0xff] }
 0x432   :  { %v22408_v50 = vmul.f32 %v22109_v9, %v22363_v4  ;;  %v22412_v45 = vmul.f32 %v22363_v4, %v22137_v61  ;;  %v22416_v31 = vmul.f32 %v22129_v47, %v22363_v4  ;;  %v22420_v10 = vmul.f32 %v22363_v4, %v22157_v63 }
 0x433   :  { %v6394_v22 = vadd.f32 %v6362_v37, %v22392_v6  ;;  %v22425_v21 = vmul.f32 %v22149_v5, %v22363_v4  ;;  %v22429_v9 = vmul.f32 %v22363_v4, %v22179_v55  ;;  %v22433_v61 = vmul.f32 %v22169_v36, %v22363_v4 }
 0x434   :  { %v22437_v47 = vmul.f32 %v22363_v4, %v22197_v15  ;;  %v22441_v63 = vmul.f32 %v22189_v51, %v22363_v4  ;;  %v22445_v5 = vmul.f32 %v22363_v4, %v22217_v18  ;;  %v22449_v55 = vmul.f32 %v22209_v44, %v22363_v4 }
 0x435   :  { %v6426_v26 = vmax.f32 %v6394_v22, 0.0  ;;  %v22453_v36 = vmul.f32 %v22363_v4, %v22237_v41  ;;  %v22457_v15 = vmul.f32 %v22229_v20, %v22363_v4  ;;  %v22461_v51 = vmul.f32 %v22363_v4, %v22257_v14  ;;  %v25644_v22 = vld [vmem:[#allocation32_spill] sm:$0xff] }
 0x436   :  { %v22465_v18 = vmul.f32 %v22249_v62, %v22363_v4  ;;  %v22469_v44 = vmul.f32 %v22363_v4, %v22277_v12  ;;  %v22473_v41 = vmul.f32 %v22269_v43, %v22363_v4  ;;  %v22477_v20 = vmul.f32 %v22363_v4, %v22297_v34 }
 0x437   :  { %6458 = vst [vmem:[#allocation3 + $0x331] sm:$0xff] %v6426_v26  ;;  %v22481_v14 = vmul.f32 %v22289_v17, %v22363_v4  ;;  %v22485_v62 = vmul.f32 %v22363_v4, %v22317_v60  ;;  %v22489_v12 = vmul.f32 %v22309_v16, %v22363_v4  ;;  %v22493_v43 = vmul.f32 %v22363_v4, %v22337_v19 }
 0x438   :  { %v22497_v34 = vmul.f32 %v22329_v35, %v22363_v4  ;;  %v22501_v17 = vmul.f32 %v22363_v4, %v22043_v8  ;;  %v22505_v60 = vmul.f32 %v22035_v1, %v22363_v4  ;;  %v22509_v16 = vmul.f32 %v22363_v4, %v22059_v30 }
 0x439   :  { %v22513_v19 = vmul.f32 %v22055_v28, %v22363_v4  ;;  %v22517_v35 = vmul.f32 %v22363_v4, %v22079_v53  ;;  %v22521_v8 = vmul.f32 %v25634_v54, %v22363_v4  ;;  %v22525_v1 = vmul.f32 %v22363_v4, %v25635_v57  ;;  %v25645_v54 = vld [vmem:[#allocation35_spill] sm:$0xff] }
 0x43a   :  { %v22529_v30 = vmul.f32 %v25636_v38, %v22363_v4  ;;  %v22533_v28 = vmul.f32 %v22363_v4, %v25637_v56  ;;  %v22537_v53 = vmul.f32 %v25638_v46, %v22363_v4  ;;  %v22541_v25 = vmul.f32 %v22363_v4, %v25639_v24  ;;  %v25646_v38 = vld [vmem:[#allocation34_spill] sm:$0xff]  ;;  %v25647_v46 = vld [vmem:[#allocation37_spill] sm:$0xff] }
 0x43b   :  { %v22545_v58 = vmul.f32 %v25640_v3, %v22363_v4  ;;  %v22549_v2 = vmul.f32 %v22363_v4, %v25641_v23  ;;  %v22553_v39 = vmul.f32 %v25642_v49, %v22363_v4  ;;  %v22557_v37 = vmul.f32 %v22363_v4, %v25643_v40  ;;  %v25648_v3 = vld [vmem:[#allocation36_spill] sm:$0xff]  ;;  %v25650_v49 = vld [vmem:[#allocation39_spill] sm:$0xff] }
 0x43c   :  { %v22561_v26 = vmul.f32 %v25644_v22, %v22363_v4  ;;  %v22565_v57 = vmul.f32 %v22363_v4, %v25645_v54  ;;  %v22569_v56 = vmul.f32 %v25646_v38, %v22363_v4  ;;  %v22573_v24 = vmul.f32 %v22363_v4, %v25647_v46  ;;  %v25652_v22 = vld [vmem:[#allocation38_spill] sm:$0xff] }
 0x43d   :  { %v22577_v23 = vmul.f32 %v25648_v3, %v22363_v4  ;;  %v22581_v40 = vmul.f32 %v22363_v4, %v25650_v49  ;;  %v22585_v54 = vmul.f32 %v25652_v22, %v22363_v4  ;;  %v22589_v38 = vmul.f32 %v22363_v4, %v25654_v42 }
 0x43e   :  { %v22593_v46 = vmul.f32 %v25656_v11, %v22363_v4  ;;  %v22597_v3 = vmul.f32 %v22363_v4, %v25658_v32 }
 0x43f   :  { %25649 = vst [vmem:[#allocation23_spill] sm:$0xff] %v22577_v23  ;;  %25651 = vst [vmem:[#allocation25_spill] sm:$0xff] %v22581_v40  ;;  %v25660_v23 = vld [vmem:[#allocation42_spill] sm:$0xff]  ;;  %v25661_v40 = vld [vmem:[#allocation45_spill] sm:$0xff] }
 0x440   :  { %25653 = vst [vmem:[#allocation24_spill] sm:$0xff] %v22585_v54  ;;  %25655 = vst [vmem:[#allocation27_spill] sm:$0xff] %v22589_v38  ;;  %v22601_v49 = vmul.f32 %v25660_v23, %v22363_v4  ;;  %v22605_v22 = vmul.f32 %v22363_v4, %v25661_v40  ;;  %v25663_v54 = vld [vmem:[#allocation44_spill] sm:$0xff]  ;;  %v25665_v38 = vld [vmem:[#allocation47_spill] sm:$0xff]  ;;  %v6204_v40 = vadd.f32 %v22392_v6, %v22369_v48 }
 0x441   :  { %25657 = vst [vmem:[#allocation26_spill] sm:$0xff] %v22593_v46  ;;  %25659 = vst [vmem:[#allocation29_spill] sm:$0xff] %v22597_v3  ;;  %v22609_v42 = vmul.f32 %v25663_v54, %v22363_v4  ;;  %v22613_v11 = vmul.f32 %v22363_v4, %v25665_v38  ;;  %v25667_v46 = vld [vmem:[#allocation46_spill] sm:$0xff]  ;;  %v25669_v3 = vld [vmem:[#allocation48_spill] sm:$0xff]  ;;  %v22629_v54 = vadd.f32 %v22392_v6, %v22377_v59 }
 0x442   :  { %25662 = vst [vmem:[#allocation28_spill] sm:$0xff] %v22605_v22  ;;  %v22617_v32 = vmul.f32 %v25667_v46, %v22363_v4  ;;  %v22621_v23 = vmul.f32 %v25669_v3, %v22363_v4  ;;  %v6205_v22 = vadd.f32 %v22392_v6, %v22373_v52  ;;  %v22633_v38 = vadd.f32 %v22392_v6, %v22381_v33 }
 0x443   :  { %25664 = vst [vmem:[#allocation31_spill] sm:$0xff] %v22609_v42  ;;  %25666 = vst [vmem:[#allocation30_spill] sm:$0xff] %v22613_v11  ;;  %v22637_v46 = vadd.f32 %v22392_v6, %v22385_v13  ;;  %v22641_v4 = vadd.f32 %v22392_v6, %v22389_v7  ;;  %v22645_v48 = vadd.f32 %v22392_v6, %v22396_v0 }
 0x444   :  { %25668 = vst [vmem:[#allocation33_spill] sm:$0xff] %v22617_v32  ;;  %25670 = vst [vmem:[#allocation32_spill] sm:$0xff] %v22621_v23  ;;  %v22649_v52 = vadd.f32 %v22392_v6, %v22400_v29  ;;  %v22653_v59 = vadd.f32 %v22392_v6, %v22404_v27  ;;  %v22657_v33 = vadd.f32 %v22392_v6, %v22408_v50  ;;  %v6237_v3 = vmax.f32 %v6205_v22, 0.0 }
 0x445   :  { %v22661_v13 = vadd.f32 %v22392_v6, %v22412_v45  ;;  %v22665_v7 = vadd.f32 %v22392_v6, %v22416_v31  ;;  %v22669_v0 = vadd.f32 %v22392_v6, %v22420_v10  ;;  %v22673_v29 = vadd.f32 %v22392_v6, %v22425_v21 }
 0x446   :  { %v22677_v27 = vadd.f32 %v22392_v6, %v22429_v9  ;;  %v22681_v50 = vadd.f32 %v22392_v6, %v22433_v61  ;;  %v22685_v45 = vadd.f32 %v22392_v6, %v22437_v47  ;;  %v22689_v31 = vadd.f32 %v22392_v6, %v22441_v63  ;;  %6269 = vst [vmem:[#allocation3 + $0x21] sm:$0xff] %v6237_v3 }
 0x447   :  { %v22693_v10 = vadd.f32 %v22392_v6, %v22445_v5  ;;  %v22697_v21 = vadd.f32 %v22392_v6, %v22449_v55  ;;  %v22701_v9 = vadd.f32 %v22392_v6, %v22453_v36  ;;  %v22705_v61 = vadd.f32 %v22392_v6, %v22457_v15 }
 0x448   :  { %v22709_v47 = vadd.f32 %v22392_v6, %v22461_v51  ;;  %v22713_v63 = vadd.f32 %v22392_v6, %v22465_v18  ;;  %v22717_v5 = vadd.f32 %v22392_v6, %v22469_v44  ;;  %v22721_v55 = vadd.f32 %v22392_v6, %v22473_v41 }
 0x449   :  { %v22725_v36 = vadd.f32 %v22392_v6, %v22477_v20  ;;  %v22729_v15 = vadd.f32 %v22392_v6, %v22481_v14  ;;  %v22733_v51 = vadd.f32 %v22392_v6, %v22485_v62  ;;  %v22737_v18 = vadd.f32 %v22392_v6, %v22489_v12 }
 0x44a   :  { %v22741_v44 = vadd.f32 %v22392_v6, %v22493_v43  ;;  %v22745_v41 = vadd.f32 %v22392_v6, %v22497_v34  ;;  %v6236_v20 = vmax.f32 %v6204_v40, 0.0  ;;  %v6238_v14 = vmax.f32 %v22629_v54, 0.0 }
 0x44b   :  { %25671 = vst [vmem:[#allocation35_spill] sm:$0xff] %v22737_v18  ;;  %v6239_v23 = vmax.f32 %v22633_v38, 0.0  ;;  %v25508_v62 = vmax.f32 %v22637_v46, 0.0  ;;  %v25507_v32 = vmax.f32 %v22641_v4, 0.0  ;;  %v25506_v12 = vmax.f32 %v22645_v48, 0.0 }
 0x44c   :  { %v25511_v43 = vmax.f32 %v22653_v59, 0.0  ;;  %v25509_v42 = vmax.f32 %v22657_v33, 0.0  ;;  %v25510_v34 = vmax.f32 %v22661_v13, 0.0  ;;  %6268 = vst [vmem:[#allocation3 + $0x19] sm:$0xff] %v6236_v20  ;;  %6270 = vst [vmem:[#allocation3 + $0x31] sm:$0xff] %v6238_v14  ;;  %17530 = vmatprep.mubr.f32.mxu0 %v6236_v20  ;;  %v25512_v40 = vmax.f32 %v22669_v0, 0.0 }
 0x44d   :  { %6271 = vst [vmem:[#allocation3 + $0x39] sm:$0xff] %v6239_v23  ;;  %6272 = vst [vmem:[#allocation3 + $0x49] sm:$0xff] %v25508_v62  ;;  %v25672_v22 = vmax.f32 %v22649_v52, 0.0  ;;  %17531 = vmatmul.mubr.f32.gmra.mrb[34].mxu0 %v6237_v3  ;;  %v25524_v20 = vmax.f32 %v22685_v45, 0.0  ;;  %v25513_v54 = vmax.f32 %v22689_v31, 0.0  ;;  %v25514_v38 = vmax.f32 %v22693_v10, 0.0 }
 0x44e   :  { %6273 = vst [vmem:[#allocation3 + $0x51] sm:$0xff] %v25507_v32  ;;  %6274 = vst [vmem:[#allocation3 + $0x61] sm:$0xff] %v25506_v12  ;;  %v25523_v11 = vmax.f32 %v22697_v21, 0.0  ;;  %17533 = vmatprep.mubr.f32.mxu0 %v6238_v14  ;;  %v25522_v3 = vmax.f32 %v22701_v9, 0.0  ;;  %v25521_v12 = vmax.f32 %v22705_v61, 0.0  ;;  %v25520_v14 = vmax.f32 %v22717_v5, 0.0 }
 0x44f   :  { %6275 = vst [vmem:[#allocation3 + $0x69] sm:$0xff] %v25672_v22  ;;  %6276 = vst [vmem:[#allocation3 + $0x79] sm:$0xff] %v25511_v43  ;;  %v25673_v22 = vmax.f32 %v22665_v7, 0.0  ;;  %v25519_v43 = vmax.f32 %v22721_v55, 0.0  ;;  %v25518_v32 = vmax.f32 %v22725_v36, 0.0  ;;  %v25517_v62 = vmax.f32 %v22729_v15, 0.0 }
 0x450   :  { %6277 = vst [vmem:[#allocation3 + $0x81] sm:$0xff] %v25509_v42  ;;  %6278 = vst [vmem:[#allocation3 + $0x91] sm:$0xff] %v25510_v34  ;;  %v25674_v42 = vmax.f32 %v22673_v29, 0.0  ;;  %v25675_v34 = vmax.f32 %v22677_v27, 0.0 }
 0x451   :  { %6279 = vst [vmem:[#allocation3 + $0x99] sm:$0xff] %v25673_v22  ;;  %6280 = vst [vmem:[#allocation3 + $0xa9] sm:$0xff] %v25512_v40  ;;  %v25676_v22 = vmax.f32 %v22681_v50, 0.0  ;;  %v6267_v40 = vmax.f32 %v22745_v41, 0.0  ;;  %17534 = vmatmul.mubr.f32.gmra.mrb[36].mxu0 %v6239_v23  ;;  %v6365_v41 = vadd.f32 %v22505_v60, %v22392_v6  ;;  %v22831_v23 = vadd.f32 %v22509_v16, %v22392_v6 }
 0x452   :  { %6281 = vst [vmem:[#allocation3 + $0xb1] sm:$0xff] %v25674_v42  ;;  %6282 = vst [vmem:[#allocation3 + $0xc1] sm:$0xff] %v25675_v34  ;;  %v25516_v42 = vmax.f32 %v22733_v51, 0.0  ;;  %v25515_v34 = vmax.f32 %v22737_v18, 0.0  ;;  %v22849_v60 = vadd.f32 %v22521_v8, %v22392_v6  ;;  %v22853_v16 = vadd.f32 %v22525_v1, %v22392_v6 }
 0x453   :  { %6283 = vst [vmem:[#allocation3 + $0xc9] sm:$0xff] %v25676_v22  ;;  %6284 = vst [vmem:[#allocation3 + $0xd9] sm:$0xff] %v25524_v20  ;;  %v6266_v22 = vmax.f32 %v22741_v44, 0.0  ;;  %v6364_v44 = vadd.f32 %v22501_v17, %v22392_v6  ;;  %v22845_v17 = vadd.f32 %v22517_v35, %v22392_v6  ;;  %v22865_v35 = vadd.f32 %v22537_v53, %v22392_v6 }
 0x454   :  { %6285 = vst [vmem:[#allocation3 + $0xe1] sm:$0xff] %v25513_v54  ;;  %6286 = vst [vmem:[#allocation3 + $0xf1] sm:$0xff] %v25514_v38  ;;  %v25677_v54 = vmax.f32 %v22709_v47, 0.0  ;;  %v25678_v38 = vmax.f32 %v22713_v63, 0.0  ;;  %v22869_v8 = vadd.f32 %v22541_v25, %v22392_v6  ;;  %v22873_v1 = vadd.f32 %v22545_v58, %v22392_v6 }
 0x455   :  { %6287 = vst [vmem:[#allocation3 + $0xf9] sm:$0xff] %v25523_v11  ;;  %6288 = vst [vmem:[#allocation3 + $0x109] sm:$0xff] %v25522_v3  ;;  %v22885_v53 = vadd.f32 %v22557_v37, %v22392_v6  ;;  %v22889_v25 = vadd.f32 %v22561_v26, %v22392_v6  ;;  %v22895_v58 = vadd.f32 %v22565_v57, %v22392_v6  ;;  %v25681_v37 = vld [vmem:[#allocation23_spill] sm:$0xff]  ;;  %v25682_v26 = vmax.f32 %v22645_v48, 0.0  ;;  %v25684_v57 = vld [vmem:[#allocation24_spill] sm:$0xff] }
 0x456   :  { %6289 = vst [vmem:[#allocation3 + $0x111] sm:$0xff] %v25521_v12  ;;  %6290 = vst [vmem:[#allocation3 + $0x121] sm:$0xff] %v25677_v54  ;;  %v22835_v54 = vadd.f32 %v22513_v19, %v22392_v6  ;;  %v22857_v19 = vadd.f32 %v22529_v30, %v22392_v6  ;;  %v22877_v30 = vadd.f32 %v22549_v2, %v22392_v6  ;;  %v6396_v12 = vmax.f32 %v6364_v44, 0.0 }
 0x457   :  { %6291 = vst [vmem:[#allocation3 + $0x129] sm:$0xff] %v25678_v38  ;;  %6292 = vst [vmem:[#allocation3 + $0x139] sm:$0xff] %v25520_v14  ;;  %v25679_v38 = vmax.f32 %v22637_v46, 0.0  ;;  %v22861_v46 = vadd.f32 %v22533_v28, %v22392_v6  ;;  %v22881_v28 = vadd.f32 %v22553_v39, %v22392_v6  ;;  %v22899_v2 = vadd.f32 %v22569_v56, %v22392_v6  ;;  %v25685_v56 = vld [vmem:[#allocation27_spill] sm:$0xff]  ;;  %v25692_v14 = vld [vmem:[#allocation32_spill] sm:$0xff] }
 0x458   :  { %6293 = vst [vmem:[#allocation3 + $0x141] sm:$0xff] %v25519_v43  ;;  %6294 = vst [vmem:[#allocation3 + $0x151] sm:$0xff] %v25518_v32  ;;  %v22903_v39 = vadd.f32 %v22573_v24, %v22392_v6  ;;  %v25686_v24 = vld [vmem:[#allocation26_spill] sm:$0xff]  ;;  %v25691_v43 = vld [vmem:[#allocation33_spill] sm:$0xff]  ;;  %v6397_v3 = vmax.f32 %v6365_v41, 0.0  ;;  %v6399_v11 = vmax.f32 %v22835_v54, 0.0  ;;  %18250 = vmatprep.mubr.f32.mxu1 %v6396_v12 }
 0x459   :  { %6295 = vst [vmem:[#allocation3 + $0x159] sm:$0xff] %v25517_v62  ;;  %17536 = vmatprep.mubr.f32.mxu0 %v25679_v38  ;;  %6296 = vst [vmem:[#allocation3 + $0x169] sm:$0xff] %v25516_v42  ;;  %v22925_v42 = vadd.f32 %v25686_v24, %v22392_v6  ;;  %v25689_v62 = vld [vmem:[#allocation31_spill] sm:$0xff]  ;;  %v25690_v32 = vld [vmem:[#allocation30_spill] sm:$0xff]  ;;  %v25694_v20 = vmax.f32 %v22653_v59, 0.0  ;;  %v6402_v18 = vmax.f32 %v22853_v16, 0.0 }
 0x45a   :  { %6297 = vst [vmem:[#allocation3 + $0x171] sm:$0xff] %v25515_v34  ;;  %6298 = vst [vmem:[#allocation3 + $0x181] sm:$0xff] %v6266_v22  ;;  %v22907_v22 = vadd.f32 %v25681_v37, %v22392_v6  ;;  %v22921_v34 = vadd.f32 %v25685_v56, %v22392_v6  ;;  %v25687_v37 = vld [vmem:[#allocation29_spill] sm:$0xff]  ;;  %v22941_v56 = vadd.f32 %v25689_v62, %v22392_v6  ;;  %v6398_v62 = vmax.f32 %v22831_v23, 0.0 }
 0x45b   :  { %6299 = vst [vmem:[#allocation3 + $0x189] sm:$0xff] %v6267_v40  ;;  %v25680_v40 = vmax.f32 %v22641_v4, 0.0  ;;  %v25683_v4 = vld [vmem:[#allocation25_spill] sm:$0xff]  ;;  %v22929_v48 = vadd.f32 %v25687_v37, %v22392_v6  ;;  %v22945_v24 = vadd.f32 %v25690_v32, %v22392_v6  ;;  %v22949_v37 = vadd.f32 %v25691_v43, %v22392_v6  ;;  %6428 = vst [vmem:[#allocation3 + $0x1c9] sm:$0xff] %v6396_v12 }
 0x45c   :  { %v22913_v38 = vadd.f32 %v25683_v4, %v22392_v6  ;;  %v25688_v4 = vld [vmem:[#allocation28_spill] sm:$0xff]  ;;  %v6400_v32 = vmax.f32 %v22845_v17, 0.0  ;;  %v25526_v43 = vmax.f32 %v22849_v60, 0.0  ;;  %v25531_v44 = vmax.f32 %v22869_v8, 0.0  ;;  %6429 = vst [vmem:[#allocation3 + $0x1d1] sm:$0xff] %v6397_v3  ;;  %6430 = vst [vmem:[#allocation3 + $0x1e1] sm:$0xff] %v6398_v62  ;;  %18251 = vmatmul.mubr.f32.gmra.mrb[34].mxu1 %v6397_v3 }
 0x45d   :  { %17537 = vmatmul.mubr.f32.gmra.mrb[38].mxu0 %v25680_v40  ;;  %v22917_v40 = vadd.f32 %v25684_v57, %v22392_v6  ;;  %v22937_v57 = vadd.f32 %v25688_v4, %v22392_v6  ;;  %v25693_v4 = vmax.f32 %v22649_v52, 0.0  ;;  %v25528_v52 = vmax.f32 %v22865_v35, 0.0  ;;  %6431 = vst [vmem:[#allocation3 + $0x1e9] sm:$0xff] %v6399_v11  ;;  %6434 = vst [vmem:[#allocation3 + $0x211] sm:$0xff] %v6402_v18 }
 0x45e   :  { %17539 = vmatprep.mubr.f32.mxu0 %v25682_v26  ;;  %v22933_v26 = vadd.f32 %v22601_v49, %v22392_v6  ;;  %v22953_v49 = vadd.f32 %v25692_v14, %v22392_v6  ;;  %v6403_v6 = vmax.f32 %v22857_v19, 0.0  ;;  %v25527_v14 = vmax.f32 %v22861_v46, 0.0  ;;  %6432 = vst [vmem:[#allocation3 + $0x1f9] sm:$0xff] %v6400_v32  ;;  %6433 = vst [vmem:[#allocation3 + $0x201] sm:$0xff] %v25526_v43 }
 0x45f   :  { %v25530_v41 = vmax.f32 %v22873_v1, 0.0  ;;  %v25529_v23 = vmax.f32 %v22877_v30, 0.0  ;;  %v6409_v59 = vmax.f32 %v22881_v28, 0.0  ;;  %v25532_v54 = vmax.f32 %v22889_v25, 0.0  ;;  %18253 = vmatprep.mubr.f32.mxu1 %v6398_v62  ;;  %6437 = vst [vmem:[#allocation3 + $0x231] sm:$0xff] %v25528_v52  ;;  %6438 = vst [vmem:[#allocation3 + $0x241] sm:$0xff] %v25531_v44 }
 0x460   :  { %6435 = vst [vmem:[#allocation3 + $0x219] sm:$0xff] %v6403_v6  ;;  %6436 = vst [vmem:[#allocation3 + $0x229] sm:$0xff] %v25527_v14  ;;  %v25695_v3 = vmax.f32 %v22657_v33, 0.0  ;;  %v6413_v17 = vmax.f32 %v22899_v2, 0.0  ;;  %v6415_v12 = vmax.f32 %v22907_v22, 0.0  ;;  %v25533_v43 = vmax.f32 %v22913_v38, 0.0  ;;  %18254 = vmatmul.mubr.f32.gmra.mrb[36].mxu1 %v6399_v11 }
 0x461   :  { %17540 = vmatmul.mubr.f32.gmra.mrb[40].mxu0 %v25693_v4  ;;  %v6414_v4 = vmax.f32 %v22903_v39, 0.0  ;;  %6439 = vst [vmem:[#allocation3 + $0x249] sm:$0xff] %v25530_v41  ;;  %6440 = vst [vmem:[#allocation3 + $0x259] sm:$0xff] %v25529_v23  ;;  %v25696_v33 = vmax.f32 %v22661_v13, 0.0  ;;  %v6417_v62 = vmax.f32 %v22917_v40, 0.0  ;;  %v6419_v14 = vmax.f32 %v22925_v42, 0.0  ;;  %18256 = vmatprep.mubr.f32.mxu1 %v6400_v32 }
 0x462   :  { %17542 = vmatprep.mubr.f32.mxu0 %v25694_v20  ;;  %v6410_v20 = vmax.f32 %v22885_v53, 0.0  ;;  %v6420_v52 = vmax.f32 %v22929_v48, 0.0  ;;  %6441 = vst [vmem:[#allocation3 + $0x261] sm:$0xff] %v6409_v59  ;;  %6443 = vst [vmem:[#allocation3 + $0x279] sm:$0xff] %v25532_v54  ;;  %v25697_v13 = vmax.f32 %v22895_v58, 0.0  ;;  %v6422_v23 = vmax.f32 %v22937_v57, 0.0 }
 0x463   :  { %v6423_v41 = vmax.f32 %v22941_v56, 0.0  ;;  %v6424_v44 = vmax.f32 %v22945_v24, 0.0  ;;  %6445 = vst [vmem:[#allocation3 + $0x291] sm:$0xff] %v6413_v17  ;;  %6446 = vst [vmem:[#allocation3 + $0x2a1] sm:$0xff] %v6414_v4  ;;  %v6427_v54 = vmax.f32 %v22953_v49, 0.0  ;;  %v25699_v11 = vmax.f32 %v22669_v0, 0.0 }
 0x464   :  { %6442 = vst [vmem:[#allocation3 + $0x271] sm:$0xff] %v6410_v20  ;;  %6444 = vst [vmem:[#allocation3 + $0x289] sm:$0xff] %v25697_v13  ;;  %v6425_v13 = vmax.f32 %v22949_v37, 0.0  ;;  %v25701_v49 = vmax.f32 %v22673_v29, 0.0  ;;  %v25702_v32 = vmax.f32 %v22677_v27, 0.0  ;;  %v25703_v0 = vmax.f32 %v22861_v46, 0.0 }
 0x465   :  { %17543 = vmatmul.mubr.f32.gmra.mrb[42].mxu0 %v25695_v3  ;;  %v6418_v3 = vmax.f32 %v22921_v34, 0.0  ;;  %6447 = vst [vmem:[#allocation3 + $0x2a9] sm:$0xff] %v6415_v12  ;;  %6448 = vst [vmem:[#allocation3 + $0x2b9] sm:$0xff] %v25533_v43  ;;  %v25698_v43 = vmax.f32 %v22665_v7, 0.0  ;;  %v25700_v7 = vmax.f32 %v22849_v60, 0.0  ;;  %v25705_v60 = vmax.f32 %v22685_v45, 0.0 }
 0x466   :  { %17545 = vmatprep.mubr.f32.mxu0 %v25696_v33  ;;  %v6421_v33 = vmax.f32 %v22933_v26, 0.0  ;;  %6449 = vst [vmem:[#allocation3 + $0x2c1] sm:$0xff] %v6417_v62  ;;  %6451 = vst [vmem:[#allocation3 + $0x2d9] sm:$0xff] %v6419_v14  ;;  %v25707_v29 = vmax.f32 %v22869_v8, 0.0  ;;  %v25708_v27 = vmax.f32 %v22689_v31, 0.0  ;;  %v25709_v16 = vmax.f32 %v22693_v10, 0.0 }
 0x467   :  { %6450 = vst [vmem:[#allocation3 + $0x2d1] sm:$0xff] %v6418_v3  ;;  %6452 = vst [vmem:[#allocation3 + $0x2e9] sm:$0xff] %v6420_v52  ;;  %18257 = vmatmul.mubr.f32.gmra.mrb[38].mxu1 %v25700_v7  ;;  %v25710_v19 = vmax.f32 %v22873_v1, 0.0  ;;  %v25712_v45 = vmax.f32 %v22697_v21, 0.0  ;;  %v25713_v46 = vmax.f32 %v22701_v9, 0.0  ;;  %v25714_v31 = vmax.f32 %v22705_v61, 0.0 }
 0x468   :  { %6453 = vst [vmem:[#allocation3 + $0x2f1] sm:$0xff] %v6421_v33  ;;  %6454 = vst [vmem:[#allocation3 + $0x301] sm:$0xff] %v6422_v23  ;;  %18259 = vmatprep.mubr.f32.mxu1 %v6402_v18  ;;  %v25706_v18 = vmax.f32 %v22865_v35, 0.0  ;;  %v25715_v10 = vmax.f32 %v22709_v47, 0.0  ;;  %v25716_v35 = vmax.f32 %v22889_v25, 0.0  ;;  %v25717_v21 = vmax.f32 %v22895_v58, 0.0 }
 0x469   :  { %17546 = vmatmul.mubr.f32.gmra.mrb[44].mxu0 %v25698_v43  ;;  %6455 = vst [vmem:[#allocation3 + $0x309] sm:$0xff] %v6423_v41  ;;  %6456 = vst [vmem:[#allocation3 + $0x319] sm:$0xff] %v6424_v44  ;;  %v25704_v43 = vmax.f32 %v22681_v50, 0.0  ;;  %v25711_v50 = vmax.f32 %v22877_v30, 0.0  ;;  %v25718_v9 = vmax.f32 %v22713_v63, 0.0  ;;  %v25719_v8 = vmax.f32 %v22717_v5, 0.0 }
 0x46a   :  { %17548 = vmatprep.mubr.f32.mxu0 %v25699_v11  ;;  %6457 = vst [vmem:[#allocation3 + $0x321] sm:$0xff] %v6425_v13  ;;  %6459 = vst [vmem:[#allocation3 + $0x339] sm:$0xff] %v6427_v54  ;;  %v25720_v61 = vmax.f32 %v22721_v55, 0.0  ;;  %v25721_v47 = vmax.f32 %v22725_v36, 0.0  ;;  %v25722_v63 = vmax.f32 %v22913_v38, 0.0  ;;  %v25723_v5 = vmax.f32 %v22729_v15, 0.0 }
 0x46b   :  { %18260 = vmatmul.mubr.f32.gmra.mrb[40].mxu1 %v6403_v6  ;;  %v25724_v1 = vmax.f32 %v22733_v51, 0.0  ;;  %v7042_v55 = vld [vmem:[#allocation10 + $0x110] sm:$0xff]  ;;  %v7043_v30 = vld [vmem:[#allocation10 + $0x118] sm:$0xff]  ;;  %v25725_v36 = vld [vmem:[#allocation35_spill] sm:$0xff] }
 0x46c   :  { %18262 = vmatprep.mubr.f32.mxu1 %v25703_v0  ;;  %v25726_v28 = vmax.f32 %v25725_v36, 0.0  ;;  %v21129_v53 = vld [vmem:[#allocation2] sm:$0xff]  ;;  %v19579_v25 = vpack.c.bf16 %v7043_v30, %v7042_v55  ;;  %v7045_v51 = vld [vmem:[#allocation10 + $0x128] sm:$0xff]  ;;  %v23120_v58 = vld [vmem:[#allocation3 + $0x18] sm:$0xff] }
 0x46d   :  { %17549 = vmatmul.mubr.f32.gmra.mrb[46].mxu0 %v25701_v49  ;;  %v7044_v15 = vld [vmem:[#allocation10 + $0x120] sm:$0xff]  ;;  %v25727_v34 = vld [vmem:[#allocation49_spill] sm:$0xff]  ;;  %v7046_v39 = vld [vmem:[#allocation10 + $0x130] sm:$0xff] }
 0x46e   :  { %17551 = vmatprep.mubr.f32.mxu0 %v25702_v32  ;;  %v23124_v2 = vpack.c.bf16 %v7045_v51, %v7044_v15  ;;  %v23128_v42 = vld [vmem:[#allocation3 + $0x20] sm:$0xff]  ;;  %v7047_v22 = vld [vmem:[#allocation10 + $0x138] sm:$0xff]  ;;  %v23133_v38 = vld [vmem:[#allocation3 + $0x30] sm:$0xff] }
 0x46f   :  { %18263 = vmatmul.mubr.f32.gmra.mrb[42].mxu1 %v25706_v18  ;;  %v23137_v40 = vpack.c.bf16 %v7047_v22, %v7046_v39  ;;  %v23141_v48 = vld [vmem:[#allocation3 + $0x38] sm:$0xff]  ;;  %v7048_v26 = vld [vmem:[#allocation10 + $0x140] sm:$0xff]  ;;  %v7049_v6 = vld [vmem:[#allocation10 + $0x148] sm:$0xff] }
 0x470   :  { %18265 = vmatprep.mubr.f32.mxu1 %v25707_v29  ;;  %v23146_v57 = vld [vmem:[#allocation3 + $0x48] sm:$0xff]  ;;  %v23155_v56 = vld [vmem:[#allocation3 + $0x50] sm:$0xff]  ;;  %v23158_v24 = vld [vmem:[#allocation3 + $0x60] sm:$0xff] }
 0x471   :  { %17552 = vmatmul.mubr.f32.gmra.mrb[48].mxu0 %v25704_v43  ;;  %v23172_v54 = vld [vmem:[#allocation3 + $0x78] sm:$0xff]  ;;  %v23191_v11 = vld [vmem:[#allocation3 + $0x1e8] sm:$0xff]  ;;  %v7346_v0 = vld [vmem:[#allocation10 + $0x180] sm:$0xff] }
 0x472   :  { %17554 = vmatprep.mubr.f32.mxu0 %v25705_v60  ;;  %v23196_v7 = vld [vmem:[#allocation3 + $0x1f8] sm:$0xff]  ;;  %v7347_v43 = vld [vmem:[#allocation10 + $0x188] sm:$0xff]  ;;  %v23207_v18 = vld [vmem:[#allocation3 + $0x200] sm:$0xff] }
 0x473   :  { %18266 = vmatmul.mubr.f32.gmra.mrb[44].mxu1 %v25710_v19  ;;  %v23201_v32 = vld [vmem:[#allocation3 + $0x98] sm:$0xff]  ;;  %v23205_v60 = vld [vmem:[#allocation3 + $0xa8] sm:$0xff]  ;;  %v23212_v29 = vld [vmem:[#allocation3 + $0x210] sm:$0xff] }
 0x474   :  { %18268 = vmatprep.mubr.f32.mxu1 %v25711_v50  ;;  %v23221_v19 = vld [vmem:[#allocation3 + $0xc0] sm:$0xff]  ;;  %v23224_v50 = vld [vmem:[#allocation3 + $0x218] sm:$0xff]  ;;  %v23273_v55 = vld [vmem:[#allocation3 + $0x110] sm:$0xff] }
 0x475   :  { %17555 = vmatmul.mubr.f32.gmra.mrb[50].mxu0 %v25708_v27  ;;  %v23214_v27 = vpack.c.bf16 %v7347_v43, %v7346_v0  ;;  %v23276_v30 = vld [vmem:[#allocation3 + $0x120] sm:$0xff]  ;;  %v23279_v36 = vld [vmem:[#allocation3 + $0x278] sm:$0xff]  ;;  %v23291_v15 = vld [vmem:[#allocation3 + $0x290] sm:$0xff] }
 0x476   :  { %17557 = vmatprep.mubr.f32.mxu0 %v25709_v16  ;;  %v23218_v16 = vld [vmem:[#allocation3 + $0xb0] sm:$0xff]  ;;  %v23295_v51 = vld [vmem:[#allocation3 + $0x2a0] sm:$0xff]  ;;  %v23303_v39 = vld [vmem:[#allocation3 + $0x2a8] sm:$0xff] }
 0x477   :  { %18269 = vmatmul.mubr.f32.gmra.mrb[46].mxu1 %v6409_v59  ;;  %v7052_v59 = vld [vmem:[#allocation10 + $0x160] sm:$0xff]  ;;  %v23307_v22 = vld [vmem:[#allocation3 + $0x2b8] sm:$0xff]  ;;  %v7351_v0 = vld [vmem:[#allocation10 + $0x1a8] sm:$0xff] }
 0x478   :  { %18271 = vmatprep.mubr.f32.mxu1 %v6410_v20  ;;  %v7053_v20 = vld [vmem:[#allocation10 + $0x168] sm:$0xff]  ;;  %v7009_v43 = vld [vmem:[#allocation3 + $0x1a] sm:$0xff] }
 0x479   :  { %17558 = vmatmul.mubr.f32.gmra.mrb[52].mxu0 %v25712_v45  ;;  %v23228_v45 = vld [vmem:[#allocation3 + $0x228] sm:$0xff] }
 0x47a   :  { %17560 = vmatprep.mubr.f32.mxu0 %v25713_v46  ;;  %v23232_v46 = vld [vmem:[#allocation3 + $0xc8] sm:$0xff] }
 0x47b   :  { %18272 = vmatmul.mubr.f32.gmra.mrb[48].mxu1 %v25716_v35  ;;  %v23243_v35 = vld [vmem:[#allocation3 + $0x240] sm:$0xff] }
 0x47c   :  { %18274 = vmatprep.mubr.f32.mxu1 %v25717_v21  ;;  %v23246_v21 = vld [vmem:[#allocation3 + $0xe0] sm:$0xff] }
 0x47d   :  { %17561 = vmatmul.mubr.f32.gmra.mrb[54].mxu0 %v25714_v31  ;;  %v23236_v31 = vld [vmem:[#allocation3 + $0xd8] sm:$0xff] }
 0x47e   :  { %17563 = vmatprep.mubr.f32.mxu0 %v25715_v10  ;;  %v23239_v10 = vld [vmem:[#allocation3 + $0x230] sm:$0xff] }
 0x47f   :  { %18275 = vmatmul.mubr.f32.gmra.mrb[50].mxu1 %v6413_v17  ;;  %v23179_v17 = vld [vmem:[#allocation3 + $0x1e0] sm:$0xff] }
 0x480   :  { %18277 = vmatprep.mubr.f32.mxu1 %v6414_v4  ;;  %v23182_v4 = vpack.c.bf16 %v7053_v20, %v7052_v59  ;;  %v7349_v59 = vld [vmem:[#allocation10 + $0x198] sm:$0xff] }
 0x481   :  { %17564 = vmatmul.mubr.f32.gmra.mrb[56].mxu0 %v25718_v9  ;;  %v23250_v9 = vld [vmem:[#allocation3 + $0xf0] sm:$0xff]  ;;  %v23325_v20 = vld [vmem:[#allocation3 + $0x2d8] sm:$0xff] }
 0x482   :  { %17566 = vmatprep.mubr.f32.mxu0 %v25719_v8  ;;  %v23253_v8 = vld [vmem:[#allocation3 + $0x248] sm:$0xff]  ;;  %25733 = vst [vmem:[#allocation41_spill] sm:$0xff] %v23325_v20 }
 0x483   :  { %18278 = vmatmul.mubr.f32.gmra.mrb[52].mxu1 %v6415_v12  ;;  %v23174_v12 = vld [vmem:[#allocation3 + $0x1d0] sm:$0xff] }
 0x484   :  { %18280 = vmatprep.mubr.f32.mxu1 %v25722_v63  ;;  %v23264_v63 = vld [vmem:[#allocation3 + $0x108] sm:$0xff] }
 0x485   :  { %17567 = vmatmul.mubr.f32.gmra.mrb[58].mxu0 %v25720_v61  ;;  %v23257_v61 = vld [vmem:[#allocation3 + $0x258] sm:$0xff] }
 0x486   :  { %17569 = vmatprep.mubr.f32.mxu0 %v25721_v47  ;;  %v23260_v47 = vld [vmem:[#allocation3 + $0xf8] sm:$0xff] }
 0x487   :  { %18281 = vmatmul.mubr.f32.gmra.mrb[54].mxu1 %v6417_v62  ;;  %v23185_v62 = vld [vmem:[#allocation3 + $0x80] sm:$0xff] }
 0x488   :  { %18283 = vmatprep.mubr.f32.mxu1 %v6418_v3  ;;  %v7054_v3 = vld [vmem:[#allocation10 + $0x170] sm:$0xff] }
 0x489   :  { %17570 = vmatmul.mubr.f32.gmra.mrb[60].mxu0 %v25723_v5  ;;  %v23266_v5 = vld [vmem:[#allocation3 + $0x260] sm:$0xff] }
 0x48a   :  { %17572 = vmatprep.mubr.f32.mxu0 %v25724_v1  ;;  %v23270_v1 = vld [vmem:[#allocation3 + $0x270] sm:$0xff] }
 0x48b   :  { %18284 = vmatmul.mubr.f32.gmra.mrb[56].mxu1 %v6419_v14  ;;  %v23151_v14 = vpack.c.bf16 %v7049_v6, %v7048_v26  ;;  %v23313_v26 = vld [vmem:[#allocation3 + $0x168] sm:$0xff]  ;;  %v23315_v6 = vld [vmem:[#allocation3 + $0x2c0] sm:$0xff] }
 0x48c   :  { %18286 = vmatprep.mubr.f32.mxu1 %v6420_v52  ;;  %v7050_v52 = vld [vmem:[#allocation10 + $0x150] sm:$0xff]  ;;  %25729 = vst [vmem:[#allocation37_spill] sm:$0xff] %v23313_v26  ;;  %25730 = vst [vmem:[#allocation36_spill] sm:$0xff] %v23315_v6 }
 0x48d   :  { %17573 = vmatmul.mubr.f32.gmra.mrb[62].mxu0 %v25726_v28  ;;  %v23283_v28 = vld [vmem:[#allocation3 + $0x288] sm:$0xff] }
 0x48e   :  { %17607 = vmatprep.mubr.f32.mxu0 %v21129_v53 }
 0x48f   :  { %18287 = vmatmul.mubr.f32.gmra.mrb[58].mxu1 %v6421_v33  ;;  %v7055_v33 = vld [vmem:[#allocation10 + $0x178] sm:$0xff] }
 0x490   :  { %18289 = vmatprep.mubr.f32.mxu1 %v6422_v23  ;;  %v23169_v23 = vld [vmem:[#allocation3 + $0x68] sm:$0xff]  ;;  %v19603_v49 = vpack.c.bf16 %v7055_v33, %v7054_v3 }
 0x491   :  { %17608 = vmatmul.mubr.f32.vlgmr.msra.gmra.mrb[32].mxu0 %v21129_v53  ;;  %v23328_v3 = vld [vmem:[#allocation3 + $0x2e8] sm:$0xff] }
 0x492   :  { %17610 = vmatprep.mubr.f32.mxu0 %v23120_v58  ;;  %19578 = vmatpush3.bf16.msra.mxu0 %v25727_v34  ;;  %25734 = vst [vmem:[#allocation40_spill] sm:$0xff] %v23328_v3 }
 0x493   :  { %19580 = vmatprep.subr.bf16.mxu0 %v19579_v25  ;;  %18290 = vmatmul.mubr.f32.gmra.mrb[60].mxu1 %v6423_v41  ;;  %v23163_v41 = vld [vmem:[#allocation3 + $0x1c8] sm:$0xff] }
 0x494   :  { %18292 = vmatprep.mubr.f32.mxu1 %v6424_v44  ;;  %v7051_v44 = vld [vmem:[#allocation10 + $0x158] sm:$0xff] }
 0x495   :  { %17611 = vmatmul.mubr.f32.gmra.mrb[34].mxu0 %v23128_v42  ;;  %v23165_v37 = vpack.c.bf16 %v7051_v44, %v7050_v52  ;;  %v7007_v52 = vld [vmem:[#allocation3 + $0x2] sm:$0xff]  ;;  %v23322_v44 = vld [vmem:[#allocation3 + $0x170] sm:$0xff] }
 0x496   :  { %17613 = vmatprep.mubr.f32.mxu0 %v23133_v38  ;;  %19582 = vmatpush3.bf16.msra.mxu0 %v19579_v25  ;;  %25732 = vst [vmem:[#allocation38_spill] sm:$0xff] %v23322_v44 }
 0x497   :  { %19584 = vmatprep.subr.bf16.mxu0 %v23124_v2  ;;  %18293 = vmatmul.mubr.f32.gmra.mrb[62].mxu1 %v6425_v13  ;;  %v23189_v13 = vld [vmem:[#allocation3 + $0x90] sm:$0xff] }
 0x498   :  { %18327 = vmatprep.mubr.f32.mxu1 %v21129_v53 }
 0x499   :  { %17614 = vmatmul.mubr.f32.gmra.mrb[36].mxu0 %v23141_v48 }
 0x49a   :  { %17616 = vmatprep.mubr.f32.mxu0 %v23146_v57  ;;  %19586 = vmatpush3.bf16.msra.mxu0 %v23124_v2 }
 0x49b   :  { %19588 = vmatprep.subr.bf16.mxu0 %v23137_v40  ;;  %18328 = vmatmul.mubr.f32.vlgmr.msra.gmra.mrb[32].mxu1 %v21129_v53  ;;  %v23286_v53 = vld [vmem:[#allocation3 + $0x128] sm:$0xff] }
 0x49c   :  { %18330 = vmatprep.mubr.f32.mxu1 %v23163_v41  ;;  %19866 = vmatpush3.bf16.msra.mxu1 %v25727_v34  ;;  %v23298_v34 = vld [vmem:[#allocation3 + $0x140] sm:$0xff] }
 0x49d   :  { %17617 = vmatmul.mubr.f32.gmra.mrb[38].mxu0 %v23155_v56  ;;  %19868 = vmatprep.subr.bf16.mxu1 %v19579_v25 }
 0x49e   :  { %17619 = vmatprep.mubr.f32.mxu0 %v23158_v24  ;;  %19590 = vmatpush3.bf16.msra.mxu0 %v23137_v40 }
 0x49f   :  { %19592 = vmatprep.subr.bf16.mxu0 %v23151_v14  ;;  %18331 = vmatmul.mubr.f32.gmra.mrb[34].mxu1 %v23174_v12 }
 0x4a0   :  { %18333 = vmatprep.mubr.f32.mxu1 %v23179_v17  ;;  %19870 = vmatpush3.bf16.msra.mxu1 %v19579_v25  ;;  %v23289_v25 = vld [vmem:[#allocation3 + $0x138] sm:$0xff] }
 0x4a1   :  { %17620 = vmatmul.mubr.f32.gmra.mrb[40].mxu0 %v23169_v23  ;;  %19872 = vmatprep.subr.bf16.mxu1 %v23124_v2 }
 0x4a2   :  { %17622 = vmatprep.mubr.f32.mxu0 %v23172_v54  ;;  %19594 = vmatpush3.bf16.msra.mxu0 %v23151_v14 }
 0x4a3   :  { %19596 = vmatprep.subr.bf16.mxu0 %v23165_v37  ;;  %18334 = vmatmul.mubr.f32.gmra.mrb[36].mxu1 %v23191_v11 }
 0x4a4   :  { %18336 = vmatprep.mubr.f32.mxu1 %v23196_v7  ;;  %19874 = vmatpush3.bf16.msra.mxu1 %v23124_v2  ;;  %v23301_v2 = vld [vmem:[#allocation3 + $0x150] sm:$0xff] }
 0x4a5   :  { %17623 = vmatmul.mubr.f32.gmra.mrb[42].mxu0 %v23185_v62  ;;  %19876 = vmatprep.subr.bf16.mxu1 %v23137_v40 }
 0x4a6   :  { %17625 = vmatprep.mubr.f32.mxu0 %v23189_v13  ;;  %19598 = vmatpush3.bf16.msra.mxu0 %v23165_v37 }
 0x4a7   :  { %19600 = vmatprep.subr.bf16.mxu0 %v23182_v4  ;;  %18337 = vmatmul.mubr.f32.gmra.mrb[38].mxu1 %v23207_v18 }
 0x4a8   :  { %18339 = vmatprep.mubr.f32.mxu1 %v23212_v29  ;;  %19878 = vmatpush3.bf16.msra.mxu1 %v23137_v40  ;;  %v23310_v40 = vld [vmem:[#allocation3 + $0x158] sm:$0xff] }
 0x4a9   :  { %17626 = vmatmul.mubr.f32.gmra.mrb[44].mxu0 %v23201_v32  ;;  %19880 = vmatprep.subr.bf16.mxu1 %v23151_v14  ;;  %25728 = vst [vmem:[#allocation34_spill] sm:$0xff] %v23310_v40 }
 0x4aa   :  { %17628 = vmatprep.mubr.f32.mxu0 %v23205_v60  ;;  %19602 = vmatpush3.bf16.msra.mxu0 %v23182_v4 }
 0x4ab   :  { %19604 = vmatprep.subr.bf16.mxu0 %v19603_v49  ;;  %18340 = vmatmul.mubr.f32.gmra.mrb[40].mxu1 %v23224_v50 }
 0x4ac   :  { %18342 = vmatprep.mubr.f32.mxu1 %v23228_v45  ;;  %19882 = vmatpush3.bf16.msra.mxu1 %v23151_v14  ;;  %v23319_v14 = vld [vmem:[#allocation3 + $0x2d0] sm:$0xff] }
 0x4ad   :  { %17629 = vmatmul.mubr.f32.gmra.mrb[46].mxu0 %v23218_v16  ;;  %19884 = vmatprep.subr.bf16.mxu1 %v23165_v37  ;;  %25731 = vst [vmem:[#allocation39_spill] sm:$0xff] %v23319_v14 }
 0x4ae   :  { %17631 = vmatprep.mubr.f32.mxu0 %v23221_v19  ;;  %19606 = vmatpush3.bf16.msra.mxu0 %v19603_v49 }
 0x4af   :  { %19608 = vmatprep.subr.bf16.mxu0 %v23214_v27  ;;  %18343 = vmatmul.mubr.f32.gmra.mrb[42].mxu1 %v23239_v10 }
 0x4b0   :  { %18345 = vmatprep.mubr.f32.mxu1 %v23243_v35  ;;  %19886 = vmatpush3.bf16.msra.mxu1 %v23165_v37  ;;  %v7348_v37 = vld [vmem:[#allocation10 + $0x190] sm:$0xff] }
 0x4b1   :  { %17632 = vmatmul.mubr.f32.gmra.mrb[48].mxu0 %v23232_v46  ;;  %19888 = vmatprep.subr.bf16.mxu1 %v23182_v4  ;;  %v23330_v33 = vpack.c.bf16 %v7349_v59, %v7348_v37  ;;  %v7010_v37 = vld [vmem:[#allocation3 + $0x22] sm:$0xff]  ;;  %v7352_v59 = vld [vmem:[#allocation10 + $0x1b0] sm:$0xff] }
 0x4b2   :  { %17634 = vmatprep.mubr.f32.mxu0 %v23236_v31 }
 0x4b3   :  { %18346 = vmatmul.mubr.f32.gmra.mrb[44].mxu1 %v23253_v8 }
 0x4b4   :  { %18348 = vmatprep.mubr.f32.mxu1 %v23257_v61  ;;  %19890 = vmatpush3.bf16.msra.mxu1 %v23182_v4  ;;  %v7008_v4 = vld [vmem:[#allocation3 + $0xa] sm:$0xff] }
 0x4b5   :  { %17635 = vmatmul.mubr.f32.gmra.mrb[50].mxu0 %v23246_v21  ;;  %19892 = vmatprep.subr.bf16.mxu1 %v19603_v49 }
 0x4b6   :  { %17637 = vmatprep.mubr.f32.mxu0 %v23250_v9 }
 0x4b7   :  { %18349 = vmatmul.mubr.f32.gmra.mrb[46].mxu1 %v23266_v5 }
 0x4b8   :  { %18351 = vmatprep.mubr.f32.mxu1 %v23270_v1  ;;  %19894 = vmatpush3.bf16.msra.mxu1 %v19603_v49  ;;  %v7350_v49 = vld [vmem:[#allocation10 + $0x1a0] sm:$0xff] }
 0x4b9   :  { %17638 = vmatmul.mubr.f32.gmra.mrb[52].mxu0 %v23260_v47  ;;  %19896 = vmatprep.subr.bf16.mxu1 %v23214_v27 }
 0x4ba   :  { %17640 = vmatprep.mubr.f32.mxu0 %v23264_v63 }
 0x4bb   :  { %18352 = vmatmul.mubr.f32.gmra.mrb[48].mxu1 %v23279_v36 }
 0x4bc   :  { %18354 = vmatprep.mubr.f32.mxu1 %v23283_v28 }
 0x4bd   :  { %17641 = vmatmul.mubr.f32.gmra.mrb[54].mxu0 %v23273_v55 }
 0x4be   :  { %17643 = vmatprep.mubr.f32.mxu0 %v23276_v30 }
 0x4bf   :  { %18355 = vmatmul.mubr.f32.gmra.mrb[50].mxu1 %v23291_v15 }
 0x4c0   :  { %18357 = vmatprep.mubr.f32.mxu1 %v23295_v51 }
 0x4c1   :  { %17644 = vmatmul.mubr.f32.gmra.mrb[56].mxu0 %v23286_v53 }
 0x4c2   :  { %17646 = vmatprep.mubr.f32.mxu0 %v23289_v25 }
 0x4c3   :  { %18358 = vmatmul.mubr.f32.gmra.mrb[52].mxu1 %v23303_v39 }
 0x4c4   :  { %18360 = vmatprep.mubr.f32.mxu1 %v23307_v22 }
 0x4c5   :  { %17647 = vmatmul.mubr.f32.gmra.mrb[58].mxu0 %v23298_v34 }
 0x4c6   :  { %17649 = vmatprep.mubr.f32.mxu0 %v23301_v2 }
 0x4c7   :  { %18361 = vmatmul.mubr.f32.gmra.mrb[54].mxu1 %v23315_v6  ;;  %v7013_v6 = vld [vmem:[#allocation3 + $0x4a] sm:$0xff] }
 0x4c8   :  { %18363 = vmatprep.mubr.f32.mxu1 %v23319_v14  ;;  %v23333_v14 = vld [vmem:[#allocation3 + $0x2f0] sm:$0xff] }
 0x4c9   :  { %17650 = vmatmul.mubr.f32.gmra.mrb[60].mxu0 %v23310_v40  ;;  %25735 = vst [vmem:[#allocation43_spill] sm:$0xff] %v23333_v14  ;;  %v7015_v40 = vld [vmem:[#allocation3 + $0x62] sm:$0xff] }
 0x4ca   :  { %17652 = vmatprep.mubr.f32.mxu0 %v23313_v26  ;;  %v23353_v26 = vld [vmem:[#allocation3 + $0x320] sm:$0xff] }
 0x4cb   :  { %18364 = vmatmul.mubr.f32.gmra.mrb[56].mxu1 %v23325_v20  ;;  %v23340_v20 = vpack.c.bf16 %v7351_v0, %v7350_v49  ;;  %v7012_v0 = vld [vmem:[#allocation3 + $0x3a] sm:$0xff]  ;;  %25739 = vst [vmem:[#allocation47_spill] sm:$0xff] %v23353_v26 }
 0x4cc   :  { %18366 = vmatprep.mubr.f32.mxu1 %v23328_v3  ;;  %v7353_v3 = vld [vmem:[#allocation10 + $0x1b8] sm:$0xff] }
 0x4cd   :  { %17653 = vmatmul.mubr.f32.gmra.mrb[62].mxu0 %v23322_v44  ;;  %v23343_v44 = vld [vmem:[#allocation3 + $0x308] sm:$0xff]  ;;  %v23350_v49 = vpack.c.bf16 %v7353_v3, %v7352_v59  ;;  %v7014_v59 = vld [vmem:[#allocation3 + $0x52] sm:$0xff] }
 0x4ce   :  { %17687 = vmatprep.mubr.f32.mxu0 %v7007_v52  ;;  %v23337_v52 = vld [vmem:[#allocation3 + $0x300] sm:$0xff]  ;;  %25737 = vst [vmem:[#allocation45_spill] sm:$0xff] %v23343_v44 }
 0x4cf   :  { %18367 = vmatmul.mubr.f32.gmra.mrb[58].mxu1 %v23333_v14  ;;  %25736 = vst [vmem:[#allocation42_spill] sm:$0xff] %v23337_v52  ;;  %v7355_v14 = vld [vmem:[#allocation10 + $0x1c8] sm:$0xff] }
 0x4d0   :  { %18369 = vmatprep.mubr.f32.mxu1 %v23337_v52  ;;  %v7354_v52 = vld [vmem:[#allocation10 + $0x1c0] sm:$0xff] }
 0x4d1   :  { %17688 = vmatmul.mubr.f32.vlgmr.msra.gmra.mrb[32].mxu0 %v7008_v4  ;;  %v7011_v4 = vld [vmem:[#allocation3 + $0x32] sm:$0xff]  ;;  %v23358_v3 = vpack.c.bf16 %v7355_v14, %v7354_v52  ;;  %v7016_v14 = vld [vmem:[#allocation3 + $0x6a] sm:$0xff]  ;;  %v7358_v52 = vld [vmem:[#allocation10 + $0x1e0] sm:$0xff] }
 0x4d2   :  { %17690 = vmatprep.mubr.f32.mxu0 %v7009_v43  ;;  %19610 = vmatpush3.bf16.msra.mxu0 %v23214_v27  ;;  %v23347_v43 = vld [vmem:[#allocation3 + $0x318] sm:$0xff] }
 0x4d3   :  { %19612 = vmatprep.subr.bf16.mxu0 %v23330_v33  ;;  %18370 = vmatmul.mubr.f32.gmra.mrb[60].mxu1 %v23343_v44  ;;  %25738 = vst [vmem:[#allocation44_spill] sm:$0xff] %v23347_v43  ;;  %v7357_v44 = vld [vmem:[#allocation10 + $0x1d8] sm:$0xff] }
 0x4d4   :  { %18372 = vmatprep.mubr.f32.mxu1 %v23347_v43  ;;  %v7356_v43 = vld [vmem:[#allocation10 + $0x1d0] sm:$0xff] }
 0x4d5   :  { %17691 = vmatmul.mubr.f32.gmra.mrb[34].mxu0 %v7010_v37  ;;  %v9837_v37 = vld [vmem:[#allocation3 + $0x1b2] sm:$0xff] }
 0x4d6   :  { %17693 = vmatprep.mubr.f32.mxu0 %v7011_v4  ;;  %19614 = vmatpush3.bf16.msra.mxu0 %v23330_v33  ;;  %v9838_v4 = vld [vmem:[#allocation3 + $0x1ba] sm:$0xff] }
 0x4d7   :  { %19616 = vmatprep.subr.bf16.mxu0 %v23340_v20  ;;  %18373 = vmatmul.mubr.f32.gmra.mrb[62].mxu1 %v23353_v26  ;;  %v9840_v26 = vld [vmem:[#allocation3 + $0x1d2] sm:$0xff] }
 0x4d8   :  { %18407 = vmatprep.mubr.f32.mxu1 %v9837_v37  ;;  %v7359_v37 = vld [vmem:[#allocation10 + $0x1e8] sm:$0xff] }
 0x4d9   :  { %17694 = vmatmul.mubr.f32.gmra.mrb[36].mxu0 %v7012_v0  ;;  %v23362_v0 = vpack.c.bf16 %v7357_v44, %v7356_v43  ;;  %v23368_v44 = vpack.c.bf16 %v7359_v37, %v7358_v52  ;;  %v7360_v43 = vld [vmem:[#allocation10 + $0x1f0] sm:$0xff]  ;;  %v7652_v37 = vld [vmem:[#allocation10 + $0x200] sm:$0xff] }
 0x4da   :  { %17696 = vmatprep.mubr.f32.mxu0 %v7013_v6  ;;  %19618 = vmatpush3.bf16.msra.mxu0 %v23340_v20  ;;  %v9839_v6 = vld [vmem:[#allocation3 + $0x1ca] sm:$0xff] }
 0x4db   :  { %19620 = vmatprep.subr.bf16.mxu0 %v23350_v49  ;;  %18408 = vmatmul.mubr.f32.vlgmr.msra.gmra.mrb[32].mxu1 %v9838_v4  ;;  %v7361_v4 = vld [vmem:[#allocation10 + $0x1f8] sm:$0xff] }
 0x4dc   :  { %18410 = vmatprep.mubr.f32.mxu1 %v9839_v6  ;;  %19898 = vmatpush3.bf16.msra.mxu1 %v23214_v27  ;;  %v7018_v27 = vld [vmem:[#allocation3 + $0x82] sm:$0xff]  ;;  %v7019_v6 = vld [vmem:[#allocation3 + $0x92] sm:$0xff]  ;;  %v19635_v52 = vpack.c.bf16 %v7361_v4, %v7360_v43  ;;  %v9846_v4 = vld [vmem:[#allocation3 + $0x21a] sm:$0xff] }
 0x4dd   :  { %17697 = vmatmul.mubr.f32.gmra.mrb[38].mxu0 %v7014_v59  ;;  %19900 = vmatprep.subr.bf16.mxu1 %v23330_v33  ;;  %v7017_v59 = vld [vmem:[#allocation3 + $0x7a] sm:$0xff]  ;;  %v7023_v43 = vld [vmem:[#allocation3 + $0xc2] sm:$0xff] }
 0x4de   :  { %17699 = vmatprep.mubr.f32.mxu0 %v7015_v40  ;;  %19622 = vmatpush3.bf16.msra.mxu0 %v23350_v49  ;;  %v9841_v40 = vld [vmem:[#allocation3 + $0x1e2] sm:$0xff] }
 0x4df   :  { %19624 = vmatprep.subr.bf16.mxu0 %v23358_v3  ;;  %18411 = vmatmul.mubr.f32.gmra.mrb[34].mxu1 %v9840_v26  ;;  %v9843_v26 = vld [vmem:[#allocation3 + $0x1fa] sm:$0xff] }
 0x4e0   :  { %18413 = vmatprep.mubr.f32.mxu1 %v9841_v40  ;;  %19902 = vmatpush3.bf16.msra.mxu1 %v23330_v33  ;;  %v7020_v33 = vld [vmem:[#allocation3 + $0x9a] sm:$0xff]  ;;  %v7021_v40 = vld [vmem:[#allocation3 + $0xaa] sm:$0xff] }
 0x4e1   :  { %17700 = vmatmul.mubr.f32.gmra.mrb[40].mxu0 %v7016_v14  ;;  %19904 = vmatprep.subr.bf16.mxu1 %v23340_v20  ;;  %v9842_v14 = vld [vmem:[#allocation3 + $0x1ea] sm:$0xff] }
 0x4e2   :  { %17702 = vmatprep.mubr.f32.mxu0 %v7017_v59  ;;  %19626 = vmatpush3.bf16.msra.mxu0 %v23358_v3  ;;  %v7653_v59 = vld [vmem:[#allocation10 + $0x208] sm:$0xff] }
 0x4e3   :  { %19628 = vmatprep.subr.bf16.mxu0 %v23362_v0  ;;  %18414 = vmatmul.mubr.f32.gmra.mrb[36].mxu1 %v9842_v14  ;;  %v23377_v14 = vpack.c.bf16 %v7653_v59, %v7652_v37  ;;  %v7025_v37 = vld [vmem:[#allocation3 + $0xda] sm:$0xff]  ;;  %v9849_v59 = vld [vmem:[#allocation3 + $0x242] sm:$0xff] }
 0x4e4   :  { %18416 = vmatprep.mubr.f32.mxu1 %v9843_v26  ;;  %19906 = vmatpush3.bf16.msra.mxu1 %v23340_v20  ;;  %v7022_v20 = vld [vmem:[#allocation3 + $0xb2] sm:$0xff]  ;;  %v9847_v26 = vld [vmem:[#allocation3 + $0x22a] sm:$0xff] }
 0x4e5   :  { %17703 = vmatmul.mubr.f32.gmra.mrb[42].mxu0 %v7018_v27  ;;  %19908 = vmatprep.subr.bf16.mxu1 %v23350_v49  ;;  %v9844_v27 = vld [vmem:[#allocation3 + $0x202] sm:$0xff] }
 0x4e6   :  { %17705 = vmatprep.mubr.f32.mxu0 %v7019_v6  ;;  %19630 = vmatpush3.bf16.msra.mxu0 %v23362_v0  ;;  %v9845_v6 = vld [vmem:[#allocation3 + $0x212] sm:$0xff] }
 0x4e7   :  { %19632 = vmatprep.subr.bf16.mxu0 %v23368_v44  ;;  %18417 = vmatmul.mubr.f32.gmra.mrb[38].mxu1 %v9844_v27  ;;  %v7027_v27 = vld [vmem:[#allocation3 + $0xf2] sm:$0xff] }
 0x4e8   :  { %18419 = vmatprep.mubr.f32.mxu1 %v9845_v6  ;;  %19910 = vmatpush3.bf16.msra.mxu1 %v23350_v49  ;;  %v9848_v49 = vld [vmem:[#allocation3 + $0x232] sm:$0xff]  ;;  %v9850_v6 = vld [vmem:[#allocation3 + $0x24a] sm:$0xff] }
 0x4e9   :  { %17706 = vmatmul.mubr.f32.gmra.mrb[44].mxu0 %v7020_v33  ;;  %19912 = vmatprep.subr.bf16.mxu1 %v23358_v3  ;;  %v7024_v33 = vld [vmem:[#allocation3 + $0xca] sm:$0xff] }
 0x4ea   :  { %17708 = vmatprep.mubr.f32.mxu0 %v7021_v40  ;;  %19634 = vmatpush3.bf16.msra.mxu0 %v23368_v44  ;;  %v7026_v40 = vld [vmem:[#allocation3 + $0xe2] sm:$0xff] }
 0x4eb   :  { %19636 = vmatprep.subr.bf16.mxu0 %v19635_v52  ;;  %18420 = vmatmul.mubr.f32.gmra.mrb[40].mxu1 %v9846_v4  ;;  %v9852_v4 = vld [vmem:[#allocation3 + $0x262] sm:$0xff] }
 0x4ec   :  { %18422 = vmatprep.mubr.f32.mxu1 %v9847_v26  ;;  %19914 = vmatpush3.bf16.msra.mxu1 %v23358_v3  ;;  %v9851_v3 = vld [vmem:[#allocation3 + $0x25a] sm:$0xff]  ;;  %v9853_v26 = vld [vmem:[#allocation3 + $0x272] sm:$0xff] }
 0x4ed   :  { %17709 = vmatmul.mubr.f32.gmra.mrb[46].mxu0 %v7022_v20  ;;  %19916 = vmatprep.subr.bf16.mxu1 %v23362_v0  ;;  %v7028_v20 = vld [vmem:[#allocation3 + $0xfa] sm:$0xff] }
 0x4ee   :  { %17711 = vmatprep.mubr.f32.mxu0 %v7023_v43  ;;  %19638 = vmatpush3.bf16.msra.mxu0 %v19635_v52  ;;  %v7029_v43 = vld [vmem:[#allocation3 + $0x10a] sm:$0xff] }
 0x4ef   :  { %19640 = vmatprep.subr.bf16.mxu0 %v23377_v14  ;;  %18423 = vmatmul.mubr.f32.gmra.mrb[42].mxu1 %v9848_v49  ;;  %v9855_v49 = vld [vmem:[#allocation3 + $0x28a] sm:$0xff] }
 0x4f0   :  { %18425 = vmatprep.mubr.f32.mxu1 %v9849_v59  ;;  %19918 = vmatpush3.bf16.msra.mxu1 %v23362_v0  ;;  %v7030_v0 = vld [vmem:[#allocation3 + $0x112] sm:$0xff]  ;;  %v7033_v59 = vld [vmem:[#allocation3 + $0x13a] sm:$0xff] }
 0x4f1   :  { %17712 = vmatmul.mubr.f32.gmra.mrb[48].mxu0 %v7024_v33  ;;  %19920 = vmatprep.subr.bf16.mxu1 %v23368_v44  ;;  %v7031_v33 = vld [vmem:[#allocation3 + $0x122] sm:$0xff] }
 0x4f2   :  { %17714 = vmatprep.mubr.f32.mxu0 %v7025_v37  ;;  %v9854_v37 = vld [vmem:[#allocation3 + $0x27a] sm:$0xff] }
 0x4f3   :  { %18426 = vmatmul.mubr.f32.gmra.mrb[44].mxu1 %v9850_v6  ;;  %v7034_v6 = vld [vmem:[#allocation3 + $0x142] sm:$0xff] }
 0x4f4   :  { %18428 = vmatprep.mubr.f32.mxu1 %v9851_v3  ;;  %19922 = vmatpush3.bf16.msra.mxu1 %v23368_v44  ;;  %v7032_v44 = vld [vmem:[#allocation3 + $0x12a] sm:$0xff] }
 0x4f5   :  { %17715 = vmatmul.mubr.f32.gmra.mrb[50].mxu0 %v7026_v40  ;;  %19924 = vmatprep.subr.bf16.mxu1 %v19635_v52  ;;  %v9856_v40 = vld [vmem:[#allocation3 + $0x292] sm:$0xff]  ;;  %v9858_v3 = vld [vmem:[#allocation3 + $0x2aa] sm:$0xff] }
 0x4f6   :  { %17717 = vmatprep.mubr.f32.mxu0 %v7027_v27  ;;  %v9857_v27 = vld [vmem:[#allocation3 + $0x2a2] sm:$0xff] }
 0x4f7   :  { %18429 = vmatmul.mubr.f32.gmra.mrb[46].mxu1 %v9852_v4  ;;  %v7037_v4 = vld [vmem:[#allocation3 + $0x16a] sm:$0xff] }
 0x4f8   :  { %18431 = vmatprep.mubr.f32.mxu1 %v9853_v26  ;;  %19926 = vmatpush3.bf16.msra.mxu1 %v19635_v52  ;;  %v7035_v52 = vld [vmem:[#allocation3 + $0x152] sm:$0xff]  ;;  %v9860_v26 = vld [vmem:[#allocation3 + $0x2c2] sm:$0xff] }
 0x4f9   :  { %17718 = vmatmul.mubr.f32.gmra.mrb[52].mxu0 %v7028_v20  ;;  %19928 = vmatprep.subr.bf16.mxu1 %v23377_v14  ;;  %v9859_v20 = vld [vmem:[#allocation3 + $0x2ba] sm:$0xff] }
 0x4fa   :  { %17720 = vmatprep.mubr.f32.mxu0 %v7029_v43  ;;  %v7036_v43 = vld [vmem:[#allocation3 + $0x15a] sm:$0xff] }
 0x4fb   :  { %18432 = vmatmul.mubr.f32.gmra.mrb[48].mxu1 %v9854_v37  ;;  %v7654_v37 = vld [vmem:[#allocation10 + $0x210] sm:$0xff] }
 0x4fc   :  { %18434 = vmatprep.mubr.f32.mxu1 %v9855_v49  ;;  %v7655_v49 = vld [vmem:[#allocation10 + $0x218] sm:$0xff] }
 0x4fd   :  { %17721 = vmatmul.mubr.f32.gmra.mrb[54].mxu0 %v7030_v0  ;;  %v9861_v0 = vld [vmem:[#allocation3 + $0x2d2] sm:$0xff] }
 0x4fe   :  { %17723 = vmatprep.mubr.f32.mxu0 %v7031_v33  ;;  %v7038_v33 = vld [vmem:[#allocation3 + $0x172] sm:$0xff] }
 0x4ff   :  { %18435 = vmatmul.mubr.f32.gmra.mrb[50].mxu1 %v9856_v40  ;;  %v19643_v40 = vpack.c.bf16 %v7655_v49, %v7654_v37  ;;  %v7663_v37 = vld [vmem:[#allocation10 + $0x258] sm:$0xff]  ;;  %v7665_v49 = vld [vmem:[#allocation10 + $0x268] sm:$0xff] }
 0x500   :  { %18437 = vmatprep.mubr.f32.mxu1 %v9857_v27  ;;  %v7656_v27 = vld [vmem:[#allocation10 + $0x220] sm:$0xff] }
 0x501   :  { %17724 = vmatmul.mubr.f32.gmra.mrb[56].mxu0 %v7032_v44  ;;  %v9862_v44 = vld [vmem:[#allocation3 + $0x2da] sm:$0xff] }
 0x502   :  { %17726 = vmatprep.mubr.f32.mxu0 %v7033_v59  ;;  %v9863_v59 = vld [vmem:[#allocation3 + $0x2ea] sm:$0xff] }
 0x503   :  { %18438 = vmatmul.mubr.f32.gmra.mrb[52].mxu1 %v9858_v3  ;;  %v9865_v3 = vld [vmem:[#allocation3 + $0x302] sm:$0xff] }
 0x504   :  { %18440 = vmatprep.mubr.f32.mxu1 %v9859_v20 }
 0x505   :  { %17727 = vmatmul.mubr.f32.gmra.mrb[58].mxu0 %v7034_v6  ;;  %v7657_v6 = vld [vmem:[#allocation10 + $0x228] sm:$0xff] }
 0x506   :  { %17729 = vmatprep.mubr.f32.mxu0 %v7035_v52  ;;  %v9864_v52 = vld [vmem:[#allocation3 + $0x2f2] sm:$0xff]  ;;  %v19647_v20 = vpack.c.bf16 %v7657_v6, %v7656_v27 }
 0x507   :  { %18441 = vmatmul.mubr.f32.gmra.mrb[54].mxu1 %v9860_v26  ;;  %v7969_v27 = vld [vmem:[#allocation10 + $0x2d8] sm:$0xff] }
 0x508   :  { %18443 = vmatprep.mubr.f32.mxu1 %v9861_v0  ;;  %v7661_v0 = vld [vmem:[#allocation10 + $0x248] sm:$0xff]  ;;  %v7627_v6 = vld [vmem:[#allocation3 + $0x79] sm:$0xff] }
 0x509   :  { %17730 = vmatmul.mubr.f32.gmra.mrb[60].mxu0 %v7036_v43  ;;  %v7658_v43 = vld [vmem:[#allocation10 + $0x230] sm:$0xff] }
 0x50a   :  { %17732 = vmatprep.mubr.f32.mxu0 %v7037_v4  ;;  %v9866_v4 = vld [vmem:[#allocation3 + $0x30a] sm:$0xff] }
 0x50b   :  { %18444 = vmatmul.mubr.f32.gmra.mrb[56].mxu1 %v9862_v44 }
 0x50c   :  { %18446 = vmatprep.mubr.f32.mxu1 %v9863_v59  ;;  %v7626_v59 = vld [vmem:[#allocation3 + $0x69] sm:$0xff] }
 0x50d   :  { %17733 = vmatmul.mubr.f32.gmra.mrb[62].mxu0 %v7038_v33  ;;  %v9868_v33 = vld [vmem:[#allocation3 + $0x322] sm:$0xff] }
 0x50e   :  { %17767 = vmatprep.mubr.f32.mxu0 %v23120_v58  ;;  %v7659_v58 = vld [vmem:[#allocation10 + $0x238] sm:$0xff] }
 0x50f   :  { %18447 = vmatmul.mubr.f32.gmra.mrb[58].mxu1 %v9864_v52  ;;  %v19651_v26 = vpack.c.bf16 %v7659_v58, %v7658_v43  ;;  %v10448_v52 = vld [vmem:[#allocation3 + $0x1d1] sm:$0xff]  ;;  %v7628_v43 = vld [vmem:[#allocation3 + $0x81] sm:$0xff] }
 0x510   :  { %18449 = vmatprep.mubr.f32.mxu1 %v9865_v3  ;;  %v10449_v3 = vld [vmem:[#allocation3 + $0x1e1] sm:$0xff] }
 0x511   :  { %17768 = vmatmul.mubr.f32.vlgmr.msra.gmra.mrb[32].mxu0 %v23128_v42  ;;  %v9867_v42 = vld [vmem:[#allocation3 + $0x31a] sm:$0xff] }
 0x512   :  { %17770 = vmatprep.mubr.f32.mxu0 %v23133_v38  ;;  %19642 = vmatpush3.bf16.msra.mxu0 %v23377_v14  ;;  %v7660_v38 = vld [vmem:[#allocation10 + $0x240] sm:$0xff] }
 0x513   :  { %19644 = vmatprep.subr.bf16.mxu0 %v19643_v40  ;;  %18450 = vmatmul.mubr.f32.gmra.mrb[60].mxu1 %v9866_v4  ;;  %v7970_v58 = vld [vmem:[#allocation10 + $0x2e0] sm:$0xff]  ;;  %v7971_v4 = vld [vmem:[#allocation10 + $0x2e8] sm:$0xff] }
 0x514   :  { %18452 = vmatprep.mubr.f32.mxu1 %v9867_v42  ;;  %v7629_v42 = vld [vmem:[#allocation3 + $0x91] sm:$0xff] }
 0x515   :  { %17771 = vmatmul.mubr.f32.gmra.mrb[34].mxu0 %v23141_v48  ;;  %v19655_v48 = vpack.c.bf16 %v7661_v0, %v7660_v38  ;;  %v10451_v38 = vld [vmem:[#allocation3 + $0x1f9] sm:$0xff]  ;;  %v23476_v0 = vpack.c.bf16 %v7971_v4, %v7970_v58 }
 0x516   :  { %17773 = vmatprep.mubr.f32.mxu0 %v23146_v57  ;;  %19646 = vmatpush3.bf16.msra.mxu0 %v19643_v40  ;;  %v7662_v57 = vld [vmem:[#allocation10 + $0x250] sm:$0xff]  ;;  %v10475_v58 = vld [vmem:[#allocation3 + $0x319] sm:$0xff] }
 0x517   :  { %19648 = vmatprep.subr.bf16.mxu0 %v19647_v20  ;;  %18453 = vmatmul.mubr.f32.gmra.mrb[62].mxu1 %v9868_v33  ;;  %v7630_v33 = vld [vmem:[#allocation3 + $0x99] sm:$0xff] }
 0x518   :  { %18487 = vmatprep.mubr.f32.mxu1 %v23163_v41 }
 0x519   :  { %17774 = vmatmul.mubr.f32.gmra.mrb[36].mxu0 %v23155_v56  ;;  %v19659_v56 = vpack.c.bf16 %v7663_v37, %v7662_v57  ;;  %v7973_v57 = vld [vmem:[#allocation10 + $0x2f8] sm:$0xff]  ;;  %v7631_v37 = vld [vmem:[#allocation3 + $0xa9] sm:$0xff] }
 0x51a   :  { %17776 = vmatprep.mubr.f32.mxu0 %v23158_v24  ;;  %19650 = vmatpush3.bf16.msra.mxu0 %v19647_v20  ;;  %v7664_v24 = vld [vmem:[#allocation10 + $0x260] sm:$0xff] }
 0x51b   :  { %19652 = vmatprep.subr.bf16.mxu0 %v19651_v26  ;;  %18488 = vmatmul.mubr.f32.vlgmr.msra.gmra.mrb[32].mxu1 %v23174_v12  ;;  %v19663_v41 = vpack.c.bf16 %v7665_v49, %v7664_v24  ;;  %v10453_v24 = vld [vmem:[#allocation3 + $0x211] sm:$0xff] }
 0x51c   :  { %18490 = vmatprep.mubr.f32.mxu1 %v23179_v17  ;;  %19930 = vmatpush3.bf16.msra.mxu1 %v23377_v14  ;;  %v7958_v17 = vld [vmem:[#allocation10 + $0x280] sm:$0xff]  ;;  %v10447_v14 = vld [vmem:[#allocation3 + $0x1c9] sm:$0xff] }
 0x51d   :  { %17777 = vmatmul.mubr.f32.gmra.mrb[38].mxu0 %v23169_v23  ;;  %19932 = vmatprep.subr.bf16.mxu1 %v19643_v40  ;;  %v7666_v23 = vld [vmem:[#allocation10 + $0x270] sm:$0xff] }
 0x51e   :  { %17779 = vmatprep.mubr.f32.mxu0 %v23172_v54  ;;  %19654 = vmatpush3.bf16.msra.mxu0 %v19651_v26  ;;  %v7667_v54 = vld [vmem:[#allocation10 + $0x278] sm:$0xff] }
 0x51f   :  { %19656 = vmatprep.subr.bf16.mxu0 %v19655_v48  ;;  %18491 = vmatmul.mubr.f32.gmra.mrb[34].mxu1 %v23191_v11  ;;  %v19667_v12 = vpack.c.bf16 %v7667_v54, %v7666_v23  ;;  %v25740_v11 = vld [vmem:[#allocation34_spill] sm:$0xff]  ;;  %v8266_v54 = vld [vmem:[#allocation10 + $0x308] sm:$0xff] }
 0x520   :  { %18493 = vmatprep.mubr.f32.mxu1 %v23196_v7  ;;  %19934 = vmatpush3.bf16.msra.mxu1 %v19643_v40  ;;  %v25741_v7 = vld [vmem:[#allocation37_spill] sm:$0xff]  ;;  %v7968_v40 = vld [vmem:[#allocation10 + $0x2d0] sm:$0xff]  ;;  %v8265_v23 = vld [vmem:[#allocation10 + $0x300] sm:$0xff] }
 0x521   :  { %17780 = vmatmul.mubr.f32.gmra.mrb[40].mxu0 %v23185_v62  ;;  %19936 = vmatprep.subr.bf16.mxu1 %v19647_v20  ;;  %v7959_v62 = vld [vmem:[#allocation10 + $0x288] sm:$0xff] }
 0x522   :  { %17782 = vmatprep.mubr.f32.mxu0 %v23189_v13  ;;  %19658 = vmatpush3.bf16.msra.mxu0 %v19655_v48  ;;  %v23413_v13 = vpack.c.bf16 %v7959_v62, %v7958_v17  ;;  %v10454_v17 = vld [vmem:[#allocation3 + $0x219] sm:$0xff]  ;;  %v10455_v62 = vld [vmem:[#allocation3 + $0x229] sm:$0xff] }
 0x523   :  { %19660 = vmatprep.subr.bf16.mxu0 %v19659_v56  ;;  %18494 = vmatmul.mubr.f32.gmra.mrb[36].mxu1 %v23207_v18  ;;  %v25744_v18 = vld [vmem:[#allocation38_spill] sm:$0xff] }
 0x524   :  { %18496 = vmatprep.mubr.f32.mxu1 %v23212_v29  ;;  %19938 = vmatpush3.bf16.msra.mxu1 %v19647_v20  ;;  %v7343_v29 = vld [vmem:[#allocation3 + $0x180] sm:$0xff]  ;;  %v23470_v20 = vpack.c.bf16 %v7969_v27, %v7968_v40 }
 0x525   :  { %17783 = vmatmul.mubr.f32.gmra.mrb[42].mxu0 %v23201_v32  ;;  %19940 = vmatprep.subr.bf16.mxu1 %v19651_v26  ;;  %v25742_v32 = vld [vmem:[#allocation36_spill] sm:$0xff]  ;;  %v10473_v40 = vld [vmem:[#allocation3 + $0x301] sm:$0xff] }
 0x526   :  { %17785 = vmatprep.mubr.f32.mxu0 %v23205_v60  ;;  %19662 = vmatpush3.bf16.msra.mxu0 %v19659_v56  ;;  %v25743_v60 = vld [vmem:[#allocation39_spill] sm:$0xff] }
 0x527   :  { %19664 = vmatprep.subr.bf16.mxu0 %v19663_v41  ;;  %18497 = vmatmul.mubr.f32.gmra.mrb[38].mxu1 %v23224_v50  ;;  %v7344_v50 = vld [vmem:[#allocation3 + $0x188] sm:$0xff] }
 0x528   :  { %18499 = vmatprep.mubr.f32.mxu1 %v23228_v45  ;;  %19942 = vmatpush3.bf16.msra.mxu1 %v19651_v26  ;;  %v7960_v45 = vld [vmem:[#allocation10 + $0x290] sm:$0xff] }
 0x529   :  { %17786 = vmatmul.mubr.f32.gmra.mrb[44].mxu0 %v23218_v16  ;;  %19944 = vmatprep.subr.bf16.mxu1 %v19655_v48  ;;  %v25745_v16 = vld [vmem:[#allocation41_spill] sm:$0xff]  ;;  %v10450_v26 = vld [vmem:[#allocation3 + $0x1e9] sm:$0xff] }
 0x52a   :  { %17788 = vmatprep.mubr.f32.mxu0 %v23221_v19  ;;  %19666 = vmatpush3.bf16.msra.mxu0 %v19663_v41  ;;  %v25746_v19 = vld [vmem:[#allocation40_spill] sm:$0xff] }
 0x52b   :  { %19668 = vmatprep.subr.bf16.mxu0 %v19667_v12  ;;  %18500 = vmatmul.mubr.f32.gmra.mrb[40].mxu1 %v23239_v10  ;;  %v25747_v10 = vld [vmem:[#allocation43_spill] sm:$0xff] }
 0x52c   :  { %18502 = vmatprep.mubr.f32.mxu1 %v23243_v35  ;;  %19946 = vmatpush3.bf16.msra.mxu1 %v19655_v48  ;;  %v7972_v48 = vld [vmem:[#allocation10 + $0x2f0] sm:$0xff] }
 0x52d   :  { %17789 = vmatmul.mubr.f32.gmra.mrb[46].mxu0 %v23232_v46  ;;  %19948 = vmatprep.subr.bf16.mxu1 %v19659_v56  ;;  %v7961_v46 = vld [vmem:[#allocation10 + $0x298] sm:$0xff]  ;;  %v19699_v49 = vpack.c.bf16 %v7973_v57, %v7972_v48 }
 0x52e   :  { %17791 = vmatprep.mubr.f32.mxu0 %v23236_v31  ;;  %19670 = vmatpush3.bf16.msra.mxu0 %v19667_v12  ;;  %v7619_v31 = vld [vmem:[#allocation3 + $0x19] sm:$0xff]  ;;  %v23450_v35 = vpack.c.bf16 %v7961_v46, %v7960_v45  ;;  %v7639_v45 = vld [vmem:[#allocation3 + $0x109] sm:$0xff]  ;;  %v10460_v46 = vld [vmem:[#allocation3 + $0x261] sm:$0xff] }
 0x52f   :  { %19672 = vmatprep.subr.bf16.mxu0 %v23413_v13  ;;  %18503 = vmatmul.mubr.f32.gmra.mrb[42].mxu1 %v23253_v8  ;;  %v7962_v8 = vld [vmem:[#allocation10 + $0x2a0] sm:$0xff]  ;;  %v10477_v48 = vld [vmem:[#allocation3 + $0x331] sm:$0xff] }
 0x530   :  { %18505 = vmatprep.mubr.f32.mxu1 %v23257_v61  ;;  %19950 = vmatpush3.bf16.msra.mxu1 %v19659_v56  ;;  %v7963_v61 = vld [vmem:[#allocation10 + $0x2a8] sm:$0xff] }
 0x531   :  { %17792 = vmatmul.mubr.f32.gmra.mrb[48].mxu0 %v23246_v21  ;;  %19952 = vmatprep.subr.bf16.mxu1 %v19663_v41  ;;  %v25748_v21 = vld [vmem:[#allocation42_spill] sm:$0xff] }
 0x532   :  { %17794 = vmatprep.mubr.f32.mxu0 %v23250_v9  ;;  %v7620_v9 = vld [vmem:[#allocation3 + $0x21] sm:$0xff] }
 0x533   :  { %18506 = vmatmul.mubr.f32.gmra.mrb[44].mxu1 %v23266_v5  ;;  %v23456_v5 = vpack.c.bf16 %v7963_v61, %v7962_v8  ;;  %v10452_v56 = vld [vmem:[#allocation3 + $0x201] sm:$0xff]  ;;  %v7642_v8 = vld [vmem:[#allocation3 + $0x129] sm:$0xff]  ;;  %v7643_v61 = vld [vmem:[#allocation3 + $0x139] sm:$0xff] }
 0x534   :  { %18508 = vmatprep.mubr.f32.mxu1 %v23270_v1  ;;  %19954 = vmatpush3.bf16.msra.mxu1 %v19663_v41  ;;  %v25750_v1 = vld [vmem:[#allocation44_spill] sm:$0xff] }
 0x535   :  { %17795 = vmatmul.mubr.f32.gmra.mrb[50].mxu0 %v23260_v47  ;;  %19956 = vmatprep.subr.bf16.mxu1 %v19667_v12  ;;  %v7621_v47 = vld [vmem:[#allocation3 + $0x31] sm:$0xff] }
 0x536   :  { %17797 = vmatprep.mubr.f32.mxu0 %v23264_v63  ;;  %v25749_v63 = vld [vmem:[#allocation45_spill] sm:$0xff] }
 0x537   :  { %18509 = vmatmul.mubr.f32.gmra.mrb[46].mxu1 %v23279_v36  ;;  %v7965_v36 = vld [vmem:[#allocation10 + $0x2b8] sm:$0xff] }
 0x538   :  { %18511 = vmatprep.mubr.f32.mxu1 %v23283_v28  ;;  %19958 = vmatpush3.bf16.msra.mxu1 %v19667_v12  ;;  %v7623_v28 = vld [vmem:[#allocation3 + $0x49] sm:$0xff]  ;;  %v7632_v41 = vld [vmem:[#allocation3 + $0xb1] sm:$0xff]  ;;  %v7633_v12 = vld [vmem:[#allocation3 + $0xc1] sm:$0xff] }
 0x539   :  { %17798 = vmatmul.mubr.f32.gmra.mrb[52].mxu0 %v23273_v55  ;;  %19960 = vmatprep.subr.bf16.mxu1 %v23413_v13  ;;  %v7622_v55 = vld [vmem:[#allocation3 + $0x39] sm:$0xff] }
 0x53a   :  { %17800 = vmatprep.mubr.f32.mxu0 %v23276_v30  ;;  %v7964_v30 = vld [vmem:[#allocation10 + $0x2b0] sm:$0xff] }
 0x53b   :  { %18512 = vmatmul.mubr.f32.gmra.mrb[48].mxu1 %v23291_v15  ;;  %v23462_v15 = vpack.c.bf16 %v7965_v36, %v7964_v30  ;;  %v10467_v30 = vld [vmem:[#allocation3 + $0x2b9] sm:$0xff] }
 0x53c   :  { %18514 = vmatprep.mubr.f32.mxu1 %v23295_v51  ;;  %v7624_v51 = vld [vmem:[#allocation3 + $0x51] sm:$0xff]  ;;  %v7646_v36 = vld [vmem:[#allocation3 + $0x159] sm:$0xff] }
 0x53d   :  { %17801 = vmatmul.mubr.f32.gmra.mrb[54].mxu0 %v23286_v53  ;;  %v25751_v53 = vld [vmem:[#allocation47_spill] sm:$0xff] }
 0x53e   :  { %17803 = vmatprep.mubr.f32.mxu0 %v23289_v25  ;;  %v10172_v25 = vld [vmem:[#allocation3 + $0x330] sm:$0xff] }
 0x53f   :  { %18515 = vmatmul.mubr.f32.gmra.mrb[50].mxu1 %v23303_v39  ;;  %v7625_v39 = vld [vmem:[#allocation3 + $0x61] sm:$0xff] }
 0x540   :  { %18517 = vmatprep.mubr.f32.mxu1 %v23307_v22  ;;  %v10173_v22 = vld [vmem:[#allocation3 + $0x338] sm:$0xff] }
 0x541   :  { %17804 = vmatmul.mubr.f32.gmra.mrb[56].mxu0 %v23298_v34  ;;  %v7966_v34 = vld [vmem:[#allocation10 + $0x2c0] sm:$0xff] }
 0x542   :  { %17806 = vmatprep.mubr.f32.mxu0 %v23301_v2  ;;  %v7967_v2 = vld [vmem:[#allocation10 + $0x2c8] sm:$0xff] }
 0x543   :  { %18518 = vmatmul.mubr.f32.gmra.mrb[52].mxu1 %v25742_v32  ;;  %v23466_v44 = vpack.c.bf16 %v7967_v2, %v7966_v34  ;;  %v10456_v32 = vld [vmem:[#allocation3 + $0x231] sm:$0xff]  ;;  %v10470_v34 = vld [vmem:[#allocation3 + $0x2d9] sm:$0xff]  ;;  %v10471_v2 = vld [vmem:[#allocation3 + $0x2e9] sm:$0xff] }
 0x544   :  { %18520 = vmatprep.mubr.f32.mxu1 %v25743_v60  ;;  %v10457_v60 = vld [vmem:[#allocation3 + $0x241] sm:$0xff] }
 0x545   :  { %17807 = vmatmul.mubr.f32.gmra.mrb[58].mxu0 %v25740_v11  ;;  %v7634_v11 = vld [vmem:[#allocation3 + $0xc9] sm:$0xff] }
 0x546   :  { %17809 = vmatprep.mubr.f32.mxu0 %v25741_v7  ;;  %v7635_v7 = vld [vmem:[#allocation3 + $0xd9] sm:$0xff] }
 0x547   :  { %18521 = vmatmul.mubr.f32.gmra.mrb[54].mxu1 %v25745_v16  ;;  %v10458_v16 = vld [vmem:[#allocation3 + $0x249] sm:$0xff] }
 0x548   :  { %18523 = vmatprep.mubr.f32.mxu1 %v25746_v19  ;;  %v10459_v19 = vld [vmem:[#allocation3 + $0x259] sm:$0xff] }
 0x549   :  { %17810 = vmatmul.mubr.f32.gmra.mrb[60].mxu0 %v25744_v18  ;;  %v7636_v18 = vld [vmem:[#allocation3 + $0xe1] sm:$0xff] }
 0x54a   :  { %17812 = vmatprep.mubr.f32.mxu0 %v7343_v29  ;;  %v7637_v29 = vld [vmem:[#allocation3 + $0xf1] sm:$0xff] }
 0x54b   :  { %18524 = vmatmul.mubr.f32.gmra.mrb[56].mxu1 %v25747_v10  ;;  %v7640_v10 = vld [vmem:[#allocation3 + $0x111] sm:$0xff] }
 0x54c   :  { %18526 = vmatprep.mubr.f32.mxu1 %v25748_v21  ;;  %v10462_v21 = vld [vmem:[#allocation3 + $0x279] sm:$0xff] }
 0x54d   :  { %17813 = vmatmul.mubr.f32.gmra.mrb[62].mxu0 %v7344_v50  ;;  %v7638_v50 = vld [vmem:[#allocation3 + $0xf9] sm:$0xff] }
 0x54e   :  { %17847 = vmatprep.mubr.f32.mxu0 %v7619_v31  ;;  %v10461_v31 = vld [vmem:[#allocation3 + $0x271] sm:$0xff] }
 0x54f   :  { %18527 = vmatmul.mubr.f32.gmra.mrb[58].mxu1 %v25749_v63  ;;  %v10465_v63 = vld [vmem:[#allocation3 + $0x2a1] sm:$0xff] }
 0x550   :  { %18529 = vmatprep.mubr.f32.mxu1 %v25750_v1  ;;  %v7645_v1 = vld [vmem:[#allocation3 + $0x151] sm:$0xff] }
 0x551   :  { %17848 = vmatmul.mubr.f32.vlgmr.msra.gmra.mrb[32].mxu0 %v7620_v9  ;;  %v10463_v9 = vld [vmem:[#allocation3 + $0x289] sm:$0xff] }
 0x552   :  { %17850 = vmatprep.mubr.f32.mxu0 %v7621_v47  ;;  %19674 = vmatpush3.bf16.msra.mxu0 %v23413_v13  ;;  %v10464_v47 = vld [vmem:[#allocation3 + $0x291] sm:$0xff] }
 0x553   :  { %19676 = vmatprep.subr.bf16.mxu0 %v23450_v35  ;;  %18530 = vmatmul.mubr.f32.gmra.mrb[60].mxu1 %v25751_v53  ;;  %v10468_v53 = vld [vmem:[#allocation3 + $0x2c1] sm:$0xff] }
 0x554   :  { %18532 = vmatprep.mubr.f32.mxu1 %v10172_v25  ;;  %v10469_v25 = vld [vmem:[#allocation3 + $0x2d1] sm:$0xff] }
 0x555   :  { %17851 = vmatmul.mubr.f32.gmra.mrb[34].mxu0 %v7622_v55  ;;  %v10466_v55 = vld [vmem:[#allocation3 + $0x2a9] sm:$0xff] }
 0x556   :  { %17853 = vmatprep.mubr.f32.mxu0 %v7623_v28  ;;  %19678 = vmatpush3.bf16.msra.mxu0 %v23450_v35  ;;  %v7647_v28 = vld [vmem:[#allocation3 + $0x169] sm:$0xff] }
 0x557   :  { %19680 = vmatprep.subr.bf16.mxu0 %v23456_v5  ;;  %18533 = vmatmul.mubr.f32.gmra.mrb[62].mxu1 %v10173_v22  ;;  %v8267_v22 = vld [vmem:[#allocation10 + $0x310] sm:$0xff] }
 0x558   :  { %18567 = vmatprep.mubr.f32.mxu1 %v10447_v14  ;;  %v8268_v14 = vld [vmem:[#allocation10 + $0x318] sm:$0xff] }
 0x559   :  { %17854 = vmatmul.mubr.f32.gmra.mrb[36].mxu0 %v7624_v51  ;;  %v7649_v51 = vld [vmem:[#allocation3 + $0x181] sm:$0xff]  ;;  %v23496_v27 = vpack.c.bf16 %v8268_v14, %v8267_v22  ;;  %v7945_v22 = vld [vmem:[#allocation3 + $0x10a] sm:$0xff] }
 0x55a   :  { %17856 = vmatprep.mubr.f32.mxu0 %v7625_v39  ;;  %19682 = vmatpush3.bf16.msra.mxu0 %v23456_v5  ;;  %v7650_v39 = vld [vmem:[#allocation3 + $0x189] sm:$0xff] }
 0x55b   :  { %19684 = vmatprep.subr.bf16.mxu0 %v23462_v15  ;;  %18568 = vmatmul.mubr.f32.vlgmr.msra.gmra.mrb[32].mxu1 %v10448_v52  ;;  %v8269_v52 = vld [vmem:[#allocation10 + $0x320] sm:$0xff] }
 0x55c   :  { %18570 = vmatprep.mubr.f32.mxu1 %v10449_v3  ;;  %19962 = vmatpush3.bf16.msra.mxu1 %v23413_v13  ;;  %v23485_v13 = vpack.c.bf16 %v8266_v54, %v8265_v23  ;;  %v8270_v3 = vld [vmem:[#allocation10 + $0x328] sm:$0xff] }
 0x55d   :  { %17857 = vmatmul.mubr.f32.gmra.mrb[38].mxu0 %v7626_v59  ;;  %19964 = vmatprep.subr.bf16.mxu1 %v23450_v35  ;;  %v10472_v59 = vld [vmem:[#allocation3 + $0x2f1] sm:$0xff]  ;;  %v23500_v4 = vpack.c.bf16 %v8270_v3, %v8269_v52  ;;  %v10765_v14 = vld [vmem:[#allocation3 + $0x262] sm:$0xff]  ;;  %v7949_v3 = vld [vmem:[#allocation3 + $0x13a] sm:$0xff] }
 0x55e   :  { %17859 = vmatprep.mubr.f32.mxu0 %v7627_v6  ;;  %19686 = vmatpush3.bf16.msra.mxu0 %v23462_v15  ;;  %v7926_v6 = vld [vmem:[#allocation3 + $0x22] sm:$0xff]  ;;  %v10752_v23 = vld [vmem:[#allocation3 + $0x1ca] sm:$0xff] }
 0x55f   :  { %19688 = vmatprep.subr.bf16.mxu0 %v23466_v44  ;;  %18571 = vmatmul.mubr.f32.gmra.mrb[34].mxu1 %v10450_v26  ;;  %v8271_v26 = vld [vmem:[#allocation10 + $0x330] sm:$0xff] }
 0x560   :  { %18573 = vmatprep.mubr.f32.mxu1 %v10451_v38  ;;  %19966 = vmatpush3.bf16.msra.mxu1 %v23450_v35  ;;  %v7641_v35 = vld [vmem:[#allocation3 + $0x121] sm:$0xff]  ;;  %v8272_v38 = vld [vmem:[#allocation10 + $0x338] sm:$0xff]  ;;  %v7948_v52 = vld [vmem:[#allocation3 + $0x12a] sm:$0xff] }
 0x561   :  { %17860 = vmatmul.mubr.f32.gmra.mrb[40].mxu0 %v7628_v43  ;;  %19968 = vmatprep.subr.bf16.mxu1 %v23456_v5  ;;  %v10474_v43 = vld [vmem:[#allocation3 + $0x309] sm:$0xff]  ;;  %v23504_v57 = vpack.c.bf16 %v8272_v38, %v8271_v26  ;;  %v10772_v26 = vld [vmem:[#allocation3 + $0x2ba] sm:$0xff] }
 0x562   :  { %17862 = vmatprep.mubr.f32.mxu0 %v7629_v42  ;;  %19690 = vmatpush3.bf16.msra.mxu0 %v23466_v44  ;;  %v7928_v42 = vld [vmem:[#allocation3 + $0x3a] sm:$0xff] }
 0x563   :  { %19692 = vmatprep.subr.bf16.mxu0 %v23470_v20  ;;  %18574 = vmatmul.mubr.f32.gmra.mrb[36].mxu1 %v10452_v56  ;;  %v8273_v56 = vld [vmem:[#allocation10 + $0x340] sm:$0xff] }
 0x564   :  { %18576 = vmatprep.mubr.f32.mxu1 %v10453_v24  ;;  %19970 = vmatpush3.bf16.msra.mxu1 %v23456_v5  ;;  %v7644_v5 = vld [vmem:[#allocation3 + $0x141] sm:$0xff] }
 0x565   :  { %17863 = vmatmul.mubr.f32.gmra.mrb[42].mxu0 %v7630_v33  ;;  %19972 = vmatprep.subr.bf16.mxu1 %v23462_v15  ;;  %v10476_v33 = vld [vmem:[#allocation3 + $0x321] sm:$0xff] }
 0x566   :  { %17865 = vmatprep.mubr.f32.mxu0 %v7631_v37  ;;  %19694 = vmatpush3.bf16.msra.mxu0 %v23470_v20  ;;  %v7930_v37 = vld [vmem:[#allocation3 + $0x52] sm:$0xff]  ;;  %v8274_v24 = vld [vmem:[#allocation10 + $0x348] sm:$0xff]  ;;  %v7952_v38 = vld [vmem:[#allocation3 + $0x15a] sm:$0xff] }
 0x567   :  { %19696 = vmatprep.subr.bf16.mxu0 %v23476_v0  ;;  %18577 = vmatmul.mubr.f32.gmra.mrb[38].mxu1 %v10454_v17  ;;  %v23508_v54 = vpack.c.bf16 %v8274_v24, %v8273_v56  ;;  %v8275_v17 = vld [vmem:[#allocation10 + $0x350] sm:$0xff]  ;;  %v10775_v56 = vld [vmem:[#allocation3 + $0x2da] sm:$0xff] }
 0x568   :  { %18579 = vmatprep.mubr.f32.mxu1 %v10455_v62  ;;  %19974 = vmatpush3.bf16.msra.mxu1 %v23462_v15  ;;  %v7648_v15 = vld [vmem:[#allocation3 + $0x171] sm:$0xff] }
 0x569   :  { %17866 = vmatmul.mubr.f32.gmra.mrb[44].mxu0 %v7632_v41  ;;  %19976 = vmatprep.subr.bf16.mxu1 %v23466_v44  ;;  %v10478_v41 = vld [vmem:[#allocation3 + $0x339] sm:$0xff]  ;;  %v10776_v24 = vld [vmem:[#allocation3 + $0x2ea] sm:$0xff] }
 0x56a   :  { %17868 = vmatprep.mubr.f32.mxu0 %v7633_v12  ;;  %19698 = vmatpush3.bf16.msra.mxu0 %v23476_v0  ;;  %v7932_v12 = vld [vmem:[#allocation3 + $0x6a] sm:$0xff]  ;;  %v8276_v62 = vld [vmem:[#allocation10 + $0x358] sm:$0xff] }
 0x56b   :  { %19700 = vmatprep.subr.bf16.mxu0 %v19699_v49  ;;  %18580 = vmatmul.mubr.f32.gmra.mrb[40].mxu1 %v10456_v32  ;;  %v10754_v32 = vld [vmem:[#allocation3 + $0x1e2] sm:$0xff] }
 0x56c   :  { %18582 = vmatprep.mubr.f32.mxu1 %v10457_v60  ;;  %19978 = vmatpush3.bf16.msra.mxu1 %v23466_v44  ;;  %v7925_v44 = vld [vmem:[#allocation3 + $0x1a] sm:$0xff]  ;;  %v23512_v60 = vpack.c.bf16 %v8276_v62, %v8275_v17  ;;  %v10778_v17 = vld [vmem:[#allocation3 + $0x302] sm:$0xff] }
 0x56d   :  { %17869 = vmatmul.mubr.f32.gmra.mrb[46].mxu0 %v7634_v11  ;;  %19980 = vmatprep.subr.bf16.mxu1 %v23470_v20  ;;  %v7933_v11 = vld [vmem:[#allocation3 + $0x7a] sm:$0xff] }
 0x56e   :  { %17871 = vmatprep.mubr.f32.mxu0 %v7635_v7  ;;  %19702 = vmatpush3.bf16.msra.mxu0 %v19699_v49  ;;  %v10753_v7 = vld [vmem:[#allocation3 + $0x1d2] sm:$0xff] }
 0x56f   :  { %19704 = vmatprep.subr.bf16.mxu0 %v23485_v13  ;;  %18583 = vmatmul.mubr.f32.gmra.mrb[42].mxu1 %v10458_v16  ;;  %v8278_v16 = vld [vmem:[#allocation10 + $0x368] sm:$0xff] }
 0x570   :  { %18585 = vmatprep.mubr.f32.mxu1 %v10459_v19  ;;  %19982 = vmatpush3.bf16.msra.mxu1 %v23470_v20  ;;  %v7927_v20 = vld [vmem:[#allocation3 + $0x32] sm:$0xff] }
 0x571   :  { %17872 = vmatmul.mubr.f32.gmra.mrb[48].mxu0 %v7636_v18  ;;  %19984 = vmatprep.subr.bf16.mxu1 %v23476_v0  ;;  %v7934_v18 = vld [vmem:[#allocation3 + $0x82] sm:$0xff]  ;;  %v7935_v19 = vld [vmem:[#allocation3 + $0x92] sm:$0xff] }
 0x572   :  { %17874 = vmatprep.mubr.f32.mxu0 %v7637_v29  ;;  %v8277_v29 = vld [vmem:[#allocation10 + $0x360] sm:$0xff] }
 0x573   :  { %18586 = vmatmul.mubr.f32.gmra.mrb[44].mxu1 %v10460_v46  ;;  %v23518_v46 = vpack.c.bf16 %v8278_v16, %v8277_v29  ;;  %v10780_v29 = vld [vmem:[#allocation3 + $0x31a] sm:$0xff] }
 0x574   :  { %18588 = vmatprep.mubr.f32.mxu1 %v10461_v31  ;;  %19986 = vmatpush3.bf16.msra.mxu1 %v23476_v0  ;;  %v7929_v0 = vld [vmem:[#allocation3 + $0x4a] sm:$0xff] }
 0x575   :  { %17875 = vmatmul.mubr.f32.gmra.mrb[50].mxu0 %v7638_v50  ;;  %19988 = vmatprep.subr.bf16.mxu1 %v19699_v49  ;;  %v10755_v50 = vld [vmem:[#allocation3 + $0x1ea] sm:$0xff] }
 0x576   :  { %17877 = vmatprep.mubr.f32.mxu0 %v7639_v45  ;;  %v10756_v45 = vld [vmem:[#allocation3 + $0x1fa] sm:$0xff]  ;;  %v8279_v31 = vld [vmem:[#allocation10 + $0x370] sm:$0xff] }
 0x577   :  { %18589 = vmatmul.mubr.f32.gmra.mrb[46].mxu1 %v10462_v21  ;;  %v10757_v21 = vld [vmem:[#allocation3 + $0x202] sm:$0xff] }
 0x578   :  { %18591 = vmatprep.mubr.f32.mxu1 %v10463_v9  ;;  %19990 = vmatpush3.bf16.msra.mxu1 %v19699_v49  ;;  %v7931_v49 = vld [vmem:[#allocation3 + $0x62] sm:$0xff]  ;;  %v10758_v9 = vld [vmem:[#allocation3 + $0x212] sm:$0xff] }
 0x579   :  { %17878 = vmatmul.mubr.f32.gmra.mrb[52].mxu0 %v7640_v10  ;;  %19992 = vmatprep.subr.bf16.mxu1 %v23485_v13  ;;  %v8280_v10 = vld [vmem:[#allocation10 + $0x378] sm:$0xff] }
 0x57a   :  { %17880 = vmatprep.mubr.f32.mxu0 %v7641_v35  ;;  %v7937_v35 = vld [vmem:[#allocation3 + $0xaa] sm:$0xff] }
 0x57b   :  { %18592 = vmatmul.mubr.f32.gmra.mrb[48].mxu1 %v10464_v47  ;;  %v8571_v47 = vld [vmem:[#allocation10 + $0x380] sm:$0xff] }
 0x57c   :  { %18594 = vmatprep.mubr.f32.mxu1 %v10465_v63  ;;  %v8572_v63 = vld [vmem:[#allocation10 + $0x388] sm:$0xff] }
 0x57d   :  { %17881 = vmatmul.mubr.f32.gmra.mrb[54].mxu0 %v7642_v8  ;;  %v19731_v8 = vpack.c.bf16 %v8280_v10, %v8279_v31  ;;  %v10782_v31 = vld [vmem:[#allocation3 + $0x332] sm:$0xff] }
 0x57e   :  { %17883 = vmatprep.mubr.f32.mxu0 %v7643_v61  ;;  %v7938_v61 = vld [vmem:[#allocation3 + $0xb2] sm:$0xff] }
 0x57f   :  { %18595 = vmatmul.mubr.f32.gmra.mrb[50].mxu1 %v10466_v55  ;;  %v10760_v55 = vld [vmem:[#allocation3 + $0x22a] sm:$0xff] }
 0x580   :  { %18597 = vmatprep.mubr.f32.mxu1 %v10467_v30  ;;  %v23527_v30 = vpack.c.bf16 %v8572_v63, %v8571_v47  ;;  %v11058_v47 = vld [vmem:[#allocation3 + $0x1e0] sm:$0xff] }
 0x581   :  { %17884 = vmatmul.mubr.f32.gmra.mrb[56].mxu0 %v7644_v5  ;;  %v7939_v5 = vld [vmem:[#allocation3 + $0xc2] sm:$0xff] }
 0x582   :  { %17886 = vmatprep.mubr.f32.mxu0 %v7645_v1  ;;  %v10759_v1 = vld [vmem:[#allocation3 + $0x21a] sm:$0xff] }
 0x583   :  { %18598 = vmatmul.mubr.f32.gmra.mrb[52].mxu1 %v10468_v53  ;;  %v10761_v53 = vld [vmem:[#allocation3 + $0x232] sm:$0xff] }
 0x584   :  { %18600 = vmatprep.mubr.f32.mxu1 %v10469_v25  ;;  %v10762_v25 = vld [vmem:[#allocation3 + $0x242] sm:$0xff] }
 0x585   :  { %17887 = vmatmul.mubr.f32.gmra.mrb[58].mxu0 %v7646_v36  ;;  %v7940_v36 = vld [vmem:[#allocation3 + $0xca] sm:$0xff] }
 0x586   :  { %17889 = vmatprep.mubr.f32.mxu0 %v7647_v28  ;;  %v7941_v28 = vld [vmem:[#allocation3 + $0xda] sm:$0xff] }
 0x587   :  { %18601 = vmatmul.mubr.f32.gmra.mrb[54].mxu1 %v10470_v34  ;;  %v10763_v34 = vld [vmem:[#allocation3 + $0x24a] sm:$0xff] }
 0x588   :  { %18603 = vmatprep.mubr.f32.mxu1 %v10471_v2  ;;  %v10764_v2 = vld [vmem:[#allocation3 + $0x25a] sm:$0xff] }
 0x589   :  { %17890 = vmatmul.mubr.f32.gmra.mrb[60].mxu0 %v7648_v15  ;;  %v7942_v15 = vld [vmem:[#allocation3 + $0xe2] sm:$0xff] }
 0x58a   :  { %17892 = vmatprep.mubr.f32.mxu0 %v7649_v51  ;;  %v7943_v51 = vld [vmem:[#allocation3 + $0xf2] sm:$0xff] }
 0x58b   :  { %18604 = vmatmul.mubr.f32.gmra.mrb[56].mxu1 %v10472_v59  ;;  %v7946_v59 = vld [vmem:[#allocation3 + $0x112] sm:$0xff] }
 0x58c   :  { %18606 = vmatprep.mubr.f32.mxu1 %v10473_v40  ;;  %v7947_v40 = vld [vmem:[#allocation3 + $0x122] sm:$0xff] }
 0x58d   :  { %17893 = vmatmul.mubr.f32.gmra.mrb[62].mxu0 %v7650_v39  ;;  %v7944_v39 = vld [vmem:[#allocation3 + $0xfa] sm:$0xff] }
 0x58e   :  { %17927 = vmatprep.mubr.f32.mxu0 %v7925_v44  ;;  %v10766_v44 = vld [vmem:[#allocation3 + $0x272] sm:$0xff] }
 0x58f   :  { %18607 = vmatmul.mubr.f32.gmra.mrb[58].mxu1 %v10474_v43  ;;  %v10770_v43 = vld [vmem:[#allocation3 + $0x2a2] sm:$0xff] }
 0x590   :  { %18609 = vmatprep.mubr.f32.mxu1 %v10475_v58  ;;  %v7950_v58 = vld [vmem:[#allocation3 + $0x142] sm:$0xff] }
 0x591   :  { %17928 = vmatmul.mubr.f32.vlgmr.msra.gmra.mrb[32].mxu0 %v7926_v6  ;;  %v10768_v6 = vld [vmem:[#allocation3 + $0x28a] sm:$0xff] }
 0x592   :  { %17930 = vmatprep.mubr.f32.mxu0 %v7927_v20  ;;  %19706 = vmatpush3.bf16.msra.mxu0 %v23485_v13  ;;  %v10769_v20 = vld [vmem:[#allocation3 + $0x292] sm:$0xff] }
 0x593   :  { %19708 = vmatprep.subr.bf16.mxu0 %v23496_v27  ;;  %18610 = vmatmul.mubr.f32.gmra.mrb[60].mxu1 %v10476_v33  ;;  %v10773_v33 = vld [vmem:[#allocation3 + $0x2c2] sm:$0xff] }
 0x594   :  { %18612 = vmatprep.mubr.f32.mxu1 %v10477_v48  ;;  %v10774_v48 = vld [vmem:[#allocation3 + $0x2d2] sm:$0xff] }
 0x595   :  { %17931 = vmatmul.mubr.f32.gmra.mrb[34].mxu0 %v7928_v42  ;;  %v10771_v42 = vld [vmem:[#allocation3 + $0x2aa] sm:$0xff] }
 0x596   :  { %17933 = vmatprep.mubr.f32.mxu0 %v7929_v0  ;;  %19710 = vmatpush3.bf16.msra.mxu0 %v23496_v27  ;;  %v7953_v0 = vld [vmem:[#allocation3 + $0x16a] sm:$0xff] }
 0x597   :  { %19712 = vmatprep.subr.bf16.mxu0 %v23500_v4  ;;  %18613 = vmatmul.mubr.f32.gmra.mrb[62].mxu1 %v10478_v41  ;;  %v8573_v41 = vld [vmem:[#allocation10 + $0x390] sm:$0xff] }
 0x598   :  { %18647 = vmatprep.mubr.f32.mxu1 %v10752_v23  ;;  %v8574_v23 = vld [vmem:[#allocation10 + $0x398] sm:$0xff] }
 0x599   :  { %17934 = vmatmul.mubr.f32.gmra.mrb[36].mxu0 %v7930_v37  ;;  %v7955_v37 = vld [vmem:[#allocation3 + $0x182] sm:$0xff]  ;;  %v23538_v62 = vpack.c.bf16 %v8574_v23, %v8573_v41  ;;  %v11071_v23 = vld [vmem:[#allocation3 + $0x278] sm:$0xff] }
 0x59a   :  { %17936 = vmatprep.mubr.f32.mxu0 %v7931_v49  ;;  %19714 = vmatpush3.bf16.msra.mxu0 %v23500_v4  ;;  %v7956_v49 = vld [vmem:[#allocation3 + $0x18a] sm:$0xff]  ;;  %v8252_v41 = vld [vmem:[#allocation3 + $0x120] sm:$0xff] }
 0x59b   :  { %19716 = vmatprep.subr.bf16.mxu0 %v23504_v57  ;;  %18648 = vmatmul.mubr.f32.vlgmr.msra.gmra.mrb[32].mxu1 %v10753_v7  ;;  %v8575_v7 = vld [vmem:[#allocation10 + $0x3a0] sm:$0xff] }
 0x59c   :  { %18650 = vmatprep.mubr.f32.mxu1 %v10754_v32  ;;  %19994 = vmatpush3.bf16.msra.mxu1 %v23485_v13  ;;  %v7936_v13 = vld [vmem:[#allocation3 + $0x9a] sm:$0xff]  ;;  %v8576_v32 = vld [vmem:[#allocation10 + $0x3a8] sm:$0xff] }
 0x59d   :  { %17937 = vmatmul.mubr.f32.gmra.mrb[38].mxu0 %v7932_v12  ;;  %19996 = vmatprep.subr.bf16.mxu1 %v23496_v27  ;;  %v10777_v12 = vld [vmem:[#allocation3 + $0x2f2] sm:$0xff]  ;;  %v23542_v16 = vpack.c.bf16 %v8576_v32, %v8575_v7  ;;  %v8255_v7 = vld [vmem:[#allocation3 + $0x140] sm:$0xff] }
 0x59e   :  { %17939 = vmatprep.mubr.f32.mxu0 %v7933_v11  ;;  %19718 = vmatpush3.bf16.msra.mxu0 %v23504_v57  ;;  %v8233_v11 = vld [vmem:[#allocation3 + $0x38] sm:$0xff]  ;;  %v8256_v32 = vld [vmem:[#allocation3 + $0x150] sm:$0xff] }
 0x59f   :  { %19720 = vmatprep.subr.bf16.mxu0 %v23508_v54  ;;  %18651 = vmatmul.mubr.f32.gmra.mrb[34].mxu1 %v10755_v50  ;;  %v8577_v50 = vld [vmem:[#allocation10 + $0x3b0] sm:$0xff] }
 0x5a0   :  { %18653 = vmatprep.mubr.f32.mxu1 %v10756_v45  ;;  %19998 = vmatpush3.bf16.msra.mxu1 %v23496_v27  ;;  %v10767_v27 = vld [vmem:[#allocation3 + $0x27a] sm:$0xff] }
 0x5a1   :  { %17940 = vmatmul.mubr.f32.gmra.mrb[40].mxu0 %v7934_v18  ;;  %20000 = vmatprep.subr.bf16.mxu1 %v23500_v4  ;;  %v10779_v18 = vld [vmem:[#allocation3 + $0x30a] sm:$0xff]  ;;  %v8578_v45 = vld [vmem:[#allocation10 + $0x3b8] sm:$0xff] }
 0x5a2   :  { %17942 = vmatprep.mubr.f32.mxu0 %v7935_v19  ;;  %19722 = vmatpush3.bf16.msra.mxu0 %v23508_v54  ;;  %v8235_v19 = vld [vmem:[#allocation3 + $0x50] sm:$0xff]  ;;  %v23546_v10 = vpack.c.bf16 %v8578_v45, %v8577_v50 }
 0x5a3   :  { %19724 = vmatprep.subr.bf16.mxu0 %v23512_v60  ;;  %18654 = vmatmul.mubr.f32.gmra.mrb[36].mxu1 %v10757_v21  ;;  %v8579_v21 = vld [vmem:[#allocation10 + $0x3c0] sm:$0xff]  ;;  %v11078_v50 = vld [vmem:[#allocation3 + $0x2d0] sm:$0xff] }
 0x5a4   :  { %18656 = vmatprep.mubr.f32.mxu1 %v10758_v9  ;;  %20002 = vmatpush3.bf16.msra.mxu1 %v23500_v4  ;;  %v7951_v4 = vld [vmem:[#allocation3 + $0x152] sm:$0xff]  ;;  %v8580_v9 = vld [vmem:[#allocation10 + $0x3c8] sm:$0xff] }
 0x5a5   :  { %17943 = vmatmul.mubr.f32.gmra.mrb[42].mxu0 %v7936_v13  ;;  %20004 = vmatprep.subr.bf16.mxu1 %v23504_v57  ;;  %v10781_v13 = vld [vmem:[#allocation3 + $0x322] sm:$0xff]  ;;  %v23550_v63 = vpack.c.bf16 %v8580_v9, %v8579_v21  ;;  %v8259_v45 = vld [vmem:[#allocation3 + $0x170] sm:$0xff] }
 0x5a6   :  { %17945 = vmatprep.mubr.f32.mxu0 %v7937_v35  ;;  %19726 = vmatpush3.bf16.msra.mxu0 %v23512_v60  ;;  %v8237_v35 = vld [vmem:[#allocation3 + $0x68] sm:$0xff]  ;;  %v21130_v21 = vld [vmem:[#allocation2] sm:$0xff] }
 0x5a7   :  { %19728 = vmatprep.subr.bf16.mxu0 %v23518_v46  ;;  %18657 = vmatmul.mubr.f32.gmra.mrb[38].mxu1 %v10759_v1  ;;  %v8581_v1 = vld [vmem:[#allocation10 + $0x3d0] sm:$0xff]  ;;  %v11082_v9 = vld [vmem:[#allocation3 + $0x300] sm:$0xff] }
 0x5a8   :  { %18659 = vmatprep.mubr.f32.mxu1 %v10760_v55  ;;  %20006 = vmatpush3.bf16.msra.mxu1 %v23504_v57  ;;  %v7954_v57 = vld [vmem:[#allocation3 + $0x172] sm:$0xff] }
 0x5a9   :  { %17946 = vmatmul.mubr.f32.gmra.mrb[44].mxu0 %v7938_v61  ;;  %20008 = vmatprep.subr.bf16.mxu1 %v23508_v54  ;;  %v10783_v61 = vld [vmem:[#allocation3 + $0x33a] sm:$0xff] }
 0x5aa   :  { %17948 = vmatprep.mubr.f32.mxu0 %v7939_v5  ;;  %19730 = vmatpush3.bf16.msra.mxu0 %v23518_v46  ;;  %v8239_v5 = vld [vmem:[#allocation3 + $0x80] sm:$0xff]  ;;  %v8582_v55 = vld [vmem:[#allocation10 + $0x3d8] sm:$0xff] }
 0x5ab   :  { %19732 = vmatprep.subr.bf16.mxu0 %v19731_v8  ;;  %18660 = vmatmul.mubr.f32.gmra.mrb[40].mxu1 %v10761_v53  ;;  %v11060_v53 = vld [vmem:[#allocation3 + $0x1f8] sm:$0xff] }
 0x5ac   :  { %18662 = vmatprep.mubr.f32.mxu1 %v10762_v25  ;;  %20010 = vmatpush3.bf16.msra.mxu1 %v23508_v54  ;;  %v8232_v54 = vld [vmem:[#allocation3 + $0x30] sm:$0xff]  ;;  %v23554_v25 = vpack.c.bf16 %v8582_v55, %v8581_v1  ;;  %v8539_v55 = vld [vmem:[#allocation3 + $0x39] sm:$0xff] }
 0x5ad   :  { %17949 = vmatmul.mubr.f32.gmra.mrb[46].mxu0 %v7940_v36  ;;  %20012 = vmatprep.subr.bf16.mxu1 %v23512_v60  ;;  %v8240_v36 = vld [vmem:[#allocation3 + $0x90] sm:$0xff] }
 0x5ae   :  { %17951 = vmatprep.mubr.f32.mxu0 %v7941_v28  ;;  %19734 = vmatpush3.bf16.msra.mxu0 %v19731_v8  ;;  %v11059_v28 = vld [vmem:[#allocation3 + $0x1e8] sm:$0xff] }
 0x5af   :  { %19736 = vmatprep.subr.bf16.mxu0 %v23527_v30  ;;  %18663 = vmatmul.mubr.f32.gmra.mrb[42].mxu1 %v10763_v34  ;;  %v8584_v34 = vld [vmem:[#allocation10 + $0x3e8] sm:$0xff] }
 0x5b0   :  { %18665 = vmatprep.mubr.f32.mxu1 %v10764_v2  ;;  %20014 = vmatpush3.bf16.msra.mxu1 %v23512_v60  ;;  %v8234_v60 = vld [vmem:[#allocation3 + $0x48] sm:$0xff] }
 0x5b1   :  { %17952 = vmatmul.mubr.f32.gmra.mrb[48].mxu0 %v7942_v15  ;;  %20016 = vmatprep.subr.bf16.mxu1 %v23518_v46  ;;  %v8241_v15 = vld [vmem:[#allocation3 + $0x98] sm:$0xff]  ;;  %v8242_v2 = vld [vmem:[#allocation3 + $0xa8] sm:$0xff] }
 0x5b2   :  { %17954 = vmatprep.mubr.f32.mxu0 %v7943_v51  ;;  %v8583_v51 = vld [vmem:[#allocation10 + $0x3e0] sm:$0xff] }
 0x5b3   :  { %18666 = vmatmul.mubr.f32.gmra.mrb[44].mxu1 %v10765_v14  ;;  %v23560_v14 = vpack.c.bf16 %v8584_v34, %v8583_v51  ;;  %v8541_v34 = vld [vmem:[#allocation3 + $0x51] sm:$0xff] }
 0x5b4   :  { %18668 = vmatprep.mubr.f32.mxu1 %v10766_v44  ;;  %20018 = vmatpush3.bf16.msra.mxu1 %v23518_v46  ;;  %v8236_v46 = vld [vmem:[#allocation3 + $0x60] sm:$0xff]  ;;  %v8585_v44 = vld [vmem:[#allocation10 + $0x3f0] sm:$0xff] }
 0x5b5   :  { %17955 = vmatmul.mubr.f32.gmra.mrb[50].mxu0 %v7944_v39  ;;  %20020 = vmatprep.subr.bf16.mxu1 %v19731_v8  ;;  %v11061_v39 = vld [vmem:[#allocation3 + $0x200] sm:$0xff] }
 0x5b6   :  { %17957 = vmatprep.mubr.f32.mxu0 %v7945_v22  ;;  %v11062_v22 = vld [vmem:[#allocation3 + $0x210] sm:$0xff] }
 0x5b7   :  { %18669 = vmatmul.mubr.f32.gmra.mrb[46].mxu1 %v10767_v27  ;;  %v11063_v27 = vld [vmem:[#allocation3 + $0x218] sm:$0xff] }
 0x5b8   :  { %18671 = vmatprep.mubr.f32.mxu1 %v10768_v6  ;;  %20022 = vmatpush3.bf16.msra.mxu1 %v19731_v8  ;;  %v8238_v8 = vld [vmem:[#allocation3 + $0x78] sm:$0xff]  ;;  %v11064_v6 = vld [vmem:[#allocation3 + $0x228] sm:$0xff] }
 0x5b9   :  { %17958 = vmatmul.mubr.f32.gmra.mrb[52].mxu0 %v7946_v59  ;;  %20024 = vmatprep.subr.bf16.mxu1 %v23527_v30  ;;  %v8586_v59 = vld [vmem:[#allocation10 + $0x3f8] sm:$0xff] }
 0x5ba   :  { %17960 = vmatprep.mubr.f32.mxu0 %v7947_v40  ;;  %v8244_v40 = vld [vmem:[#allocation3 + $0xc0] sm:$0xff] }
 0x5bb   :  { %18672 = vmatmul.mubr.f32.gmra.mrb[48].mxu1 %v10769_v20  ;;  %v8877_v20 = vld [vmem:[#allocation10 + $0x400] sm:$0xff] }
 0x5bc   :  { %18674 = vmatprep.mubr.f32.mxu1 %v10770_v43  ;;  %v8878_v43 = vld [vmem:[#allocation10 + $0x408] sm:$0xff] }
 0x5bd   :  { %17961 = vmatmul.mubr.f32.gmra.mrb[54].mxu0 %v7948_v52  ;;  %v19763_v52 = vpack.c.bf16 %v8586_v59, %v8585_v44  ;;  %v8543_v44 = vld [vmem:[#allocation3 + $0x69] sm:$0xff]  ;;  %v8885_v59 = vld [vmem:[#allocation10 + $0x440] sm:$0xff] }
 0x5be   :  { %17963 = vmatprep.mubr.f32.mxu0 %v7949_v3  ;;  %v8245_v3 = vld [vmem:[#allocation3 + $0xc8] sm:$0xff] }
 0x5bf   :  { %18675 = vmatmul.mubr.f32.gmra.mrb[50].mxu1 %v10771_v42  ;;  %v11066_v42 = vld [vmem:[#allocation3 + $0x240] sm:$0xff] }
 0x5c0   :  { %18677 = vmatprep.mubr.f32.mxu1 %v10772_v26  ;;  %v23569_v26 = vpack.c.bf16 %v8878_v43, %v8877_v20  ;;  %v8887_v20 = vld [vmem:[#allocation10 + $0x450] sm:$0xff]  ;;  %v8888_v43 = vld [vmem:[#allocation10 + $0x458] sm:$0xff] }
 0x5c1   :  { %17964 = vmatmul.mubr.f32.gmra.mrb[56].mxu0 %v7950_v58  ;;  %v8246_v58 = vld [vmem:[#allocation3 + $0xd8] sm:$0xff] }
 0x5c2   :  { %17966 = vmatprep.mubr.f32.mxu0 %v7951_v4  ;;  %v11065_v4 = vld [vmem:[#allocation3 + $0x230] sm:$0xff] }
 0x5c3   :  { %18678 = vmatmul.mubr.f32.gmra.mrb[52].mxu1 %v10773_v33  ;;  %v11067_v33 = vld [vmem:[#allocation3 + $0x248] sm:$0xff] }
 0x5c4   :  { %18680 = vmatprep.mubr.f32.mxu1 %v10774_v48  ;;  %v11068_v48 = vld [vmem:[#allocation3 + $0x258] sm:$0xff] }
 0x5c5   :  { %17967 = vmatmul.mubr.f32.gmra.mrb[58].mxu0 %v7952_v38  ;;  %v8247_v38 = vld [vmem:[#allocation3 + $0xe0] sm:$0xff] }
 0x5c6   :  { %17969 = vmatprep.mubr.f32.mxu0 %v7953_v0  ;;  %v8248_v0 = vld [vmem:[#allocation3 + $0xf0] sm:$0xff] }
 0x5c7   :  { %18681 = vmatmul.mubr.f32.gmra.mrb[54].mxu1 %v10775_v56  ;;  %v11069_v56 = vld [vmem:[#allocation3 + $0x260] sm:$0xff] }
 0x5c8   :  { %18683 = vmatprep.mubr.f32.mxu1 %v10776_v24  ;;  %v11070_v24 = vld [vmem:[#allocation3 + $0x270] sm:$0xff] }
 0x5c9   :  { %17970 = vmatmul.mubr.f32.gmra.mrb[60].mxu0 %v7954_v57  ;;  %v8249_v57 = vld [vmem:[#allocation3 + $0xf8] sm:$0xff] }
 0x5ca   :  { %17972 = vmatprep.mubr.f32.mxu0 %v7955_v37  ;;  %v8250_v37 = vld [vmem:[#allocation3 + $0x108] sm:$0xff] }
 0x5cb   :  { %18684 = vmatmul.mubr.f32.gmra.mrb[56].mxu1 %v10777_v12  ;;  %v8253_v12 = vld [vmem:[#allocation3 + $0x128] sm:$0xff] }
 0x5cc   :  { %18686 = vmatprep.mubr.f32.mxu1 %v10778_v17  ;;  %v8254_v17 = vld [vmem:[#allocation3 + $0x138] sm:$0xff] }
 0x5cd   :  { %17973 = vmatmul.mubr.f32.gmra.mrb[62].mxu0 %v7956_v49  ;;  %v8251_v49 = vld [vmem:[#allocation3 + $0x110] sm:$0xff] }
 0x5ce   :  { %18007 = vmatprep.mubr.f32.mxu0 %v8232_v54  ;;  %v11072_v54 = vld [vmem:[#allocation3 + $0x288] sm:$0xff] }
 0x5cf   :  { %18687 = vmatmul.mubr.f32.gmra.mrb[58].mxu1 %v10779_v18  ;;  %v11076_v18 = vld [vmem:[#allocation3 + $0x2b8] sm:$0xff] }
 0x5d0   :  { %18689 = vmatprep.mubr.f32.mxu1 %v10780_v29  ;;  %v8257_v29 = vld [vmem:[#allocation3 + $0x158] sm:$0xff] }
 0x5d1   :  { %18008 = vmatmul.mubr.f32.vlgmr.msra.gmra.mrb[32].mxu0 %v8233_v11  ;;  %v11074_v11 = vld [vmem:[#allocation3 + $0x2a0] sm:$0xff] }
 0x5d2   :  { %18010 = vmatprep.mubr.f32.mxu0 %v8234_v60  ;;  %19738 = vmatpush3.bf16.msra.mxu0 %v23527_v30  ;;  %v11075_v60 = vld [vmem:[#allocation3 + $0x2a8] sm:$0xff] }
 0x5d3   :  { %19740 = vmatprep.subr.bf16.mxu0 %v23538_v62  ;;  %18690 = vmatmul.mubr.f32.gmra.mrb[60].mxu1 %v10781_v13  ;;  %v11079_v13 = vld [vmem:[#allocation3 + $0x2d8] sm:$0xff] }
 0x5d4   :  { %18692 = vmatprep.mubr.f32.mxu1 %v10782_v31  ;;  %v11080_v31 = vld [vmem:[#allocation3 + $0x2e8] sm:$0xff] }
 0x5d5   :  { %18011 = vmatmul.mubr.f32.gmra.mrb[34].mxu0 %v8235_v19  ;;  %v11077_v19 = vld [vmem:[#allocation3 + $0x2c0] sm:$0xff] }
 0x5d6   :  { %18013 = vmatprep.mubr.f32.mxu0 %v8236_v46  ;;  %19742 = vmatpush3.bf16.msra.mxu0 %v23538_v62  ;;  %v8260_v46 = vld [vmem:[#allocation3 + $0x180] sm:$0xff] }
 0x5d7   :  { %19744 = vmatprep.subr.bf16.mxu0 %v23542_v16  ;;  %18693 = vmatmul.mubr.f32.gmra.mrb[62].mxu1 %v10783_v61  ;;  %v8880_v61 = vld [vmem:[#allocation10 + $0x418] sm:$0xff] }
 0x5d8   :  { %18727 = vmatprep.mubr.f32.mxu1 %v11058_v47  ;;  %v8538_v47 = vld [vmem:[#allocation3 + $0x31] sm:$0xff] }
 0x5d9   :  { %18014 = vmatmul.mubr.f32.gmra.mrb[36].mxu0 %v8237_v35  ;;  %v11081_v35 = vld [vmem:[#allocation3 + $0x2f0] sm:$0xff] }
 0x5da   :  { %18016 = vmatprep.mubr.f32.mxu0 %v8238_v8  ;;  %19746 = vmatpush3.bf16.msra.mxu0 %v23542_v16  ;;  %v8879_v8 = vld [vmem:[#allocation10 + $0x410] sm:$0xff] }
 0x5db   :  { %19748 = vmatprep.subr.bf16.mxu0 %v23546_v10  ;;  %18728 = vmatmul.mubr.f32.vlgmr.msra.gmra.mrb[32].mxu1 %v11059_v28  ;;  %v23580_v1 = vpack.c.bf16 %v8880_v61, %v8879_v8  ;;  %v8882_v28 = vld [vmem:[#allocation10 + $0x428] sm:$0xff]  ;;  %v11378_v8 = vld [vmem:[#allocation3 + $0x291] sm:$0xff] }
 0x5dc   :  { %18730 = vmatprep.mubr.f32.mxu1 %v11060_v53  ;;  %20026 = vmatpush3.bf16.msra.mxu1 %v23527_v30  ;;  %v8243_v30 = vld [vmem:[#allocation3 + $0xb0] sm:$0xff]  ;;  %v11379_v61 = vld [vmem:[#allocation3 + $0x2a1] sm:$0xff] }
 0x5dd   :  { %18017 = vmatmul.mubr.f32.gmra.mrb[38].mxu0 %v8239_v5  ;;  %20028 = vmatprep.subr.bf16.mxu1 %v23538_v62  ;;  %v11084_v5 = vld [vmem:[#allocation3 + $0x318] sm:$0xff]  ;;  %v8540_v53 = vld [vmem:[#allocation3 + $0x49] sm:$0xff] }
 0x5de   :  { %18019 = vmatprep.mubr.f32.mxu0 %v8240_v36  ;;  %19750 = vmatpush3.bf16.msra.mxu0 %v23546_v10  ;;  %v8881_v36 = vld [vmem:[#allocation10 + $0x420] sm:$0xff] }
 0x5df   :  { %19752 = vmatprep.subr.bf16.mxu0 %v23550_v63  ;;  %18731 = vmatmul.mubr.f32.gmra.mrb[34].mxu1 %v11061_v39  ;;  %v23584_v51 = vpack.c.bf16 %v8882_v28, %v8881_v36  ;;  %v8884_v39 = vld [vmem:[#allocation10 + $0x438] sm:$0xff]  ;;  %v8564_v36 = vld [vmem:[#allocation3 + $0x169] sm:$0xff]  ;;  %v11382_v28 = vld [vmem:[#allocation3 + $0x2c1] sm:$0xff] }
 0x5e0   :  { %18733 = vmatprep.mubr.f32.mxu1 %v11062_v22  ;;  %20030 = vmatpush3.bf16.msra.mxu1 %v23538_v62  ;;  %v11073_v62 = vld [vmem:[#allocation3 + $0x290] sm:$0xff]  ;;  %v8542_v22 = vld [vmem:[#allocation3 + $0x61] sm:$0xff] }
 0x5e1   :  { %18020 = vmatmul.mubr.f32.gmra.mrb[40].mxu0 %v8241_v15  ;;  %20032 = vmatprep.subr.bf16.mxu1 %v23542_v16  ;;  %v11086_v15 = vld [vmem:[#allocation3 + $0x330] sm:$0xff] }
 0x5e2   :  { %18022 = vmatprep.mubr.f32.mxu0 %v8242_v2  ;;  %19754 = vmatpush3.bf16.msra.mxu0 %v23550_v63  ;;  %v8883_v2 = vld [vmem:[#allocation10 + $0x430] sm:$0xff] }
 0x5e3   :  { %19756 = vmatprep.subr.bf16.mxu0 %v23554_v25  ;;  %18734 = vmatmul.mubr.f32.gmra.mrb[36].mxu1 %v11063_v27  ;;  %v8544_v27 = vld [vmem:[#allocation3 + $0x79] sm:$0xff] }
 0x5e4   :  { %18736 = vmatprep.mubr.f32.mxu1 %v11064_v6  ;;  %20034 = vmatpush3.bf16.msra.mxu1 %v23542_v16  ;;  %v8258_v16 = vld [vmem:[#allocation3 + $0x168] sm:$0xff] }
 0x5e5   :  { %18023 = vmatmul.mubr.f32.gmra.mrb[42].mxu0 %v8243_v30  ;;  %20036 = vmatprep.subr.bf16.mxu1 %v23546_v10  ;;  %v23588_v30 = vpack.c.bf16 %v8884_v39, %v8883_v2  ;;  %v11363_v6 = vld [vmem:[#allocation3 + $0x1e1] sm:$0xff]  ;;  %v8568_v2 = vld [vmem:[#allocation3 + $0x199] sm:$0xff]  ;;  %v8567_v39 = vld [vmem:[#allocation3 + $0x189] sm:$0xff] }
 0x5e6   :  { %18025 = vmatprep.mubr.f32.mxu0 %v8244_v40  ;;  %19758 = vmatpush3.bf16.msra.mxu0 %v23554_v25  ;;  %v8886_v40 = vld [vmem:[#allocation10 + $0x448] sm:$0xff] }
 0x5e7   :  { %19760 = vmatprep.subr.bf16.mxu0 %v23560_v14  ;;  %18737 = vmatmul.mubr.f32.gmra.mrb[38].mxu1 %v11065_v4  ;;  %v11364_v4 = vld [vmem:[#allocation3 + $0x1e9] sm:$0xff] }
 0x5e8   :  { %18739 = vmatprep.mubr.f32.mxu1 %v11066_v42  ;;  %20038 = vmatpush3.bf16.msra.mxu1 %v23546_v10  ;;  %v8261_v10 = vld [vmem:[#allocation3 + $0x188] sm:$0xff]  ;;  %v11365_v42 = vld [vmem:[#allocation3 + $0x1f9] sm:$0xff] }
 0x5e9   :  { %18026 = vmatmul.mubr.f32.gmra.mrb[44].mxu0 %v8245_v3  ;;  %20040 = vmatprep.subr.bf16.mxu1 %v23550_v63  ;;  %v8545_v3 = vld [vmem:[#allocation3 + $0x81] sm:$0xff] }
 0x5ea   :  { %18028 = vmatprep.mubr.f32.mxu0 %v8246_v58  ;;  %19762 = vmatpush3.bf16.msra.mxu0 %v23560_v14  ;;  %v8546_v58 = vld [vmem:[#allocation3 + $0x91] sm:$0xff] }
 0x5eb   :  { %19764 = vmatprep.subr.bf16.mxu0 %v19763_v52  ;;  %18740 = vmatmul.mubr.f32.gmra.mrb[40].mxu1 %v11067_v33  ;;  %v8889_v33 = vld [vmem:[#allocation10 + $0x460] sm:$0xff] }
 0x5ec   :  { %18742 = vmatprep.mubr.f32.mxu1 %v11068_v48  ;;  %20042 = vmatpush3.bf16.msra.mxu1 %v23550_v63  ;;  %v11083_v63 = vld [vmem:[#allocation3 + $0x308] sm:$0xff] }
 0x5ed   :  { %18029 = vmatmul.mubr.f32.gmra.mrb[46].mxu0 %v8247_v38  ;;  %20044 = vmatprep.subr.bf16.mxu1 %v23554_v25  ;;  %v23596_v38 = vpack.c.bf16 %v8888_v43, %v8887_v20  ;;  %v8890_v48 = vld [vmem:[#allocation10 + $0x468] sm:$0xff]  ;;  %v8847_v20 = vld [vmem:[#allocation3 + $0x52] sm:$0xff] }
 0x5ee   :  { %18031 = vmatprep.mubr.f32.mxu0 %v8248_v0  ;;  %19766 = vmatpush3.bf16.msra.mxu0 %v19763_v52  ;;  %v8547_v0 = vld [vmem:[#allocation3 + $0x99] sm:$0xff]  ;;  %v11393_v43 = vld [vmem:[#allocation3 + $0x349] sm:$0xff] }
 0x5ef   :  { %19768 = vmatprep.subr.bf16.mxu0 %v23569_v26  ;;  %18743 = vmatmul.mubr.f32.gmra.mrb[42].mxu1 %v11069_v56  ;;  %v11367_v56 = vld [vmem:[#allocation3 + $0x211] sm:$0xff] }
 0x5f0   :  { %18745 = vmatprep.mubr.f32.mxu1 %v11070_v24  ;;  %20046 = vmatpush3.bf16.msra.mxu1 %v23554_v25  ;;  %v11085_v25 = vld [vmem:[#allocation3 + $0x320] sm:$0xff]  ;;  %v19791_v24 = vpack.c.bf16 %v8890_v48, %v8889_v33 }
 0x5f1   :  { %18032 = vmatmul.mubr.f32.gmra.mrb[48].mxu0 %v8249_v57  ;;  %20048 = vmatprep.subr.bf16.mxu1 %v23560_v14  ;;  %v8548_v57 = vld [vmem:[#allocation3 + $0xa9] sm:$0xff] }
 0x5f2   :  { %18034 = vmatprep.mubr.f32.mxu0 %v8250_v37  ;;  %v11366_v37 = vld [vmem:[#allocation3 + $0x201] sm:$0xff] }
 0x5f3   :  { %18746 = vmatmul.mubr.f32.gmra.mrb[44].mxu1 %v11071_v23  ;;  %v8550_v23 = vld [vmem:[#allocation3 + $0xc1] sm:$0xff] }
 0x5f4   :  { %18748 = vmatprep.mubr.f32.mxu1 %v11072_v54  ;;  %20050 = vmatpush3.bf16.msra.mxu1 %v23560_v14  ;;  %v11087_v14 = vld [vmem:[#allocation3 + $0x338] sm:$0xff]  ;;  %v11668_v33 = vld [vmem:[#allocation3 + $0x1e2] sm:$0xff] }
 0x5f5   :  { %18035 = vmatmul.mubr.f32.gmra.mrb[50].mxu0 %v8251_v49  ;;  %20052 = vmatprep.subr.bf16.mxu1 %v19763_v52  ;;  %v8891_v49 = vld [vmem:[#allocation10 + $0x470] sm:$0xff]  ;;  %v11368_v54 = vld [vmem:[#allocation3 + $0x219] sm:$0xff]  ;;  %v8851_v48 = vld [vmem:[#allocation3 + $0x82] sm:$0xff] }
 0x5f6   :  { %18037 = vmatprep.mubr.f32.mxu0 %v8252_v41  ;;  %v8892_v41 = vld [vmem:[#allocation10 + $0x478] sm:$0xff] }
 0x5f7   :  { %18749 = vmatmul.mubr.f32.gmra.mrb[46].mxu1 %v11073_v62  ;;  %v8551_v62 = vld [vmem:[#allocation3 + $0xc9] sm:$0xff] }
 0x5f8   :  { %18751 = vmatprep.mubr.f32.mxu1 %v11074_v11  ;;  %20054 = vmatpush3.bf16.msra.mxu1 %v19763_v52  ;;  %v23592_v52 = vpack.c.bf16 %v8886_v40, %v8885_v59  ;;  %v8552_v11 = vld [vmem:[#allocation3 + $0xd9] sm:$0xff]  ;;  %v11388_v59 = vld [vmem:[#allocation3 + $0x309] sm:$0xff] }
 0x5f9   :  { %18038 = vmatmul.mubr.f32.gmra.mrb[52].mxu0 %v8253_v12  ;;  %20056 = vmatprep.subr.bf16.mxu1 %v23569_v26  ;;  %v11369_v12 = vld [vmem:[#allocation3 + $0x229] sm:$0xff]  ;;  %v11389_v40 = vld [vmem:[#allocation3 + $0x319] sm:$0xff] }
 0x5fa   :  { %18040 = vmatprep.mubr.f32.mxu0 %v8254_v17  ;;  %v19795_v17 = vpack.c.bf16 %v8892_v41, %v8891_v49  ;;  %v11671_v49 = vld [vmem:[#allocation3 + $0x202] sm:$0xff]  ;;  %v11672_v41 = vld [vmem:[#allocation3 + $0x212] sm:$0xff] }
 0x5fb   :  { %18752 = vmatmul.mubr.f32.gmra.mrb[48].mxu1 %v11075_v60  ;;  %v8553_v60 = vld [vmem:[#allocation3 + $0xe1] sm:$0xff] }
 0x5fc   :  { %18754 = vmatprep.mubr.f32.mxu1 %v11076_v18  ;;  %v8554_v18 = vld [vmem:[#allocation3 + $0xf1] sm:$0xff] }
 0x5fd   :  { %18041 = vmatmul.mubr.f32.gmra.mrb[54].mxu0 %v8255_v7  ;;  %v11370_v7 = vld [vmem:[#allocation3 + $0x231] sm:$0xff] }
 0x5fe   :  { %18043 = vmatprep.mubr.f32.mxu0 %v8256_v32  ;;  %v11371_v32 = vld [vmem:[#allocation3 + $0x241] sm:$0xff] }
 0x5ff   :  { %18755 = vmatmul.mubr.f32.gmra.mrb[50].mxu1 %v11077_v19  ;;  %v8555_v19 = vld [vmem:[#allocation3 + $0xf9] sm:$0xff] }
 0x600   :  { %18757 = vmatprep.mubr.f32.mxu1 %v11078_v50  ;;  %v8556_v50 = vld [vmem:[#allocation3 + $0x109] sm:$0xff] }
 0x601   :  { %18044 = vmatmul.mubr.f32.gmra.mrb[56].mxu0 %v8257_v29  ;;  %v11372_v29 = vld [vmem:[#allocation3 + $0x249] sm:$0xff] }
 0x602   :  { %18046 = vmatprep.mubr.f32.mxu0 %v8258_v16  ;;  %v11373_v16 = vld [vmem:[#allocation3 + $0x259] sm:$0xff] }
 0x603   :  { %18758 = vmatmul.mubr.f32.gmra.mrb[52].mxu1 %v11079_v13  ;;  %v8557_v13 = vld [vmem:[#allocation3 + $0x111] sm:$0xff] }
 0x604   :  { %18760 = vmatprep.mubr.f32.mxu1 %v11080_v31  ;;  %v8558_v31 = vld [vmem:[#allocation3 + $0x121] sm:$0xff] }
 0x605   :  { %18047 = vmatmul.mubr.f32.gmra.mrb[58].mxu0 %v8259_v45  ;;  %v11374_v45 = vld [vmem:[#allocation3 + $0x261] sm:$0xff] }
 0x606   :  { %18049 = vmatprep.mubr.f32.mxu0 %v8260_v46  ;;  %v11375_v46 = vld [vmem:[#allocation3 + $0x271] sm:$0xff] }
 0x607   :  { %18761 = vmatmul.mubr.f32.gmra.mrb[54].mxu1 %v11081_v35  ;;  %v11377_v35 = vld [vmem:[#allocation3 + $0x289] sm:$0xff] }
 0x608   :  { %18763 = vmatprep.mubr.f32.mxu1 %v11082_v9  ;;  %v8560_v9 = vld [vmem:[#allocation3 + $0x139] sm:$0xff] }
 0x609   :  { %18050 = vmatmul.mubr.f32.gmra.mrb[60].mxu0 %v8261_v10  ;;  %v11376_v10 = vld [vmem:[#allocation3 + $0x279] sm:$0xff] }
 0x60a   :  { %18052 = vmatprep.mubr.f32.mxu0 %v21130_v21 }
 0x60b   :  { %18764 = vmatmul.mubr.f32.gmra.mrb[56].mxu1 %v11083_v63  ;;  %v8562_v63 = vld [vmem:[#allocation3 + $0x151] sm:$0xff] }
 0x60c   :  { %18766 = vmatprep.mubr.f32.mxu1 %v11084_v5  ;;  %v11380_v5 = vld [vmem:[#allocation3 + $0x2a9] sm:$0xff] }
 0x60d   :  { %18053 = vmatmul.mubr.f32.gmra.mrb[62].mxu0 %v21130_v21 }
 0x60e   :  { %18087 = vmatprep.mubr.f32.mxu0 %v8538_v47  ;;  %v8561_v47 = vld [vmem:[#allocation3 + $0x141] sm:$0xff] }
 0x60f   :  { %18767 = vmatmul.mubr.f32.gmra.mrb[58].mxu1 %v11085_v25  ;;  %v8565_v25 = vld [vmem:[#allocation3 + $0x171] sm:$0xff] }
 0x610   :  { %18769 = vmatprep.mubr.f32.mxu1 %v11086_v15  ;;  %v8566_v15 = vld [vmem:[#allocation3 + $0x181] sm:$0xff] }
 0x611   :  { %18088 = vmatmul.mubr.f32.vlgmr.msra.gmra.mrb[32].mxu0 %v8539_v55  ;;  %v8563_v55 = vld [vmem:[#allocation3 + $0x159] sm:$0xff] }
 0x612   :  { %18090 = vmatprep.mubr.f32.mxu0 %v8540_v53  ;;  %19770 = vmatpush3.bf16.msra.mxu0 %v23569_v26  ;;  %v11383_v53 = vld [vmem:[#allocation3 + $0x2d1] sm:$0xff] }
 0x613   :  { %19772 = vmatprep.subr.bf16.mxu0 %v23580_v1  ;;  %18770 = vmatmul.mubr.f32.gmra.mrb[60].mxu1 %v11087_v14  ;;  %v8569_v14 = vld [vmem:[#allocation3 + $0x1a1] sm:$0xff] }
 0x614   :  { %18772 = vmatprep.mubr.f32.mxu1 %v21130_v21 }
 0x615   :  { %18091 = vmatmul.mubr.f32.gmra.mrb[34].mxu0 %v8541_v34  ;;  %v11385_v34 = vld [vmem:[#allocation3 + $0x2e9] sm:$0xff] }
 0x616   :  { %18093 = vmatprep.mubr.f32.mxu0 %v8542_v22  ;;  %19774 = vmatpush3.bf16.msra.mxu0 %v23580_v1  ;;  %v11386_v22 = vld [vmem:[#allocation3 + $0x2f1] sm:$0xff] }
 0x617   :  { %19776 = vmatprep.subr.bf16.mxu0 %v23584_v51  ;;  %18773 = vmatmul.mubr.f32.gmra.mrb[62].mxu1 %v21130_v21  ;;  %v8559_v21 = vld [vmem:[#allocation3 + $0x129] sm:$0xff] }
 0x618   :  { %18807 = vmatprep.mubr.f32.mxu1 %v11363_v6  ;;  %v8846_v6 = vld [vmem:[#allocation3 + $0x4a] sm:$0xff] }
 0x619   :  { %18094 = vmatmul.mubr.f32.gmra.mrb[36].mxu0 %v8543_v44  ;;  %v8844_v44 = vld [vmem:[#allocation3 + $0x32] sm:$0xff] }
 0x61a   :  { %18096 = vmatprep.mubr.f32.mxu0 %v8544_v27  ;;  %19778 = vmatpush3.bf16.msra.mxu0 %v23584_v51  ;;  %v8845_v27 = vld [vmem:[#allocation3 + $0x3a] sm:$0xff] }
 0x61b   :  { %19780 = vmatprep.subr.bf16.mxu0 %v23588_v30  ;;  %18808 = vmatmul.mubr.f32.vlgmr.msra.gmra.mrb[32].mxu1 %v11364_v4  ;;  %v11392_v4 = vld [vmem:[#allocation3 + $0x339] sm:$0xff] }
 0x61c   :  { %18810 = vmatprep.mubr.f32.mxu1 %v11365_v42  ;;  %20058 = vmatpush3.bf16.msra.mxu1 %v23569_v26  ;;  %v8549_v26 = vld [vmem:[#allocation3 + $0xb1] sm:$0xff] }
 0x61d   :  { %18097 = vmatmul.mubr.f32.gmra.mrb[38].mxu0 %v8545_v3  ;;  %20060 = vmatprep.subr.bf16.mxu1 %v23580_v1  ;;  %v11391_v3 = vld [vmem:[#allocation3 + $0x331] sm:$0xff] }
 0x61e   :  { %18099 = vmatprep.mubr.f32.mxu0 %v8546_v58  ;;  %19782 = vmatpush3.bf16.msra.mxu0 %v23588_v30  ;;  %v8848_v58 = vld [vmem:[#allocation3 + $0x62] sm:$0xff]  ;;  %v11394_v42 = vld [vmem:[#allocation3 + $0x351] sm:$0xff] }
 0x61f   :  { %19784 = vmatprep.subr.bf16.mxu0 %v23592_v52  ;;  %18811 = vmatmul.mubr.f32.gmra.mrb[34].mxu1 %v11366_v37  ;;  %v11669_v37 = vld [vmem:[#allocation3 + $0x1ea] sm:$0xff] }
 0x620   :  { %18813 = vmatprep.mubr.f32.mxu1 %v11367_v56  ;;  %20062 = vmatpush3.bf16.msra.mxu1 %v23580_v1  ;;  %v11381_v1 = vld [vmem:[#allocation3 + $0x2b9] sm:$0xff] }
 0x621   :  { %18100 = vmatmul.mubr.f32.gmra.mrb[40].mxu0 %v8547_v0  ;;  %20064 = vmatprep.subr.bf16.mxu1 %v23584_v51  ;;  %v8850_v0 = vld [vmem:[#allocation3 + $0x7a] sm:$0xff] }
 0x622   :  { %18102 = vmatprep.mubr.f32.mxu0 %v8548_v57  ;;  %19786 = vmatpush3.bf16.msra.mxu0 %v23592_v52  ;;  %v8852_v57 = vld [vmem:[#allocation3 + $0x92] sm:$0xff]  ;;  %v11670_v56 = vld [vmem:[#allocation3 + $0x1fa] sm:$0xff] }
 0x623   :  { %19788 = vmatprep.subr.bf16.mxu0 %v23596_v38  ;;  %18814 = vmatmul.mubr.f32.gmra.mrb[36].mxu1 %v11368_v54  ;;  %v8856_v54 = vld [vmem:[#allocation3 + $0xc2] sm:$0xff] }
 0x624   :  { %18816 = vmatprep.mubr.f32.mxu1 %v11369_v12  ;;  %20066 = vmatpush3.bf16.msra.mxu1 %v23584_v51  ;;  %v11384_v51 = vld [vmem:[#allocation3 + $0x2d9] sm:$0xff] }
 0x625   :  { %18103 = vmatmul.mubr.f32.gmra.mrb[42].mxu0 %v8549_v26  ;;  %20068 = vmatprep.subr.bf16.mxu1 %v23588_v30  ;;  %v8854_v26 = vld [vmem:[#allocation3 + $0xaa] sm:$0xff]  ;;  %v11673_v12 = vld [vmem:[#allocation3 + $0x21a] sm:$0xff] }
 0x626   :  { %18105 = vmatprep.mubr.f32.mxu0 %v8550_v23  ;;  %19790 = vmatpush3.bf16.msra.mxu0 %v23596_v38  ;;  %v8855_v23 = vld [vmem:[#allocation3 + $0xb2] sm:$0xff] }
 0x627   :  { %19792 = vmatprep.subr.bf16.mxu0 %v19791_v24  ;;  %18817 = vmatmul.mubr.f32.gmra.mrb[38].mxu1 %v11370_v7  ;;  %v11675_v7 = vld [vmem:[#allocation3 + $0x232] sm:$0xff] }
 0x628   :  { %18819 = vmatprep.mubr.f32.mxu1 %v11371_v32  ;;  %20070 = vmatpush3.bf16.msra.mxu1 %v23588_v30  ;;  %v11387_v30 = vld [vmem:[#allocation3 + $0x301] sm:$0xff] }
 0x629   :  { %18106 = vmatmul.mubr.f32.gmra.mrb[44].mxu0 %v8551_v62  ;;  %20072 = vmatprep.subr.bf16.mxu1 %v23592_v52  ;;  %v8857_v62 = vld [vmem:[#allocation3 + $0xca] sm:$0xff]  ;;  %v11676_v32 = vld [vmem:[#allocation3 + $0x242] sm:$0xff] }
 0x62a   :  { %18108 = vmatprep.mubr.f32.mxu0 %v8552_v11  ;;  %19794 = vmatpush3.bf16.msra.mxu0 %v19791_v24  ;;  %v8858_v11 = vld [vmem:[#allocation3 + $0xda] sm:$0xff] }
 0x62b   :  { %19796 = vmatprep.subr.bf16.mxu0 %v19795_v17  ;;  %18820 = vmatmul.mubr.f32.gmra.mrb[40].mxu1 %v11372_v29  ;;  %v11677_v29 = vld [vmem:[#allocation3 + $0x24a] sm:$0xff] }
 0x62c   :  { %18822 = vmatprep.mubr.f32.mxu1 %v11373_v16  ;;  %20074 = vmatpush3.bf16.msra.mxu1 %v23592_v52  ;;  %v11390_v52 = vld [vmem:[#allocation3 + $0x321] sm:$0xff] }
 0x62d   :  { %18109 = vmatmul.mubr.f32.gmra.mrb[46].mxu0 %v8553_v60  ;;  %20076 = vmatprep.subr.bf16.mxu1 %v23596_v38  ;;  %v8859_v60 = vld [vmem:[#allocation3 + $0xe2] sm:$0xff]  ;;  %v11678_v16 = vld [vmem:[#allocation3 + $0x25a] sm:$0xff] }
 0x62e   :  { %18111 = vmatprep.mubr.f32.mxu0 %v8554_v18  ;;  %19798 = vmatpush3.bf16.msra.mxu0 %v19795_v17  ;;  %v8860_v18 = vld [vmem:[#allocation3 + $0xf2] sm:$0xff] }
 0x62f   :  { %18823 = vmatmul.mubr.f32.gmra.mrb[42].mxu1 %v11374_v45  ;;  %v11679_v45 = vld [vmem:[#allocation3 + $0x262] sm:$0xff] }
 0x630   :  { %18825 = vmatprep.mubr.f32.mxu1 %v11375_v46  ;;  %20078 = vmatpush3.bf16.msra.mxu1 %v23596_v38  ;;  %v8849_v38 = vld [vmem:[#allocation3 + $0x6a] sm:$0xff]  ;;  %v11680_v46 = vld [vmem:[#allocation3 + $0x272] sm:$0xff] }
 0x631   :  { %18112 = vmatmul.mubr.f32.gmra.mrb[48].mxu0 %v8555_v19  ;;  %20080 = vmatprep.subr.bf16.mxu1 %v19791_v24  ;;  %v8861_v19 = vld [vmem:[#allocation3 + $0xfa] sm:$0xff] }
 0x632   :  { %18114 = vmatprep.mubr.f32.mxu0 %v8556_v50  ;;  %v8862_v50 = vld [vmem:[#allocation3 + $0x10a] sm:$0xff] }
 0x633   :  { %18826 = vmatmul.mubr.f32.gmra.mrb[44].mxu1 %v11376_v10  ;;  %v11681_v10 = vld [vmem:[#allocation3 + $0x27a] sm:$0xff] }
 0x634   :  { %18828 = vmatprep.mubr.f32.mxu1 %v11377_v35  ;;  %20082 = vmatpush3.bf16.msra.mxu1 %v19791_v24  ;;  %v8853_v24 = vld [vmem:[#allocation3 + $0x9a] sm:$0xff]  ;;  %v11682_v35 = vld [vmem:[#allocation3 + $0x28a] sm:$0xff] }
 0x635   :  { %18115 = vmatmul.mubr.f32.gmra.mrb[50].mxu0 %v8557_v13  ;;  %20084 = vmatprep.subr.bf16.mxu1 %v19795_v17  ;;  %v8863_v13 = vld [vmem:[#allocation3 + $0x112] sm:$0xff] }
 0x636   :  { %18117 = vmatprep.mubr.f32.mxu0 %v8558_v31  ;;  %v8864_v31 = vld [vmem:[#allocation3 + $0x122] sm:$0xff] }
 0x637   :  { %18829 = vmatmul.mubr.f32.gmra.mrb[46].mxu1 %v11378_v8  ;;  %v11683_v8 = vld [vmem:[#allocation3 + $0x292] sm:$0xff] }
 0x638   :  { %18831 = vmatprep.mubr.f32.mxu1 %v11379_v61  ;;  %20086 = vmatpush3.bf16.msra.mxu1 %v19795_v17  ;;  %v11674_v17 = vld [vmem:[#allocation3 + $0x22a] sm:$0xff]  ;;  %v11684_v61 = vld [vmem:[#allocation3 + $0x2a2] sm:$0xff] }
 0x639   :  { %18118 = vmatmul.mubr.f32.gmra.mrb[52].mxu0 %v8559_v21  ;;  %v8865_v21 = vld [vmem:[#allocation3 + $0x12a] sm:$0xff] }
 0x63a   :  { %18120 = vmatprep.mubr.f32.mxu0 %v8560_v9  ;;  %v8866_v9 = vld [vmem:[#allocation3 + $0x13a] sm:$0xff] }
 0x63b   :  { %18832 = vmatmul.mubr.f32.gmra.mrb[48].mxu1 %v11380_v5  ;;  %v11685_v5 = vld [vmem:[#allocation3 + $0x2aa] sm:$0xff] }
 0x63c   :  { %18834 = vmatprep.mubr.f32.mxu1 %v11381_v1  ;;  %v11686_v1 = vld [vmem:[#allocation3 + $0x2ba] sm:$0xff] }
 0x63d   :  { %18121 = vmatmul.mubr.f32.gmra.mrb[54].mxu0 %v8561_v47  ;;  %v8867_v47 = vld [vmem:[#allocation3 + $0x142] sm:$0xff] }
 0x63e   :  { %18123 = vmatprep.mubr.f32.mxu0 %v8562_v63  ;;  %v8868_v63 = vld [vmem:[#allocation3 + $0x152] sm:$0xff] }
 0x63f   :  { %18835 = vmatmul.mubr.f32.gmra.mrb[50].mxu1 %v11382_v28  ;;  %v11687_v28 = vld [vmem:[#allocation3 + $0x2c2] sm:$0xff] }
 0x640   :  { %18837 = vmatprep.mubr.f32.mxu1 %v11383_v53  ;;  %v11688_v53 = vld [vmem:[#allocation3 + $0x2d2] sm:$0xff] }
 0x641   :  { %18124 = vmatmul.mubr.f32.gmra.mrb[56].mxu0 %v8563_v55  ;;  %v8869_v55 = vld [vmem:[#allocation3 + $0x15a] sm:$0xff] }
 0x642   :  { %18126 = vmatprep.mubr.f32.mxu0 %v8564_v36  ;;  %v8870_v36 = vld [vmem:[#allocation3 + $0x16a] sm:$0xff] }
 0x643   :  { %18838 = vmatmul.mubr.f32.gmra.mrb[52].mxu1 %v11384_v51  ;;  %v11689_v51 = vld [vmem:[#allocation3 + $0x2da] sm:$0xff] }
 0x644   :  { %18840 = vmatprep.mubr.f32.mxu1 %v11385_v34  ;;  %v11690_v34 = vld [vmem:[#allocation3 + $0x2ea] sm:$0xff] }
 0x645   :  { %18127 = vmatmul.mubr.f32.gmra.mrb[58].mxu0 %v8565_v25  ;;  %v8871_v25 = vld [vmem:[#allocation3 + $0x172] sm:$0xff] }
 0x646   :  { %18129 = vmatprep.mubr.f32.mxu0 %v8566_v15  ;;  %v8872_v15 = vld [vmem:[#allocation3 + $0x182] sm:$0xff] }
 0x647   :  { %18841 = vmatmul.mubr.f32.gmra.mrb[54].mxu1 %v11386_v22  ;;  %v11691_v22 = vld [vmem:[#allocation3 + $0x2f2] sm:$0xff] }
 0x648   :  { %18843 = vmatprep.mubr.f32.mxu1 %v11387_v30  ;;  %v11692_v30 = vld [vmem:[#allocation3 + $0x302] sm:$0xff] }
 0x649   :  { %18130 = vmatmul.mubr.f32.gmra.mrb[60].mxu0 %v8567_v39  ;;  %v8873_v39 = vld [vmem:[#allocation3 + $0x18a] sm:$0xff] }
 0x64a   :  { %18132 = vmatprep.mubr.f32.mxu0 %v8568_v2  ;;  %v8874_v2 = vld [vmem:[#allocation3 + $0x19a] sm:$0xff] }
 0x64b   :  { %18844 = vmatmul.mubr.f32.gmra.mrb[56].mxu1 %v11388_v59  ;;  %v11694_v59 = vld [vmem:[#allocation3 + $0x31a] sm:$0xff] }
 0x64c   :  { %18846 = vmatprep.mubr.f32.mxu1 %v11389_v40  ;;  %v11695_v40 = vld [vmem:[#allocation3 + $0x322] sm:$0xff] }
 0x64d   :  { %18133 = vmatmul.mubr.f32.gmra.mrb[62].mxu0 %v8569_v14  ;;  %v8875_v14 = vld [vmem:[#allocation3 + $0x1a2] sm:$0xff] }
 0x64e   :  { %18167 = vmatprep.mubr.f32.mxu0 %v8844_v44  ;;  %v11693_v44 = vld [vmem:[#allocation3 + $0x30a] sm:$0xff] }
 0x64f   :  { %18847 = vmatmul.mubr.f32.gmra.mrb[58].mxu1 %v11390_v52  ;;  %v11697_v52 = vld [vmem:[#allocation3 + $0x33a] sm:$0xff] }
 0x650   :  { %18849 = vmatprep.mubr.f32.mxu1 %v11391_v3  ;;  %v11699_v3 = vld [vmem:[#allocation3 + $0x352] sm:$0xff] }
 0x651   :  { %18168 = vmatmul.mubr.f32.vlgmr.msra.gmra.mrb[32].mxu0 %v8845_v27  ;;  %v11696_v27 = vld [vmem:[#allocation3 + $0x332] sm:$0xff] }
 0x652   :  { %18170 = vmatprep.mubr.f32.mxu0 %v8846_v6  ;;  %v11698_v6 = vld [vmem:[#allocation3 + $0x34a] sm:$0xff] }
 0x653   :  { %18850 = vmatmul.mubr.f32.gmra.mrb[60].mxu1 %v11392_v4 }
 0x654   :  { %18852 = vmatprep.mubr.f32.mxu1 %v11393_v43 }
 0x655   :  { %18171 = vmatmul.mubr.f32.gmra.mrb[34].mxu0 %v8847_v20 }
 0x656   :  { %18173 = vmatprep.mubr.f32.mxu0 %v8848_v58 }
 0x657   :  { %18853 = vmatmul.mubr.f32.gmra.mrb[62].mxu1 %v11394_v42 }
 0x658   :  { %18887 = vmatprep.mubr.f32.mxu1 %v11668_v33 }
 0x659   :  { %18174 = vmatmul.mubr.f32.gmra.mrb[36].mxu0 %v8849_v38 }
 0x65a   :  { %18176 = vmatprep.mubr.f32.mxu0 %v8850_v0 }
 0x65b   :  { %18888 = vmatmul.mubr.f32.vlgmr.msra.gmra.mrb[32].mxu1 %v11669_v37 }
 0x65c   :  { %18890 = vmatprep.mubr.f32.mxu1 %v11670_v56 }
 0x65d   :  { %18177 = vmatmul.mubr.f32.gmra.mrb[38].mxu0 %v8851_v48 }
 0x65e   :  { %18179 = vmatprep.mubr.f32.mxu0 %v8852_v57 }
 0x65f   :  { %18891 = vmatmul.mubr.f32.gmra.mrb[34].mxu1 %v11671_v49 }
 0x660   :  { %18893 = vmatprep.mubr.f32.mxu1 %v11672_v41 }
 0x661   :  { %18180 = vmatmul.mubr.f32.gmra.mrb[40].mxu0 %v8853_v24 }
 0x662   :  { %18182 = vmatprep.mubr.f32.mxu0 %v8854_v26 }
 0x663   :  { %18894 = vmatmul.mubr.f32.gmra.mrb[36].mxu1 %v11673_v12 }
 0x664   :  { %18896 = vmatprep.mubr.f32.mxu1 %v11674_v17 }
 0x665   :  { %18183 = vmatmul.mubr.f32.gmra.mrb[42].mxu0 %v8855_v23 }
 0x666   :  { %18185 = vmatprep.mubr.f32.mxu0 %v8856_v54 }
 0x667   :  { %18897 = vmatmul.mubr.f32.gmra.mrb[38].mxu1 %v11675_v7 }
 0x668   :  { %18899 = vmatprep.mubr.f32.mxu1 %v11676_v32 }
 0x669   :  { %18186 = vmatmul.mubr.f32.gmra.mrb[44].mxu0 %v8857_v62 }
 0x66a   :  { %18188 = vmatprep.mubr.f32.mxu0 %v8858_v11 }
 0x66b   :  { %18900 = vmatmul.mubr.f32.gmra.mrb[40].mxu1 %v11677_v29 }
 0x66c   :  { %18902 = vmatprep.mubr.f32.mxu1 %v11678_v16 }
 0x66d   :  { %18189 = vmatmul.mubr.f32.gmra.mrb[46].mxu0 %v8859_v60 }
 0x66e   :  { %18191 = vmatprep.mubr.f32.mxu0 %v8860_v18 }
 0x66f   :  { %18903 = vmatmul.mubr.f32.gmra.mrb[42].mxu1 %v11679_v45 }
 0x670   :  { %18905 = vmatprep.mubr.f32.mxu1 %v11680_v46 }
 0x671   :  { %18192 = vmatmul.mubr.f32.gmra.mrb[48].mxu0 %v8861_v19 }
 0x672   :  { %18194 = vmatprep.mubr.f32.mxu0 %v8862_v50 }
 0x673   :  { %18906 = vmatmul.mubr.f32.gmra.mrb[44].mxu1 %v11681_v10 }
 0x674   :  { %18908 = vmatprep.mubr.f32.mxu1 %v11682_v35 }
 0x675   :  { %18195 = vmatmul.mubr.f32.gmra.mrb[50].mxu0 %v8863_v13 }
 0x676   :  { %18197 = vmatprep.mubr.f32.mxu0 %v8864_v31 }
 0x677   :  { %18909 = vmatmul.mubr.f32.gmra.mrb[46].mxu1 %v11683_v8 }
 0x678   :  { %18911 = vmatprep.mubr.f32.mxu1 %v11684_v61 }
 0x679   :  { %18198 = vmatmul.mubr.f32.gmra.mrb[52].mxu0 %v8865_v21 }
 0x67a   :  { %18200 = vmatprep.mubr.f32.mxu0 %v8866_v9 }
 0x67b   :  { %18912 = vmatmul.mubr.f32.gmra.mrb[48].mxu1 %v11685_v5 }
 0x67c   :  { %18914 = vmatprep.mubr.f32.mxu1 %v11686_v1 }
 0x67d   :  { %18201 = vmatmul.mubr.f32.gmra.mrb[54].mxu0 %v8867_v47 }
 0x67e   :  { %18203 = vmatprep.mubr.f32.mxu0 %v8868_v63 }
 0x67f   :  { %18915 = vmatmul.mubr.f32.gmra.mrb[50].mxu1 %v11687_v28 }
 0x680   :  { %18917 = vmatprep.mubr.f32.mxu1 %v11688_v53 }
 0x681   :  { %18204 = vmatmul.mubr.f32.gmra.mrb[56].mxu0 %v8869_v55 }
 0x682   :  { %18206 = vmatprep.mubr.f32.mxu0 %v8870_v36 }
 0x683   :  { %18918 = vmatmul.mubr.f32.gmra.mrb[52].mxu1 %v11689_v51 }
 0x684   :  { %18920 = vmatprep.mubr.f32.mxu1 %v11690_v34 }
 0x685   :  { %18207 = vmatmul.mubr.f32.gmra.mrb[58].mxu0 %v8871_v25 }
 0x686   :  { %18209 = vmatprep.mubr.f32.mxu0 %v8872_v15 }
 0x687   :  { %18921 = vmatmul.mubr.f32.gmra.mrb[54].mxu1 %v11691_v22 }
 0x688   :  { %18923 = vmatprep.mubr.f32.mxu1 %v11692_v30 }
 0x689   :  { %18210 = vmatmul.mubr.f32.gmra.mrb[60].mxu0 %v8873_v39 }
 0x68a   :  { %18212 = vmatprep.mubr.f32.mxu0 %v8874_v2 }
 0x68b   :  { %18924 = vmatmul.mubr.f32.gmra.mrb[56].mxu1 %v11693_v44 }
 0x68c   :  { %18926 = vmatprep.mubr.f32.mxu1 %v11694_v59 }
 0x68d   :  { %18213 = vmatmul.mubr.f32.gmra.mrb[62].mxu0 %v8875_v14 }
 0x68f   :  { %18927 = vmatmul.mubr.f32.gmra.mrb[58].mxu1 %v11695_v40 }
 0x690   :  { %18929 = vmatprep.mubr.f32.mxu1 %v11696_v27 }
 0x693   :  { %18930 = vmatmul.mubr.f32.gmra.mrb[60].mxu1 %v11697_v52 }
 0x694   :  { %18932 = vmatprep.mubr.f32.mxu1 %v11698_v6 }
 0x697   :  { %18933 = vmatmul.mubr.f32.gmra.mrb[62].mxu1 %v11699_v3 }
 0x724   :  { %v23612_v20 = vpop.f32.mrb[32].mxu0 }
 0x725   :  { %v9221_v43 = vmul.f32 %v23612_v20, %v23612_v20  ;;  %v23616_v58 = vpop.f32.mrb[33].mxu0 }
 0x726   :  { %v9182_v4 = vadd.f32 %v23612_v20, %v23616_v58  ;;  %v9220_v42 = vmul.f32 %v23616_v58, %v23616_v58 }
 0x728   :  { %v9252_v38 = vadd.f32 %v9221_v43, %v9220_v42  ;;  %v23622_v0 = vpop.f32.mrb[34].mxu0 }
 0x729   :  { %v23624_v33 = vpop.f32.mrb[35].mxu0  ;;  %v9223_v37 = vmul.f32 %v23622_v0, %v23622_v0 }
 0x72a   :  { %v9183_v48 = vadd.f32 %v9182_v4, %v23624_v33  ;;  %v9222_v57 = vmul.f32 %v23624_v33, %v23624_v33 }
 0x72c   :  { %v9253_v56 = vadd.f32 %v9252_v38, %v9222_v57  ;;  %v23631_v24 = vpop.f32.mrb[36].mxu0  ;;  %v9184_v26 = vadd.f32 %v23622_v0, %v9183_v48 }
 0x72d   :  { %v23634_v49 = vpop.f32.mrb[37].mxu0  ;;  %v9225_v12 = vmul.f32 %v23631_v24, %v23631_v24 }
 0x72e   :  { %v9185_v41 = vadd.f32 %v9184_v26, %v23634_v49  ;;  %v9224_v23 = vmul.f32 %v23634_v49, %v23634_v49  ;;  %v9254_v54 = vadd.f32 %v9253_v56, %v9223_v37  ;;  %v23646_v32 = vpop.f32.mrb[32].mxu1 }
 0x72f   :  { %25752 = vst [vmem:[#allocation46_spill] sm:$0xff] %v23646_v32  ;;  %v12045_v16 = vmul.f32 %v23646_v32, %v23646_v32  ;;  %v23653_v19 = vpop.f32.mrb[33].mxu1 }
 0x730   :  { %v9255_v17 = vadd.f32 %v9254_v54, %v9224_v23  ;;  %v23641_v62 = vpop.f32.mrb[38].mxu0  ;;  %v9186_v11 = vadd.f32 %v23631_v24, %v9185_v41  ;;  %25753 = vst [vmem:[#allocation48_spill] sm:$0xff] %v23653_v19  ;;  %v12006_v45 = vadd.f32 %v23646_v32, %v23653_v19  ;;  %v12044_v46 = vmul.f32 %v23653_v19, %v23653_v19 }
 0x731   :  { %v23644_v7 = vpop.f32.mrb[39].mxu0  ;;  %v9227_v50 = vmul.f32 %v23641_v62, %v23641_v62 }
 0x732   :  { %v9187_v60 = vadd.f32 %v9186_v11, %v23644_v7  ;;  %v9226_v18 = vmul.f32 %v23644_v7, %v23644_v7  ;;  %v9256_v29 = vadd.f32 %v9255_v17, %v9225_v12  ;;  %v12076_v21 = vadd.f32 %v12045_v16, %v12044_v46  ;;  %v23666_v9 = vpop.f32.mrb[34].mxu1 }
 0x733   :  { %25754 = vst [vmem:[#allocation23_spill] sm:$0xff] %v23666_v9  ;;  %v23671_v63 = vpop.f32.mrb[35].mxu1  ;;  %v12047_v53 = vmul.f32 %v23666_v9, %v23666_v9 }
 0x734   :  { %v9257_v13 = vadd.f32 %v9256_v29, %v9226_v18  ;;  %v23661_v31 = vpop.f32.mrb[40].mxu0  ;;  %v9188_v10 = vadd.f32 %v23641_v62, %v9187_v60  ;;  %25755 = vst [vmem:[#allocation25_spill] sm:$0xff] %v23671_v63  ;;  %v12007_v5 = vadd.f32 %v12006_v45, %v23671_v63  ;;  %v12046_v1 = vmul.f32 %v23671_v63, %v23671_v63 }
 0x735   :  { %v23664_v35 = vpop.f32.mrb[41].mxu0  ;;  %v9229_v25 = vmul.f32 %v23661_v31, %v23661_v31 }
 0x736   :  { %v9189_v8 = vadd.f32 %v9188_v10, %v23664_v35  ;;  %v9228_v61 = vmul.f32 %v23664_v35, %v23664_v35  ;;  %v9258_v47 = vadd.f32 %v9257_v13, %v9227_v50  ;;  %v12077_v51 = vadd.f32 %v12076_v21, %v12046_v1  ;;  %v23685_v34 = vpop.f32.mrb[36].mxu1 }
 0x737   :  { %25756 = vst [vmem:[#allocation24_spill] sm:$0xff] %v23685_v34  ;;  %v12008_v2 = vadd.f32 %v23666_v9, %v12007_v5  ;;  %v23691_v14 = vpop.f32.mrb[37].mxu1  ;;  %v12049_v52 = vmul.f32 %v23685_v34, %v23685_v34 }
 0x738   :  { %v9259_v55 = vadd.f32 %v9258_v47, %v9228_v61  ;;  %v23676_v36 = vpop.f32.mrb[42].mxu0  ;;  %v9190_v28 = vadd.f32 %v23661_v31, %v9189_v8  ;;  %25757 = vst [vmem:[#allocation27_spill] sm:$0xff] %v23691_v14  ;;  %v12048_v59 = vmul.f32 %v23691_v14, %v23691_v14  ;;  %v12078_v40 = vadd.f32 %v12077_v51, %v12047_v53 }
 0x739   :  { %v23683_v15 = vpop.f32.mrb[43].mxu0  ;;  %v12009_v44 = vadd.f32 %v12008_v2, %v23691_v14  ;;  %v9231_v3 = vmul.f32 %v23676_v36, %v23676_v36 }
 0x73a   :  { %v9191_v39 = vadd.f32 %v9190_v28, %v23683_v15  ;;  %v9230_v22 = vmul.f32 %v23683_v15, %v23683_v15  ;;  %v9260_v30 = vadd.f32 %v9259_v55, %v9229_v25  ;;  %v12079_v42 = vadd.f32 %v12078_v40, %v12048_v59  ;;  %v23705_v38 = vpop.f32.mrb[38].mxu1 }
 0x73b   :  { %25758 = vst [vmem:[#allocation26_spill] sm:$0xff] %v23705_v38  ;;  %v12010_v48 = vadd.f32 %v23685_v34, %v12009_v44  ;;  %v23711_v56 = vpop.f32.mrb[39].mxu1  ;;  %v12051_v11 = vmul.f32 %v23705_v38, %v23705_v38 }
 0x73c   :  { %v23696_v27 = vpop.f32.mrb[44].mxu0  ;;  %v9192_v6 = vadd.f32 %v23676_v36, %v9191_v39  ;;  %v9261_v43 = vadd.f32 %v9260_v30, %v9230_v22  ;;  %25759 = vst [vmem:[#allocation29_spill] sm:$0xff] %v23711_v56  ;;  %v12050_v23 = vmul.f32 %v23711_v56, %v23711_v56  ;;  %v12080_v54 = vadd.f32 %v12079_v42, %v12049_v52 }
 0x73d   :  { %v23703_v4 = vpop.f32.mrb[45].mxu0  ;;  %v12011_v41 = vadd.f32 %v12010_v48, %v23711_v56  ;;  %v9233_v60 = vmul.f32 %v23696_v27, %v23696_v27 }
 0x73e   :  { %v9193_v57 = vadd.f32 %v9192_v6, %v23703_v4  ;;  %v9232_v37 = vmul.f32 %v23703_v4, %v23703_v4  ;;  %v9262_v26 = vadd.f32 %v9261_v43, %v9231_v3  ;;  %v12081_v16 = vadd.f32 %v12080_v54, %v12050_v23  ;;  %v23725_v50 = vpop.f32.mrb[40].mxu1 }
 0x73f   :  { %25760 = vst [vmem:[#allocation28_spill] sm:$0xff] %v23725_v50  ;;  %v12012_v45 = vadd.f32 %v23705_v38, %v12011_v41  ;;  %v23731_v10 = vpop.f32.mrb[41].mxu1  ;;  %v12053_v55 = vmul.f32 %v23725_v50, %v23725_v50 }
 0x740   :  { %v23716_v12 = vpop.f32.mrb[46].mxu0  ;;  %v9194_v17 = vadd.f32 %v23696_v27, %v9193_v57  ;;  %v9263_v18 = vadd.f32 %v9262_v26, %v9232_v37  ;;  %25761 = vst [vmem:[#allocation31_spill] sm:$0xff] %v23731_v10  ;;  %v12052_v61 = vmul.f32 %v23731_v10, %v23731_v10  ;;  %v12082_v47 = vadd.f32 %v12081_v16, %v12051_v11 }
 0x741   :  { %v23723_v29 = vpop.f32.mrb[47].mxu0  ;;  %v12013_v8 = vadd.f32 %v12012_v45, %v23731_v10  ;;  %v9235_v28 = vmul.f32 %v23716_v12, %v23716_v12 }
 0x742   :  { %v9195_v46 = vadd.f32 %v9194_v17, %v23723_v29  ;;  %v9234_v13 = vmul.f32 %v23723_v29, %v23723_v29  ;;  %v9264_v21 = vadd.f32 %v9263_v18, %v9233_v60  ;;  %v12083_v51 = vadd.f32 %v12082_v47, %v12052_v61  ;;  %v23745_v2 = vpop.f32.mrb[42].mxu1 }
 0x743   :  { %25762 = vst [vmem:[#allocation30_spill] sm:$0xff] %v23745_v2  ;;  %v12014_v39 = vadd.f32 %v23725_v50, %v12013_v8  ;;  %v23751_v44 = vpop.f32.mrb[43].mxu1  ;;  %v12055_v42 = vmul.f32 %v23745_v2, %v23745_v2 }
 0x744   :  { %v23736_v5 = vpop.f32.mrb[48].mxu0  ;;  %v9196_v1 = vadd.f32 %v23716_v12, %v9195_v46  ;;  %v9265_v53 = vadd.f32 %v9264_v21, %v9234_v13  ;;  %25763 = vst [vmem:[#allocation33_spill] sm:$0xff] %v23751_v44  ;;  %v12054_v6 = vmul.f32 %v23751_v44, %v23751_v44  ;;  %v12084_v52 = vadd.f32 %v12083_v51, %v12053_v55 }
 0x745   :  { %v23743_v25 = vpop.f32.mrb[49].mxu0  ;;  %v12015_v40 = vadd.f32 %v12014_v39, %v23751_v44  ;;  %v9237_v48 = vmul.f32 %v23736_v5, %v23736_v5 }
 0x746   :  { %v9197_v22 = vadd.f32 %v9196_v1, %v23743_v25  ;;  %v9236_v30 = vmul.f32 %v23743_v25, %v23743_v25  ;;  %v9266_v59 = vadd.f32 %v9265_v53, %v9235_v28  ;;  %v12085_v26 = vadd.f32 %v12084_v52, %v12054_v6  ;;  %v23765_v41 = vpop.f32.mrb[44].mxu1 }
 0x747   :  { %25764 = vst [vmem:[#allocation32_spill] sm:$0xff] %v23765_v41  ;;  %v12016_v23 = vadd.f32 %v23745_v2, %v12015_v40  ;;  %v23771_v11 = vpop.f32.mrb[45].mxu1  ;;  %v12057_v21 = vmul.f32 %v23765_v41, %v23765_v41 }
 0x748   :  { %v23756_v3 = vpop.f32.mrb[50].mxu0  ;;  %v9198_v43 = vadd.f32 %v23736_v5, %v9197_v22  ;;  %v9267_v57 = vadd.f32 %v9266_v59, %v9236_v30  ;;  %25765 = vst [vmem:[#allocation35_spill] sm:$0xff] %v23771_v11  ;;  %v12056_v16 = vmul.f32 %v23771_v11, %v23771_v11  ;;  %v12086_v45 = vadd.f32 %v12085_v26, %v12055_v42 }
 0x749   :  { %v23763_v37 = vpop.f32.mrb[51].mxu0  ;;  %v12017_v18 = vadd.f32 %v12016_v23, %v23771_v11  ;;  %v9239_v8 = vmul.f32 %v23756_v3, %v23756_v3 }
 0x74a   :  { %v9199_v54 = vadd.f32 %v9198_v43, %v23763_v37  ;;  %v9238_v17 = vmul.f32 %v23763_v37, %v23763_v37  ;;  %v9268_v60 = vadd.f32 %v9267_v57, %v9237_v48  ;;  %v12087_v1 = vadd.f32 %v12086_v45, %v12056_v16  ;;  %v23785_v55 = vpop.f32.mrb[46].mxu1 }
 0x74b   :  { %25766 = vst [vmem:[#allocation49_spill] sm:$0xff] %v23785_v55  ;;  %v12018_v28 = vadd.f32 %v23765_v41, %v12017_v18  ;;  %v23791_v39 = vpop.f32.mrb[47].mxu1  ;;  %v12059_v43 = vmul.f32 %v23785_v55, %v23785_v55 }
 0x74c   :  { %v23776_v46 = vpop.f32.mrb[52].mxu0  ;;  %v9200_v13 = vadd.f32 %v23756_v3, %v9199_v54  ;;  %v9269_v61 = vadd.f32 %v9268_v60, %v9238_v17  ;;  %25767 = vst [vmem:[#allocation34_spill] sm:$0xff] %v23791_v39  ;;  %v12058_v59 = vmul.f32 %v23791_v39, %v23791_v39  ;;  %v12088_v40 = vadd.f32 %v12087_v1, %v12057_v21 }
 0x74d   :  { %v23783_v47 = vpop.f32.mrb[53].mxu0  ;;  %v12019_v30 = vadd.f32 %v12018_v28, %v23791_v39  ;;  %v9241_v42 = vmul.f32 %v23776_v46, %v23776_v46 }
 0x74e   :  { %v9201_v53 = vadd.f32 %v9200_v13, %v23783_v47  ;;  %v9240_v51 = vmul.f32 %v23783_v47, %v23783_v47  ;;  %v9270_v22 = vadd.f32 %v9269_v61, %v9239_v8  ;;  %v12089_v26 = vadd.f32 %v12088_v40, %v12058_v59  ;;  %v23805_v23 = vpop.f32.mrb[48].mxu1 }
 0x74f   :  { %25768 = vst [vmem:[#allocation37_spill] sm:$0xff] %v23805_v23  ;;  %v12020_v54 = vadd.f32 %v23785_v55, %v12019_v30  ;;  %v23811_v18 = vpop.f32.mrb[49].mxu1  ;;  %v12061_v1 = vmul.f32 %v23805_v23, %v23805_v23 }
 0x750   :  { %v23796_v6 = vpop.f32.mrb[54].mxu0  ;;  %v9202_v52 = vadd.f32 %v23776_v46, %v9201_v53  ;;  %v9271_v48 = vadd.f32 %v9270_v22, %v9240_v51  ;;  %25769 = vst [vmem:[#allocation36_spill] sm:$0xff] %v23811_v18  ;;  %v12060_v13 = vmul.f32 %v23811_v18, %v23811_v18  ;;  %v12090_v21 = vadd.f32 %v12089_v26, %v12059_v43 }
 0x751   :  { %v23803_v57 = vpop.f32.mrb[55].mxu0  ;;  %v12021_v45 = vadd.f32 %v12020_v54, %v23811_v18  ;;  %v9243_v28 = vmul.f32 %v23796_v6, %v23796_v6 }
 0x752   :  { %v9203_v17 = vadd.f32 %v9202_v52, %v23803_v57  ;;  %v9242_v60 = vmul.f32 %v23803_v57, %v23803_v57  ;;  %v9272_v16 = vadd.f32 %v9271_v48, %v9241_v42  ;;  %v12091_v22 = vadd.f32 %v12090_v21, %v12060_v13  ;;  %v23825_v30 = vpop.f32.mrb[50].mxu1 }
 0x753   :  { %25770 = vst [vmem:[#allocation39_spill] sm:$0xff] %v23825_v30  ;;  %v12022_v59 = vadd.f32 %v23805_v23, %v12021_v45  ;;  %v23831_v43 = vpop.f32.mrb[51].mxu1 }
 0x754   :  { %v23816_v8 = vpop.f32.mrb[56].mxu0  ;;  %v9204_v61 = vadd.f32 %v23796_v6, %v9203_v17  ;;  %v9273_v53 = vadd.f32 %v9272_v16, %v9242_v60  ;;  %25771 = vst [vmem:[#allocation38_spill] sm:$0xff] %v23831_v43  ;;  %v12062_v26 = vmul.f32 %v23831_v43, %v23831_v43  ;;  %v12092_v54 = vadd.f32 %v12091_v22, %v12061_v1 }
 0x755   :  { %v23823_v51 = vpop.f32.mrb[57].mxu0  ;;  %v12023_v48 = vadd.f32 %v12022_v59, %v23831_v43  ;;  %v12063_v16 = vmul.f32 %v23825_v30, %v23825_v30  ;;  %v9245_v45 = vmul.f32 %v23816_v8, %v23816_v8 }
 0x756   :  { %v9205_v40 = vadd.f32 %v9204_v61, %v23823_v51  ;;  %v9244_v52 = vmul.f32 %v23823_v51, %v23823_v51  ;;  %v9274_v42 = vadd.f32 %v9273_v53, %v9243_v28  ;;  %v12093_v61 = vadd.f32 %v12092_v54, %v12062_v26  ;;  %v23845_v28 = vpop.f32.mrb[52].mxu1 }
 0x757   :  { %25772 = vst [vmem:[#allocation41_spill] sm:$0xff] %v23845_v28  ;;  %v12024_v53 = vadd.f32 %v23825_v30, %v12023_v48  ;;  %v23851_v59 = vpop.f32.mrb[53].mxu1  ;;  %v12065_v48 = vmul.f32 %v23845_v28, %v23845_v28 }
 0x758   :  { %v23836_v17 = vpop.f32.mrb[58].mxu0  ;;  %v9206_v60 = vadd.f32 %v23816_v8, %v9205_v40  ;;  %v9275_v13 = vadd.f32 %v9274_v42, %v9244_v52  ;;  %25773 = vst [vmem:[#allocation40_spill] sm:$0xff] %v23851_v59  ;;  %v12064_v52 = vmul.f32 %v23851_v59, %v23851_v59  ;;  %v12094_v42 = vadd.f32 %v12093_v61, %v12063_v16 }
 0x759   :  { %v23843_v21 = vpop.f32.mrb[59].mxu0  ;;  %v12025_v43 = vadd.f32 %v12024_v53, %v23851_v59  ;;  %v9247_v54 = vmul.f32 %v23836_v17, %v23836_v17 }
 0x75a   :  { %v9207_v1 = vadd.f32 %v9206_v60, %v23843_v21  ;;  %v9246_v22 = vmul.f32 %v23843_v21, %v23843_v21  ;;  %v9276_v40 = vadd.f32 %v9275_v13, %v9245_v45  ;;  %v12095_v45 = vadd.f32 %v12094_v42, %v12064_v52  ;;  %v23865_v13 = vpop.f32.mrb[54].mxu1 }
 0x75b   :  { %25774 = vst [vmem:[#allocation43_spill] sm:$0xff] %v23865_v13  ;;  %v12026_v53 = vadd.f32 %v23845_v28, %v12025_v43  ;;  %v12067_v43 = vmul.f32 %v23865_v13, %v23865_v13 }
 0x75c   :  { %v23856_v23 = vpop.f32.mrb[60].mxu0  ;;  %v9208_v26 = vadd.f32 %v23836_v17, %v9207_v1  ;;  %v9277_v60 = vadd.f32 %v9276_v40, %v9246_v22  ;;  %v23871_v1 = vpop.f32.mrb[55].mxu1  ;;  %v12096_v40 = vadd.f32 %v12095_v45, %v12065_v48 }
 0x75d   :  { %v23863_v30 = vpop.f32.mrb[61].mxu0  ;;  %25775 = vst [vmem:[#allocation42_spill] sm:$0xff] %v23871_v1  ;;  %v12027_v18 = vadd.f32 %v12026_v53, %v23871_v1  ;;  %v12066_v22 = vmul.f32 %v23871_v1, %v23871_v1  ;;  %v9249_v42 = vmul.f32 %v23856_v23, %v23856_v23 }
 0x75e   :  { %v9209_v16 = vadd.f32 %v9208_v26, %v23863_v30  ;;  %v9248_v61 = vmul.f32 %v23863_v30, %v23863_v30  ;;  %v9278_v59 = vadd.f32 %v9277_v60, %v9247_v54  ;;  %v23885_v60 = vpop.f32.mrb[56].mxu1 }
 0x75f   :  { %v12097_v54 = vadd.f32 %v12096_v40, %v12066_v22  ;;  %25776 = vst [vmem:[#allocation45_spill] sm:$0xff] %v23885_v60  ;;  %v12028_v53 = vadd.f32 %v23865_v13, %v12027_v18 }
 0x760   :  { %v23876_v55 = vpop.f32.mrb[62].mxu0  ;;  %v9210_v52 = vadd.f32 %v23856_v23, %v9209_v16  ;;  %v9279_v26 = vadd.f32 %v9278_v59, %v9248_v61  ;;  %v23891_v16 = vpop.f32.mrb[57].mxu1 }
 0x761   :  { %v23883_v28 = vpop.f32.mrb[63].mxu0  ;;  %25777 = vst [vmem:[#allocation44_spill] sm:$0xff] %v23891_v16  ;;  %v12029_v39 = vadd.f32 %v12028_v53, %v23891_v16  ;;  %v12068_v59 = vmul.f32 %v23891_v16, %v23891_v16  ;;  %v12098_v61 = vadd.f32 %v12097_v54, %v12067_v43  ;;  %v9251_v40 = vmul.f32 %v23876_v55, %v23876_v55 }
 0x762   :  { %v9211_v48 = vadd.f32 %v9210_v52, %v23883_v28  ;;  %v9250_v45 = vmul.f32 %v23883_v28, %v23883_v28  ;;  %v9280_v1 = vadd.f32 %v9279_v26, %v9249_v42  ;;  %v12069_v52 = vmul.f32 %v23885_v60, %v23885_v60  ;;  %v23901_v41 = vpop.f32.mrb[58].mxu1 }
 0x763   :  { %v12099_v13 = vadd.f32 %v12098_v61, %v12068_v59  ;;  %25778 = vst [vmem:[#allocation47_spill] sm:$0xff] %v23901_v41  ;;  %v12030_v42 = vadd.f32 %v23885_v60, %v12029_v39  ;;  %v23904_v26 = vpop.f32.mrb[59].mxu1 }
 0x764   :  { %v9212_v22 = vadd.f32 %v23876_v55, %v9211_v48  ;;  %v9281_v18 = vadd.f32 %v9280_v1, %v9250_v45  ;;  %25779 = vst [vmem:[#allocation52_spill] sm:$0xff] %v23904_v26  ;;  %v12070_v43 = vmul.f32 %v23904_v26, %v23904_v26  ;;  %v12071_v1 = vmul.f32 %v23901_v41, %v23901_v41 }
 0x765   :  { %v12031_v16 = vadd.f32 %v12030_v42, %v23904_v26  ;;  %v12100_v54 = vadd.f32 %v12099_v13, %v12069_v52 }
 0x766   :  { %v9282_v53 = vadd.f32 %v9281_v18, %v9251_v40  ;;  %v9213_v48 = vrot.slane %v9212_v22, 4  ;;  %v18931_v11 = vpop.f32.mrb[60].mxu1 }
 0x767   :  { %v12101_v45 = vadd.f32 %v12100_v54, %v12070_v43  ;;  %v12032_v59 = vadd.f32 %v23901_v41, %v12031_v16  ;;  %v11922_v2 = vpop.f32.mrb[61].mxu1  ;;  %v12073_v18 = vmul.f32 %v18931_v11, %v18931_v11 }
 0x768   :  { %v9283_v61 = vrot.slane %v9282_v53, 4  ;;  %v12072_v60 = vmul.f32 %v11922_v2, %v11922_v2  ;;  %v9214_v40 = vadd.f32 %v9213_v48, %v9212_v22 }
 0x769   :  { %v12033_v39 = vadd.f32 %v12032_v59, %v11922_v2  ;;  %v12102_v44 = vadd.f32 %v12101_v45, %v12071_v1 }
 0x76a   :  { %v18934_v50 = vpop.f32.mrb[62].mxu1  ;;  %v9284_v10 = vadd.f32 %v9283_v61, %v9282_v53  ;;  %v9215_v52 = vrot.slane %v9214_v40, 2 }
 0x76b   :  { %v12103_v42 = vadd.f32 %v12102_v44, %v12072_v60  ;;  %v12034_v26 = vadd.f32 %v18931_v11, %v12033_v39  ;;  %v11932_v13 = vpop.f32.mrb[63].mxu1  ;;  %v12075_v43 = vmul.f32 %v18934_v50, %v18934_v50 }
 0x76c   :  { %v12074_v56 = vmul.f32 %v11932_v13, %v11932_v13  ;;  %v9285_v54 = vrot.slane %v9284_v10, 2  ;;  %v9216_v41 = vadd.f32 %v9215_v52, %v9214_v40 }
 0x76d   :  { %v12035_v38 = vadd.f32 %v12034_v26, %v11932_v13  ;;  %v12104_v34 = vadd.f32 %v12103_v42, %v12073_v18 }
 0x76e   :  { %v9286_v63 = vadd.f32 %v9285_v54, %v9284_v10  ;;  %v9217_v48 = vrot.slane %v9216_v41, 1  ;;  %v21327_v54 = vmov 1983009808  }
 0x76f   :  { %v12036_v14 = vadd.f32 %v18934_v50, %v12035_v38  ;;  %v12105_v16 = vadd.f32 %v12104_v34, %v12074_v56 }
 0x770   :  { %v9287_v53 = vrot.slane %v9286_v63, 1  ;;  %v9218_v39 = vadd.f32 %v9217_v48, %v9216_v41  ;;  %v12115_v48 = vld [vmem:[#allocation16] sm:$0x1] }
 0x771   :  { %v12037_v9 = vrot.slane %v12036_v14, 4  ;;  %v12106_v59 = vadd.f32 %v12105_v16, %v12075_v43  ;;  %v12300_v16 = vunpack.c.l.s4 %v21327_v54 }
 0x772   :  { %v9288_v18 = vadd.f32 %v9287_v53, %v9286_v63 }
 0x773   :  { %v12038_v1 = vadd.f32 %v12037_v9, %v12036_v14  ;;  %v12107_v22 = vrot.slane %v12106_v59, 4  ;;  %v12301_v41 = vunpack.c.0.s8 %v12300_v16 }
 0x775   :  { %v12039_v44 = vrot.slane %v12038_v1, 2  ;;  %v12108_v60 = vadd.f32 %v12107_v22, %v12106_v59  ;;  %v12114_v59 = vld [vmem:[#allocation14] sm:$0x1] }
 0x777   :  { %v12040_v45 = vadd.f32 %v12039_v44, %v12038_v1  ;;  %v12109_v61 = vrot.slane %v12108_v60, 2  ;;  %v25780_v44 = vld [vmem:[#allocation51_spill] sm:$0xff] }
 0x779   :  { %v12041_v26 = vrot.slane %v12040_v45, 1  ;;  %v12110_v32 = vadd.f32 %v12109_v61, %v12108_v60 }
 0x77b   :  { %v12042_v42 = vadd.f32 %v12041_v26, %v12040_v45  ;;  %v12111_v19 = vrot.slane %v12110_v32, 1 }
 0x77d   :  { %v12043_v38 = vadd.f32 %v12042_v42, %v9218_v39  ;;  %v12112_v34 = vadd.f32 %v12111_v19, %v12110_v32  ;;  %v25781_v32 = vld [vmem:[#allocation50_spill] sm:$0xff] }
 0x77e   :  { %v23916_v19 = vsub.s32 %v12301_v41, %v25781_v32 }
 0x77f   :  { %v12113_v56 = vadd.f32 %v12112_v34, %v9288_v18  ;;  %v12116_v40 = vmul.f32 0.001953125, %v12043_v38 }
 0x780   :  { %25782 = vst [vmem:[#allocation51_spill] sm:$0xff] %v23916_v19 }
 0x781   :  { %v12117_v52 = vmul.f32 0.001953125, %v12113_v56  ;;  %v12118_v10 = vmul.f32 %v12116_v40, %v12116_v40 }
 0x783   :  { %v12119_v9 = vsub.f32 %v12117_v52, %v12118_v10 }
 0x785   :  { %v12120_v14 = vmax.f32 %v12119_v9, 0.0 }
 0x787   :  { %v12121_v43 = vadd.f32 1e-05, %v12120_v14 }
 0x789   :  { %21125 = vrsqrt.f32 %v12121_v43 }
 0x793   :  { %v21126_v1 = vpop.eup %21125 }
 0x794   :  { %v12123_v22 = vmul.f32 %v21126_v1, %v12114_v59 }
 0x796   :  { %v12124_v63 = vmul.f32 %v12123_v22, %v12116_v40  ;;  %v23913_v60 = vrot.slane %v12123_v22, %v25780_v44 }
 0x798   :  { %v12125_v53 = vsub.f32 %v12115_v48, %v12124_v63  ;;  %v13286_v45 = vmul.f32 %v23913_v60, %v11922_v2  ;;  %v13287_v61 = vmul.f32 %v18931_v11, %v23913_v60  ;;  %v13288_v39 = vmul.f32 %v23913_v60, %v11932_v13 }
 0x799   :  { %v13289_v26 = vmul.f32 %v18934_v50, %v23913_v60  ;;  %v23924_v18 = vmul.f32 %v23913_v60, %v23616_v58  ;;  %v23928_v42 = vmul.f32 %v23612_v20, %v23913_v60  ;;  %v23932_v38 = vmul.f32 %v23913_v60, %v23624_v33 }
 0x79a   :  { %v23935_v2 = vrot.slane %v12125_v53, %v25780_v44  ;;  %v23939_v11 = vmul.f32 %v23622_v0, %v23913_v60  ;;  %v23943_v58 = vmul.f32 %v23913_v60, %v23634_v49  ;;  %v23947_v20 = vmul.f32 %v23631_v24, %v23913_v60 }
 0x79b   :  { %v23951_v33 = vmul.f32 %v23913_v60, %v23644_v7  ;;  %v23955_v50 = vmul.f32 %v23641_v62, %v23913_v60  ;;  %v23959_v0 = vmul.f32 %v23913_v60, %v23664_v35  ;;  %v23963_v49 = vmul.f32 %v23661_v31, %v23913_v60 }
 0x79c   :  { %25783 = vst [vmem:[#allocation50_spill] sm:$0xff] %v23935_v2  ;;  %v13318_v13 = vadd.f32 %v13286_v45, %v23935_v2  ;;  %v13319_v24 = vadd.f32 %v13287_v61, %v23935_v2  ;;  %v13320_v34 = vadd.f32 %v13288_v39, %v23935_v2  ;;  %v13321_v7 = vadd.f32 %v13289_v26, %v23935_v2 }
 0x79d   :  { %v23971_v62 = vmul.f32 %v23913_v60, %v23683_v15  ;;  %v23975_v35 = vmul.f32 %v23676_v36, %v23913_v60  ;;  %v23979_v31 = vmul.f32 %v23913_v60, %v23703_v4  ;;  %v23983_v56 = vmul.f32 %v23696_v27, %v23913_v60 }
 0x79e   :  { %v13350_v40 = vmax.f32 %v13318_v13, 0.0  ;;  %v13351_v52 = vmax.f32 %v13319_v24, 0.0  ;;  %v13352_v10 = vmax.f32 %v13320_v34, 0.0  ;;  %v13353_v9 = vmax.f32 %v13321_v7, 0.0 }
 0x79f   :  { %v23987_v15 = vmul.f32 %v23913_v60, %v23723_v29  ;;  %v23991_v36 = vmul.f32 %v23716_v12, %v23913_v60  ;;  %v23995_v4 = vmul.f32 %v23913_v60, %v23743_v25  ;;  %v23999_v27 = vmul.f32 %v23736_v5, %v23913_v60 }
 0x7a0   :  { %v13368_v14 = vmax.f32 %v13350_v40, %v13352_v10  ;;  %v13369_v43 = vmax.f32 %v13351_v52, %v13353_v9  ;;  %v24003_v54 = vmul.f32 %v23913_v60, %v23763_v37  ;;  %v24007_v29 = vmul.f32 %v23756_v3, %v23913_v60 }
 0x7a1   :  { %v24011_v12 = vmul.f32 %v23913_v60, %v23783_v47  ;;  %v24015_v25 = vmul.f32 %v23776_v46, %v23913_v60  ;;  %v24019_v5 = vmul.f32 %v23913_v60, %v23803_v57  ;;  %v24023_v37 = vmul.f32 %v23796_v6, %v23913_v60 }
 0x7a2   :  { %v13624_v16 = vcombine.high %v13368_v14, %v13368_v14  ;;  %v13631_v3 = vrot.slane %v13368_v14, %v23916_v19  ;;  %v13641_v59 = vcombine.high %v13369_v43, %v13369_v43  ;;  %v13648_v1 = vrot.slane %v13369_v43, %v23916_v19 }
 0x7a3   :  { %v24029_v47 = vmul.f32 %v23913_v60, %v23823_v51  ;;  %v24033_v46 = vmul.f32 %v23816_v8, %v23913_v60  ;;  %v24037_v57 = vmul.f32 %v23913_v60, %v23843_v21  ;;  %v24041_v6 = vmul.f32 %v23836_v17, %v23913_v60 }
 0x7a4   :  { %v13638_v41 = vrot.slane %v13624_v16, %v23916_v19  ;;  %v13639_v22 = vcombine.high %v13631_v3, %v13631_v3  ;;  %v13655_v48 = vrot.slane %v13641_v59, %v23916_v19  ;;  %v13656_v63 = vcombine.high %v13648_v1, %v13648_v1 }
 0x7a5   :  { %v14114_v51 = vsel %vm12634_vm1, %v13631_v3, -inf  ;;  %v14142_v44 = vsel %vm12634_vm1, %v13648_v1, -inf  ;;  %v24049_v8 = vmul.f32 %v23913_v60, %v23863_v30  ;;  %v24053_v21 = vmul.f32 %v23856_v23, %v23913_v60 }
 0x7a6   :  { %v13640_v17 = vcombine.high %v13638_v41, %v13638_v41  ;;  %v13657_v32 = vcombine.high %v13655_v48, %v13655_v48  ;;  %v14115_v53 = vrot.slane %v14114_v51, 4  ;;  %v14121_v45 = vsel %vm12634_vm1, %v13639_v22, -inf }
 0x7a7   :  { %25784 = vst [vmem:[#allocation53_spill] sm:$0xff] %v24053_v21  ;;  %v14122_v61 = vrot.slane %v14121_v45, 4  ;;  %v14128_v39 = vsel %vm12634_vm1, %v13638_v41, -inf  ;;  %v14143_v26 = vrot.slane %v14142_v44, 4  ;;  %v14149_v13 = vsel %vm12634_vm1, %v13656_v63, -inf }
 0x7a8   :  { %v14116_v24 = vmax.f32 %v14114_v51, %v14115_v53  ;;  %v14129_v34 = vrot.slane %v14128_v39, 4  ;;  %v14135_v30 = vsel %vm12634_vm1, %v13640_v17, -inf  ;;  %v14150_v7 = vrot.slane %v14149_v13, 4 }
 0x7a9   :  { %v14123_v23 = vmax.f32 %v14121_v45, %v14122_v61  ;;  %v14136_v40 = vrot.slane %v14135_v30, 4  ;;  %v14144_v52 = vmax.f32 %v14142_v44, %v14143_v26  ;;  %v14156_v10 = vsel %vm12634_vm1, %v13655_v48, -inf }
 0x7aa   :  { %v14117_v9 = vrot.slane %v14116_v24, 2  ;;  %v14130_v14 = vmax.f32 %v14128_v39, %v14129_v34  ;;  %v14151_v43 = vmax.f32 %v14149_v13, %v14150_v7  ;;  %v14157_v16 = vrot.slane %v14156_v10, 4 }
 0x7ab   :  { %v14124_v3 = vrot.slane %v14123_v23, 2  ;;  %v14137_v59 = vmax.f32 %v14135_v30, %v14136_v40  ;;  %v14145_v1 = vrot.slane %v14144_v52, 2  ;;  %v14163_v41 = vsel %vm12634_vm1, %v13657_v32, -inf }
 0x7ac   :  { %v14118_v22 = vmax.f32 %v14116_v24, %v14117_v9  ;;  %v14131_v63 = vrot.slane %v14130_v14, 2  ;;  %v14152_v51 = vrot.slane %v14151_v43, 2  ;;  %v14158_v17 = vmax.f32 %v14156_v10, %v14157_v16 }
 0x7ad   :  { %v14125_v44 = vmax.f32 %v14123_v23, %v14124_v3  ;;  %v14138_v53 = vrot.slane %v14137_v59, 2  ;;  %v14146_v48 = vmax.f32 %v14144_v52, %v14145_v1  ;;  %v14164_v45 = vrot.slane %v14163_v41, 4 }
 0x7ae   :  { %v14119_v61 = vrot.slane %v14118_v22, 1  ;;  %v14132_v39 = vmax.f32 %v14130_v14, %v14131_v63  ;;  %v14153_v26 = vmax.f32 %v14151_v43, %v14152_v51  ;;  %v14159_v13 = vrot.slane %v14158_v17, 2 }
 0x7af   :  { %v14126_v34 = vrot.slane %v14125_v44, 1  ;;  %v14139_v30 = vmax.f32 %v14137_v59, %v14138_v53  ;;  %v14147_v7 = vrot.slane %v14146_v48, 1  ;;  %v14165_v40 = vmax.f32 %v14163_v41, %v14164_v45  ;;  %v25789_v45 = vld [vmem:[#allocation25_spill] sm:$0xff] }
 0x7b0   :  { %v14120_v32 = vmax.f32 %v14118_v22, %v14119_v61  ;;  %v14133_v19 = vrot.slane %v14132_v39, 1  ;;  %v14154_v24 = vrot.slane %v14153_v26, 1  ;;  %v14160_v9 = vmax.f32 %v14158_v17, %v14159_v13  ;;  %v25785_v17 = vld [vmem:[#allocation48_spill] sm:$0xff] }
 0x7b1   :  { %v14127_v21 = vmax.f32 %v14125_v44, %v14126_v34  ;;  %v14140_v10 = vrot.slane %v14139_v30, 1  ;;  %v14148_v16 = vmax.f32 %v14146_v48, %v14147_v7  ;;  %v14166_v23 = vrot.slane %v14165_v40, 2  ;;  %v25787_v44 = vld [vmem:[#allocation46_spill] sm:$0xff]  ;;  %v25795_v34 = vld [vmem:[#allocation24_spill] sm:$0xff]  ;;  %v25797_v7 = vld [vmem:[#allocation29_spill] sm:$0xff] }
 0x7b2   :  { %v14134_v3 = vmax.f32 %v14132_v39, %v14133_v19  ;;  %v14155_v52 = vmax.f32 %v14153_v26, %v14154_v24  ;;  %v14161_v1 = vrot.slane %v14160_v9, 1  ;;  %v24063_v14 = vmul.f32 %v23913_v60, %v23883_v28  ;;  %v25793_v26 = vld [vmem:[#allocation27_spill] sm:$0xff] }
 0x7b3   :  { %v14141_v43 = vmax.f32 %v14139_v30, %v14140_v10  ;;  %v14167_v63 = vmax.f32 %v14165_v40, %v14166_v23  ;;  %v14283_v59 = vsel %vm13147_vm2, %v14127_v21, %v14120_v32  ;;  %v24068_v41 = vmul.f32 %v23876_v55, %v23913_v60  ;;  %v25791_v55 = vld [vmem:[#allocation23_spill] sm:$0xff] }
 0x7b4   :  { %v14162_v22 = vmax.f32 %v14160_v9, %v14161_v1  ;;  %v14284_v51 = vsel %vm13149_vm3, %v14134_v3, %v14283_v59  ;;  %v24073_v19 = vmul.f32 %v23913_v60, %v25785_v17  ;;  %v24077_v53 = vmul.f32 %v25787_v44, %v23913_v60  ;;  %v25799_v9 = vld [vmem:[#allocation26_spill] sm:$0xff]  ;;  %v25803_v1 = vld [vmem:[#allocation28_spill] sm:$0xff]  ;;  %v25805_v59 = vld [vmem:[#allocation33_spill] sm:$0xff] }
 0x7b5   :  { %v14168_v28 = vrot.slane %v14167_v63, 1  ;;  %v14285_v48 = vsel %vm13151_vm4, %v14141_v43, %v14284_v51  ;;  %v24082_v21 = vmul.f32 %v23913_v60, %v25789_v45  ;;  %v24086_v61 = vmul.f32 %v25791_v55, %v23913_v60  ;;  %v25809_v44 = vld [vmem:[#allocation35_spill] sm:$0xff]  ;;  %v25813_v45 = vld [vmem:[#allocation34_spill] sm:$0xff] }
 0x7b6   :  { %25786 = vst [vmem:[#allocation48_spill] sm:$0xff] %v24073_v19  ;;  %25788 = vst [vmem:[#allocation46_spill] sm:$0xff] %v24077_v53  ;;  %v14286_v39 = vsel %vm13153_vm5, %v14148_v16, %v14285_v48  ;;  %v24091_v13 = vmul.f32 %v23913_v60, %v25793_v26  ;;  %v24095_v30 = vmul.f32 %v25795_v34, %v23913_v60  ;;  %v25801_v16 = vld [vmem:[#allocation31_spill] sm:$0xff]  ;;  %v25817_v34 = vld [vmem:[#allocation36_spill] sm:$0xff] }
 0x7b7   :  { %25790 = vst [vmem:[#allocation25_spill] sm:$0xff] %v24082_v21  ;;  %25792 = vst [vmem:[#allocation23_spill] sm:$0xff] %v24086_v61  ;;  %v24099_v40 = vmul.f32 %v23913_v60, %v25797_v7  ;;  %v14169_v32 = vmax.f32 %v14167_v63, %v14168_v28  ;;  %v14287_v24 = vsel %vm13155_vm6, %v14155_v52, %v14286_v39  ;;  %v25807_v52 = vld [vmem:[#allocation30_spill] sm:$0xff]  ;;  %v25815_v39 = vld [vmem:[#allocation49_spill] sm:$0xff] }
 0x7b8   :  { %25794 = vst [vmem:[#allocation27_spill] sm:$0xff] %v24091_v13  ;;  %25796 = vst [vmem:[#allocation24_spill] sm:$0xff] %v24095_v30  ;;  %v24104_v10 = vmul.f32 %v25799_v9, %v23913_v60  ;;  %v24108_v23 = vmul.f32 %v23913_v60, %v25801_v16  ;;  %v14288_v3 = vsel %vm13157_vm7, %v14162_v22, %v14287_v24  ;;  %v25811_v22 = vld [vmem:[#allocation32_spill] sm:$0xff]  ;;  %v25821_v9 = vld [vmem:[#allocation38_spill] sm:$0xff] }
 0x7b9   :  { %25798 = vst [vmem:[#allocation29_spill] sm:$0xff] %v24099_v40  ;;  %v24113_v43 = vmul.f32 %v25803_v1, %v23913_v60  ;;  %v24117_v51 = vmul.f32 %v23913_v60, %v25805_v59  ;;  %v24121_v63 = vmul.f32 %v25807_v52, %v23913_v60  ;;  %v14289_v17 = vsel %vm13159_vm8, %v14169_v32, %v14288_v3  ;;  %v25819_v32 = vld [vmem:[#allocation37_spill] sm:$0xff]  ;;  %v25823_v3 = vld [vmem:[#allocation39_spill] sm:$0xff]  ;;  %v25825_v59 = vld [vmem:[#allocation40_spill] sm:$0xff] }
 0x7ba   :  { %25800 = vst [vmem:[#allocation26_spill] sm:$0xff] %v24104_v10  ;;  %25802 = vst [vmem:[#allocation31_spill] sm:$0xff] %v24108_v23  ;;  %v24126_v28 = vmul.f32 %v23913_v60, %v25809_v44  ;;  %v24130_v48 = vmul.f32 %v25811_v22, %v23913_v60  ;;  %v24134_v55 = vmul.f32 %v23913_v60, %v25813_v45  ;;  %v25829_v22 = vld [vmem:[#allocation42_spill] sm:$0xff] }
 0x7bb   :  { %25804 = vst [vmem:[#allocation28_spill] sm:$0xff] %v24113_v43  ;;  %25806 = vst [vmem:[#allocation33_spill] sm:$0xff] %v24117_v51  ;;  %v24138_v26 = vmul.f32 %v25815_v39, %v23913_v60  ;;  %v24142_v7 = vmul.f32 %v23913_v60, %v25817_v34  ;;  %v24146_v24 = vmul.f32 %v25819_v32, %v23913_v60  ;;  %v25831_v39 = vld [vmem:[#allocation43_spill] sm:$0xff]  ;;  %v25833_v32 = vld [vmem:[#allocation44_spill] sm:$0xff] }
 0x7bc   :  { %25808 = vst [vmem:[#allocation30_spill] sm:$0xff] %v24121_v63  ;;  %25810 = vst [vmem:[#allocation35_spill] sm:$0xff] %v24126_v28  ;;  %v24150_v16 = vmul.f32 %v23913_v60, %v25821_v9  ;;  %v24154_v1 = vmul.f32 %v25823_v3, %v23913_v60  ;;  %v24158_v52 = vmul.f32 %v23913_v60, %v25825_v59  ;;  %v25835_v3 = vld [vmem:[#allocation45_spill] sm:$0xff] }
 0x7bd   :  { %25812 = vst [vmem:[#allocation32_spill] sm:$0xff] %v24130_v48  ;;  %25814 = vst [vmem:[#allocation34_spill] sm:$0xff] %v24134_v55  ;;  %v24166_v45 = vmul.f32 %v23913_v60, %v25829_v22  ;;  %v24170_v34 = vmul.f32 %v25831_v39, %v23913_v60  ;;  %v24174_v9 = vmul.f32 %v23913_v60, %v25833_v32 }
 0x7be   :  { %14306 = vst [vmem:[#allocation17 + $0x78] sm:$0xff] %v14289_v17  ;;  %25816 = vst [vmem:[#allocation49_spill] sm:$0xff] %v24138_v26  ;;  %v25827_v17 = vld [vmem:[#allocation41_spill] sm:$0xff]  ;;  %v24178_v59 = vmul.f32 %v25835_v3, %v23913_v60  ;;  %v24190_v39 = vadd.f32 %v23935_v2, %v23924_v18  ;;  %v24194_v32 = vadd.f32 %v23935_v2, %v23928_v42 }
 0x7bf   :  { %25818 = vst [vmem:[#allocation36_spill] sm:$0xff] %v24142_v7  ;;  %25820 = vst [vmem:[#allocation37_spill] sm:$0xff] %v24146_v24  ;;  %v24162_v44 = vmul.f32 %v25827_v17, %v23913_v60  ;;  %v24198_v3 = vadd.f32 %v23935_v2, %v23932_v38  ;;  %v24210_v18 = vadd.f32 %v23935_v2, %v23947_v20 }
 0x7c0   :  { %25822 = vst [vmem:[#allocation38_spill] sm:$0xff] %v24150_v16  ;;  %25824 = vst [vmem:[#allocation39_spill] sm:$0xff] %v24154_v1  ;;  %v12208_v42 = vadd.f32 %v23935_v2, %v23951_v33  ;;  %v12210_v38 = vadd.f32 %v23935_v2, %v23959_v0  ;;  %v12214_v20 = vadd.f32 %v23935_v2, %v23979_v31 }
 0x7c1   :  { %25826 = vst [vmem:[#allocation40_spill] sm:$0xff] %v24158_v52  ;;  %25828 = vst [vmem:[#allocation41_spill] sm:$0xff] %v24162_v44  ;;  %v25837_v52 = vld [vmem:[#allocation52_spill] sm:$0xff]  ;;  %v25839_v44 = vld [vmem:[#allocation47_spill] sm:$0xff]  ;;  %v12215_v33 = vadd.f32 %v23935_v2, %v23983_v56  ;;  %v12217_v0 = vadd.f32 %v23935_v2, %v23991_v36  ;;  %v12221_v31 = vadd.f32 %v23935_v2, %v24007_v29 }
 0x7c2   :  { %25830 = vst [vmem:[#allocation42_spill] sm:$0xff] %v24166_v45  ;;  %25832 = vst [vmem:[#allocation43_spill] sm:$0xff] %v24170_v34  ;;  %v24182_v17 = vmul.f32 %v23913_v60, %v25837_v52  ;;  %v24186_v22 = vmul.f32 %v25839_v44, %v23913_v60  ;;  %v24202_v52 = vadd.f32 %v23935_v2, %v23939_v11  ;;  %v12240_v34 = vmax.f32 %v12208_v42, 0.0 }
 0x7c3   :  { %25834 = vst [vmem:[#allocation44_spill] sm:$0xff] %v24174_v9  ;;  %25836 = vst [vmem:[#allocation45_spill] sm:$0xff] %v24178_v59  ;;  %v24206_v60 = vadd.f32 %v23935_v2, %v23943_v58  ;;  %v12209_v44 = vadd.f32 %v23935_v2, %v23955_v50  ;;  %v12211_v11 = vadd.f32 %v23935_v2, %v23963_v49  ;;  %v12235_v59 = vmax.f32 %v24194_v32, 0.0 }
 0x7c4   :  { %25838 = vst [vmem:[#allocation52_spill] sm:$0xff] %v24182_v17  ;;  %25840 = vst [vmem:[#allocation47_spill] sm:$0xff] %v24186_v22  ;;  %v12212_v58 = vadd.f32 %v23935_v2, %v23971_v62  ;;  %v12213_v22 = vadd.f32 %v23935_v2, %v23975_v35  ;;  %v12216_v50 = vadd.f32 %v23935_v2, %v23987_v15  ;;  %v25841_v17 = vld [vmem:[#allocation53_spill] sm:$0xff]  ;;  %v12242_v45 = vmax.f32 %v12210_v38, 0.0 }
 0x7c5   :  { %v12218_v49 = vadd.f32 %v23935_v2, %v23995_v4  ;;  %v12219_v62 = vadd.f32 %v23935_v2, %v23999_v27  ;;  %v12220_v35 = vadd.f32 %v23935_v2, %v24003_v54  ;;  %v12222_v56 = vadd.f32 %v23935_v2, %v24011_v12 }
 0x7c6   :  { %v12223_v15 = vadd.f32 %v23935_v2, %v24015_v25  ;;  %v12224_v36 = vadd.f32 %v23935_v2, %v24019_v5  ;;  %v12225_v4 = vadd.f32 %v23935_v2, %v24023_v37  ;;  %v12226_v27 = vadd.f32 %v23935_v2, %v24029_v47 }
 0x7c7   :  { %v12227_v54 = vadd.f32 %v23935_v2, %v24033_v46  ;;  %v12228_v29 = vadd.f32 %v23935_v2, %v24037_v57  ;;  %v12229_v12 = vadd.f32 %v23935_v2, %v24041_v6  ;;  %v12230_v25 = vadd.f32 %v23935_v2, %v24049_v8 }
 0x7c8   :  { %v12231_v5 = vadd.f32 %v23935_v2, %v25841_v17  ;;  %v12232_v37 = vadd.f32 %v23935_v2, %v24063_v14  ;;  %v12233_v47 = vadd.f32 %v23935_v2, %v24068_v41  ;;  %v12234_v46 = vmax.f32 %v24190_v39, 0.0 }
 0x7c9   :  { %v12236_v57 = vmax.f32 %v24198_v3, 0.0  ;;  %v12237_v6 = vmax.f32 %v24202_v52, 0.0  ;;  %v12238_v9 = vmax.f32 %v24206_v60, 0.0  ;;  %v12239_v8 = vmax.f32 %v24210_v18, 0.0 }
 0x7ca   :  { %v12241_v17 = vmax.f32 %v12209_v44, 0.0  ;;  %v12243_v1 = vmax.f32 %v12211_v11, 0.0  ;;  %v12244_v14 = vmax.f32 %v12212_v58, 0.0  ;;  %v12245_v16 = vmax.f32 %v12213_v22, 0.0 }
 0x7cb   :  { %v12246_v24 = vmax.f32 %v12214_v20, 0.0  ;;  %v12247_v41 = vmax.f32 %v12215_v33, 0.0  ;;  %v12248_v7 = vmax.f32 %v12216_v50, 0.0  ;;  %v12249_v39 = vmax.f32 %v12217_v0, 0.0 }
 0x7cc   :  { %v12250_v26 = vmax.f32 %v12218_v49, 0.0  ;;  %v12251_v32 = vmax.f32 %v12219_v62, 0.0  ;;  %v12252_v55 = vmax.f32 %v12220_v35, 0.0  ;;  %v12253_v3 = vmax.f32 %v12221_v31, 0.0 }
 0x7cd   :  { %v12254_v48 = vmax.f32 %v12222_v56, 0.0  ;;  %v12255_v52 = vmax.f32 %v12223_v15, 0.0  ;;  %v12256_v28 = vmax.f32 %v12224_v36, 0.0  ;;  %v12257_v60 = vmax.f32 %v12225_v4, 0.0 }
 0x7ce   :  { %v12258_v63 = vmax.f32 %v12226_v27, 0.0  ;;  %v12259_v18 = vmax.f32 %v12227_v54, 0.0  ;;  %v12260_v42 = vmax.f32 %v12228_v29, 0.0  ;;  %v12261_v44 = vmax.f32 %v12229_v12, 0.0 }
 0x7cf   :  { %v12262_v38 = vmax.f32 %v12230_v25, 0.0  ;;  %v12263_v11 = vmax.f32 %v12231_v5, 0.0  ;;  %v12264_v58 = vmax.f32 %v12232_v37, 0.0  ;;  %v12265_v22 = vmax.f32 %v12233_v47, 0.0 }
 0x7d0   :  { %v12266_v20 = vmax.f32 %v12234_v46, %v12236_v57  ;;  %v12267_v33 = vmax.f32 %v12235_v59, %v12237_v6  ;;  %v12268_v50 = vmax.f32 %v12238_v9, %v12240_v34  ;;  %v12269_v0 = vmax.f32 %v12239_v8, %v12241_v17  ;;  %v25842_v59 = vld [vmem:[#allocation51_spill] sm:$0xff] }
 0x7d1   :  { %v12270_v49 = vmax.f32 %v12242_v45, %v12244_v14  ;;  %v12271_v62 = vmax.f32 %v12243_v1, %v12245_v16  ;;  %v12272_v35 = vmax.f32 %v12246_v24, %v12248_v7  ;;  %v12273_v31 = vmax.f32 %v12247_v41, %v12249_v39 }
 0x7d2   :  { %v12274_v56 = vmax.f32 %v12250_v26, %v12252_v55  ;;  %v12275_v15 = vmax.f32 %v12251_v32, %v12253_v3  ;;  %v12276_v36 = vmax.f32 %v12254_v48, %v12256_v28  ;;  %v12277_v4 = vmax.f32 %v12255_v52, %v12257_v60 }
 0x7d3   :  { %v24270_v27 = vmax.f32 %v12258_v63, %v12260_v42  ;;  %v24272_v54 = vmax.f32 %v12259_v18, %v12261_v44  ;;  %v24274_v29 = vmax.f32 %v12262_v38, %v12264_v58  ;;  %v24276_v12 = vmax.f32 %v12263_v11, %v12265_v22 }
 0x7d4   :  { %v12298_v25 = vcombine.high %v12266_v20, %v12266_v20  ;;  %v24279_v34 = vrot.slane %v12266_v20, %v25842_v59  ;;  %v12315_v45 = vcombine.high %v12267_v33, %v12267_v33  ;;  %v24282_v7 = vrot.slane %v12267_v33, %v25842_v59 }
 0x7d5   :  { %v12332_v55 = vcombine.high %v12268_v50, %v12268_v50  ;;  %v24285_v28 = vrot.slane %v12268_v50, %v25842_v59  ;;  %v12349_v63 = vcombine.high %v12269_v0, %v12269_v0  ;;  %v24296_v16 = vrot.slane %v12269_v0, %v25842_v59 }
 0x7d6   :  { %v24288_v48 = vrot.slane %v12298_v25, %v25842_v59  ;;  %v12313_v26 = vcombine.high %v24279_v34, %v24279_v34  ;;  %v24293_v24 = vrot.slane %v12315_v45, %v25842_v59  ;;  %v12330_v1 = vcombine.high %v24282_v7, %v24282_v7 }
 0x7d7   :  { %v24301_v9 = vrot.slane %v12332_v55, %v25842_v59  ;;  %v24306_v37 = vrot.slane %v12349_v63, %v25842_v59  ;;  %v12366_v6 = vcombine.high %v12270_v49, %v12270_v49  ;;  %v24319_v14 = vrot.slane %v12270_v49, %v25842_v59 }
 0x7d8   :  { %v12314_v47 = vcombine.high %v24288_v48, %v24288_v48  ;;  %v12331_v46 = vcombine.high %v24293_v24, %v24293_v24  ;;  %v12383_v41 = vcombine.high %v12271_v62, %v12271_v62  ;;  %v24325_v32 = vrot.slane %v12271_v62, %v25842_v59 }
 0x7d9   :  { %v24322_v39 = vrot.slane %v12366_v6, %v25842_v59  ;;  %v12400_v3 = vcombine.high %v12272_v35, %v12272_v35  ;;  %v24328_v52 = vrot.slane %v12272_v35, %v25842_v59  ;;  %v12417_v42 = vcombine.high %v12273_v31, %v12273_v31 }
 0x7da   :  { %v24333_v18 = vrot.slane %v12383_v41, %v25842_v59  ;;  %v24336_v44 = vrot.slane %v12273_v31, %v25842_v59  ;;  %v12434_v0 = vcombine.high %v12274_v56, %v12274_v56  ;;  %v24357_v62 = vrot.slane %v12274_v56, %v25842_v59 }
 0x7db   :  { %v24343_v58 = vrot.slane %v12400_v3, %v25842_v59  ;;  %v24350_v33 = vrot.slane %v12417_v42, %v25842_v59  ;;  %v12451_v35 = vcombine.high %v12275_v15, %v12275_v15  ;;  %v24360_v31 = vrot.slane %v12275_v15, %v25842_v59 }
 0x7dc   :  { %v24365_v45 = vrot.slane %v12434_v0, %v25842_v59  ;;  %v12468_v55 = vcombine.high %v12276_v36, %v12276_v36  ;;  %v24368_v63 = vrot.slane %v12276_v36, %v25842_v59  ;;  %v12485_v41 = vcombine.high %v12277_v4, %v12277_v4 }
 0x7dd   :  { %v24373_v56 = vrot.slane %v12451_v35, %v25842_v59  ;;  %v24385_v0 = vrot.slane %v12277_v4, %v25842_v59  ;;  %v12502_v15 = vcombine.high %v24270_v27, %v24270_v27  ;;  %v24396_v3 = vrot.slane %v24270_v27, %v25842_v59 }
 0x7de   :  { %v24380_v42 = vrot.slane %v12468_v55, %v25842_v59  ;;  %v24390_v6 = vrot.slane %v12485_v41, %v25842_v59  ;;  %v12519_v36 = vcombine.high %v24272_v54, %v24272_v54  ;;  %v24406_v41 = vrot.slane %v24272_v54, %v25842_v59 }
 0x7df   :  { %v24411_v25 = vrot.slane %v12502_v15, %v25842_v59  ;;  %v12536_v55 = vcombine.high %v24274_v29, %v24274_v29  ;;  %v24424_v54 = vrot.slane %v24274_v29, %v25842_v59  ;;  %v12553_v15 = vcombine.high %v24276_v12, %v24276_v12 }
 0x7e0   :  { %v24418_v4 = vrot.slane %v12519_v36, %v25842_v59  ;;  %v24435_v36 = vrot.slane %v24276_v12, %v25842_v59  ;;  %v12635_v50 = vsel %vm12634_vm1, %v24279_v34, -inf  ;;  %v12642_v20 = vsel %vm12634_vm1, %v12313_v26, -inf }
 0x7e1   :  { %v24431_v27 = vrot.slane %v12536_v55, %v25842_v59  ;;  %v24444_v22 = vrot.slane %v12553_v15, %v25842_v59  ;;  %v12636_v35 = vrot.slane %v12635_v50, 4  ;;  %v12649_v29 = vsel %vm12634_vm1, %v24288_v48, -inf }
 0x7e2   :  { %v12643_v11 = vrot.slane %v12642_v20, 4  ;;  %v12650_v38 = vrot.slane %v12649_v29, 4  ;;  %v12656_v55 = vsel %vm12634_vm1, %v12314_v47, -inf  ;;  %v12663_v12 = vsel %vm12634_vm1, %v24282_v7, -inf }
 0x7e3   :  { %v12637_v15 = vmax.f32 %v12635_v50, %v12636_v35  ;;  %v12670_v34 = vsel %vm12634_vm1, %v12330_v1, -inf  ;;  %v12677_v26 = vsel %vm12634_vm1, %v24293_v24, -inf  ;;  %v12657_v60 = vrot.slane %v12656_v55, 4 }
 0x7e4   :  { %v12644_v50 = vmax.f32 %v12642_v20, %v12643_v11  ;;  %v12651_v35 = vmax.f32 %v12649_v29, %v12650_v38  ;;  %v12664_v17 = vrot.slane %v12663_v12, 4  ;;  %v12671_v57 = vrot.slane %v12670_v34, 4 }
 0x7e5   :  { %v12638_v49 = vrot.slane %v12637_v15, 2  ;;  %v12678_v48 = vrot.slane %v12677_v26, 4  ;;  %v12684_v47 = vsel %vm12634_vm1, %v12331_v46, -inf  ;;  %v12658_v59 = vmax.f32 %v12656_v55, %v12657_v60 }
 0x7e6   :  { %v12645_v5 = vrot.slane %v12644_v50, 2  ;;  %v12652_v7 = vrot.slane %v12651_v35, 2  ;;  %v12665_v1 = vmax.f32 %v12663_v12, %v12664_v17  ;;  %v12672_v51 = vmax.f32 %v12670_v34, %v12671_v57 }
 0x7e7   :  { %v12639_v8 = vmax.f32 %v12637_v15, %v12638_v49  ;;  %v12679_v43 = vmax.f32 %v12677_v26, %v12678_v48  ;;  %v12685_v23 = vrot.slane %v12684_v47, 4  ;;  %v12659_v20 = vrot.slane %v12658_v59, 2 }
 0x7e8   :  { %v12646_v11 = vmax.f32 %v12644_v50, %v12645_v5  ;;  %v12653_v38 = vmax.f32 %v12651_v35, %v12652_v7  ;;  %v12666_v29 = vrot.slane %v12665_v1, 2  ;;  %v12673_v40 = vrot.slane %v12672_v51, 2 }
 0x7e9   :  { %v12640_v10 = vrot.slane %v12639_v8, 1  ;;  %v12680_v30 = vrot.slane %v12679_v43, 2  ;;  %v12686_v13 = vmax.f32 %v12684_v47, %v12685_v23  ;;  %v12660_v49 = vmax.f32 %v12658_v59, %v12659_v20 }
 0x7ea   :  { %v12647_v24 = vrot.slane %v12646_v11, 1  ;;  %v12654_v46 = vrot.slane %v12653_v38, 1  ;;  %v12667_v15 = vmax.f32 %v12665_v1, %v12666_v29  ;;  %v12674_v21 = vmax.f32 %v12672_v51, %v12673_v40 }
 0x7eb   :  { %v24474_v61 = vmax.f32 %v12639_v8, %v12640_v10  ;;  %v12681_v60 = vmax.f32 %v12679_v43, %v12680_v30  ;;  %v12687_v17 = vrot.slane %v12686_v13, 2  ;;  %v12661_v5 = vrot.slane %v12660_v49, 1 }
 0x7ec   :  { %v24476_v57 = vmax.f32 %v12646_v11, %v12647_v24  ;;  %v24478_v55 = vmax.f32 %v12653_v38, %v12654_v46  ;;  %v12691_v12 = vsel %vm12634_vm1, %v24285_v28, -inf  ;;  %v12668_v34 = vrot.slane %v12667_v15, 1 }
 0x7ed   :  { %v12675_v26 = vrot.slane %v12674_v21, 1  ;;  %v12682_v23 = vrot.slane %v12681_v60, 1  ;;  %v12688_v10 = vmax.f32 %v12686_v13, %v12687_v17  ;;  %v24482_v8 = vmax.f32 %v12660_v49, %v12661_v5 }
 0x7ee   :  { %v12692_v50 = vrot.slane %v12691_v12, 4  ;;  %v25843_v40 = vcombine.high %v24285_v28, %v24285_v28  ;;  %v12705_v43 = vsel %vm12634_vm1, %v24301_v9, -inf  ;;  %v24490_v51 = vmax.f32 %v12667_v15, %v12668_v34 }
 0x7ef   :  { %v24492_v59 = vmax.f32 %v12674_v21, %v12675_v26  ;;  %v24494_v35 = vmax.f32 %v12681_v60, %v12682_v23  ;;  %v12689_v48 = vrot.slane %v12688_v10, 1  ;;  %v12706_v7 = vrot.slane %v12705_v43, 4 }
 0x7f0   :  { %v12698_v30 = vsel %vm12634_vm1, %v25843_v40, -inf  ;;  %v12693_v47 = vmax.f32 %v12691_v12, %v12692_v50  ;;  %v25844_v1 = vcombine.high %v24301_v9, %v24301_v9  ;;  %v12719_v20 = vsel %vm12634_vm1, %v24296_v16, -inf }
 0x7f1   :  { %v12699_v13 = vrot.slane %v12698_v30, 4  ;;  %v24500_v11 = vmax.f32 %v12688_v10, %v12689_v48  ;;  %v25845_v21 = vcombine.high %v24296_v16, %v24296_v16  ;;  %v12707_v49 = vmax.f32 %v12705_v43, %v12706_v7 }
 0x7f2   :  { %v12712_v28 = vsel %vm12634_vm1, %v25844_v1, -inf  ;;  %v12694_v24 = vrot.slane %v12693_v47, 2  ;;  %v12720_v15 = vrot.slane %v12719_v20, 4  ;;  %v12733_v9 = vsel %vm12634_vm1, %v24306_v37, -inf }
 0x7f3   :  { %v12713_v38 = vrot.slane %v12712_v28, 4  ;;  %v12726_v29 = vsel %vm12634_vm1, %v25845_v21, -inf  ;;  %v12700_v46 = vmax.f32 %v12698_v30, %v12699_v13  ;;  %v25846_v5 = vcombine.high %v24306_v37, %v24306_v37 }
 0x7f4   :  { %v12727_v17 = vrot.slane %v12726_v29, 4  ;;  %v12695_v34 = vmax.f32 %v12693_v47, %v12694_v24  ;;  %v12708_v23 = vrot.slane %v12707_v49, 2  ;;  %v12721_v16 = vmax.f32 %v12719_v20, %v12720_v15 }
 0x7f5   :  { %v12714_v60 = vmax.f32 %v12712_v28, %v12713_v38  ;;  %v12740_v12 = vsel %vm12634_vm1, %v25846_v5, -inf  ;;  %v12701_v26 = vrot.slane %v12700_v46, 2  ;;  %v12734_v40 = vrot.slane %v12733_v9, 4 }
 0x7f6   :  { %v12728_v50 = vmax.f32 %v12726_v29, %v12727_v17  ;;  %v12741_v30 = vrot.slane %v12740_v12, 4  ;;  %v12696_v43 = vrot.slane %v12695_v34, 1  ;;  %v12709_v13 = vmax.f32 %v12707_v49, %v12708_v23 }
 0x7f7   :  { %v12715_v10 = vrot.slane %v12714_v60, 2  ;;  %v12702_v48 = vmax.f32 %v12700_v46, %v12701_v26  ;;  %v12722_v7 = vrot.slane %v12721_v16, 2  ;;  %v12735_v38 = vmax.f32 %v12733_v9, %v12734_v40 }
 0x7f8   :  { %v12729_v28 = vrot.slane %v12728_v50, 2  ;;  %v12742_v21 = vmax.f32 %v12740_v12, %v12741_v30  ;;  %v24514_v53 = vmax.f32 %v12695_v34, %v12696_v43  ;;  %v12710_v5 = vrot.slane %v12709_v13, 1 }
 0x7f9   :  { %v12716_v1 = vmax.f32 %v12714_v60, %v12715_v10  ;;  %v12703_v37 = vrot.slane %v12702_v48, 1  ;;  %v12723_v47 = vmax.f32 %v12721_v16, %v12722_v7  ;;  %v12736_v20 = vrot.slane %v12735_v38, 2 }
 0x7fa   :  { %v12730_v19 = vmax.f32 %v12728_v50, %v12729_v28  ;;  %v12743_v15 = vrot.slane %v12742_v21, 2  ;;  %v24518_v17 = vmax.f32 %v12709_v13, %v12710_v5  ;;  %v12747_v49 = vsel %vm12634_vm1, %v24319_v14, -inf }
 0x7fb   :  { %v12717_v24 = vrot.slane %v12716_v1, 1  ;;  %v24516_v29 = vmax.f32 %v12702_v48, %v12703_v37  ;;  %v12724_v46 = vrot.slane %v12723_v47, 1  ;;  %v12737_v12 = vmax.f32 %v12735_v38, %v12736_v20 }
 0x7fc   :  { %v12731_v9 = vrot.slane %v12730_v19, 1  ;;  %v12744_v34 = vmax.f32 %v12742_v21, %v12743_v15  ;;  %v12748_v23 = vrot.slane %v12747_v49, 4  ;;  %v25847_v16 = vcombine.high %v24319_v14, %v24319_v14 }
 0x7fd   :  { %v24522_v60 = vmax.f32 %v12716_v1, %v12717_v24  ;;  %v24524_v26 = vmax.f32 %v12723_v47, %v12724_v46  ;;  %v12761_v50 = vsel %vm12634_vm1, %v24322_v39, -inf  ;;  %v12738_v30 = vrot.slane %v12737_v12, 1 }
 0x7fe   :  { %v12754_v10 = vsel %vm12634_vm1, %v25847_v16, -inf  ;;  %v24532_v40 = vmax.f32 %v12730_v19, %v12731_v9  ;;  %v12745_v43 = vrot.slane %v12744_v34, 1  ;;  %v12749_v13 = vmax.f32 %v12747_v49, %v12748_v23 }
 0x7ff   :  { %v12755_v48 = vrot.slane %v12754_v10, 4  ;;  %v12762_v7 = vrot.slane %v12761_v50, 4  ;;  %v25848_v1 = vcombine.high %v24322_v39, %v24322_v39  ;;  %v12775_v14 = vsel %vm12634_vm1, %v24325_v32, -inf }
 0x800   :  { %v24540_v38 = vmax.f32 %v12737_v12, %v12738_v30  ;;  %v24542_v21 = vmax.f32 %v12744_v34, %v12745_v43  ;;  %v12750_v5 = vrot.slane %v12749_v13, 2  ;;  %v12776_v24 = vrot.slane %v12775_v14, 4 }
 0x801   :  { %v12768_v28 = vsel %vm12634_vm1, %v25848_v1, -inf  ;;  %v12756_v37 = vmax.f32 %v12754_v10, %v12755_v48  ;;  %v12763_v47 = vmax.f32 %v12761_v50, %v12762_v7  ;;  %v25851_v20 = vcombine.high %v24325_v32, %v24325_v32 }
 0x802   :  { %25849 = vst [vmem:[#allocation53_spill] sm:$0xff] %v24540_v38  ;;  %25850 = vst [vmem:[#allocation54_spill] sm:$0xff] %v24542_v21  ;;  %v12769_v19 = vrot.slane %v12768_v28, 4  ;;  %v12789_v9 = vsel %vm12634_vm1, %v24333_v18, -inf  ;;  %v12751_v12 = vmax.f32 %v12749_v13, %v12750_v5  ;;  %v12777_v34 = vmax.f32 %v12775_v14, %v12776_v24 }
 0x803   :  { %v12782_v15 = vsel %vm12634_vm1, %v25851_v20, -inf  ;;  %v12757_v39 = vrot.slane %v12756_v37, 2  ;;  %v12764_v23 = vrot.slane %v12763_v47, 2  ;;  %v12790_v16 = vrot.slane %v12789_v9, 4 }
 0x804   :  { %v12770_v46 = vmax.f32 %v12768_v28, %v12769_v19  ;;  %v12783_v49 = vrot.slane %v12782_v15, 4  ;;  %v25852_v50 = vcombine.high %v24333_v18, %v24333_v18  ;;  %v12752_v48 = vrot.slane %v12751_v12, 1 }
 0x805   :  { %v12758_v10 = vmax.f32 %v12756_v37, %v12757_v39  ;;  %v12765_v7 = vmax.f32 %v12763_v47, %v12764_v23  ;;  %v12778_v1 = vrot.slane %v12777_v34, 2  ;;  %v12791_v28 = vmax.f32 %v12789_v9, %v12790_v16 }
 0x806   :  { %v12771_v30 = vrot.slane %v12770_v46, 2  ;;  %v12784_v43 = vmax.f32 %v12782_v15, %v12783_v49  ;;  %v12796_v32 = vsel %vm12634_vm1, %v25852_v50, -inf  ;;  %v24554_v13 = vmax.f32 %v12751_v12, %v12752_v48 }
 0x807   :  { %v12759_v19 = vrot.slane %v12758_v10, 1  ;;  %v12797_v21 = vrot.slane %v12796_v32, 4  ;;  %v12766_v14 = vrot.slane %v12765_v7, 1  ;;  %v12779_v5 = vmax.f32 %v12777_v34, %v12778_v1 }
 0x808   :  { %v12772_v20 = vmax.f32 %v12770_v46, %v12771_v30  ;;  %v12785_v2 = vrot.slane %v12784_v43, 2  ;;  %v12792_v37 = vrot.slane %v12791_v28, 2  ;;  %v12803_v9 = vsel %vm12634_vm1, %v24328_v52, -inf }
 0x809   :  { %v24556_v24 = vmax.f32 %v12758_v10, %v12759_v19  ;;  %v12798_v18 = vmax.f32 %v12796_v32, %v12797_v21  ;;  %v24558_v49 = vmax.f32 %v12765_v7, %v12766_v14  ;;  %v12780_v50 = vrot.slane %v12779_v5, 1 }
 0x80a   :  { %v12773_v15 = vrot.slane %v12772_v20, 1  ;;  %v12786_v39 = vmax.f32 %v12784_v43, %v12785_v2  ;;  %v12793_v47 = vmax.f32 %v12791_v28, %v12792_v37  ;;  %v12804_v16 = vrot.slane %v12803_v9, 4 }
 0x80b   :  { %v12799_v12 = vrot.slane %v12798_v18, 2  ;;  %v24564_v30 = vmax.f32 %v12779_v5, %v12780_v50  ;;  %v25854_v10 = vcombine.high %v24328_v52, %v24328_v52  ;;  %v12817_v21 = vsel %vm12634_vm1, %v24343_v58, -inf }
 0x80c   :  { %v24562_v46 = vmax.f32 %v12772_v20, %v12773_v15  ;;  %v12787_v23 = vrot.slane %v12786_v39, 1  ;;  %v12794_v34 = vrot.slane %v12793_v47, 1  ;;  %v12805_v48 = vmax.f32 %v12803_v9, %v12804_v16 }
 0x80d   :  { %25853 = vst [vmem:[#allocation55_spill] sm:$0xff] %v24564_v30  ;;  %v12810_v2 = vsel %vm12634_vm1, %v25854_v10, -inf  ;;  %v12800_v32 = vmax.f32 %v12798_v18, %v12799_v12  ;;  %v12818_v28 = vrot.slane %v12817_v21, 4  ;;  %v25857_v19 = vcombine.high %v24343_v58, %v24343_v58 }
 0x80e   :  { %v24572_v43 = vmax.f32 %v12786_v39, %v12787_v23  ;;  %v12811_v7 = vrot.slane %v12810_v2, 4  ;;  %v24574_v1 = vmax.f32 %v12793_v47, %v12794_v34  ;;  %v12831_v52 = vsel %vm12634_vm1, %v24336_v44, -inf }
 0x80f   :  { %v12824_v20 = vsel %vm12634_vm1, %v25857_v19, -inf  ;;  %v12801_v14 = vrot.slane %v12800_v32, 1  ;;  %v12806_v5 = vrot.slane %v12805_v48, 2  ;;  %v12819_v39 = vmax.f32 %v12817_v21, %v12818_v28 }
 0x810   :  { %25855 = vst [vmem:[#allocation56_spill] sm:$0xff] %v24572_v43  ;;  %25856 = vst [vmem:[#allocation57_spill] sm:$0xff] %v24574_v1  ;;  %v12812_v37 = vmax.f32 %v12810_v2, %v12811_v7  ;;  %v12825_v15 = vrot.slane %v12824_v20, 4  ;;  %v12832_v50 = vrot.slane %v12831_v52, 4  ;;  %v25858_v18 = vcombine.high %v24336_v44, %v24336_v44 }
 0x811   :  { %v12845_v9 = vsel %vm12634_vm1, %v24350_v33, -inf  ;;  %v24588_v58 = vmax.f32 %v12800_v32, %v12801_v14  ;;  %v12807_v23 = vmax.f32 %v12805_v48, %v12806_v5  ;;  %v12820_v34 = vrot.slane %v12819_v39, 2 }
 0x812   :  { %v12838_v47 = vsel %vm12634_vm1, %v25858_v18, -inf  ;;  %v12813_v12 = vrot.slane %v12812_v37, 2  ;;  %v12826_v16 = vmax.f32 %v12824_v20, %v12825_v15  ;;  %v12833_v10 = vmax.f32 %v12831_v52, %v12832_v50 }
 0x813   :  { %25859 = vst [vmem:[#allocation58_spill] sm:$0xff] %v24588_v58  ;;  %v12839_v19 = vrot.slane %v12838_v47, 4  ;;  %v12846_v2 = vrot.slane %v12845_v9, 4  ;;  %v12808_v7 = vrot.slane %v12807_v23, 1  ;;  %v25860_v44 = vcombine.high %v24350_v33, %v24350_v33 }
 0x814   :  { %v12814_v21 = vmax.f32 %v12812_v37, %v12813_v12  ;;  %v12827_v28 = vrot.slane %v12826_v16, 2  ;;  %v12821_v1 = vmax.f32 %v12819_v39, %v12820_v34  ;;  %v12834_v43 = vrot.slane %v12833_v10, 2 }
 0x815   :  { %v12852_v18 = vsel %vm12634_vm1, %v25860_v44, -inf  ;;  %v12840_v30 = vmax.f32 %v12838_v47, %v12839_v19  ;;  %v12847_v32 = vmax.f32 %v12845_v9, %v12846_v2  ;;  %v24594_v14 = vmax.f32 %v12807_v23, %v12808_v7 }
 0x816   :  { %v12815_v48 = vrot.slane %v12814_v21, 1  ;;  %v12828_v20 = vmax.f32 %v12826_v16, %v12827_v28  ;;  %v12853_v5 = vrot.slane %v12852_v18, 4  ;;  %v12822_v52 = vrot.slane %v12821_v1, 1 }
 0x817   :  { %v12835_v15 = vmax.f32 %v12833_v10, %v12834_v43  ;;  %v12841_v50 = vrot.slane %v12840_v30, 2  ;;  %v12848_v58 = vrot.slane %v12847_v32, 2  ;;  %v12859_v33 = vsel %vm12634_vm1, %v24357_v62, -inf }
 0x818   :  { %v24596_v37 = vmax.f32 %v12814_v21, %v12815_v48  ;;  %v12829_v12 = vrot.slane %v12828_v20, 1  ;;  %v12854_v38 = vmax.f32 %v12852_v18, %v12853_v5  ;;  %v24600_v39 = vmax.f32 %v12821_v1, %v12822_v52 }
 0x819   :  { %v12836_v47 = vrot.slane %v12835_v15, 1  ;;  %v12842_v9 = vmax.f32 %v12840_v30, %v12841_v50  ;;  %v12849_v23 = vmax.f32 %v12847_v32, %v12848_v58  ;;  %v12860_v19 = vrot.slane %v12859_v33, 4 }
 0x81a   :  { %v24602_v34 = vmax.f32 %v12828_v20, %v12829_v12  ;;  %v12855_v16 = vrot.slane %v12854_v38, 2  ;;  %v25861_v43 = vcombine.high %v24357_v62, %v24357_v62  ;;  %v12873_v30 = vsel %vm12634_vm1, %v24365_v45, -inf }
 0x81b   :  { %v24608_v2 = vmax.f32 %v12835_v15, %v12836_v47  ;;  %v12843_v7 = vrot.slane %v12842_v9, 1  ;;  %v12850_v21 = vrot.slane %v12849_v23, 1  ;;  %v12861_v1 = vmax.f32 %v12859_v33, %v12860_v19 }
 0x81c   :  { %v12866_v10 = vsel %vm12634_vm1, %v25861_v43, -inf  ;;  %v12856_v44 = vmax.f32 %v12854_v38, %v12855_v16  ;;  %v25862_v58 = vcombine.high %v24365_v45, %v24365_v45  ;;  %v12874_v20 = vrot.slane %v12873_v30, 4 }
 0x81d   :  { %v12867_v28 = vrot.slane %v12866_v10, 4  ;;  %v24616_v32 = vmax.f32 %v12842_v9, %v12843_v7  ;;  %v24618_v62 = vmax.f32 %v12849_v23, %v12850_v21  ;;  %v12862_v52 = vrot.slane %v12861_v1, 2 }
 0x81e   :  { %v12880_v18 = vsel %vm12634_vm1, %v25862_v58, -inf  ;;  %v12857_v5 = vrot.slane %v12856_v44, 1  ;;  %v12887_v38 = vsel %vm12634_vm1, %v24360_v31, -inf  ;;  %v12875_v12 = vmax.f32 %v12873_v30, %v12874_v20 }
 0x81f   :  { %25863 = vst [vmem:[#allocation59_spill] sm:$0xff] %v24616_v32  ;;  %25864 = vst [vmem:[#allocation60_spill] sm:$0xff] %v24618_v62  ;;  %v12868_v48 = vmax.f32 %v12866_v10, %v12867_v28  ;;  %v12881_v15 = vrot.slane %v12880_v18, 4  ;;  %v12888_v33 = vrot.slane %v12887_v38, 4  ;;  %v25865_v45 = vcombine.high %v24360_v31, %v24360_v31 }
 0x820   :  { %v24626_v9 = vmax.f32 %v12856_v44, %v12857_v5  ;;  %v12863_v23 = vmax.f32 %v12861_v1, %v12862_v52  ;;  %v12876_v10 = vrot.slane %v12875_v12, 2  ;;  %v12901_v21 = vsel %vm12634_vm1, %v24373_v56, -inf }
 0x821   :  { %v12869_v50 = vrot.slane %v12868_v48, 2  ;;  %v12894_v47 = vsel %vm12634_vm1, %v25865_v45, -inf  ;;  %v12882_v16 = vmax.f32 %v12880_v18, %v12881_v15  ;;  %v12889_v7 = vmax.f32 %v12887_v38, %v12888_v33 }
 0x822   :  { %25866 = vst [vmem:[#allocation61_spill] sm:$0xff] %v24626_v9  ;;  %v12895_v19 = vrot.slane %v12894_v47, 4  ;;  %v12864_v28 = vrot.slane %v12863_v23, 1  ;;  %v12902_v20 = vrot.slane %v12901_v21, 4  ;;  %v12877_v32 = vmax.f32 %v12875_v12, %v12876_v10 }
 0x823   :  { %v12870_v43 = vmax.f32 %v12868_v48, %v12869_v50  ;;  %v12883_v58 = vrot.slane %v12882_v16, 2  ;;  %v12890_v31 = vrot.slane %v12889_v7, 2  ;;  %v25867_v44 = vcombine.high %v24373_v56, %v24373_v56 }
 0x824   :  { %v12896_v30 = vmax.f32 %v12894_v47, %v12895_v19  ;;  %v24634_v18 = vmax.f32 %v12863_v23, %v12864_v28  ;;  %v12903_v52 = vmax.f32 %v12901_v21, %v12902_v20  ;;  %v12878_v38 = vrot.slane %v12877_v32, 1 }
 0x825   :  { %v12871_v62 = vrot.slane %v12870_v43, 1  ;;  %v12908_v1 = vsel %vm12634_vm1, %v25867_v44, -inf  ;;  %v12884_v48 = vmax.f32 %v12882_v16, %v12883_v58  ;;  %v12891_v50 = vmax.f32 %v12889_v7, %v12890_v31 }
 0x826   :  { %v12897_v5 = vrot.slane %v12896_v30, 2  ;;  %v12909_v33 = vrot.slane %v12908_v1, 4  ;;  %v12904_v19 = vrot.slane %v12903_v52, 2  ;;  %v12915_v12 = vsel %vm12634_vm1, %v24368_v63, -inf }
 0x827   :  { %v24636_v15 = vmax.f32 %v12870_v43, %v12871_v62  ;;  %v12885_v45 = vrot.slane %v12884_v48, 1  ;;  %v24640_v10 = vmax.f32 %v12877_v32, %v12878_v38  ;;  %v12892_v56 = vrot.slane %v12891_v50, 1 }
 0x828   :  { %v12898_v47 = vmax.f32 %v12896_v30, %v12897_v5  ;;  %v12910_v44 = vmax.f32 %v12908_v1, %v12909_v33  ;;  %v12916_v23 = vrot.slane %v12915_v12, 4  ;;  %v12905_v21 = vmax.f32 %v12903_v52, %v12904_v19 }
 0x829   :  { %v24642_v28 = vmax.f32 %v12884_v48, %v12885_v45  ;;  %v25868_v62 = vcombine.high %v24368_v63, %v24368_v63  ;;  %v24648_v7 = vmax.f32 %v12891_v50, %v12892_v56  ;;  %v12929_v1 = vsel %vm12634_vm1, %v24380_v42, -inf }
 0x82a   :  { %v12899_v16 = vrot.slane %v12898_v47, 1  ;;  %v12911_v58 = vrot.slane %v12910_v44, 2  ;;  %v12917_v30 = vmax.f32 %v12915_v12, %v12916_v23  ;;  %v12906_v32 = vrot.slane %v12905_v21, 1 }
 0x82b   :  { %v12922_v43 = vsel %vm12634_vm1, %v25868_v62, -inf  ;;  %25869 = vst [vmem:[#allocation62_spill] sm:$0xff] %v24648_v7  ;;  %v25871_v48 = vcombine.high %v24380_v42, %v24380_v42  ;;  %v12930_v33 = vrot.slane %v12929_v1, 4  ;;  %v25873_v19 = vcombine.high %v24385_v0, %v24385_v0 }
 0x82c   :  { %v12923_v20 = vrot.slane %v12922_v43, 4  ;;  %v24650_v31 = vmax.f32 %v12898_v47, %v12899_v16  ;;  %v12912_v52 = vmax.f32 %v12910_v44, %v12911_v58  ;;  %v12918_v63 = vrot.slane %v12917_v30, 2 }
 0x82d   :  { %v12936_v5 = vsel %vm12634_vm1, %v25871_v48, -inf  ;;  %v24658_v50 = vmax.f32 %v12905_v21, %v12906_v32  ;;  %v12943_v47 = vsel %vm12634_vm1, %v24385_v0, -inf  ;;  %v12950_v12 = vsel %vm12634_vm1, %v25873_v19, -inf }
 0x82e   :  { %25870 = vst [vmem:[#allocation63_spill] sm:$0xff] %v24650_v31  ;;  %v12924_v38 = vmax.f32 %v12922_v43, %v12923_v20  ;;  %v12937_v45 = vrot.slane %v12936_v5, 4  ;;  %v12913_v56 = vrot.slane %v12912_v52, 1  ;;  %v12919_v23 = vmax.f32 %v12917_v30, %v12918_v63 }
 0x82f   :  { %25872 = vst [vmem:[#allocation64_spill] sm:$0xff] %v24658_v50  ;;  %v12931_v16 = vmax.f32 %v12929_v1, %v12930_v33  ;;  %v12944_v44 = vrot.slane %v12943_v47, 4  ;;  %v12951_v58 = vrot.slane %v12950_v12, 4  ;;  %v12957_v21 = vsel %vm12634_vm1, %v24390_v6, -inf }
 0x830   :  { %v12925_v42 = vrot.slane %v12924_v38, 2  ;;  %v12938_v62 = vmax.f32 %v12936_v5, %v12937_v45  ;;  %v24668_v43 = vmax.f32 %v12912_v52, %v12913_v56  ;;  %v12920_v20 = vrot.slane %v12919_v23, 1 }
 0x831   :  { %v12932_v48 = vrot.slane %v12931_v16, 2  ;;  %v12945_v31 = vmax.f32 %v12943_v47, %v12944_v44  ;;  %v12952_v0 = vmax.f32 %v12950_v12, %v12951_v58  ;;  %v12958_v9 = vrot.slane %v12957_v21, 4 }
 0x832   :  { %25874 = vst [vmem:[#allocation65_spill] sm:$0xff] %v24668_v43  ;;  %v12926_v32 = vmax.f32 %v12924_v38, %v12925_v42  ;;  %v12939_v50 = vrot.slane %v12938_v62, 2  ;;  %v24670_v19 = vmax.f32 %v12919_v23, %v12920_v20  ;;  %v25875_v1 = vcombine.high %v24390_v6, %v24390_v6 }
 0x833   :  { %v12933_v63 = vmax.f32 %v12931_v16, %v12932_v48  ;;  %v12946_v45 = vrot.slane %v12945_v31, 2  ;;  %v12953_v52 = vrot.slane %v12952_v0, 2  ;;  %v12959_v56 = vmax.f32 %v12957_v21, %v12958_v9 }
 0x834   :  { %v12927_v30 = vrot.slane %v12926_v32, 1  ;;  %v12964_v5 = vsel %vm12634_vm1, %v25875_v1, -inf  ;;  %v12940_v33 = vmax.f32 %v12938_v62, %v12939_v50  ;;  %v12971_v47 = vsel %vm12634_vm1, %v24396_v3, -inf }
 0x835   :  { %v12934_v38 = vrot.slane %v12933_v63, 1  ;;  %v12965_v42 = vrot.slane %v12964_v5, 4  ;;  %v12947_v23 = vmax.f32 %v12945_v31, %v12946_v45  ;;  %v12954_v44 = vmax.f32 %v12952_v0, %v12953_v52 }
 0x836   :  { %v24676_v43 = vmax.f32 %v12926_v32, %v12927_v30  ;;  %v12941_v12 = vrot.slane %v12940_v33, 1  ;;  %v12960_v16 = vrot.slane %v12959_v56, 2  ;;  %v12972_v20 = vrot.slane %v12971_v47, 4 }
 0x837   :  { %v24680_v58 = vmax.f32 %v12933_v63, %v12934_v38  ;;  %v12966_v6 = vmax.f32 %v12964_v5, %v12965_v42  ;;  %v25876_v50 = vcombine.high %v24396_v3, %v24396_v3  ;;  %v12948_v21 = vrot.slane %v12947_v23, 1 }
 0x838   :  { %v24686_v62 = vmax.f32 %v12940_v33, %v12941_v12  ;;  %v12955_v32 = vrot.slane %v12954_v44, 1  ;;  %v12961_v48 = vmax.f32 %v12959_v56, %v12960_v16  ;;  %v12973_v1 = vmax.f32 %v12971_v47, %v12972_v20 }
 0x839   :  { %v12978_v9 = vsel %vm12634_vm1, %v25876_v50, -inf  ;;  %v12967_v30 = vrot.slane %v12966_v6, 2  ;;  %v12985_v31 = vsel %vm12634_vm1, %v24411_v25, -inf  ;;  %v24690_v0 = vmax.f32 %v12947_v23, %v12948_v21 }
 0x83a   :  { %v12979_v7 = vrot.slane %v12978_v9, 4  ;;  %v24692_v63 = vmax.f32 %v12954_v44, %v12955_v32  ;;  %v12962_v5 = vrot.slane %v12961_v48, 1  ;;  %v12986_v45 = vrot.slane %v12985_v31, 4 }
 0x83b   :  { %25877 = vst [vmem:[#allocation66_spill] sm:$0xff] %v24690_v0  ;;  %v12968_v3 = vmax.f32 %v12966_v6, %v12967_v30  ;;  %v12974_v52 = vrot.slane %v12973_v1, 2  ;;  %v25879_v33 = vcombine.high %v24411_v25, %v24411_v25  ;;  %v12999_v23 = vsel %vm12634_vm1, %v24406_v41, -inf }
 0x83c   :  { %25878 = vst [vmem:[#allocation67_spill] sm:$0xff] %v24692_v63  ;;  %v12980_v38 = vmax.f32 %v12978_v9, %v12979_v7  ;;  %v24698_v42 = vmax.f32 %v12961_v48, %v12962_v5  ;;  %v12987_v47 = vmax.f32 %v12985_v31, %v12986_v45  ;;  %v13000_v50 = vrot.slane %v12999_v23, 4 }
 0x83d   :  { %v12992_v56 = vsel %vm12634_vm1, %v25879_v33, -inf  ;;  %v12969_v16 = vrot.slane %v12968_v3, 1  ;;  %v12975_v44 = vmax.f32 %v12973_v1, %v12974_v52  ;;  %v25881_v7 = vcombine.high %v24406_v41, %v24406_v41 }
 0x83e   :  { %25880 = vst [vmem:[#allocation68_spill] sm:$0xff] %v24698_v42  ;;  %v12993_v12 = vrot.slane %v12992_v56, 4  ;;  %v12981_v20 = vrot.slane %v12980_v38, 2  ;;  %v12988_v21 = vrot.slane %v12987_v47, 2  ;;  %v13013_v9 = vsel %vm12634_vm1, %v24418_v4, -inf }
 0x83f   :  { %v13006_v25 = vsel %vm12634_vm1, %v25881_v7, -inf  ;;  %v24708_v32 = vmax.f32 %v12968_v3, %v12969_v16  ;;  %v12976_v48 = vrot.slane %v12975_v44, 1  ;;  %v13001_v31 = vmax.f32 %v12999_v23, %v13000_v50 }
 0x840   :  { %v12994_v6 = vmax.f32 %v12992_v56, %v12993_v12  ;;  %v12982_v30 = vmax.f32 %v12980_v38, %v12981_v20  ;;  %v12989_v5 = vmax.f32 %v12987_v47, %v12988_v21  ;;  %v13007_v1 = vrot.slane %v13006_v25, 4 }
 0x841   :  { %25882 = vst [vmem:[#allocation69_spill] sm:$0xff] %v24708_v32  ;;  %v13014_v52 = vrot.slane %v13013_v9, 4  ;;  %v24710_v33 = vmax.f32 %v12975_v44, %v12976_v48  ;;  %v13002_v12 = vrot.slane %v13001_v31, 2  ;;  %v25883_v41 = vcombine.high %v24418_v4, %v24418_v4 }
 0x842   :  { %v12995_v45 = vrot.slane %v12994_v6, 2  ;;  %v12983_v56 = vrot.slane %v12982_v30, 1  ;;  %v12990_v42 = vrot.slane %v12989_v5, 1  ;;  %v13008_v3 = vmax.f32 %v13006_v25, %v13007_v1 }
 0x843   :  { %v13020_v7 = vsel %vm12634_vm1, %v25883_v41, -inf  ;;  %v13015_v16 = vmax.f32 %v13013_v9, %v13014_v52  ;;  %v13003_v38 = vmax.f32 %v13001_v31, %v13002_v12  ;;  %v13027_v23 = vsel %vm12634_vm1, %v24424_v54, -inf }
 0x844   :  { %v12996_v63 = vmax.f32 %v12994_v6, %v12995_v45  ;;  %v24716_v32 = vmax.f32 %v12982_v30, %v12983_v56  ;;  %v13021_v47 = vrot.slane %v13020_v7, 4  ;;  %v24720_v44 = vmax.f32 %v12989_v5, %v12990_v42 }
 0x845   :  { %v13009_v50 = vrot.slane %v13008_v3, 2  ;;  %v13016_v21 = vrot.slane %v13015_v16, 2  ;;  %v13004_v48 = vrot.slane %v13003_v38, 1  ;;  %v13028_v0 = vrot.slane %v13027_v23, 4 }
 0x846   :  { %v12997_v20 = vrot.slane %v12996_v63, 1  ;;  %v13022_v4 = vmax.f32 %v13020_v7, %v13021_v47  ;;  %v25884_v6 = vcombine.high %v24424_v54, %v24424_v54  ;;  %v13041_v52 = vsel %vm12634_vm1, %v24431_v27, -inf }
 0x847   :  { %v13010_v30 = vmax.f32 %v13008_v3, %v13009_v50  ;;  %v13017_v31 = vmax.f32 %v13015_v16, %v13016_v21  ;;  %v24728_v1 = vmax.f32 %v13003_v38, %v13004_v48  ;;  %v13029_v5 = vmax.f32 %v13027_v23, %v13028_v0 }
 0x848   :  { %v13034_v25 = vsel %vm12634_vm1, %v25884_v6, -inf  ;;  %v24726_v9 = vmax.f32 %v12996_v63, %v12997_v20  ;;  %v13023_v42 = vrot.slane %v13022_v4, 2  ;;  %v13042_v7 = vrot.slane %v13041_v52, 4 }
 0x849   :  { %v13035_v45 = vrot.slane %v13034_v25, 4  ;;  %v13011_v56 = vrot.slane %v13010_v30, 1  ;;  %v13018_v12 = vrot.slane %v13017_v31, 1  ;;  %v13030_v54 = vrot.slane %v13029_v5, 2 }
 0x84a   :  { %v13024_v47 = vmax.f32 %v13022_v4, %v13023_v42  ;;  %v25885_v63 = vcombine.high %v24431_v27, %v24431_v27  ;;  %v13055_v16 = vsel %vm12634_vm1, %v24435_v36, -inf  ;;  %v13043_v20 = vmax.f32 %v13041_v52, %v13042_v7 }
 0x84b   :  { %v13036_v41 = vmax.f32 %v13034_v25, %v13035_v45  ;;  %v24738_v38 = vmax.f32 %v13010_v30, %v13011_v56  ;;  %v24740_v0 = vmax.f32 %v13017_v31, %v13018_v12  ;;  %v13031_v21 = vmax.f32 %v13029_v5, %v13030_v54 }
 0x84c   :  { %v13048_v3 = vsel %vm12634_vm1, %v25885_v63, -inf  ;;  %v13025_v50 = vrot.slane %v13024_v47, 1  ;;  %v13056_v6 = vrot.slane %v13055_v16, 4  ;;  %v13044_v25 = vrot.slane %v13043_v20, 2 }
 0x84d   :  { %25886 = vst [vmem:[#allocation70_spill] sm:$0xff] %v24740_v0  ;;  %v13037_v23 = vrot.slane %v13036_v41, 2  ;;  %v13049_v48 = vrot.slane %v13048_v3, 4  ;;  %v25887_v27 = vcombine.high %v24435_v36, %v24435_v36  ;;  %v13069_v42 = vsel %vm12634_vm1, %v24444_v22, -inf }
 0x84e   :  { %v24748_v30 = vmax.f32 %v13024_v47, %v13025_v50  ;;  %v13032_v31 = vrot.slane %v13031_v21, 1  ;;  %v13057_v12 = vmax.f32 %v13055_v16, %v13056_v6  ;;  %v13045_v7 = vmax.f32 %v13043_v20, %v13044_v25 }
 0x84f   :  { %v13038_v4 = vmax.f32 %v13036_v41, %v13037_v23  ;;  %v13062_v45 = vsel %vm12634_vm1, %v25887_v27, -inf  ;;  %v13050_v56 = vmax.f32 %v13048_v3, %v13049_v48  ;;  %v13070_v54 = vrot.slane %v13069_v42, 4 }
 0x850   :  { %25888 = vst [vmem:[#allocation71_spill] sm:$0xff] %v24748_v30  ;;  %v13063_v5 = vrot.slane %v13062_v45, 4  ;;  %v24750_v63 = vmax.f32 %v13031_v21, %v13032_v31  ;;  %v13058_v23 = vrot.slane %v13057_v12, 2  ;;  %v25889_v36 = vcombine.high %v24444_v22, %v24444_v22 }
 0x851   :  { %v13039_v52 = vrot.slane %v13038_v4, 1  ;;  %v13051_v41 = vrot.slane %v13050_v56, 2  ;;  %v13046_v47 = vrot.slane %v13045_v7, 1  ;;  %v13071_v30 = vmax.f32 %v13069_v42, %v13070_v54 }
 0x852   :  { %v13076_v27 = vsel %vm12634_vm1, %v25889_v36, -inf  ;;  %v13064_v50 = vmax.f32 %v13062_v45, %v13063_v5  ;;  %v13059_v16 = vmax.f32 %v13057_v12, %v13058_v23  ;;  %v13148_v20 = vsel %vm13147_vm2, %v24476_v57, %v24474_v61 }
 0x853   :  { %v24756_v0 = vmax.f32 %v13038_v4, %v13039_v52  ;;  %v13052_v3 = vmax.f32 %v13050_v56, %v13051_v41  ;;  %v13077_v48 = vrot.slane %v13076_v27, 4  ;;  %v24761_v21 = vmax.f32 %v13045_v7, %v13046_v47 }
 0x854   :  { %v13065_v6 = vrot.slane %v13064_v50, 2  ;;  %v13072_v25 = vrot.slane %v13071_v30, 2  ;;  %v13150_v22 = vsel %vm13149_vm3, %v24478_v55, %v13148_v20  ;;  %v13060_v4 = vrot.slane %v13059_v16, 1  ;;  %v25894_v20 = vld [vmem:[#allocation57_spill] sm:$0xff] }
 0x855   :  { %v13053_v31 = vrot.slane %v13052_v3, 1  ;;  %v13078_v52 = vmax.f32 %v13076_v27, %v13077_v48  ;;  %v13152_v45 = vsel %vm13151_vm4, %v24482_v8, %v13150_v22  ;;  %v13161_v61 = vsel %vm13147_vm2, %v24516_v29, %v24514_v53  ;;  %v25893_v48 = vld [vmem:[#allocation56_spill] sm:$0xff] }
 0x856   :  { %v13066_v42 = vmax.f32 %v13064_v50, %v13065_v6  ;;  %v13073_v56 = vmax.f32 %v13071_v30, %v13072_v25  ;;  %v13154_v12 = vsel %vm13153_vm5, %v24490_v51, %v13152_v45  ;;  %v13061_v7 = vmax.f32 %v13059_v16, %v13060_v4  ;;  %v25891_v50 = vld [vmem:[#allocation55_spill] sm:$0xff]  ;;  %v25892_v16 = vld [vmem:[#allocation54_spill] sm:$0xff] }
 0x857   :  { %v13054_v57 = vmax.f32 %v13052_v3, %v13053_v31  ;;  %v13079_v5 = vrot.slane %v13078_v52, 2  ;;  %v13156_v55 = vsel %vm13155_vm6, %v24492_v59, %v13154_v12  ;;  %v13162_v30 = vsel %vm13149_vm3, %v24518_v17, %v13161_v61  ;;  %v25896_v31 = vld [vmem:[#allocation59_spill] sm:$0xff]  ;;  %v25898_v45 = vld [vmem:[#allocation62_spill] sm:$0xff] }
 0x858   :  { %v13067_v54 = vrot.slane %v13066_v42, 1  ;;  %v13074_v41 = vrot.slane %v13073_v56, 1  ;;  %v13158_v8 = vsel %vm13157_vm7, %v24494_v35, %v13156_v55  ;;  %v13163_v53 = vsel %vm13151_vm4, %v24522_v60, %v13162_v30  ;;  %v25900_v12 = vld [vmem:[#allocation63_spill] sm:$0xff]  ;;  %v25901_v61 = vld [vmem:[#allocation66_spill] sm:$0xff]  ;;  %v25904_v30 = vld [vmem:[#allocation65_spill] sm:$0xff] }
 0x859   :  { %v13080_v23 = vmax.f32 %v13078_v52, %v13079_v5  ;;  %v13160_v51 = vsel %vm13159_vm8, %v24500_v11, %v13158_v8  ;;  %v13168_v29 = vsel %vm13147_vm2, %v24556_v24, %v24554_v13  ;;  %v13164_v27 = vsel %vm13153_vm5, %v24524_v26, %v13163_v53  ;;  %v25890_v24 = vld [vmem:[#allocation53_spill] sm:$0xff]  ;;  %v25897_v52 = vld [vmem:[#allocation60_spill] sm:$0xff] }
 0x85a   :  { %v13068_v59 = vmax.f32 %v13066_v42, %v13067_v54  ;;  %v13075_v36 = vmax.f32 %v13073_v56, %v13074_v41  ;;  %v13169_v35 = vsel %vm13149_vm3, %v24558_v49, %v13168_v29  ;;  %13218 = vst [vmem:[#allocation17] sm:$0xff] %v13160_v51  ;;  %v13165_v11 = vsel %vm13155_vm6, %v24532_v40, %v13164_v27  ;;  %v25899_v56 = vld [vmem:[#allocation61_spill] sm:$0xff]  ;;  %v25902_v54 = vld [vmem:[#allocation64_spill] sm:$0xff]  ;;  %v25903_v41 = vld [vmem:[#allocation67_spill] sm:$0xff] }
 0x85b   :  { %v13081_v17 = vrot.slane %v13080_v23, 1  ;;  %v13170_v60 = vsel %vm13151_vm4, %v24562_v46, %v13169_v35  ;;  %v13175_v13 = vsel %vm13147_vm2, %v24596_v37, %v24594_v14  ;;  %v13166_v47 = vsel %vm13157_vm7, %v25890_v24, %v13165_v11  ;;  %v25905_v51 = vld [vmem:[#allocation68_spill] sm:$0xff]  ;;  %v25906_v27 = vld [vmem:[#allocation69_spill] sm:$0xff] }
 0x85c   :  { %v13171_v26 = vsel %vm13153_vm5, %v25891_v50, %v13170_v60  ;;  %v13176_v49 = vsel %vm13149_vm3, %v24600_v39, %v13175_v13  ;;  %v13182_v40 = vsel %vm13147_vm2, %v24636_v15, %v24634_v18  ;;  %v13167_v46 = vsel %vm13159_vm8, %v25892_v16, %v13166_v47  ;;  %v25895_v15 = vld [vmem:[#allocation58_spill] sm:$0xff]  ;;  %v25911_v47 = vld [vmem:[#allocation25_spill] sm:$0xff]  ;;  %v25912_v50 = vld [vmem:[#allocation71_spill] sm:$0xff] }
 0x85d   :  { %v13082_v3 = vmax.f32 %v13080_v23, %v13081_v17  ;;  %v13172_v14 = vsel %vm13155_vm6, %v25893_v48, %v13171_v26  ;;  %v13177_v37 = vsel %vm13151_vm4, %v24602_v34, %v13176_v49  ;;  %v13183_v25 = vsel %vm13149_vm3, %v24640_v10, %v13182_v40  ;;  %13219 = vst [vmem:[#allocation17 + $0x8] sm:$0xff] %v13167_v46  ;;  %v25908_v17 = vld [vmem:[#allocation48_spill] sm:$0xff]  ;;  %v25909_v60 = vld [vmem:[#allocation70_spill] sm:$0xff]  ;;  %v25913_v49 = vld [vmem:[#allocation23_spill] sm:$0xff] }
 0x85e   :  { %v13173_v6 = vsel %vm13157_vm7, %v25894_v20, %v13172_v14  ;;  %v13178_v39 = vsel %vm13153_vm5, %v24608_v2, %v13177_v37  ;;  %v13189_v18 = vsel %vm13147_vm2, %v24676_v43, %v24670_v19  ;;  %v13184_v4 = vsel %vm13151_vm4, %v24642_v28, %v13183_v25  ;;  %v25914_v16 = vld [vmem:[#allocation27_spill] sm:$0xff]  ;;  %v25915_v48 = vld [vmem:[#allocation24_spill] sm:$0xff]  ;;  %v25916_v37 = vld [vmem:[#allocation29_spill] sm:$0xff] }
 0x85f   :  { %v13174_v22 = vsel %vm13159_vm8, %v25895_v15, %v13173_v6  ;;  %v13179_v34 = vsel %vm13155_vm6, %v25896_v31, %v13178_v39  ;;  %v13190_v2 = vsel %vm13149_vm3, %v24680_v58, %v13189_v18  ;;  %v13185_v42 = vsel %vm13153_vm5, %v25898_v45, %v13184_v4  ;;  %v25917_v6 = vld [vmem:[#allocation26_spill] sm:$0xff]  ;;  %v25918_v25 = vld [vmem:[#allocation31_spill] sm:$0xff]  ;;  %v25919_v15 = vld [vmem:[#allocation28_spill] sm:$0xff] }
 0x860   :  { %v13180_v10 = vsel %vm13157_vm7, %v25897_v52, %v13179_v34  ;;  %v13191_v43 = vsel %vm13151_vm4, %v24686_v62, %v13190_v2  ;;  %v13196_v19 = vsel %vm13147_vm2, %v24716_v32, %v24710_v33  ;;  %13220 = vst [vmem:[#allocation17 + $0x10] sm:$0xff] %v13174_v22  ;;  %v13186_v58 = vsel %vm13155_vm6, %v25900_v12, %v13185_v42  ;;  %v25921_v34 = vld [vmem:[#allocation30_spill] sm:$0xff]  ;;  %v25922_v2 = vld [vmem:[#allocation35_spill] sm:$0xff]  ;;  %v25927_v12 = vld [vmem:[#allocation37_spill] sm:$0xff] }
 0x861   :  { %v13181_v28 = vsel %vm13159_vm8, %v25899_v56, %v13180_v10  ;;  %v13192_v5 = vsel %vm13153_vm5, %v25901_v61, %v13191_v43  ;;  %v13197_v55 = vsel %vm13149_vm3, %v24720_v44, %v13196_v19  ;;  %v13187_v62 = vsel %vm13157_vm7, %v25902_v54, %v13186_v58  ;;  %v25923_v10 = vld [vmem:[#allocation32_spill] sm:$0xff]  ;;  %v25925_v43 = vld [vmem:[#allocation49_spill] sm:$0xff]  ;;  %v25928_v61 = vld [vmem:[#allocation38_spill] sm:$0xff] }
 0x862   :  { %v13193_v8 = vsel %vm13155_vm6, %v25903_v41, %v13192_v5  ;;  %v13198_v32 = vsel %vm13151_vm4, %v24726_v9, %v13197_v55  ;;  %v13203_v33 = vsel %vm13147_vm2, %v24756_v0, %v24750_v63  ;;  %13221 = vst [vmem:[#allocation17 + $0x18] sm:$0xff] %v13181_v28  ;;  %v13188_v23 = vsel %vm13159_vm8, %v25904_v30, %v13187_v62  ;;  %v25907_v63 = vld [vmem:[#allocation50_spill] sm:$0xff]  ;;  %v25926_v56 = vld [vmem:[#allocation36_spill] sm:$0xff]  ;;  %v25929_v55 = vld [vmem:[#allocation39_spill] sm:$0xff] }
 0x863   :  { %v13194_v44 = vsel %vm13157_vm7, %v25905_v51, %v13193_v8  ;;  %v13199_v53 = vsel %vm13153_vm5, %v24728_v1, %v13198_v32  ;;  %v13204_v29 = vsel %vm13149_vm3, %v24761_v21, %v13203_v33  ;;  %13222 = vst [vmem:[#allocation17 + $0x20] sm:$0xff] %v13188_v23  ;;  %v24869_v11 = vadd.f32 %v25908_v17, %v25907_v63  ;;  %v25910_v21 = vld [vmem:[#allocation46_spill] sm:$0xff]  ;;  %v25930_v62 = vld [vmem:[#allocation40_spill] sm:$0xff]  ;;  %v25931_v8 = vld [vmem:[#allocation41_spill] sm:$0xff] }
 0x864   :  { %v13195_v9 = vsel %vm13159_vm8, %v25906_v27, %v13194_v44  ;;  %v13200_v35 = vsel %vm13155_vm6, %v24738_v38, %v13199_v53  ;;  %v13205_v0 = vsel %vm13151_vm4, %v13054_v57, %v13204_v29  ;;  %v24876_v24 = vadd.f32 %v25910_v21, %v25907_v63  ;;  %v25932_v33 = vld [vmem:[#allocation42_spill] sm:$0xff]  ;;  %v25933_v23 = vld [vmem:[#allocation43_spill] sm:$0xff]  ;;  %v25934_v44 = vld [vmem:[#allocation44_spill] sm:$0xff] }
 0x865   :  { %v13201_v13 = vsel %vm13157_vm7, %v25909_v60, %v13200_v35  ;;  %v13206_v1 = vsel %vm13153_vm5, %v13061_v7, %v13205_v0  ;;  %13223 = vst [vmem:[#allocation17 + $0x28] sm:$0xff] %v13195_v9  ;;  %v13292_v38 = vadd.f32 %v25911_v47, %v25907_v63  ;;  %v13293_v40 = vadd.f32 %v25913_v49, %v25907_v63  ;;  %v25935_v29 = vld [vmem:[#allocation45_spill] sm:$0xff]  ;;  %v25936_v9 = vld [vmem:[#allocation52_spill] sm:$0xff]  ;;  %v25937_v0 = vld [vmem:[#allocation47_spill] sm:$0xff] }
 0x866   :  { %v13202_v57 = vsel %vm13159_vm8, %v25912_v50, %v13201_v13  ;;  %v13207_v26 = vsel %vm13155_vm6, %v13068_v59, %v13206_v1  ;;  %v13294_v46 = vadd.f32 %v25914_v16, %v25907_v63  ;;  %v13295_v14 = vadd.f32 %v25915_v48, %v25907_v63 }
 0x867   :  { %v13208_v7 = vsel %vm13157_vm7, %v13075_v36, %v13207_v26  ;;  %13224 = vst [vmem:[#allocation17 + $0x30] sm:$0xff] %v13202_v57  ;;  %v13296_v20 = vadd.f32 %v25916_v37, %v25907_v63  ;;  %v13297_v39 = vadd.f32 %v25917_v6, %v25907_v63  ;;  %v13298_v18 = vadd.f32 %v25918_v25, %v25907_v63  ;;  %v25920_v36 = vld [vmem:[#allocation33_spill] sm:$0xff] }
 0x868   :  { %v13209_v59 = vsel %vm13159_vm8, %v13082_v3, %v13208_v7  ;;  %v13299_v22 = vadd.f32 %v25919_v15, %v25907_v63  ;;  %v13300_v31 = vadd.f32 %v25920_v36, %v25907_v63  ;;  %v13301_v4 = vadd.f32 %v25921_v34, %v25907_v63  ;;  %v25924_v3 = vld [vmem:[#allocation34_spill] sm:$0xff] }
 0x869   :  { %13225 = vst [vmem:[#allocation17 + $0x38] sm:$0xff] %v13209_v59  ;;  %v13302_v52 = vadd.f32 %v25922_v2, %v25907_v63  ;;  %v13303_v45 = vadd.f32 %v25923_v10, %v25907_v63  ;;  %v13304_v42 = vadd.f32 %v25924_v3, %v25907_v63  ;;  %v13305_v19 = vadd.f32 %v25925_v43, %v25907_v63 }
 0x86a   :  { %v13306_v28 = vadd.f32 %v25926_v56, %v25907_v63  ;;  %v13307_v58 = vadd.f32 %v25927_v12, %v25907_v63  ;;  %v13308_v5 = vadd.f32 %v25928_v61, %v25907_v63  ;;  %v13309_v54 = vadd.f32 %v25929_v55, %v25907_v63 }
 0x86b   :  { %v13310_v41 = vadd.f32 %v25930_v62, %v25907_v63  ;;  %v13311_v32 = vadd.f32 %v25931_v8, %v25907_v63  ;;  %v13312_v30 = vadd.f32 %v25932_v33, %v25907_v63  ;;  %v13313_v51 = vadd.f32 %v25933_v23, %v25907_v63 }
 0x86c   :  { %v13314_v53 = vadd.f32 %v25934_v44, %v25907_v63  ;;  %v13315_v27 = vadd.f32 %v25935_v29, %v25907_v63  ;;  %v13316_v35 = vadd.f32 %v25936_v9, %v25907_v63  ;;  %v13317_v17 = vadd.f32 %v25937_v0, %v25907_v63 }
 0x86d   :  { %v13322_v60 = vmax.f32 %v24869_v11, 0.0  ;;  %v13323_v13 = vmax.f32 %v24876_v24, 0.0  ;;  %v13324_v1 = vmax.f32 %v13292_v38, 0.0  ;;  %v13325_v21 = vmax.f32 %v13293_v40, 0.0 }
 0x86e   :  { %v13326_v47 = vmax.f32 %v13294_v46, 0.0  ;;  %v13327_v50 = vmax.f32 %v13295_v14, 0.0  ;;  %v13328_v57 = vmax.f32 %v13296_v20, 0.0  ;;  %v13329_v26 = vmax.f32 %v13297_v39, 0.0 }
 0x86f   :  { %v13330_v49 = vmax.f32 %v13298_v18, 0.0  ;;  %v13331_v16 = vmax.f32 %v13299_v22, 0.0  ;;  %v13332_v7 = vmax.f32 %v13300_v31, 0.0  ;;  %v13333_v48 = vmax.f32 %v13301_v4, 0.0 }
 0x870   :  { %v13334_v37 = vmax.f32 %v13302_v52, 0.0  ;;  %v13335_v6 = vmax.f32 %v13303_v45, 0.0  ;;  %v13336_v59 = vmax.f32 %v13304_v42, 0.0  ;;  %v13337_v25 = vmax.f32 %v13305_v19, 0.0 }
 0x871   :  { %v13338_v15 = vmax.f32 %v13306_v28, 0.0  ;;  %v13339_v63 = vmax.f32 %v13307_v58, 0.0  ;;  %v13340_v36 = vmax.f32 %v13308_v5, 0.0  ;;  %v13341_v11 = vmax.f32 %v13309_v54, 0.0  ;;  %v25938_v58 = vld [vmem:[#allocation51_spill] sm:$0xff] }
 0x872   :  { %v13342_v34 = vmax.f32 %v13310_v41, 0.0  ;;  %v13343_v24 = vmax.f32 %v13311_v32, 0.0  ;;  %v13344_v38 = vmax.f32 %v13312_v30, 0.0  ;;  %v13345_v40 = vmax.f32 %v13313_v51, 0.0 }
 0x873   :  { %v13346_v46 = vmax.f32 %v13314_v53, 0.0  ;;  %v13347_v14 = vmax.f32 %v13315_v27, 0.0  ;;  %v13348_v20 = vmax.f32 %v13316_v35, 0.0  ;;  %v13349_v39 = vmax.f32 %v13317_v17, 0.0 }
 0x874   :  { %v13354_v18 = vmax.f32 %v13322_v60, %v13324_v1  ;;  %v13355_v22 = vmax.f32 %v13323_v13, %v13325_v21  ;;  %v13356_v31 = vmax.f32 %v13326_v47, %v13328_v57  ;;  %v13357_v4 = vmax.f32 %v13327_v50, %v13329_v26 }
 0x875   :  { %v13358_v2 = vmax.f32 %v13330_v49, %v13332_v7  ;;  %v13359_v52 = vmax.f32 %v13331_v16, %v13333_v48  ;;  %v13360_v10 = vmax.f32 %v13334_v37, %v13336_v59  ;;  %v13361_v45 = vmax.f32 %v13335_v6, %v13337_v25 }
 0x876   :  { %v13362_v3 = vmax.f32 %v13338_v15, %v13340_v36  ;;  %v13363_v42 = vmax.f32 %v13339_v63, %v13341_v11  ;;  %v13364_v43 = vmax.f32 %v13342_v34, %v13344_v38  ;;  %v13365_v19 = vmax.f32 %v13343_v24, %v13345_v40 }
 0x877   :  { %v24937_v56 = vmax.f32 %v13346_v46, %v13348_v20  ;;  %v24939_v28 = vmax.f32 %v13347_v14, %v13349_v39  ;;  %v13386_v12 = vcombine.high %v13354_v18, %v13354_v18  ;;  %v24942_v61 = vrot.slane %v13354_v18, %v25938_v58 }
 0x878   :  { %v13403_v5 = vcombine.high %v13355_v22, %v13355_v22  ;;  %v24945_v55 = vrot.slane %v13355_v22, %v25938_v58  ;;  %v13420_v54 = vcombine.high %v13356_v31, %v13356_v31  ;;  %v24951_v41 = vrot.slane %v13356_v31, %v25938_v58 }
 0x879   :  { %v24948_v62 = vrot.slane %v13386_v12, %v25938_v58  ;;  %v13437_v8 = vcombine.high %v13357_v4, %v13357_v4  ;;  %v24954_v32 = vrot.slane %v13357_v4, %v25938_v58  ;;  %v13401_v33 = vcombine.high %v24942_v61, %v24942_v61 }
 0x87a   :  { %v24959_v30 = vrot.slane %v13403_v5, %v25938_v58  ;;  %v24962_v23 = vrot.slane %v13420_v54, %v25938_v58  ;;  %v13418_v53 = vcombine.high %v24945_v55, %v24945_v55  ;;  %v13454_v29 = vcombine.high %v13358_v2, %v13358_v2 }
 0x87b   :  { %v24965_v51 = vrot.slane %v13437_v8, %v25938_v58  ;;  %v13402_v44 = vcombine.high %v24948_v62, %v24948_v62  ;;  %v24972_v27 = vrot.slane %v13358_v2, %v25938_v58  ;;  %v13435_v9 = vcombine.high %v24951_v41, %v24951_v41 }
 0x87c   :  { %v13471_v35 = vcombine.high %v13359_v52, %v13359_v52  ;;  %v24977_v0 = vrot.slane %v13359_v52, %v25938_v58  ;;  %v13488_v17 = vcombine.high %v13360_v10, %v13360_v10  ;;  %v13452_v60 = vcombine.high %v24954_v32, %v24954_v32 }
 0x87d   :  { %v24982_v13 = vrot.slane %v13454_v29, %v25938_v58  ;;  %v24985_v1 = vrot.slane %v13360_v10, %v25938_v58  ;;  %v13505_v21 = vcombine.high %v13361_v45, %v13361_v45  ;;  %v13419_v47 = vcombine.high %v24959_v30, %v24959_v30 }
 0x87e   :  { %v13436_v50 = vcombine.high %v24962_v23, %v24962_v23  ;;  %v13453_v57 = vcombine.high %v24965_v51, %v24965_v51  ;;  %v24994_v26 = vrot.slane %v13471_v35, %v25938_v58  ;;  %v24999_v16 = vrot.slane %v13488_v17, %v25938_v58 }
 0x87f   :  { %v25002_v7 = vrot.slane %v13361_v45, %v25938_v58  ;;  %v13522_v48 = vcombine.high %v13362_v3, %v13362_v3  ;;  %v25011_v25 = vrot.slane %v13505_v21, %v25938_v58  ;;  %v25014_v15 = vrot.slane %v13362_v3, %v25938_v58 }
 0x880   :  { %v13539_v36 = vcombine.high %v13363_v42, %v13363_v42  ;;  %v25020_v11 = vrot.slane %v13363_v42, %v25938_v58  ;;  %v13556_v24 = vcombine.high %v13364_v43, %v13364_v43  ;;  %v25025_v38 = vrot.slane %v13364_v43, %v25938_v58 }
 0x881   :  { %v25017_v63 = vrot.slane %v13522_v48, %v25938_v58  ;;  %v13573_v40 = vcombine.high %v13365_v19, %v13365_v19  ;;  %v25035_v39 = vrot.slane %v13365_v19, %v25938_v58  ;;  %v13590_v4 = vcombine.high %v24937_v56, %v24937_v56 }
 0x882   :  { %v25032_v20 = vrot.slane %v13539_v36, %v25938_v58  ;;  %v25040_v22 = vrot.slane %v13556_v24, %v25938_v58  ;;  %v13607_v45 = vcombine.high %v24939_v28, %v24939_v28  ;;  %v25063_v19 = vrot.slane %v24937_v56, %v25938_v58 }
 0x883   :  { %v25043_v31 = vrot.slane %v13573_v40, %v25938_v58  ;;  %v13722_v54 = vsel %vm12634_vm1, %v24942_v61, -inf  ;;  %v13729_v8 = vsel %vm12634_vm1, %v13401_v33, -inf  ;;  %v25073_v29 = vrot.slane %v13590_v4, %v25938_v58 }
 0x884   :  { %v25077_v35 = vrot.slane %v24939_v28, %v25938_v58  ;;  %v13723_v56 = vrot.slane %v13722_v54, 4  ;;  %v13730_v17 = vrot.slane %v13729_v8, 4  ;;  %v25080_v21 = vrot.slane %v13607_v45, %v25938_v58 }
 0x885   :  { %v13736_v48 = vsel %vm12634_vm1, %v24948_v62, -inf  ;;  %v13743_v36 = vsel %vm12634_vm1, %v13402_v44, -inf  ;;  %v13750_v61 = vsel %vm12634_vm1, %v24945_v55, -inf  ;;  %v13757_v28 = vsel %vm12634_vm1, %v13418_v53, -inf }
 0x886   :  { %v13724_v33 = vmax.f32 %v13722_v54, %v13723_v56  ;;  %v13731_v24 = vmax.f32 %v13729_v8, %v13730_v17  ;;  %v13737_v40 = vrot.slane %v13736_v48, 4  ;;  %v13744_v4 = vrot.slane %v13743_v36, 4 }
 0x887   :  { %v13751_v5 = vrot.slane %v13750_v61, 4  ;;  %v13764_v58 = vsel %vm12634_vm1, %v24959_v30, -inf  ;;  %v13771_v62 = vsel %vm12634_vm1, %v13419_v47, -inf  ;;  %v13758_v54 = vrot.slane %v13757_v28, 4 }
 0x888   :  { %v13725_v45 = vrot.slane %v13724_v33, 2  ;;  %v13732_v44 = vrot.slane %v13731_v24, 2  ;;  %v13738_v43 = vmax.f32 %v13736_v48, %v13737_v40  ;;  %v13745_v12 = vmax.f32 %v13743_v36, %v13744_v4 }
 0x889   :  { %v13752_v42 = vmax.f32 %v13750_v61, %v13751_v5  ;;  %v13765_v8 = vrot.slane %v13764_v58, 4  ;;  %v13772_v56 = vrot.slane %v13771_v62, 4  ;;  %v13759_v2 = vmax.f32 %v13757_v28, %v13758_v54 }
 0x88a   :  { %v13726_v17 = vmax.f32 %v13724_v33, %v13725_v45  ;;  %v13733_v3 = vmax.f32 %v13731_v24, %v13732_v44  ;;  %v13739_v10 = vrot.slane %v13738_v43, 2  ;;  %v13746_v52 = vrot.slane %v13745_v12, 2 }
 0x88b   :  { %v13753_v55 = vrot.slane %v13752_v42, 2  ;;  %v13766_v53 = vmax.f32 %v13764_v58, %v13765_v8  ;;  %v13773_v18 = vmax.f32 %v13771_v62, %v13772_v56  ;;  %v13760_v34 = vrot.slane %v13759_v2, 2 }
 0x88c   :  { %v13727_v14 = vrot.slane %v13726_v17, 1  ;;  %v13734_v30 = vrot.slane %v13733_v3, 1  ;;  %v13740_v46 = vmax.f32 %v13738_v43, %v13739_v10  ;;  %v13747_v47 = vmax.f32 %v13745_v12, %v13746_v52 }
 0x88d   :  { %v13754_v59 = vmax.f32 %v13752_v42, %v13753_v55  ;;  %v13767_v48 = vrot.slane %v13766_v53, 2  ;;  %v13774_v36 = vrot.slane %v13773_v18, 2  ;;  %v13761_v4 = vmax.f32 %v13759_v2, %v13760_v34 }
 0x88e   :  { %v13741_v33 = vrot.slane %v13740_v46, 1  ;;  %v13748_v24 = vrot.slane %v13747_v47, 1  ;;  %v25102_v10 = vmax.f32 %v13726_v17, %v13727_v14  ;;  %v13778_v42 = vsel %vm12634_vm1, %v24951_v41, -inf }
 0x88f   :  { %v13768_v28 = vmax.f32 %v13766_v53, %v13767_v48  ;;  %v13775_v58 = vmax.f32 %v13773_v18, %v13774_v36  ;;  %v13785_v43 = vsel %vm12634_vm1, %v13435_v9, -inf  ;;  %v25110_v12 = vmax.f32 %v13733_v3, %v13734_v30 }
 0x890   :  { %v25112_v62 = vmax.f32 %v13740_v46, %v13741_v33  ;;  %v25114_v34 = vmax.f32 %v13747_v47, %v13748_v24  ;;  %v13755_v18 = vrot.slane %v13754_v59, 1  ;;  %v13779_v2 = vrot.slane %v13778_v42, 4 }
 0x891   :  { %v13786_v45 = vrot.slane %v13785_v43, 4  ;;  %v13792_v14 = vsel %vm12634_vm1, %v24962_v23, -inf  ;;  %v13799_v44 = vsel %vm12634_vm1, %v13436_v50, -inf  ;;  %v13762_v41 = vrot.slane %v13761_v4, 1 }
 0x892   :  { %v13769_v54 = vrot.slane %v13768_v28, 1  ;;  %v13776_v9 = vrot.slane %v13775_v58, 1  ;;  %v13793_v3 = vrot.slane %v13792_v14, 4  ;;  %v13780_v8 = vmax.f32 %v13778_v42, %v13779_v2 }
 0x893   :  { %v13787_v46 = vmax.f32 %v13785_v43, %v13786_v45  ;;  %v13800_v56 = vrot.slane %v13799_v44, 4  ;;  %v13806_v17 = vsel %vm12634_vm1, %v24954_v32, -inf  ;;  %v13813_v30 = vsel %vm12634_vm1, %v13452_v60, -inf }
 0x894   :  { %v13794_v55 = vmax.f32 %v13792_v14, %v13793_v3  ;;  %v13807_v53 = vrot.slane %v13806_v17, 4  ;;  %v13820_v23 = vsel %vm12634_vm1, %v24965_v51, -inf  ;;  %v13781_v50 = vrot.slane %v13780_v8, 2 }
 0x895   :  { %v13788_v47 = vrot.slane %v13787_v46, 2  ;;  %v13801_v48 = vmax.f32 %v13799_v44, %v13800_v56  ;;  %v13814_v36 = vrot.slane %v13813_v30, 4  ;;  %v13821_v42 = vrot.slane %v13820_v23, 4 }
 0x896   :  { %v13795_v33 = vrot.slane %v13794_v55, 2  ;;  %v13808_v24 = vmax.f32 %v13806_v17, %v13807_v53  ;;  %v13827_v43 = vsel %vm12634_vm1, %v13453_v57, -inf  ;;  %v13782_v2 = vmax.f32 %v13780_v8, %v13781_v50 }
 0x897   :  { %v13789_v45 = vmax.f32 %v13787_v46, %v13788_v47  ;;  %v13802_v32 = vrot.slane %v13801_v48, 2  ;;  %v13815_v14 = vmax.f32 %v13813_v30, %v13814_v36  ;;  %v13822_v52 = vmax.f32 %v13820_v23, %v13821_v42 }
 0x898   :  { %v13796_v60 = vmax.f32 %v13794_v55, %v13795_v33  ;;  %v13809_v3 = vrot.slane %v13808_v24, 2  ;;  %v13828_v40 = vrot.slane %v13827_v43, 4  ;;  %v13783_v61 = vrot.slane %v13782_v2, 1 }
 0x899   :  { %v13790_v5 = vrot.slane %v13789_v45, 1  ;;  %v13803_v44 = vmax.f32 %v13801_v48, %v13802_v32  ;;  %v13816_v56 = vrot.slane %v13815_v14, 2  ;;  %v13823_v53 = vrot.slane %v13822_v52, 2 }
 0x89a   :  { %v13797_v6 = vrot.slane %v13796_v60, 1  ;;  %v13810_v17 = vmax.f32 %v13808_v24, %v13809_v3  ;;  %v13829_v37 = vmax.f32 %v13827_v43, %v13828_v40  ;;  %v25134_v49 = vmax.f32 %v13754_v59, %v13755_v18 }
 0x89b   :  { %v25136_v51 = vmax.f32 %v13761_v4, %v13762_v41  ;;  %v25138_v57 = vmax.f32 %v13768_v28, %v13769_v54  ;;  %v13804_v8 = vrot.slane %v13803_v44, 1  ;;  %v25140_v46 = vmax.f32 %v13775_v58, %v13776_v9 }
 0x89c   :  { %v13817_v55 = vmax.f32 %v13815_v14, %v13816_v56  ;;  %v13824_v30 = vmax.f32 %v13822_v52, %v13823_v53  ;;  %v13830_v23 = vrot.slane %v13829_v37, 2  ;;  %v25142_v50 = vmax.f32 %v13782_v2, %v13783_v61 }
 0x89d   :  { %25939 = vst [vmem:[#allocation53_spill] sm:$0xff] %v25140_v46  ;;  %v25144_v47 = vmax.f32 %v13789_v45, %v13790_v5  ;;  %v13834_v48 = vsel %vm12634_vm1, %v24972_v27, -inf  ;;  %v25940_v59 = vcombine.high %v24972_v27, %v24972_v27  ;;  %v25152_v4 = vmax.f32 %v13796_v60, %v13797_v6 }
 0x89e   :  { %v13811_v28 = vrot.slane %v13810_v17, 1  ;;  %v13831_v58 = vmax.f32 %v13829_v37, %v13830_v23  ;;  %v13835_v18 = vrot.slane %v13834_v48, 4  ;;  %v25154_v41 = vmax.f32 %v13803_v44, %v13804_v8 }
 0x89f   :  { %v13841_v40 = vsel %vm12634_vm1, %v25940_v59, -inf  ;;  %v13848_v5 = vsel %vm12634_vm1, %v24982_v13, -inf  ;;  %v25941_v61 = vcombine.high %v24982_v13, %v24982_v13  ;;  %v13818_v9 = vrot.slane %v13817_v55, 1 }
 0x8a0   :  { %v13842_v52 = vrot.slane %v13841_v40, 4  ;;  %v13825_v27 = vrot.slane %v13824_v30, 1  ;;  %v13836_v36 = vmax.f32 %v13834_v48, %v13835_v18  ;;  %v13849_v33 = vrot.slane %v13848_v5, 4 }
 0x8a1   :  { %v13855_v54 = vsel %vm12634_vm1, %v25941_v61, -inf  ;;  %v13862_v37 = vsel %vm12634_vm1, %v24977_v0, -inf  ;;  %v25942_v42 = vcombine.high %v24977_v0, %v24977_v0  ;;  %v13832_v2 = vrot.slane %v13831_v58, 1 }
 0x8a2   :  { %v13843_v6 = vmax.f32 %v13841_v40, %v13842_v52  ;;  %v13856_v24 = vrot.slane %v13855_v54, 4  ;;  %v13837_v45 = vrot.slane %v13836_v36, 2  ;;  %v13850_v32 = vmax.f32 %v13848_v5, %v13849_v33 }
 0x8a3   :  { %v13869_v43 = vsel %vm12634_vm1, %v25942_v42, -inf  ;;  %v13863_v13 = vrot.slane %v13862_v37, 4  ;;  %v13876_v44 = vsel %vm12634_vm1, %v24994_v26, -inf  ;;  %v25943_v0 = vcombine.high %v24994_v26, %v24994_v26 }
 0x8a4   :  { %v13844_v14 = vrot.slane %v13843_v6, 2  ;;  %v13857_v60 = vmax.f32 %v13855_v54, %v13856_v24  ;;  %v13870_v3 = vrot.slane %v13869_v43, 4  ;;  %v13838_v56 = vmax.f32 %v13836_v36, %v13837_v45 }
 0x8a5   :  { %v13851_v53 = vrot.slane %v13850_v32, 2  ;;  %v13864_v8 = vmax.f32 %v13862_v37, %v13863_v13  ;;  %v13877_v23 = vrot.slane %v13876_v44, 4  ;;  %v13883_v18 = vsel %vm12634_vm1, %v25943_v0, -inf }
 0x8a6   :  { %v13845_v48 = vmax.f32 %v13843_v6, %v13844_v14  ;;  %v13858_v59 = vrot.slane %v13857_v60, 2  ;;  %v13871_v40 = vmax.f32 %v13869_v43, %v13870_v3  ;;  %v13839_v52 = vrot.slane %v13838_v56, 1 }
 0x8a7   :  { %v13852_v5 = vmax.f32 %v13850_v32, %v13851_v53  ;;  %v13865_v61 = vrot.slane %v13864_v8, 2  ;;  %v13878_v54 = vmax.f32 %v13876_v44, %v13877_v23  ;;  %v13884_v46 = vrot.slane %v13883_v18, 4 }
 0x8a8   :  { %v13846_v33 = vrot.slane %v13845_v48, 1  ;;  %v13859_v24 = vmax.f32 %v13857_v60, %v13858_v59  ;;  %v13872_v42 = vrot.slane %v13871_v40, 2  ;;  %v25174_v36 = vmax.f32 %v13810_v17, %v13811_v28 }
 0x8a9   :  { %v13853_v37 = vrot.slane %v13852_v5, 1  ;;  %v13866_v45 = vmax.f32 %v13864_v8, %v13865_v61  ;;  %v13879_v6 = vrot.slane %v13878_v54, 2  ;;  %v25176_v13 = vmax.f32 %v13817_v55, %v13818_v9 }
 0x8aa   :  { %v13860_v43 = vrot.slane %v13859_v24, 1  ;;  %v13873_v14 = vmax.f32 %v13871_v40, %v13872_v42  ;;  %v13885_v26 = vmax.f32 %v13883_v18, %v13884_v46  ;;  %v25178_v3 = vmax.f32 %v13824_v30, %v13825_v27 }
 0x8ab   :  { %v25180_v0 = vmax.f32 %v13831_v58, %v13832_v2  ;;  %v13867_v32 = vrot.slane %v13866_v45, 1  ;;  %v13890_v60 = vsel %vm12634_vm1, %v24985_v1, -inf  ;;  %v25184_v44 = vmax.f32 %v13838_v56, %v13839_v52 }
 0x8ac   :  { %v25186_v17 = vmax.f32 %v13845_v48, %v13846_v33  ;;  %v13886_v28 = vrot.slane %v13885_v26, 2  ;;  %v13891_v53 = vrot.slane %v13890_v60, 4  ;;  %v25188_v8 = vmax.f32 %v13852_v5, %v13853_v37 }
 0x8ad   :  { %25944 = vst [vmem:[#allocation55_spill] sm:$0xff] %v25180_v0  ;;  %v13880_v55 = vmax.f32 %v13878_v54, %v13879_v6  ;;  %v25945_v46 = vcombine.high %v24985_v1, %v24985_v1  ;;  %v13904_v58 = vsel %vm12634_vm1, %v24999_v16, -inf  ;;  %v25196_v9 = vmax.f32 %v13859_v24, %v13860_v43 }
 0x8ae   :  { %v13874_v27 = vrot.slane %v13873_v14, 1  ;;  %v13892_v2 = vmax.f32 %v13890_v60, %v13891_v53  ;;  %v25198_v23 = vmax.f32 %v13866_v45, %v13867_v32  ;;  %v13905_v48 = vrot.slane %v13904_v58, 4 }
 0x8af   :  { %v13897_v30 = vsel %vm12634_vm1, %v25945_v46, -inf  ;;  %25946 = vst [vmem:[#allocation54_spill] sm:$0xff] %v25196_v9  ;;  %v25948_v59 = vcombine.high %v24999_v16, %v24999_v16  ;;  %v13918_v1 = vsel %vm12634_vm1, %v25002_v7, -inf  ;;  %v13887_v18 = vmax.f32 %v13885_v26, %v13886_v28 }
 0x8b0   :  { %v13898_v56 = vrot.slane %v13897_v30, 4  ;;  %25947 = vst [vmem:[#allocation56_spill] sm:$0xff] %v25198_v23  ;;  %v13893_v52 = vrot.slane %v13892_v2, 2  ;;  %v13906_v54 = vmax.f32 %v13904_v58, %v13905_v48  ;;  %v13919_v33 = vrot.slane %v13918_v1, 4 }
 0x8b1   :  { %v13911_v40 = vsel %vm12634_vm1, %v25948_v59, -inf  ;;  %v25949_v24 = vcombine.high %v25002_v7, %v25002_v7  ;;  %v13932_v37 = vsel %vm12634_vm1, %v25011_v25, -inf  ;;  %v13881_v16 = vrot.slane %v13880_v55, 1 }
 0x8b2   :  { %v13899_v5 = vmax.f32 %v13897_v30, %v13898_v56  ;;  %v13912_v61 = vrot.slane %v13911_v40, 4  ;;  %v13894_v45 = vmax.f32 %v13892_v2, %v13893_v52  ;;  %v13907_v32 = vrot.slane %v13906_v54, 2 }
 0x8b3   :  { %v13925_v42 = vsel %vm12634_vm1, %v25949_v24, -inf  ;;  %v13920_v60 = vmax.f32 %v13918_v1, %v13919_v33  ;;  %v13933_v28 = vrot.slane %v13932_v37, 4  ;;  %v13888_v53 = vrot.slane %v13887_v18, 1 }
 0x8b4   :  { %v13900_v6 = vrot.slane %v13899_v5, 2  ;;  %v13913_v43 = vmax.f32 %v13911_v40, %v13912_v61  ;;  %v13926_v26 = vrot.slane %v13925_v42, 4  ;;  %v25950_v58 = vcombine.high %v25011_v25, %v25011_v25 }
 0x8b5   :  { %v13908_v56 = vmax.f32 %v13906_v54, %v13907_v32  ;;  %v13921_v48 = vrot.slane %v13920_v60, 2  ;;  %v13934_v24 = vmax.f32 %v13932_v37, %v13933_v28  ;;  %v13895_v23 = vrot.slane %v13894_v45, 1 }
 0x8b6   :  { %v13901_v46 = vmax.f32 %v13899_v5, %v13900_v6  ;;  %v13914_v30 = vrot.slane %v13913_v43, 2  ;;  %v13939_v7 = vsel %vm12634_vm1, %v25950_v58, -inf  ;;  %v13927_v59 = vmax.f32 %v13925_v42, %v13926_v26 }
 0x8b7   :  { %v13940_v40 = vrot.slane %v13939_v7, 4  ;;  %v13909_v61 = vrot.slane %v13908_v56, 1  ;;  %v13922_v1 = vmax.f32 %v13920_v60, %v13921_v48  ;;  %v13935_v9 = vrot.slane %v13934_v24, 2 }
 0x8b8   :  { %v13902_v2 = vrot.slane %v13901_v46, 1  ;;  %v13915_v52 = vmax.f32 %v13913_v43, %v13914_v30  ;;  %v13928_v33 = vrot.slane %v13927_v59, 2  ;;  %v25216_v0 = vmax.f32 %v13873_v14, %v13874_v27 }
 0x8b9   :  { %v13941_v6 = vmax.f32 %v13939_v7, %v13940_v40  ;;  %v13946_v25 = vsel %vm12634_vm1, %v25014_v15, -inf  ;;  %v25220_v58 = vmax.f32 %v13880_v55, %v13881_v16  ;;  %v25222_v54 = vmax.f32 %v13887_v18, %v13888_v53 }
 0x8ba   :  { %v13916_v5 = vrot.slane %v13915_v52, 1  ;;  %v13923_v42 = vrot.slane %v13922_v1, 1  ;;  %v13929_v37 = vmax.f32 %v13927_v59, %v13928_v33  ;;  %v25224_v32 = vmax.f32 %v13894_v45, %v13895_v23 }
 0x8bb   :  { %25951 = vst [vmem:[#allocation57_spill] sm:$0xff] %v25220_v58  ;;  %25952 = vst [vmem:[#allocation58_spill] sm:$0xff] %v25222_v54  ;;  %v13942_v43 = vrot.slane %v13941_v6, 2  ;;  %v13947_v26 = vrot.slane %v13946_v25, 4  ;;  %v25953_v60 = vcombine.high %v25014_v15, %v25014_v15  ;;  %v25230_v27 = vmax.f32 %v13901_v46, %v13902_v2 }
 0x8bc   :  { %v25232_v28 = vmax.f32 %v13908_v56, %v13909_v61  ;;  %v13936_v30 = vmax.f32 %v13934_v24, %v13935_v9  ;;  %v25234_v16 = vmax.f32 %v13915_v52, %v13916_v5  ;;  %v13960_v23 = vsel %vm12634_vm1, %v25017_v63, -inf }
 0x8bd   :  { %v13953_v14 = vsel %vm12634_vm1, %v25953_v60, -inf  ;;  %v13948_v18 = vmax.f32 %v13946_v25, %v13947_v26  ;;  %v25954_v45 = vcombine.high %v25017_v63, %v25017_v63  ;;  %v25242_v15 = vmax.f32 %v13922_v1, %v13923_v42 }
 0x8be   :  { %v13954_v55 = vrot.slane %v13953_v14, 4  ;;  %v13930_v7 = vrot.slane %v13929_v37, 1  ;;  %v13961_v48 = vrot.slane %v13960_v23, 4  ;;  %v13943_v56 = vmax.f32 %v13941_v6, %v13942_v43 }
 0x8bf   :  { %v13967_v53 = vsel %vm12634_vm1, %v25954_v45, -inf  ;;  %v13949_v59 = vrot.slane %v13948_v18, 2  ;;  %v13974_v24 = vsel %vm12634_vm1, %v25020_v11, -inf  ;;  %v25955_v61 = vcombine.high %v25020_v11, %v25020_v11 }
 0x8c0   :  { %v13955_v46 = vmax.f32 %v13953_v14, %v13954_v55  ;;  %v13968_v9 = vrot.slane %v13967_v53, 4  ;;  %v13962_v52 = vmax.f32 %v13960_v23, %v13961_v48  ;;  %v13975_v40 = vrot.slane %v13974_v24, 4 }
 0x8c1   :  { %v13981_v63 = vsel %vm12634_vm1, %v25955_v61, -inf  ;;  %v13937_v33 = vrot.slane %v13936_v30, 1  ;;  %v13950_v1 = vmax.f32 %v13948_v18, %v13949_v59  ;;  %v13988_v43 = vsel %vm12634_vm1, %v25032_v20, -inf }
 0x8c2   :  { %v13956_v2 = vrot.slane %v13955_v46, 2  ;;  %v13969_v5 = vmax.f32 %v13967_v53, %v13968_v9  ;;  %v13982_v25 = vrot.slane %v13981_v63, 4  ;;  %v13963_v26 = vrot.slane %v13962_v52, 2 }
 0x8c3   :  { %v13976_v6 = vmax.f32 %v13974_v24, %v13975_v40  ;;  %v13944_v60 = vrot.slane %v13943_v56, 1  ;;  %v13989_v23 = vrot.slane %v13988_v43, 4  ;;  %v13951_v45 = vrot.slane %v13950_v1, 1 }
 0x8c4   :  { %v13957_v42 = vmax.f32 %v13955_v46, %v13956_v2  ;;  %v13970_v14 = vrot.slane %v13969_v5, 2  ;;  %v13983_v55 = vmax.f32 %v13981_v63, %v13982_v25  ;;  %v13964_v48 = vmax.f32 %v13962_v52, %v13963_v26 }
 0x8c5   :  { %v13977_v54 = vrot.slane %v13976_v6, 2  ;;  %v25956_v11 = vcombine.high %v25032_v20, %v25032_v20  ;;  %v13990_v9 = vmax.f32 %v13988_v43, %v13989_v23  ;;  %v25256_v24 = vmax.f32 %v13929_v37, %v13930_v7 }
 0x8c6   :  { %v13958_v53 = vrot.slane %v13957_v42, 1  ;;  %v13971_v59 = vmax.f32 %v13969_v5, %v13970_v14  ;;  %v13984_v46 = vrot.slane %v13983_v55, 2  ;;  %v13965_v2 = vrot.slane %v13964_v48, 1 }
 0x8c7   :  { %v13995_v18 = vsel %vm12634_vm1, %v25956_v11, -inf  ;;  %25957 = vst [vmem:[#allocation59_spill] sm:$0xff] %v25256_v24  ;;  %v13978_v40 = vmax.f32 %v13976_v6, %v13977_v54  ;;  %v25258_v58 = vmax.f32 %v13936_v30, %v13937_v33  ;;  %v13991_v25 = vrot.slane %v13990_v9, 2 }
 0x8c8   :  { %v13996_v61 = vrot.slane %v13995_v18, 4  ;;  %v13972_v63 = vrot.slane %v13971_v59, 1  ;;  %v14002_v52 = vsel %vm12634_vm1, %v25025_v38, -inf  ;;  %v25262_v26 = vmax.f32 %v13943_v56, %v13944_v60 }
 0x8c9   :  { %25958 = vst [vmem:[#allocation60_spill] sm:$0xff] %v25258_v58  ;;  %v25264_v20 = vmax.f32 %v13950_v1, %v13951_v45  ;;  %v14003_v5 = vrot.slane %v14002_v52, 4  ;;  %v25266_v14 = vmax.f32 %v13957_v42, %v13958_v53  ;;  %v25268_v37 = vmax.f32 %v13964_v48, %v13965_v2 }
 0x8ca   :  { %25959 = vst [vmem:[#allocation62_spill] sm:$0xff] %v25262_v26  ;;  %v13997_v11 = vmax.f32 %v13995_v18, %v13996_v61  ;;  %v13985_v7 = vmax.f32 %v13983_v55, %v13984_v46  ;;  %v25960_v54 = vcombine.high %v25025_v38, %v25025_v38  ;;  %v13979_v33 = vrot.slane %v13978_v40, 1 }
 0x8cb   :  { %v14004_v43 = vmax.f32 %v14002_v52, %v14003_v5  ;;  %v25274_v56 = vmax.f32 %v13971_v59, %v13972_v63  ;;  %v13992_v1 = vmax.f32 %v13990_v9, %v13991_v25  ;;  %v14016_v60 = vsel %vm12634_vm1, %v25040_v22, -inf }
 0x8cc   :  { %v14009_v30 = vsel %vm12634_vm1, %v25960_v54, -inf  ;;  %v13998_v6 = vrot.slane %v13997_v11, 2  ;;  %v25961_v42 = vcombine.high %v25040_v22, %v25040_v22  ;;  %v14017_v18 = vrot.slane %v14016_v60, 4 }
 0x8cd   :  { %v14010_v23 = vrot.slane %v14009_v30, 4  ;;  %v14005_v48 = vrot.slane %v14004_v43, 2  ;;  %v13986_v53 = vrot.slane %v13985_v7, 1  ;;  %v14030_v2 = vsel %vm12634_vm1, %v25035_v39, -inf }
 0x8ce   :  { %v14023_v55 = vsel %vm12634_vm1, %v25961_v42, -inf  ;;  %v13999_v45 = vmax.f32 %v13997_v11, %v13998_v6  ;;  %v25962_v59 = vcombine.high %v25035_v39, %v25035_v39  ;;  %v25288_v61 = vmax.f32 %v13978_v40, %v13979_v33 }
 0x8cf   :  { %v14011_v38 = vmax.f32 %v14009_v30, %v14010_v23  ;;  %v14024_v46 = vrot.slane %v14023_v55, 4  ;;  %v14006_v63 = vmax.f32 %v14004_v43, %v14005_v48  ;;  %v14018_v25 = vmax.f32 %v14016_v60, %v14017_v18 }
 0x8d0   :  { %v14037_v9 = vsel %vm12634_vm1, %v25962_v59, -inf  ;;  %25963 = vst [vmem:[#allocation61_spill] sm:$0xff] %v25288_v61  ;;  %v14031_v11 = vrot.slane %v14030_v2, 4  ;;  %v14044_v54 = vsel %vm12634_vm1, %v25043_v31, -inf  ;;  %v13993_v30 = vrot.slane %v13992_v1, 1 }
 0x8d1   :  { %v14012_v22 = vrot.slane %v14011_v38, 2  ;;  %v14025_v52 = vmax.f32 %v14023_v55, %v14024_v46  ;;  %v14038_v5 = vrot.slane %v14037_v9, 4  ;;  %v14000_v6 = vrot.slane %v13999_v45, 1 }
 0x8d2   :  { %v14019_v42 = vrot.slane %v14018_v25, 2  ;;  %v14032_v58 = vmax.f32 %v14030_v2, %v14031_v11  ;;  %v14045_v24 = vrot.slane %v14044_v54, 4  ;;  %v14007_v59 = vrot.slane %v14006_v63, 1 }
 0x8d3   :  { %v14013_v23 = vmax.f32 %v14011_v38, %v14012_v22  ;;  %v14026_v26 = vrot.slane %v14025_v52, 2  ;;  %v14039_v39 = vmax.f32 %v14037_v9, %v14038_v5  ;;  %v25964_v43 = vcombine.high %v25043_v31, %v25043_v31 }
 0x8d4   :  { %v14020_v33 = vmax.f32 %v14018_v25, %v14019_v42  ;;  %v14033_v48 = vrot.slane %v14032_v58, 2  ;;  %v14046_v46 = vmax.f32 %v14044_v54, %v14045_v24  ;;  %v25296_v61 = vmax.f32 %v13985_v7, %v13986_v53 }
 0x8d5   :  { %v14014_v40 = vrot.slane %v14013_v23, 1  ;;  %v14051_v60 = vsel %vm12634_vm1, %v25964_v43, -inf  ;;  %v14027_v55 = vmax.f32 %v14025_v52, %v14026_v26  ;;  %v14040_v18 = vrot.slane %v14039_v39, 2 }
 0x8d6   :  { %v25298_v38 = vmax.f32 %v13992_v1, %v13993_v30  ;;  %v14052_v22 = vrot.slane %v14051_v60, 4  ;;  %v14058_v2 = vsel %vm12634_vm1, %v25063_v19, -inf  ;;  %v14021_v9 = vrot.slane %v14020_v33, 1 }
 0x8d7   :  { %v14028_v11 = vrot.slane %v14027_v55, 1  ;;  %v14034_v25 = vmax.f32 %v14032_v58, %v14033_v48  ;;  %v14047_v5 = vrot.slane %v14046_v46, 2  ;;  %v25302_v42 = vmax.f32 %v13999_v45, %v14000_v6 }
 0x8d8   :  { %25965 = vst [vmem:[#allocation63_spill] sm:$0xff] %v25298_v38  ;;  %v14053_v31 = vmax.f32 %v14051_v60, %v14052_v22  ;;  %v14059_v43 = vrot.slane %v14058_v2, 4  ;;  %v25967_v26 = vcombine.high %v25063_v19, %v25063_v19  ;;  %v25308_v7 = vmax.f32 %v14006_v63, %v14007_v59 }
 0x8d9   :  { %25966 = vst [vmem:[#allocation66_spill] sm:$0xff] %v25302_v42  ;;  %v25310_v1 = vmax.f32 %v14013_v23, %v14014_v40  ;;  %v14035_v53 = vrot.slane %v14034_v25, 1  ;;  %v14041_v52 = vmax.f32 %v14039_v39, %v14040_v18  ;;  %v14072_v58 = vsel %vm12634_vm1, %v25073_v29, -inf }
 0x8da   :  { %v14065_v24 = vsel %vm12634_vm1, %v25967_v26, -inf  ;;  %v14054_v54 = vrot.slane %v14053_v31, 2  ;;  %v14060_v30 = vmax.f32 %v14058_v2, %v14059_v43  ;;  %v25314_v45 = vmax.f32 %v14020_v33, %v14021_v9 }
 0x8db   :  { %v14066_v38 = vrot.slane %v14065_v24, 4  ;;  %v25316_v6 = vmax.f32 %v14027_v55, %v14028_v11  ;;  %v14048_v60 = vmax.f32 %v14046_v46, %v14047_v5  ;;  %v14073_v19 = vrot.slane %v14072_v58, 4 }
 0x8dc   :  { %v14055_v48 = vmax.f32 %v14053_v31, %v14054_v54  ;;  %v14061_v22 = vrot.slane %v14060_v30, 2  ;;  %v25969_v23 = vcombine.high %v25073_v29, %v25073_v29  ;;  %v14042_v59 = vrot.slane %v14041_v52, 1 }
 0x8dd   :  { %25968 = vst [vmem:[#allocation64_spill] sm:$0xff] %v25316_v6  ;;  %v14067_v63 = vmax.f32 %v14065_v24, %v14066_v38  ;;  %v14074_v40 = vmax.f32 %v14072_v58, %v14073_v19  ;;  %v14086_v2 = vsel %vm12634_vm1, %v25077_v35, -inf  ;;  %v25324_v33 = vmax.f32 %v14034_v25, %v14035_v53 }
 0x8de   :  { %v14079_v39 = vsel %vm12634_vm1, %v25969_v23, -inf  ;;  %v14062_v55 = vmax.f32 %v14060_v30, %v14061_v22  ;;  %v14087_v46 = vrot.slane %v14086_v2, 4  ;;  %v25971_v38 = vcombine.high %v25077_v35, %v25077_v35 }
 0x8df   :  { %v14080_v18 = vrot.slane %v14079_v39, 4  ;;  %25970 = vst [vmem:[#allocation67_spill] sm:$0xff] %v25324_v33  ;;  %v14068_v9 = vrot.slane %v14067_v63, 2  ;;  %v14075_v11 = vrot.slane %v14074_v40, 2  ;;  %v14100_v31 = vsel %vm12634_vm1, %v25080_v21, -inf }
 0x8e0   :  { %v14093_v29 = vsel %vm12634_vm1, %v25971_v38, -inf  ;;  %v14049_v43 = vrot.slane %v14048_v60, 1  ;;  %v14056_v26 = vrot.slane %v14055_v48, 1  ;;  %v14088_v54 = vmax.f32 %v14086_v2, %v14087_v46 }
 0x8e1   :  { %v14081_v5 = vmax.f32 %v14079_v39, %v14080_v18  ;;  %v14069_v24 = vmax.f32 %v14067_v63, %v14068_v9  ;;  %v14076_v58 = vmax.f32 %v14074_v40, %v14075_v11  ;;  %v14094_v53 = vrot.slane %v14093_v29, 4 }
 0x8e2   :  { %v14101_v30 = vrot.slane %v14100_v31, 4  ;;  %v25332_v19 = vmax.f32 %v14041_v52, %v14042_v59  ;;  %v14063_v22 = vrot.slane %v14062_v55, 1  ;;  %v14089_v23 = vrot.slane %v14088_v54, 2 }
 0x8e3   :  { %v14082_v25 = vrot.slane %v14081_v5, 2  ;;  %v25972_v35 = vcombine.high %v25080_v21, %v25080_v21  ;;  %v14070_v18 = vrot.slane %v14069_v24, 1  ;;  %v14095_v42 = vmax.f32 %v14093_v29, %v14094_v53 }
 0x8e4   :  { %v14102_v33 = vmax.f32 %v14100_v31, %v14101_v30  ;;  %v25338_v6 = vmax.f32 %v14048_v60, %v14049_v43  ;;  %v25340_v63 = vmax.f32 %v14055_v48, %v14056_v26  ;;  %v14234_v52 = vsel %vm13147_vm2, %v25110_v12, %v25102_v10  ;;  %v25975_v30 = vld [vmem:[#allocation54_spill] sm:$0xff] }
 0x8e5   :  { %v14107_v39 = vsel %vm12634_vm1, %v25972_v35, -inf  ;;  %v14083_v38 = vmax.f32 %v14081_v5, %v14082_v25  ;;  %v14077_v59 = vrot.slane %v14076_v58, 1  ;;  %v14090_v2 = vmax.f32 %v14088_v54, %v14089_v23 }
 0x8e6   :  { %v14108_v40 = vrot.slane %v14107_v39, 4  ;;  %v14096_v9 = vrot.slane %v14095_v42, 2  ;;  %v14103_v46 = vrot.slane %v14102_v33, 2  ;;  %v14064_v21 = vmax.f32 %v14062_v55, %v14063_v22 }
 0x8e7   :  { %v14235_v5 = vsel %vm13149_vm3, %v25112_v62, %v14234_v52  ;;  %v14241_v60 = vsel %vm13147_vm2, %v25144_v47, %v25142_v50  ;;  %v14071_v48 = vmax.f32 %v14069_v24, %v14070_v18  ;;  %v14084_v29 = vrot.slane %v14083_v38, 1  ;;  %v25973_v24 = vld [vmem:[#allocation53_spill] sm:$0xff] }
 0x8e8   :  { %v14109_v11 = vmax.f32 %v14107_v39, %v14108_v40  ;;  %v14097_v31 = vmax.f32 %v14095_v42, %v14096_v9  ;;  %v14236_v43 = vsel %vm13151_vm4, %v25114_v34, %v14235_v5  ;;  %v14104_v10 = vmax.f32 %v14102_v33, %v14103_v46  ;;  %v25977_v18 = vld [vmem:[#allocation57_spill] sm:$0xff] }
 0x8e9   :  { %v14237_v26 = vsel %vm13153_vm5, %v25134_v49, %v14236_v43  ;;  %v14242_v55 = vsel %vm13149_vm3, %v25152_v4, %v14241_v60  ;;  %v14078_v54 = vmax.f32 %v14076_v58, %v14077_v59  ;;  %v14091_v62 = vrot.slane %v14090_v2, 1  ;;  %v25979_v40 = vld [vmem:[#allocation61_spill] sm:$0xff]  ;;  %v25984_v60 = vld [vmem:[#allocation63_spill] sm:$0xff] }
 0x8ea   :  { %v14110_v12 = vrot.slane %v14109_v11, 2  ;;  %v14238_v25 = vsel %vm13155_vm6, %v25136_v51, %v14237_v26  ;;  %v14243_v50 = vsel %vm13151_vm4, %v25154_v41, %v14242_v55  ;;  %v14248_v49 = vsel %vm13147_vm2, %v25186_v17, %v25184_v44  ;;  %v25974_v44 = vld [vmem:[#allocation55_spill] sm:$0xff]  ;;  %v25986_v55 = vld [vmem:[#allocation66_spill] sm:$0xff] }
 0x8eb   :  { %v14239_v34 = vsel %vm13157_vm7, %v25138_v57, %v14238_v25  ;;  %v14244_v42 = vsel %vm13153_vm5, %v25174_v36, %v14243_v50  ;;  %v14085_v4 = vmax.f32 %v14083_v38, %v14084_v29  ;;  %v14098_v33 = vrot.slane %v14097_v31, 1  ;;  %v25978_v38 = vld [vmem:[#allocation59_spill] sm:$0xff] }
 0x8ec   :  { %v14111_v47 = vmax.f32 %v14109_v11, %v14110_v12  ;;  %v14240_v58 = vsel %vm13159_vm8, %v25973_v24, %v14239_v34  ;;  %v14245_v51 = vsel %vm13155_vm6, %v25176_v13, %v14244_v42  ;;  %v14105_v41 = vrot.slane %v14104_v10, 1  ;;  %v25983_v11 = vld [vmem:[#allocation62_spill] sm:$0xff]  ;;  %v25985_v43 = vld [vmem:[#allocation67_spill] sm:$0xff] }
 0x8ed   :  { %v14246_v53 = vsel %vm13157_vm7, %v25178_v3, %v14245_v51  ;;  %v14249_v57 = vsel %vm13149_vm3, %v25188_v8, %v14248_v49  ;;  %v14255_v36 = vsel %vm13147_vm2, %v25230_v27, %v25224_v32  ;;  %14299 = vst [vmem:[#allocation17 + $0x40] sm:$0xff] %v14240_v58  ;;  %v14262_v3 = vsel %vm13147_vm2, %v25266_v14, %v25264_v20  ;;  %v25976_v8 = vld [vmem:[#allocation56_spill] sm:$0xff] }
 0x8ee   :  { %v14247_v17 = vsel %vm13159_vm8, %v25974_v44, %v14246_v53  ;;  %v14250_v22 = vsel %vm13151_vm4, %v25975_v30, %v14249_v57  ;;  %v14256_v13 = vsel %vm13149_vm3, %v25232_v28, %v14255_v36  ;;  %v14112_v23 = vrot.slane %v14111_v47, 1 }
 0x8ef   :  { %v14251_v35 = vsel %vm13153_vm5, %v25976_v8, %v14250_v22  ;;  %v14257_v32 = vsel %vm13151_vm4, %v25234_v16, %v14256_v13  ;;  %v14263_v27 = vsel %vm13149_vm3, %v25268_v37, %v14262_v3  ;;  %14300 = vst [vmem:[#allocation17 + $0x48] sm:$0xff] %v14247_v17  ;;  %v14269_v14 = vsel %vm13147_vm2, %v25310_v1, %v25308_v7  ;;  %v25982_v1 = vld [vmem:[#allocation64_spill] sm:$0xff] }
 0x8f0   :  { %v14252_v39 = vsel %vm13155_vm6, %v25216_v0, %v14251_v35  ;;  %v14258_v28 = vsel %vm13153_vm5, %v25242_v15, %v14257_v32  ;;  %v14264_v20 = vsel %vm13151_vm4, %v25274_v56, %v14263_v27  ;;  %v14270_v0 = vsel %vm13149_vm3, %v25314_v45, %v14269_v14  ;;  %v25980_v15 = vld [vmem:[#allocation58_spill] sm:$0xff]  ;;  %v25981_v56 = vld [vmem:[#allocation60_spill] sm:$0xff] }
 0x8f1   :  { %v14253_v16 = vsel %vm13157_vm7, %v25977_v18, %v14252_v39  ;;  %v14259_v37 = vsel %vm13155_vm6, %v25978_v38, %v14258_v28  ;;  %v14265_v52 = vsel %vm13153_vm5, %v25979_v40, %v14264_v20  ;;  %v14271_v46 = vsel %vm13151_vm4, %v25982_v1, %v14270_v0 }
 0x8f2   :  { %v14254_v59 = vsel %vm13159_vm8, %v25980_v15, %v14253_v16  ;;  %v14260_v9 = vsel %vm13157_vm7, %v25981_v56, %v14259_v37  ;;  %v14266_v7 = vsel %vm13155_vm6, %v25296_v61, %v14265_v52  ;;  %v14272_v45 = vsel %vm13153_vm5, %v25985_v43, %v14271_v46 }
 0x8f3   :  { %v14261_v5 = vsel %vm13159_vm8, %v25983_v11, %v14260_v9  ;;  %v14267_v29 = vsel %vm13157_vm7, %v25984_v60, %v14266_v7  ;;  %v14276_v12 = vsel %vm13147_vm2, %v14071_v48, %v14064_v21  ;;  %14301 = vst [vmem:[#allocation17 + $0x50] sm:$0xff] %v14254_v59  ;;  %v14092_v26 = vmax.f32 %v14090_v2, %v14091_v62 }
 0x8f4   :  { %v14268_v25 = vsel %vm13159_vm8, %v25986_v55, %v14267_v29  ;;  %v14273_v61 = vsel %vm13155_vm6, %v25332_v19, %v14272_v45  ;;  %v14277_v50 = vsel %vm13149_vm3, %v14078_v54, %v14276_v12  ;;  %14302 = vst [vmem:[#allocation17 + $0x58] sm:$0xff] %v14261_v5  ;;  %v14099_v34 = vmax.f32 %v14097_v31, %v14098_v33 }
 0x8f5   :  { %v14274_v42 = vsel %vm13157_vm7, %v25338_v6, %v14273_v61  ;;  %v14278_v49 = vsel %vm13151_vm4, %v14085_v4, %v14277_v50  ;;  %14303 = vst [vmem:[#allocation17 + $0x60] sm:$0xff] %v14268_v25  ;;  %v14106_v21 = vmax.f32 %v14104_v10, %v14105_v41  ;;  %v14113_v62 = vmax.f32 %v14111_v47, %v14112_v23 }
 0x8f6   :  { %v14275_v2 = vsel %vm13159_vm8, %v25340_v63, %v14274_v42  ;;  %v14279_v48 = vsel %vm13153_vm5, %v14092_v26, %v14278_v49 }
 0x8f7   :  { %v14280_v19 = vsel %vm13155_vm6, %v14099_v34, %v14279_v48  ;;  %14304 = vst [vmem:[#allocation17 + $0x68] sm:$0xff] %v14275_v2 }
 0x8f8   :  { %v14281_v31 = vsel %vm13157_vm7, %v14106_v21, %v14280_v19 }
 0x8f9   :  { %v14282_v6 = vsel %vm13159_vm8, %v14113_v62, %v14281_v31 }
 0x8fa   :  { %14305 = vst [vmem:[#allocation17 + $0x70] sm:$0xff] %v14282_v6 }
 0x8fb   :  { %21296 = shalt.err (!%p21293_p4)
}
 0x8fc   :  { %s21297_s20 = scalar_lea.hbm %s25461_s7, 2048 }
 0x8fd   :  { %p21298_p5 = scmp.ne.s32.totalorder %s25461_s7, %s21297_s20  ;;  %p21301_p6 = scmp.lt.u32.totalorder %s21297_s20, %s25461_s7 }
 0x8ff   :  { %p21303_p7 = pnand %p21301_p6, %p21298_p5 }
 0x901   :  { %21306 = shalt.err (!%p21303_p7)
}
 0x902   :  { %14318 = dma.vmem_to_hbm [thread:$0]  %s14313_s0, 2048, %s25461_s7, [#allocation7], %s21319_s13, %s21319_s13, %s21320_s14  }
 0x903   :  { %21315 = dma.done.wait [#allocation7], 2048  }
 0x904   :  { %21316 = vsyncadd [#allocation7], 4294965248 }
 0x905   :  { %14322 = vsyncpa [#allocation6], 1 }
 0x906   :  { %14323 = vsyncpa [#allocation9], 1 }
 0x907   :  { %14324 = vsyncpa [#allocation12], 1 }
 0x908   :  { %14325 = vsyncpa [#allocation15], 1 }
 0x909   :  { %14326 = vsyncpa [#allocation7], 1 }

</bundles_post_ra>
